<compile_context>
chip_gen: v6e
topology: v6e:2x2x1
jax: 0.10.0
libtpu: 0.0.40
codegen_flags: <defaults>
</compile_context>

<pallas_src>
import functools

import jax
import jax.numpy as jnp
from jax.experimental import pallas as pl
from jax.experimental.pallas import tpu as pltpu

LATENT_DIM = 64


def _round_up(x, m):
    return ((x + m - 1) // m) * m


# ----------------------------------------------------------------------------
# Pallas kernel: fused  out = relu?(A @ W + b)  on one (tm, N) output tile.
# A and W are bf16 (fp32 A is cast in-kernel), accumulation is fp32 on the MXU.
# ----------------------------------------------------------------------------
def _matmul_bias_kernel(a_ref, w_ref, b_ref, o_ref, *, apply_relu):
    a = a_ref[...]
    if a.dtype != jnp.bfloat16:
        a = a.astype(jnp.bfloat16)
    acc = jnp.dot(a, w_ref[...], preferred_element_type=jnp.float32)
    acc = acc + b_ref[...]          # (1, N) broadcasts over (tm, N), fp32 epilogue
    if apply_relu:
        acc = jnp.maximum(acc, 0.0)
    o_ref[...] = acc.astype(o_ref.dtype)


def matmul_bias(a, w, b2d, *, apply_relu, out_dtype, tm):
    """a: (M, K) bf16/f32, w: (K, N) bf16, b2d: (1, N) f32 -> (M, N) out_dtype."""
    M, K = a.shape
    Kw, N = w.shape
    assert K == Kw, (K, Kw)

    # Single N block (N is 32..256 here); tile only over M.  Keep tm a multiple
    # of 16 (bf16 sublane packing) unless the block spans the whole (padded) M.
    tm = min(tm, _round_up(M, 16))
    Mp = _round_up(M, tm)
    a_p = a if Mp == M else jnp.pad(a, ((0, Mp - M), (0, 0)))

    out = pl.pallas_call(
        functools.partial(_matmul_bias_kernel, apply_relu=apply_relu),
        out_shape=jax.ShapeDtypeStruct((Mp, N), out_dtype),
        grid=(Mp // tm,),
        in_specs=[
            pl.BlockSpec((tm, K), lambda i: (i, 0)),   # A row-block, full K
            pl.BlockSpec((K, N), lambda i: (0, 0)),    # full weight, resident
            pl.BlockSpec((1, N), lambda i: (0, 0)),    # bias
        ],
        out_specs=pl.BlockSpec((tm, N), lambda i: (i, 0)),
        compiler_params=pltpu.CompilerParams(
            dimension_semantics=("parallel",),
            vmem_limit_bytes=32 * 1024 * 1024,   # safe on v5e/v6e/v7x
        ),
    )(a_p, w, b2d)
    return out if Mp == M else out[:M]


# ----------------------------------------------------------------------------
# Conv2d(k=4, stride=2, pad=1) via im2col (XLA glue) + Pallas matmul (hot path).
# Weights arrive pre-laid-out as (16*Cin, Cout) bf16, bias as (1, Cout) f32.
# ----------------------------------------------------------------------------
def conv4s2p1(x_nhwc, w_kc, b2d, *, relu, tm):
    N, H, W, Cin = x_nhwc.shape
    Cout = w_kc.shape[1]
    Ho, Wo = H // 2, W // 2

    xp = jnp.pad(x_nhwc, ((0, 0), (1, 1), (1, 1), (0, 0)))
    patches = []
    for kh in range(4):
        for kw in range(4):
            patches.append(
                xp[:, kh:kh + 2 * Ho - 1:2, kw:kw + 2 * Wo - 1:2, :]
            )  # (N, Ho, Wo, Cin), bf16
    # feature order: (kh, kw, cin) -- matches the weight layout built at init.
    p = jnp.stack(patches, axis=3)                    # (N, Ho, Wo, 16, Cin)
    a = p.reshape(N * Ho * Wo, 16 * Cin)

    out = matmul_bias(a, w_kc, b2d, apply_relu=relu,
                      out_dtype=jnp.bfloat16, tm=tm)  # (N*Ho*Wo, Cout) bf16
    return out.reshape(N, Ho, Wo, Cout)


# ----------------------------------------------------------------------------
# Parameters: deterministic synthetic init in PyTorch weight shapes, then a
# one-time conversion to the kernel layout (hoisted out of the forward pass).
# ----------------------------------------------------------------------------
def init_params(key, latent_dim=LATENT_DIM):
    conv_specs = [(32, 3), (64, 32), (128, 64), (256, 128)]
    params = {}
    keys = jax.random.split(key, len(conv_specs) * 2 + 2)
    ki = 0
    for li, (cout, cin) in enumerate(conv_specs):
        fan_in = cin * 4 * 4
        scale = 1.0 / jnp.sqrt(fan_in)
        params[f"conv{li}_w"] = scale * jax.random.normal(
            keys[ki], (cout, cin, 4, 4), jnp.float32)
        ki += 1
        params[f"conv{li}_b"] = scale * jax.random.normal(
            keys[ki], (cout,), jnp.float32)
        ki += 1
    fc_in = 256 * 5 * 5
    scale = 1.0 / jnp.sqrt(fc_in)
    params["fc_w"] = scale * jax.random.normal(
        keys[ki], (latent_dim, fc_in), jnp.float32)     # PyTorch Linear (out, in)
    ki += 1
    params["fc_b"] = scale * jax.random.normal(keys[ki], (latent_dim,), jnp.float32)
    return params


def prepare_params(params):
    """One-time re-layout: (Cout,Cin,4,4) -> (16*Cin, Cout) bf16, fc_w -> (K, N) bf16."""
    kp = {}
    for li in range(4):
        w = params[f"conv{li}_w"]                       # (Cout, Cin, 4, 4)
        cout = w.shape[0]
        kp[f"conv{li}_w"] = (
            jnp.transpose(w, (2, 3, 1, 0)).reshape(-1, cout).astype(jnp.bfloat16)
        )                                               # (16*Cin, Cout), (kh,kw,cin) order
        kp[f"conv{li}_b"] = params[f"conv{li}_b"].reshape(1, -1).astype(jnp.float32)
    kp["fc_w"] = params["fc_w"].T.astype(jnp.bfloat16)  # (6400, latent_dim)
    kp["fc_b"] = params["fc_b"].reshape(1, -1).astype(jnp.float32)
    return jax.tree_util.tree_map(jnp.asarray, kp)


# ----------------------------------------------------------------------------
# Forward pass (matches Encoder.forward).
# ----------------------------------------------------------------------------
_CONV_TM = (800, 400, 256, 256)   # per-layer M-tile: few grid steps, tiny VMEM


def encoder_forward(kparams, x_nchw):
    # NCHW (PyTorch) -> NHWC, bf16 activations through the conv stack.
    x = jnp.transpose(x_nchw, (0, 2, 3, 1)).astype(jnp.bfloat16)  # (B, 80, 80, 3)
    for li in range(4):
        x = conv4s2p1(x, kparams[f"conv{li}_w"], kparams[f"conv{li}_b"],
                      relu=True, tm=_CONV_TM[li])
    # x: (B, 5, 5, 256) -> NCHW -> flatten in (C, H, W) order (= torch .view(B, -1))
    B = x.shape[0]
    x_flat = jnp.transpose(x, (0, 3, 1, 2)).reshape(B, 256 * 5 * 5)
    latent = matmul_bias(x_flat, kparams["fc_w"], kparams["fc_b"],
                         apply_relu=False, out_dtype=jnp.float32, tm=16)
    return latent                                       # (B, LATENT_DIM) f32


if __name__ == "__main__":
    key = jax.random.PRNGKey(0)
    k_in, k_params = jax.random.split(key)

    # Forward implies 80x80 input (80 -> 40 -> 20 -> 10 -> 5 spatial).
    x = jax.random.normal(k_in, (2, 3, 80, 80), jnp.float32)
    params = init_params(k_params)
    kparams = prepare_params(params)        # one-time weight re-layout + bf16 cast

    fwd = jax.jit(encoder_forward)
    latent = fwd(kparams, x)
    latent = jax.block_until_ready(latent)
    assert latent.shape == (2, LATENT_DIM), latent.shape
    assert latent.dtype == jnp.float32
    print("KERNEL_OK")
</pallas_src>

<mosaic_0001>
module attributes {stable_mosaic.version = 11 : i64} {
  func.func @_matmul_bias_kernel(%arg0: i32, %arg1: memref<800x48xbf16, #tpu.memory_space<vmem>>, %arg2: memref<48x32xbf16, #tpu.memory_space<vmem>>, %arg3: memref<1x32xf32, #tpu.memory_space<vmem>>, %arg4: memref<800x32xbf16, #tpu.memory_space<vmem>>) attributes {dimension_semantics = [#tpu.dimension_semantics<parallel>], iteration_bounds = array<i64: 4>, scalar_prefetch = 0 : i64, scratch_operands = 0 : i64, tpu.core_type = #tpu.core_type<tc>, window_params = [{transform_indices = @transform_0, window_bounds = array<i64: 800, 48>}, {pipeline_mode = #tpu.pipeline_mode<synchronous>, transform_indices = @transform_1, window_bounds = array<i64: 48, 32>}, {pipeline_mode = #tpu.pipeline_mode<synchronous>, transform_indices = @transform_2, window_bounds = array<i64: 1, 32>}, {transform_indices = @transform_3, window_bounds = array<i64: 800, 32>}]} {
    %c0 = arith.constant 0 : index
    %c0_0 = arith.constant 0 : index
    %0 = vector.load %arg1[%c0, %c0_0] : memref<800x48xbf16, #tpu.memory_space<vmem>>, vector<800x48xbf16>
    %c0_1 = arith.constant 0 : index
    %c0_2 = arith.constant 0 : index
    %1 = vector.load %arg2[%c0_1, %c0_2] : memref<48x32xbf16, #tpu.memory_space<vmem>>, vector<48x32xbf16>
    %cst = arith.constant dense<0.000000e+00> : vector<800x32xf32>
    %2 = tpu.matmul %0, %1, %cst {dimension_numbers = #tpu.dot_dimension_numbers<[1], [0], [0], [1], [0, 0, 1, 1], [], []>} : vector<800x48xbf16>, vector<48x32xbf16>, vector<800x32xf32> -> vector<800x32xf32>
    %c0_3 = arith.constant 0 : index
    %c0_4 = arith.constant 0 : index
    %3 = vector.load %arg3[%c0_3, %c0_4] : memref<1x32xf32, #tpu.memory_space<vmem>>, vector<1x32xf32>
    %4 = vector.broadcast %3 : vector<1x32xf32> to vector<800x32xf32>
    %5 = arith.addf %2, %4 : vector<800x32xf32>
    %cst_5 = arith.constant 0.000000e+00 : f32
    %6 = vector.broadcast %cst_5 : f32 to vector<800x32xf32>
    %7 = arith.maximumf %5, %6 : vector<800x32xf32>
    %8 = arith.truncf %7 : vector<800x32xf32> to vector<800x32xbf16>
    %c0_6 = arith.constant 0 : index
    %c0_7 = arith.constant 0 : index
    %9 = vector.load %arg4[%c0_6, %c0_7] : memref<800x32xbf16, #tpu.memory_space<vmem>>, vector<800x32xbf16>
    tpu.vector_store %arg4[%c0_6, %c0_7], %8 {strides = array<i32>} : memref<800x32xbf16, #tpu.memory_space<vmem>>, vector<800x32xbf16>,
    return
  }
  func.func @transform_0(%arg0: i32) -> (i32, i32) {
    %c0_i32 = arith.constant 0 : i32
    %c0_i32_0 = arith.constant 0 : i32
    return %arg0, %c0_i32 : i32, i32
  }
  func.func @transform_1(%arg0: i32) -> (i32, i32) {
    %c0_i32 = arith.constant 0 : i32
    %c0_i32_0 = arith.constant 0 : i32
    %c0_i32_1 = arith.constant 0 : i32
    return %c0_i32, %c0_i32_0 : i32, i32
  }
  func.func @transform_2(%arg0: i32) -> (i32, i32) {
    %c0_i32 = arith.constant 0 : i32
    %c0_i32_0 = arith.constant 0 : i32
    %c0_i32_1 = arith.constant 0 : i32
    return %c0_i32, %c0_i32_0 : i32, i32
  }
  func.func @transform_3(%arg0: i32) -> (i32, i32) {
    %c0_i32 = arith.constant 0 : i32
    %c0_i32_0 = arith.constant 0 : i32
    return %arg0, %c0_i32 : i32, i32
  }
}

module attributes {stable_mosaic.version = 11 : i64} {
  func.func @_matmul_bias_kernel(%arg0: i32, %arg1: memref<400x512xbf16, #tpu.memory_space<vmem>>, %arg2: memref<512x64xbf16, #tpu.memory_space<vmem>>, %arg3: memref<1x64xf32, #tpu.memory_space<vmem>>, %arg4: memref<400x64xbf16, #tpu.memory_space<vmem>>) attributes {dimension_semantics = [#tpu.dimension_semantics<parallel>], iteration_bounds = array<i64: 2>, scalar_prefetch = 0 : i64, scratch_operands = 0 : i64, tpu.core_type = #tpu.core_type<tc>, window_params = [{transform_indices = @transform_0, window_bounds = array<i64: 400, 512>}, {pipeline_mode = #tpu.pipeline_mode<synchronous>, transform_indices = @transform_1, window_bounds = array<i64: 512, 64>}, {pipeline_mode = #tpu.pipeline_mode<synchronous>, transform_indices = @transform_2, window_bounds = array<i64: 1, 64>}, {transform_indices = @transform_3, window_bounds = array<i64: 400, 64>}]} {
    %c0 = arith.constant 0 : index
    %c0_0 = arith.constant 0 : index
    %0 = vector.load %arg1[%c0, %c0_0] : memref<400x512xbf16, #tpu.memory_space<vmem>>, vector<400x512xbf16>
    %c0_1 = arith.constant 0 : index
    %c0_2 = arith.constant 0 : index
    %1 = vector.load %arg2[%c0_1, %c0_2] : memref<512x64xbf16, #tpu.memory_space<vmem>>, vector<512x64xbf16>
    %cst = arith.constant dense<0.000000e+00> : vector<400x64xf32>
    %2 = tpu.matmul %0, %1, %cst {dimension_numbers = #tpu.dot_dimension_numbers<[1], [0], [0], [1], [0, 0, 1, 1], [], []>} : vector<400x512xbf16>, vector<512x64xbf16>, vector<400x64xf32> -> vector<400x64xf32>
    %c0_3 = arith.constant 0 : index
    %c0_4 = arith.constant 0 : index
    %3 = vector.load %arg3[%c0_3, %c0_4] : memref<1x64xf32, #tpu.memory_space<vmem>>, vector<1x64xf32>
    %4 = vector.broadcast %3 : vector<1x64xf32> to vector<400x64xf32>
    %5 = arith.addf %2, %4 : vector<400x64xf32>
    %cst_5 = arith.constant 0.000000e+00 : f32
    %6 = vector.broadcast %cst_5 : f32 to vector<400x64xf32>
    %7 = arith.maximumf %5, %6 : vector<400x64xf32>
    %8 = arith.truncf %7 : vector<400x64xf32> to vector<400x64xbf16>
    %c0_6 = arith.constant 0 : index
    %c0_7 = arith.constant 0 : index
    %9 = vector.load %arg4[%c0_6, %c0_7] : memref<400x64xbf16, #tpu.memory_space<vmem>>, vector<400x64xbf16>
    tpu.vector_store %arg4[%c0_6, %c0_7], %8 {strides = array<i32>} : memref<400x64xbf16, #tpu.memory_space<vmem>>, vector<400x64xbf16>,
    return
  }
  func.func @transform_0(%arg0: i32) -> (i32, i32) {
    %c0_i32 = arith.constant 0 : i32
    %c0_i32_0 = arith.constant 0 : i32
    return %arg0, %c0_i32 : i32, i32
  }
  func.func @transform_1(%arg0: i32) -> (i32, i32) {
    %c0_i32 = arith.constant 0 : i32
    %c0_i32_0 = arith.constant 0 : i32
    %c0_i32_1 = arith.constant 0 : i32
    return %c0_i32, %c0_i32_0 : i32, i32
  }
  func.func @transform_2(%arg0: i32) -> (i32, i32) {
    %c0_i32 = arith.constant 0 : i32
    %c0_i32_0 = arith.constant 0 : i32
    %c0_i32_1 = arith.constant 0 : i32
    return %c0_i32, %c0_i32_0 : i32, i32
  }
  func.func @transform_3(%arg0: i32) -> (i32, i32) {
    %c0_i32 = arith.constant 0 : i32
    %c0_i32_0 = arith.constant 0 : i32
    return %arg0, %c0_i32 : i32, i32
  }
}

module attributes {stable_mosaic.version = 11 : i64} {
  func.func @_matmul_bias_kernel(%arg0: i32, %arg1: memref<208x1024xbf16, #tpu.memory_space<vmem>>, %arg2: memref<1024x128xbf16, #tpu.memory_space<vmem>>, %arg3: memref<1x128xf32, #tpu.memory_space<vmem>>, %arg4: memref<208x128xbf16, #tpu.memory_space<vmem>>) attributes {dimension_semantics = [#tpu.dimension_semantics<parallel>], iteration_bounds = array<i64: 1>, scalar_prefetch = 0 : i64, scratch_operands = 0 : i64, tpu.core_type = #tpu.core_type<tc>, window_params = [{transform_indices = @transform_0, window_bounds = array<i64: 208, 1024>}, {pipeline_mode = #tpu.pipeline_mode<synchronous>, transform_indices = @transform_1, window_bounds = array<i64: 1024, 128>}, {pipeline_mode = #tpu.pipeline_mode<synchronous>, transform_indices = @transform_2, window_bounds = array<i64: 1, 128>}, {transform_indices = @transform_3, window_bounds = array<i64: 208, 128>}]} {
    %c0 = arith.constant 0 : index
    %c0_0 = arith.constant 0 : index
    %0 = vector.load %arg1[%c0, %c0_0] : memref<208x1024xbf16, #tpu.memory_space<vmem>>, vector<208x1024xbf16>
    %c0_1 = arith.constant 0 : index
    %c0_2 = arith.constant 0 : index
    %1 = vector.load %arg2[%c0_1, %c0_2] : memref<1024x128xbf16, #tpu.memory_space<vmem>>, vector<1024x128xbf16>
    %cst = arith.constant dense<0.000000e+00> : vector<208x128xf32>
    %2 = tpu.matmul %0, %1, %cst {dimension_numbers = #tpu.dot_dimension_numbers<[1], [0], [0], [1], [0, 0, 1, 1], [], []>} : vector<208x1024xbf16>, vector<1024x128xbf16>, vector<208x128xf32> -> vector<208x128xf32>
    %c0_3 = arith.constant 0 : index
    %c0_4 = arith.constant 0 : index
    %3 = vector.load %arg3[%c0_3, %c0_4] : memref<1x128xf32, #tpu.memory_space<vmem>>, vector<1x128xf32>
    %4 = vector.broadcast %3 : vector<1x128xf32> to vector<208x128xf32>
    %5 = arith.addf %2, %4 : vector<208x128xf32>
    %cst_5 = arith.constant 0.000000e+00 : f32
    %6 = vector.broadcast %cst_5 : f32 to vector<208x128xf32>
    %7 = arith.maximumf %5, %6 : vector<208x128xf32>
    %8 = arith.truncf %7 : vector<208x128xf32> to vector<208x128xbf16>
    %c0_6 = arith.constant 0 : index
    %c0_7 = arith.constant 0 : index
    %9 = vector.load %arg4[%c0_6, %c0_7] : memref<208x128xbf16, #tpu.memory_space<vmem>>, vector<208x128xbf16>
    tpu.vector_store %arg4[%c0_6, %c0_7], %8 {strides = array<i32>} : memref<208x128xbf16, #tpu.memory_space<vmem>>, vector<208x128xbf16>,
    return
  }
  func.func @transform_0(%arg0: i32) -> (i32, i32) {
    %c0_i32 = arith.constant 0 : i32
    %c0_i32_0 = arith.constant 0 : i32
    return %arg0, %c0_i32 : i32, i32
  }
  func.func @transform_1(%arg0: i32) -> (i32, i32) {
    %c0_i32 = arith.constant 0 : i32
    %c0_i32_0 = arith.constant 0 : i32
    %c0_i32_1 = arith.constant 0 : i32
    return %c0_i32, %c0_i32_0 : i32, i32
  }
  func.func @transform_2(%arg0: i32) -> (i32, i32) {
    %c0_i32 = arith.constant 0 : i32
    %c0_i32_0 = arith.constant 0 : i32
    %c0_i32_1 = arith.constant 0 : i32
    return %c0_i32, %c0_i32_0 : i32, i32
  }
  func.func @transform_3(%arg0: i32) -> (i32, i32) {
    %c0_i32 = arith.constant 0 : i32
    %c0_i32_0 = arith.constant 0 : i32
    return %arg0, %c0_i32 : i32, i32
  }
}

module attributes {stable_mosaic.version = 11 : i64} {
  func.func @_matmul_bias_kernel(%arg0: i32, %arg1: memref<64x2048xbf16, #tpu.memory_space<vmem>>, %arg2: memref<2048x256xbf16, #tpu.memory_space<vmem>>, %arg3: memref<1x256xf32, #tpu.memory_space<vmem>>, %arg4: memref<64x256xbf16, #tpu.memory_space<vmem>>) attributes {dimension_semantics = [#tpu.dimension_semantics<parallel>], iteration_bounds = array<i64: 1>, scalar_prefetch = 0 : i64, scratch_operands = 0 : i64, tpu.core_type = #tpu.core_type<tc>, window_params = [{transform_indices = @transform_0, window_bounds = array<i64: 64, 2048>}, {pipeline_mode = #tpu.pipeline_mode<synchronous>, transform_indices = @transform_1, window_bounds = array<i64: 2048, 256>}, {pipeline_mode = #tpu.pipeline_mode<synchronous>, transform_indices = @transform_2, window_bounds = array<i64: 1, 256>}, {transform_indices = @transform_3, window_bounds = array<i64: 64, 256>}]} {
    %c0 = arith.constant 0 : index
    %c0_0 = arith.constant 0 : index
    %0 = vector.load %arg1[%c0, %c0_0] : memref<64x2048xbf16, #tpu.memory_space<vmem>>, vector<64x2048xbf16>
    %c0_1 = arith.constant 0 : index
    %c0_2 = arith.constant 0 : index
    %1 = vector.load %arg2[%c0_1, %c0_2] : memref<2048x256xbf16, #tpu.memory_space<vmem>>, vector<2048x256xbf16>
    %cst = arith.constant dense<0.000000e+00> : vector<64x256xf32>
    %2 = tpu.matmul %0, %1, %cst {dimension_numbers = #tpu.dot_dimension_numbers<[1], [0], [0], [1], [0, 0, 1, 1], [], []>} : vector<64x2048xbf16>, vector<2048x256xbf16>, vector<64x256xf32> -> vector<64x256xf32>
    %c0_3 = arith.constant 0 : index
    %c0_4 = arith.constant 0 : index
    %3 = vector.load %arg3[%c0_3, %c0_4] : memref<1x256xf32, #tpu.memory_space<vmem>>, vector<1x256xf32>
    %4 = vector.broadcast %3 : vector<1x256xf32> to vector<64x256xf32>
    %5 = arith.addf %2, %4 : vector<64x256xf32>
    %cst_5 = arith.constant 0.000000e+00 : f32
    %6 = vector.broadcast %cst_5 : f32 to vector<64x256xf32>
    %7 = arith.maximumf %5, %6 : vector<64x256xf32>
    %8 = arith.truncf %7 : vector<64x256xf32> to vector<64x256xbf16>
    %c0_6 = arith.constant 0 : index
    %c0_7 = arith.constant 0 : index
    %9 = vector.load %arg4[%c0_6, %c0_7] : memref<64x256xbf16, #tpu.memory_space<vmem>>, vector<64x256xbf16>
    tpu.vector_store %arg4[%c0_6, %c0_7], %8 {strides = array<i32>} : memref<64x256xbf16, #tpu.memory_space<vmem>>, vector<64x256xbf16>,
    return
  }
  func.func @transform_0(%arg0: i32) -> (i32, i32) {
    %c0_i32 = arith.constant 0 : i32
    %c0_i32_0 = arith.constant 0 : i32
    return %arg0, %c0_i32 : i32, i32
  }
  func.func @transform_1(%arg0: i32) -> (i32, i32) {
    %c0_i32 = arith.constant 0 : i32
    %c0_i32_0 = arith.constant 0 : i32
    %c0_i32_1 = arith.constant 0 : i32
    return %c0_i32, %c0_i32_0 : i32, i32
  }
  func.func @transform_2(%arg0: i32) -> (i32, i32) {
    %c0_i32 = arith.constant 0 : i32
    %c0_i32_0 = arith.constant 0 : i32
    %c0_i32_1 = arith.constant 0 : i32
    return %c0_i32, %c0_i32_0 : i32, i32
  }
  func.func @transform_3(%arg0: i32) -> (i32, i32) {
    %c0_i32 = arith.constant 0 : i32
    %c0_i32_0 = arith.constant 0 : i32
    return %arg0, %c0_i32 : i32, i32
  }
}

module attributes {stable_mosaic.version = 11 : i64} {
  func.func @_matmul_bias_kernel(%arg0: i32, %arg1: memref<16x6400xbf16, #tpu.memory_space<vmem>>, %arg2: memref<6400x64xbf16, #tpu.memory_space<vmem>>, %arg3: memref<1x64xf32, #tpu.memory_space<vmem>>, %arg4: memref<16x64xf32, #tpu.memory_space<vmem>>) attributes {dimension_semantics = [#tpu.dimension_semantics<parallel>], iteration_bounds = array<i64: 1>, scalar_prefetch = 0 : i64, scratch_operands = 0 : i64, tpu.core_type = #tpu.core_type<tc>, window_params = [{transform_indices = @transform_0, window_bounds = array<i64: 16, 6400>}, {pipeline_mode = #tpu.pipeline_mode<synchronous>, transform_indices = @transform_1, window_bounds = array<i64: 6400, 64>}, {pipeline_mode = #tpu.pipeline_mode<synchronous>, transform_indices = @transform_2, window_bounds = array<i64: 1, 64>}, {transform_indices = @transform_3, window_bounds = array<i64: 16, 64>}]} {
    %c0 = arith.constant 0 : index
    %c0_0 = arith.constant 0 : index
    %0 = vector.load %arg1[%c0, %c0_0] : memref<16x6400xbf16, #tpu.memory_space<vmem>>, vector<16x6400xbf16>
    %c0_1 = arith.constant 0 : index
    %c0_2 = arith.constant 0 : index
    %1 = vector.load %arg2[%c0_1, %c0_2] : memref<6400x64xbf16, #tpu.memory_space<vmem>>, vector<6400x64xbf16>
    %cst = arith.constant dense<0.000000e+00> : vector<16x64xf32>
    %2 = tpu.matmul %0, %1, %cst {dimension_numbers = #tpu.dot_dimension_numbers<[1], [0], [0], [1], [0, 0, 1, 1], [], []>} : vector<16x6400xbf16>, vector<6400x64xbf16>, vector<16x64xf32> -> vector<16x64xf32>
    %c0_3 = arith.constant 0 : index
    %c0_4 = arith.constant 0 : index
    %3 = vector.load %arg3[%c0_3, %c0_4] : memref<1x64xf32, #tpu.memory_space<vmem>>, vector<1x64xf32>
    %4 = vector.broadcast %3 : vector<1x64xf32> to vector<16x64xf32>
    %5 = arith.addf %2, %4 : vector<16x64xf32>
    %c0_5 = arith.constant 0 : index
    %c0_6 = arith.constant 0 : index
    %6 = vector.load %arg4[%c0_5, %c0_6] : memref<16x64xf32, #tpu.memory_space<vmem>>, vector<16x64xf32>
    tpu.vector_store %arg4[%c0_5, %c0_6], %5 {strides = array<i32>} : memref<16x64xf32, #tpu.memory_space<vmem>>, vector<16x64xf32>,
    return
  }
  func.func @transform_0(%arg0: i32) -> (i32, i32) {
    %c0_i32 = arith.constant 0 : i32
    %c0_i32_0 = arith.constant 0 : i32
    return %arg0, %c0_i32 : i32, i32
  }
  func.func @transform_1(%arg0: i32) -> (i32, i32) {
    %c0_i32 = arith.constant 0 : i32
    %c0_i32_0 = arith.constant 0 : i32
    %c0_i32_1 = arith.constant 0 : i32
    return %c0_i32, %c0_i32_0 : i32, i32
  }
  func.func @transform_2(%arg0: i32) -> (i32, i32) {
    %c0_i32 = arith.constant 0 : i32
    %c0_i32_0 = arith.constant 0 : i32
    %c0_i32_1 = arith.constant 0 : i32
    return %c0_i32, %c0_i32_0 : i32, i32
  }
  func.func @transform_3(%arg0: i32) -> (i32, i32) {
    %c0_i32 = arith.constant 0 : i32
    %c0_i32_0 = arith.constant 0 : i32
    return %arg0, %c0_i32 : i32, i32
  }
}

</mosaic_0001>

<bundles_post_ra>
// kernel: encoder_forward.5
= control target key start
LH: loop header
LB: loop body
LE: loop exit
PB: predicated region body
PF: predicated region fallthrough
CT: control target
= control target key end

     0   :  { %s2364_s12 = smov 0   ;;  %s2806_s0 = inlined_call_operand.vmem [shape: bf16[3200,48], index: 0, kind: input, shape index: {}]   ;;  %s2807_s1 = inlined_call_operand.vmem [shape: bf16[48,32], index: 1, kind: input, shape index: {}]   ;;  %s2808_s2 = inlined_call_operand.vmem [shape: f32[1,32], index: 2, kind: input, shape index: {}]   ;;  %s2809_s3 = inlined_call_operand.vmem [shape: bf16[3200,32], index: 3, kind: output, shape index: {}]  }
   0x1 LB: > { %s1797_s13 = sadd.s32 4294967295, %s2342_s12   ;;  %p1801_p0 = scmp.ge.s32.totalorder %s2342_s12, 1  ;;  %s2342_s12 = sphi %s2364_s12, %s13_s12  }
   0x2   : > { %p138_p1 = scmp.lt.s32.totalorder %s2342_s12, 5 }
   0x4   : > { %p139_p2 = pnand %p1801_p0, %p138_p1 }
   0x5   : > { %s162_s16 = smul.u32 (!%p139_p2), 100, %s1797_s13 }
   0x6   : > { %142 = sbr.rel (%p139_p2) target bundleno = 326 (0x146), region = 32 }
   0x7   : > { %p163_p3 = scmp.lt.s32.totalorder (!%p139_p2), %s162_s16, 399 }
   0xb   : > { %v2283_v0 = vld [vmem:[%s2807_s1 + $0x10] sm:$0xff]   ;;  %v2284_v1 = vld [vmem:[%s2807_s1 + $0x8] sm:$0xff]   ;;  %v2285_v2 = vld [vmem:[%s2807_s1] sm:$0xff]   ;;  %s2811_s16 = smov (!%p163_p3, %s162_s16), 399  ;;  %vm556_vm0 = vcmask 392192   ;;  %vm1640_vm1 = vcmask 257024  }
   0xc   : > { %2163 = vmatprep.subr.bf16.mxu0 %v2283_v0  ;;  %2269 = vmatprep.subr.bf16.mxu1 %v2283_v0  ;;  %s1802_s21 = sshll.u32 %s2811_s16, 2  ;;  %v2494_v53 = vld [vmem:[%s2808_s2] ss:$0 sm:$0xff] }
   0xd   : > { %2164 = vmatpush3.bf16.msra.mxu0 %v2283_v0  ;;  %2272 = vmatpush3.bf16.msra.mxu1 %v2283_v0  ;;  %s2389_s24 = scalar_lea.vmem %s2806_s0, %s1802_s21  ;;  %s2505_s29 = scalar_lea.vmem %s2809_s3, %s1802_s21 }
   0xe   : > { %2165 = vmatprep.subr.bf16.mxu0 %v2284_v1  ;;  %2270 = vmatprep.subr.bf16.mxu1 %v2284_v1  ;;  %v2286_v3 = vld [vmem:[%s2389_s24] sm:$0xff]   ;;  %v2287_v4 = vld [vmem:[%s2389_s24 + $0x8] sm:$0xff]   ;;  %v2288_v5 = vld [vmem:[%s2389_s24 + $0xd0] sm:$0xff]  }
   0xf   : > { %2169 = vmatprep.mubr.msk.bf16.mxu0 %vm556_vm0, %v2286_v3  ;;  %v2289_v6 = vld [vmem:[%s2389_s24 + $0xd8] sm:$0xff]   ;;  %2221 = vmatprep.mubr.msk.bf16.mxu1 %vm556_vm0, %v2288_v5  ;;  %v2290_v7 = vld [vmem:[%s2389_s24 + $0x10] sm:$0xff]   ;;  %v2292_v8 = vld [vmem:[%s2389_s24 + $0xe0] sm:$0xff]  }
  0x10   : > { %v2291_v9 = vld [vmem:[%s2389_s24 + $0x18] sm:$0xff]   ;;  %v2293_v10 = vld [vmem:[%s2389_s24 + $0xe8] sm:$0xff]   ;;  %v2294_v11 = vld [vmem:[%s2389_s24 + $0x20] sm:$0xff]  }
  0x11   : > { %2166 = vmatpush3.bf16.msra.mxu0 %v2284_v1  ;;  %2273 = vmatpush3.bf16.msra.mxu1 %v2284_v1  ;;  %v2296_v12 = vld [vmem:[%s2389_s24 + $0xf0] sm:$0xff]   ;;  %v2295_v13 = vld [vmem:[%s2389_s24 + $0x28] sm:$0xff]   ;;  %v2297_v14 = vld [vmem:[%s2389_s24 + $0xf8] sm:$0xff]  }
  0x12   : > { %2167 = vmatprep.subr.bf16.mxu0 %v2285_v2  ;;  %2271 = vmatprep.subr.bf16.mxu1 %v2285_v2  ;;  %v2298_v15 = vld [vmem:[%s2389_s24 + $0x30] sm:$0xff]   ;;  %v2300_v16 = vld [vmem:[%s2389_s24 + $0x100] sm:$0xff]   ;;  %v2299_v17 = vld [vmem:[%s2389_s24 + $0x38] sm:$0xff]  }
  0x13   : > { %v2301_v18 = vld [vmem:[%s2389_s24 + $0x108] sm:$0xff]   ;;  %v2302_v19 = vld [vmem:[%s2389_s24 + $0x40] sm:$0xff]   ;;  %v2304_v20 = vld [vmem:[%s2389_s24 + $0x110] sm:$0xff]  }
  0x14   : > { %v2303_v21 = vld [vmem:[%s2389_s24 + $0x48] sm:$0xff]   ;;  %v2305_v22 = vld [vmem:[%s2389_s24 + $0x118] sm:$0xff]   ;;  %v2306_v23 = vld [vmem:[%s2389_s24 + $0x50] sm:$0xff]  }
  0x15   : > { %2168 = vmatpush3.bf16.msra.mxu0 %v2285_v2  ;;  %2274 = vmatpush3.bf16.msra.mxu1 %v2285_v2  ;;  %v2308_v24 = vld [vmem:[%s2389_s24 + $0x120] sm:$0xff]   ;;  %v2307_v25 = vld [vmem:[%s2389_s24 + $0x58] sm:$0xff]   ;;  %v2309_v26 = vld [vmem:[%s2389_s24 + $0x128] sm:$0xff]  }
  0x16   : > { %v2310_v27 = vld [vmem:[%s2389_s24 + $0x60] sm:$0xff]   ;;  %v2312_v28 = vld [vmem:[%s2389_s24 + $0x130] sm:$0xff]   ;;  %v2311_v29 = vld [vmem:[%s2389_s24 + $0x68] sm:$0xff]  }
  0x17   : > { %v2313_v30 = vld [vmem:[%s2389_s24 + $0x138] sm:$0xff]   ;;  %v2314_v31 = vld [vmem:[%s2389_s24 + $0x70] sm:$0xff]   ;;  %v2316_v32 = vld [vmem:[%s2389_s24 + $0x140] sm:$0xff]  }
  0x18   : > { %2170 = vmatmul.mubr.msk.bf16.vlgmr.msra.gmra.mxu0 %vm556_vm0, %v2287_v4  ;;  %2222 = vmatmul.mubr.msk.bf16.vlgmr.msra.gmra.mxu1 %vm556_vm0, %v2289_v6  ;;  %v2315_v33 = vld [vmem:[%s2389_s24 + $0x78] sm:$0xff]   ;;  %v2317_v34 = vld [vmem:[%s2389_s24 + $0x148] sm:$0xff]   ;;  %v2318_v35 = vld [vmem:[%s2389_s24 + $0x80] sm:$0xff]  }
  0x19   : > { %2173 = vmatprep.mubr.msk.bf16.mxu0 %vm556_vm0, %v2290_v7  ;;  %2225 = vmatprep.mubr.msk.bf16.mxu1 %vm556_vm0, %v2292_v8  ;;  %v2320_v36 = vld [vmem:[%s2389_s24 + $0x150] sm:$0xff]   ;;  %v2319_v37 = vld [vmem:[%s2389_s24 + $0x88] sm:$0xff]   ;;  %v2321_v38 = vld [vmem:[%s2389_s24 + $0x158] sm:$0xff]  }
  0x1a   : > { %v2322_v39 = vld [vmem:[%s2389_s24 + $0x90] sm:$0xff]   ;;  %v2324_v40 = vld [vmem:[%s2389_s24 + $0x160] sm:$0xff]   ;;  %v2323_v41 = vld [vmem:[%s2389_s24 + $0x98] sm:$0xff]  }
  0x1b   : > { %v2325_v42 = vld [vmem:[%s2389_s24 + $0x168] sm:$0xff]   ;;  %v2326_v43 = vld [vmem:[%s2389_s24 + $0xa0] sm:$0xff]   ;;  %v2328_v44 = vld [vmem:[%s2389_s24 + $0x170] sm:$0xff]  }
  0x1c   : > { %v2327_v45 = vld [vmem:[%s2389_s24 + $0xa8] sm:$0xff]   ;;  %v2329_v46 = vld [vmem:[%s2389_s24 + $0x178] sm:$0xff]   ;;  %v2330_v47 = vld [vmem:[%s2389_s24 + $0xb0] sm:$0xff]  }
  0x1d   : > { %v2332_v48 = vld [vmem:[%s2389_s24 + $0x180] sm:$0xff]   ;;  %v2331_v49 = vld [vmem:[%s2389_s24 + $0xb8] sm:$0xff]   ;;  %v2333_v50 = vld [vmem:[%s2389_s24 + $0x188] sm:$0xff]  }
  0x1e   : > { %v2334_v51 = vld [vmem:[%s2389_s24 + $0xc0] sm:$0xff]   ;;  %v2335_v52 = vld [vmem:[%s2389_s24 + $0xc8] sm:$0xff]  }
  0x20   : > { %2174 = vmatmul.mubr.msk.bf16.gmra.mxu0 %vm556_vm0, %v2291_v9  ;;  %2226 = vmatmul.mubr.msk.bf16.gmra.mxu1 %vm556_vm0, %v2293_v10 }
  0x21   : > { %2177 = vmatprep.mubr.msk.bf16.mxu0 %vm556_vm0, %v2294_v11  ;;  %2229 = vmatprep.mubr.msk.bf16.mxu1 %vm556_vm0, %v2296_v12 }
  0x28   : > { %2178 = vmatmul.mubr.msk.bf16.gmra.mxu0 %vm556_vm0, %v2295_v13  ;;  %2230 = vmatmul.mubr.msk.bf16.gmra.mxu1 %vm556_vm0, %v2297_v14 }
  0x29   : > { %2181 = vmatprep.mubr.msk.bf16.mxu0 %vm556_vm0, %v2298_v15  ;;  %2233 = vmatprep.mubr.msk.bf16.mxu1 %vm556_vm0, %v2300_v16 }
  0x30   : > { %2182 = vmatmul.mubr.msk.bf16.gmra.mxu0 %vm556_vm0, %v2299_v17  ;;  %2234 = vmatmul.mubr.msk.bf16.gmra.mxu1 %vm556_vm0, %v2301_v18 }
  0x31   : > { %2185 = vmatprep.mubr.msk.bf16.mxu0 %vm556_vm0, %v2302_v19  ;;  %2237 = vmatprep.mubr.msk.bf16.mxu1 %vm556_vm0, %v2304_v20 }
  0x38   : > { %2186 = vmatmul.mubr.msk.bf16.gmra.mxu0 %vm556_vm0, %v2303_v21  ;;  %2238 = vmatmul.mubr.msk.bf16.gmra.mxu1 %vm556_vm0, %v2305_v22 }
  0x39   : > { %2189 = vmatprep.mubr.msk.bf16.mxu0 %vm556_vm0, %v2306_v23  ;;  %2241 = vmatprep.mubr.msk.bf16.mxu1 %vm556_vm0, %v2308_v24 }
  0x40   : > { %2190 = vmatmul.mubr.msk.bf16.gmra.mxu0 %vm556_vm0, %v2307_v25  ;;  %2242 = vmatmul.mubr.msk.bf16.gmra.mxu1 %vm556_vm0, %v2309_v26 }
  0x41   : > { %2193 = vmatprep.mubr.msk.bf16.mxu0 %vm556_vm0, %v2310_v27  ;;  %2245 = vmatprep.mubr.msk.bf16.mxu1 %vm556_vm0, %v2312_v28 }
  0x48   : > { %2194 = vmatmul.mubr.msk.bf16.gmra.mxu0 %vm556_vm0, %v2311_v29  ;;  %2246 = vmatmul.mubr.msk.bf16.gmra.mxu1 %vm556_vm0, %v2313_v30 }
  0x49   : > { %2197 = vmatprep.mubr.msk.bf16.mxu0 %vm556_vm0, %v2314_v31  ;;  %2249 = vmatprep.mubr.msk.bf16.mxu1 %vm556_vm0, %v2316_v32 }
  0x50   : > { %2198 = vmatmul.mubr.msk.bf16.gmra.mxu0 %vm556_vm0, %v2315_v33  ;;  %2250 = vmatmul.mubr.msk.bf16.gmra.mxu1 %vm556_vm0, %v2317_v34 }
  0x51   : > { %2201 = vmatprep.mubr.msk.bf16.mxu0 %vm556_vm0, %v2318_v35  ;;  %2253 = vmatprep.mubr.msk.bf16.mxu1 %vm556_vm0, %v2320_v36 }
  0x58   : > { %2202 = vmatmul.mubr.msk.bf16.gmra.mxu0 %vm556_vm0, %v2319_v37  ;;  %2254 = vmatmul.mubr.msk.bf16.gmra.mxu1 %vm556_vm0, %v2321_v38 }
  0x59   : > { %2205 = vmatprep.mubr.msk.bf16.mxu0 %vm556_vm0, %v2322_v39  ;;  %2257 = vmatprep.mubr.msk.bf16.mxu1 %vm556_vm0, %v2324_v40 }
  0x60   : > { %2206 = vmatmul.mubr.msk.bf16.gmra.mxu0 %vm556_vm0, %v2323_v41  ;;  %2258 = vmatmul.mubr.msk.bf16.gmra.mxu1 %vm556_vm0, %v2325_v42 }
  0x61   : > { %2209 = vmatprep.mubr.msk.bf16.mxu0 %vm556_vm0, %v2326_v43  ;;  %2261 = vmatprep.mubr.msk.bf16.mxu1 %vm556_vm0, %v2328_v44 }
  0x68   : > { %2210 = vmatmul.mubr.msk.bf16.gmra.mxu0 %vm556_vm0, %v2327_v45  ;;  %2262 = vmatmul.mubr.msk.bf16.gmra.mxu1 %vm556_vm0, %v2329_v46 }
  0x69   : > { %2213 = vmatprep.mubr.msk.bf16.mxu0 %vm556_vm0, %v2330_v47  ;;  %2265 = vmatprep.mubr.msk.bf16.mxu1 %vm556_vm0, %v2332_v48 }
  0x70   : > { %2214 = vmatmul.mubr.msk.bf16.gmra.mxu0 %vm556_vm0, %v2331_v49  ;;  %2266 = vmatmul.mubr.msk.bf16.gmra.mxu1 %vm556_vm0, %v2333_v50 }
  0x71   : > { %2217 = vmatprep.mubr.msk.bf16.mxu0 %vm556_vm0, %v2334_v51 }
  0x78   : > { %2218 = vmatmul.mubr.msk.bf16.gmra.mxu0 %vm556_vm0, %v2335_v52 }
  0xd8   : > { %v2171_v54 = vpop.f32.mrf.mxu0  ;;  %v2223_v55 = vpop.f32.mrf.mxu1 }
  0xd9   : > { %v750_v56 = vadd.f32 %v2171_v54, %v2494_v53  ;;  %v958_v57 = vadd.f32 %v2223_v55, %v2494_v53 }
  0xda   : > { %v741_v58 = vpop.f32.mrf.mxu0  ;;  %v949_v59 = vpop.f32.mrf.mxu1 }
  0xdb   : > { %v1142_v60 = vmax.f32 %v750_v56, 0.0  ;;  %v742_v61 = vadd.f32 %v2494_v53, %v741_v58  ;;  %v1194_v62 = vmax.f32 %v958_v57, 0.0  ;;  %v950_v63 = vadd.f32 %v2494_v53, %v949_v59 }
  0xdc   : > { %v2172_v0 = vpop.f32.mrf.mxu0  ;;  %v2224_v1 = vpop.f32.mrf.mxu1 }
  0xdd   : > { %v2012_v2 = vpack.c.bf16 %v1142_v60, %v1142_v60  ;;  %v1140_v3 = vmax.f32 %v742_v61, 0.0  ;;  %v2064_v4 = vpack.c.bf16 %v1194_v62, %v1194_v62  ;;  %v753_v5 = vadd.f32 %v2172_v0, %v2494_v53 }
  0xde   : > { %v1192_v6 = vmax.f32 %v950_v63, 0.0  ;;  %v744_v7 = vpop.f32.mrf.mxu0  ;;  %v961_v8 = vadd.f32 %v2224_v1, %v2494_v53  ;;  %v952_v9 = vpop.f32.mrf.mxu1 }
  0xdf   : > { %1643 = vst.msk [vmem:[%s2505_s29 + $0x8] sm:$0xf] %vm1640_vm1, %v2012_v2  ;;  %v2010_v10 = vpack.c.bf16 %v1140_v3, %v1140_v3  ;;  %1695 = vst.msk [vmem:[%s2505_s29 + $0xd8] sm:$0xf] %vm1640_vm1, %v2064_v4  ;;  %v1143_v11 = vmax.f32 %v753_v5, 0.0  ;;  %v745_v12 = vadd.f32 %v2494_v53, %v744_v7  ;;  %v953_v13 = vadd.f32 %v2494_v53, %v952_v9 }
  0xe0   : > { %v2062_v14 = vpack.c.bf16 %v1192_v6, %v1192_v6  ;;  %v1195_v15 = vmax.f32 %v961_v8, 0.0  ;;  %v2175_v16 = vpop.f32.mrf.mxu0  ;;  %v2227_v17 = vpop.f32.mrf.mxu1 }
  0xe1   : > { %1641 = vst.msk [vmem:[%s2505_s29] sm:$0xf] %vm1640_vm1, %v2010_v10  ;;  %v2013_v18 = vpack.c.bf16 %v1143_v11, %v1143_v11  ;;  %v1141_v19 = vmax.f32 %v745_v12, 0.0  ;;  %v766_v20 = vadd.f32 %v2175_v16, %v2494_v53  ;;  %v1193_v21 = vmax.f32 %v953_v13, 0.0 }
  0xe2   : > { %1693 = vst.msk [vmem:[%s2505_s29 + $0xd0] sm:$0xf] %vm1640_vm1, %v2062_v14  ;;  %v2065_v22 = vpack.c.bf16 %v1195_v15, %v1195_v15  ;;  %v757_v23 = vpop.f32.mrf.mxu0  ;;  %v974_v24 = vadd.f32 %v2227_v17, %v2494_v53  ;;  %v965_v25 = vpop.f32.mrf.mxu1 }
  0xe3   : > { %1644 = vst.msk [vmem:[%s2505_s29 + $0xc] sm:$0xf] %vm1640_vm1, %v2013_v18  ;;  %v2011_v26 = vpack.c.bf16 %v1141_v19, %v1141_v19  ;;  %v1146_v27 = vmax.f32 %v766_v20, 0.0  ;;  %v2063_v28 = vpack.c.bf16 %v1193_v21, %v1193_v21  ;;  %v758_v29 = vadd.f32 %v2494_v53, %v757_v23 }
  0xe4   : > { %1696 = vst.msk [vmem:[%s2505_s29 + $0xdc] sm:$0xf] %vm1640_vm1, %v2065_v22  ;;  %v1198_v30 = vmax.f32 %v974_v24, 0.0  ;;  %v2176_v31 = vpop.f32.mrf.mxu0  ;;  %v966_v32 = vadd.f32 %v2494_v53, %v965_v25  ;;  %v2228_v33 = vpop.f32.mrf.mxu1 }
  0xe5   : > { %1642 = vst.msk [vmem:[%s2505_s29 + $0x4] sm:$0xf] %vm1640_vm1, %v2011_v26  ;;  %v2016_v34 = vpack.c.bf16 %v1146_v27, %v1146_v27  ;;  %1694 = vst.msk [vmem:[%s2505_s29 + $0xd4] sm:$0xf] %vm1640_vm1, %v2063_v28  ;;  %v1144_v35 = vmax.f32 %v758_v29, 0.0  ;;  %v769_v36 = vadd.f32 %v2176_v31, %v2494_v53  ;;  %v977_v37 = vadd.f32 %v2228_v33, %v2494_v53 }
  0xe6   : > { %v2068_v38 = vpack.c.bf16 %v1198_v30, %v1198_v30  ;;  %v1196_v39 = vmax.f32 %v966_v32, 0.0  ;;  %v760_v40 = vpop.f32.mrf.mxu0  ;;  %v968_v41 = vpop.f32.mrf.mxu1 }
  0xe7   : > { %1647 = vst.msk [vmem:[%s2505_s29 + $0x18] sm:$0xf] %vm1640_vm1, %v2016_v34  ;;  %v2014_v42 = vpack.c.bf16 %v1144_v35, %v1144_v35  ;;  %v1147_v43 = vmax.f32 %v769_v36, 0.0  ;;  %v761_v44 = vadd.f32 %v2494_v53, %v760_v40  ;;  %v1199_v45 = vmax.f32 %v977_v37, 0.0 }
  0xe8   : > { %1699 = vst.msk [vmem:[%s2505_s29 + $0xe8] sm:$0xf] %vm1640_vm1, %v2068_v38  ;;  %v2066_v46 = vpack.c.bf16 %v1196_v39, %v1196_v39  ;;  %v2179_v47 = vpop.f32.mrf.mxu0  ;;  %v969_v48 = vadd.f32 %v2494_v53, %v968_v41  ;;  %v2231_v49 = vpop.f32.mrf.mxu1 }
  0xe9   : > { %1645 = vst.msk [vmem:[%s2505_s29 + $0x10] sm:$0xf] %vm1640_vm1, %v2014_v42  ;;  %v2017_v50 = vpack.c.bf16 %v1147_v43, %v1147_v43  ;;  %v1145_v51 = vmax.f32 %v761_v44, 0.0  ;;  %v2069_v52 = vpack.c.bf16 %v1199_v45, %v1199_v45  ;;  %v782_v54 = vadd.f32 %v2179_v47, %v2494_v53 }
  0xea   : > { %1697 = vst.msk [vmem:[%s2505_s29 + $0xe0] sm:$0xf] %vm1640_vm1, %v2066_v46  ;;  %v1197_v55 = vmax.f32 %v969_v48, 0.0  ;;  %v773_v56 = vpop.f32.mrf.mxu0  ;;  %v990_v57 = vadd.f32 %v2231_v49, %v2494_v53  ;;  %v981_v58 = vpop.f32.mrf.mxu1 }
  0xeb   : > { %1648 = vst.msk [vmem:[%s2505_s29 + $0x1c] sm:$0xf] %vm1640_vm1, %v2017_v50  ;;  %v2015_v59 = vpack.c.bf16 %v1145_v51, %v1145_v51  ;;  %1700 = vst.msk [vmem:[%s2505_s29 + $0xec] sm:$0xf] %vm1640_vm1, %v2069_v52  ;;  %v1150_v60 = vmax.f32 %v782_v54, 0.0  ;;  %v774_v61 = vadd.f32 %v2494_v53, %v773_v56  ;;  %v982_v62 = vadd.f32 %v2494_v53, %v981_v58 }
  0xec   : > { %v2067_v63 = vpack.c.bf16 %v1197_v55, %v1197_v55  ;;  %v1202_v0 = vmax.f32 %v990_v57, 0.0  ;;  %v2180_v1 = vpop.f32.mrf.mxu0  ;;  %v2232_v2 = vpop.f32.mrf.mxu1 }
  0xed   : > { %1646 = vst.msk [vmem:[%s2505_s29 + $0x14] sm:$0xf] %vm1640_vm1, %v2015_v59  ;;  %v2020_v3 = vpack.c.bf16 %v1150_v60, %v1150_v60  ;;  %v1148_v4 = vmax.f32 %v774_v61, 0.0  ;;  %v785_v5 = vadd.f32 %v2180_v1, %v2494_v53  ;;  %v1200_v6 = vmax.f32 %v982_v62, 0.0 }
  0xee   : > { %1698 = vst.msk [vmem:[%s2505_s29 + $0xe4] sm:$0xf] %vm1640_vm1, %v2067_v63  ;;  %v2072_v7 = vpack.c.bf16 %v1202_v0, %v1202_v0  ;;  %v776_v8 = vpop.f32.mrf.mxu0  ;;  %v993_v9 = vadd.f32 %v2232_v2, %v2494_v53  ;;  %v984_v10 = vpop.f32.mrf.mxu1 }
  0xef   : > { %1651 = vst.msk [vmem:[%s2505_s29 + $0x28] sm:$0xf] %vm1640_vm1, %v2020_v3  ;;  %v2018_v11 = vpack.c.bf16 %v1148_v4, %v1148_v4  ;;  %v1151_v12 = vmax.f32 %v785_v5, 0.0  ;;  %v2070_v13 = vpack.c.bf16 %v1200_v6, %v1200_v6  ;;  %v777_v14 = vadd.f32 %v2494_v53, %v776_v8 }
  0xf0   : > { %1703 = vst.msk [vmem:[%s2505_s29 + $0xf8] sm:$0xf] %vm1640_vm1, %v2072_v7  ;;  %v1203_v15 = vmax.f32 %v993_v9, 0.0  ;;  %v2183_v16 = vpop.f32.mrf.mxu0  ;;  %v985_v17 = vadd.f32 %v2494_v53, %v984_v10  ;;  %v2235_v18 = vpop.f32.mrf.mxu1 }
  0xf1   : > { %1649 = vst.msk [vmem:[%s2505_s29 + $0x20] sm:$0xf] %vm1640_vm1, %v2018_v11  ;;  %v2021_v19 = vpack.c.bf16 %v1151_v12, %v1151_v12  ;;  %1701 = vst.msk [vmem:[%s2505_s29 + $0xf0] sm:$0xf] %vm1640_vm1, %v2070_v13  ;;  %v1149_v20 = vmax.f32 %v777_v14, 0.0  ;;  %v798_v21 = vadd.f32 %v2183_v16, %v2494_v53  ;;  %v1006_v22 = vadd.f32 %v2235_v18, %v2494_v53 }
  0xf2   : > { %v2073_v23 = vpack.c.bf16 %v1203_v15, %v1203_v15  ;;  %v1201_v24 = vmax.f32 %v985_v17, 0.0  ;;  %v789_v25 = vpop.f32.mrf.mxu0  ;;  %v997_v26 = vpop.f32.mrf.mxu1 }
  0xf3   : > { %1652 = vst.msk [vmem:[%s2505_s29 + $0x2c] sm:$0xf] %vm1640_vm1, %v2021_v19  ;;  %v2019_v27 = vpack.c.bf16 %v1149_v20, %v1149_v20  ;;  %v1154_v28 = vmax.f32 %v798_v21, 0.0  ;;  %v790_v29 = vadd.f32 %v2494_v53, %v789_v25  ;;  %v1206_v30 = vmax.f32 %v1006_v22, 0.0 }
  0xf4   : > { %1704 = vst.msk [vmem:[%s2505_s29 + $0xfc] sm:$0xf] %vm1640_vm1, %v2073_v23  ;;  %v2071_v31 = vpack.c.bf16 %v1201_v24, %v1201_v24  ;;  %v2184_v32 = vpop.f32.mrf.mxu0  ;;  %v998_v33 = vadd.f32 %v2494_v53, %v997_v26  ;;  %v2236_v34 = vpop.f32.mrf.mxu1 }
  0xf5   : > { %1650 = vst.msk [vmem:[%s2505_s29 + $0x24] sm:$0xf] %vm1640_vm1, %v2019_v27  ;;  %v2024_v35 = vpack.c.bf16 %v1154_v28, %v1154_v28  ;;  %v1152_v36 = vmax.f32 %v790_v29, 0.0  ;;  %v2076_v37 = vpack.c.bf16 %v1206_v30, %v1206_v30  ;;  %v801_v38 = vadd.f32 %v2184_v32, %v2494_v53 }
  0xf6   : > { %1702 = vst.msk [vmem:[%s2505_s29 + $0xf4] sm:$0xf] %vm1640_vm1, %v2071_v31  ;;  %v1204_v39 = vmax.f32 %v998_v33, 0.0  ;;  %v792_v40 = vpop.f32.mrf.mxu0  ;;  %v1009_v41 = vadd.f32 %v2236_v34, %v2494_v53  ;;  %v1000_v42 = vpop.f32.mrf.mxu1 }
  0xf7   : > { %1655 = vst.msk [vmem:[%s2505_s29 + $0x38] sm:$0xf] %vm1640_vm1, %v2024_v35  ;;  %v2022_v43 = vpack.c.bf16 %v1152_v36, %v1152_v36  ;;  %1707 = vst.msk [vmem:[%s2505_s29 + $0x108] sm:$0xf] %vm1640_vm1, %v2076_v37  ;;  %v1155_v44 = vmax.f32 %v801_v38, 0.0  ;;  %v793_v45 = vadd.f32 %v2494_v53, %v792_v40  ;;  %v1001_v46 = vadd.f32 %v2494_v53, %v1000_v42 }
  0xf8   : > { %v2074_v47 = vpack.c.bf16 %v1204_v39, %v1204_v39  ;;  %v1207_v48 = vmax.f32 %v1009_v41, 0.0  ;;  %v2187_v49 = vpop.f32.mrf.mxu0  ;;  %v2239_v50 = vpop.f32.mrf.mxu1 }
  0xf9   : > { %1653 = vst.msk [vmem:[%s2505_s29 + $0x30] sm:$0xf] %vm1640_vm1, %v2022_v43  ;;  %v2025_v51 = vpack.c.bf16 %v1155_v44, %v1155_v44  ;;  %v1153_v52 = vmax.f32 %v793_v45, 0.0  ;;  %v814_v54 = vadd.f32 %v2187_v49, %v2494_v53  ;;  %v1205_v55 = vmax.f32 %v1001_v46, 0.0 }
  0xfa   : > { %1705 = vst.msk [vmem:[%s2505_s29 + $0x100] sm:$0xf] %vm1640_vm1, %v2074_v47  ;;  %v2077_v56 = vpack.c.bf16 %v1207_v48, %v1207_v48  ;;  %v805_v57 = vpop.f32.mrf.mxu0  ;;  %v1022_v58 = vadd.f32 %v2239_v50, %v2494_v53  ;;  %v1013_v59 = vpop.f32.mrf.mxu1 }
  0xfb   : > { %1656 = vst.msk [vmem:[%s2505_s29 + $0x3c] sm:$0xf] %vm1640_vm1, %v2025_v51  ;;  %v2023_v60 = vpack.c.bf16 %v1153_v52, %v1153_v52  ;;  %v1158_v61 = vmax.f32 %v814_v54, 0.0  ;;  %v2075_v62 = vpack.c.bf16 %v1205_v55, %v1205_v55  ;;  %v806_v63 = vadd.f32 %v2494_v53, %v805_v57 }
  0xfc   : > { %1708 = vst.msk [vmem:[%s2505_s29 + $0x10c] sm:$0xf] %vm1640_vm1, %v2077_v56  ;;  %v1210_v0 = vmax.f32 %v1022_v58, 0.0  ;;  %v2188_v1 = vpop.f32.mrf.mxu0  ;;  %v1014_v2 = vadd.f32 %v2494_v53, %v1013_v59  ;;  %v2240_v3 = vpop.f32.mrf.mxu1 }
  0xfd   : > { %1654 = vst.msk [vmem:[%s2505_s29 + $0x34] sm:$0xf] %vm1640_vm1, %v2023_v60  ;;  %v2028_v4 = vpack.c.bf16 %v1158_v61, %v1158_v61  ;;  %1706 = vst.msk [vmem:[%s2505_s29 + $0x104] sm:$0xf] %vm1640_vm1, %v2075_v62  ;;  %v1156_v5 = vmax.f32 %v806_v63, 0.0  ;;  %v817_v6 = vadd.f32 %v2188_v1, %v2494_v53  ;;  %v1025_v7 = vadd.f32 %v2240_v3, %v2494_v53 }
  0xfe   : > { %v2080_v8 = vpack.c.bf16 %v1210_v0, %v1210_v0  ;;  %v1208_v9 = vmax.f32 %v1014_v2, 0.0  ;;  %v808_v10 = vpop.f32.mrf.mxu0  ;;  %v1016_v11 = vpop.f32.mrf.mxu1 }
  0xff   : > { %1659 = vst.msk [vmem:[%s2505_s29 + $0x48] sm:$0xf] %vm1640_vm1, %v2028_v4  ;;  %v2026_v12 = vpack.c.bf16 %v1156_v5, %v1156_v5  ;;  %v1159_v13 = vmax.f32 %v817_v6, 0.0  ;;  %v809_v14 = vadd.f32 %v2494_v53, %v808_v10  ;;  %v1211_v15 = vmax.f32 %v1025_v7, 0.0 }
 0x100   : > { %1711 = vst.msk [vmem:[%s2505_s29 + $0x118] sm:$0xf] %vm1640_vm1, %v2080_v8  ;;  %v2078_v16 = vpack.c.bf16 %v1208_v9, %v1208_v9  ;;  %v2191_v17 = vpop.f32.mrf.mxu0  ;;  %v1017_v18 = vadd.f32 %v2494_v53, %v1016_v11  ;;  %v2243_v19 = vpop.f32.mrf.mxu1 }
 0x101   : > { %1657 = vst.msk [vmem:[%s2505_s29 + $0x40] sm:$0xf] %vm1640_vm1, %v2026_v12  ;;  %v2029_v20 = vpack.c.bf16 %v1159_v13, %v1159_v13  ;;  %v1157_v21 = vmax.f32 %v809_v14, 0.0  ;;  %v2081_v22 = vpack.c.bf16 %v1211_v15, %v1211_v15  ;;  %v830_v23 = vadd.f32 %v2191_v17, %v2494_v53 }
 0x102   : > { %1709 = vst.msk [vmem:[%s2505_s29 + $0x110] sm:$0xf] %vm1640_vm1, %v2078_v16  ;;  %v1209_v24 = vmax.f32 %v1017_v18, 0.0  ;;  %v821_v25 = vpop.f32.mrf.mxu0  ;;  %v1038_v26 = vadd.f32 %v2243_v19, %v2494_v53  ;;  %v1029_v27 = vpop.f32.mrf.mxu1 }
 0x103   : > { %1660 = vst.msk [vmem:[%s2505_s29 + $0x4c] sm:$0xf] %vm1640_vm1, %v2029_v20  ;;  %v2027_v28 = vpack.c.bf16 %v1157_v21, %v1157_v21  ;;  %1712 = vst.msk [vmem:[%s2505_s29 + $0x11c] sm:$0xf] %vm1640_vm1, %v2081_v22  ;;  %v1162_v29 = vmax.f32 %v830_v23, 0.0  ;;  %v822_v30 = vadd.f32 %v2494_v53, %v821_v25  ;;  %v1030_v31 = vadd.f32 %v2494_v53, %v1029_v27 }
 0x104   : > { %v2079_v32 = vpack.c.bf16 %v1209_v24, %v1209_v24  ;;  %v1214_v33 = vmax.f32 %v1038_v26, 0.0  ;;  %v2192_v34 = vpop.f32.mrf.mxu0  ;;  %v2244_v35 = vpop.f32.mrf.mxu1 }
 0x105   : > { %1658 = vst.msk [vmem:[%s2505_s29 + $0x44] sm:$0xf] %vm1640_vm1, %v2027_v28  ;;  %v2032_v36 = vpack.c.bf16 %v1162_v29, %v1162_v29  ;;  %v1160_v37 = vmax.f32 %v822_v30, 0.0  ;;  %v833_v38 = vadd.f32 %v2192_v34, %v2494_v53  ;;  %v1212_v39 = vmax.f32 %v1030_v31, 0.0 }
 0x106   : > { %1710 = vst.msk [vmem:[%s2505_s29 + $0x114] sm:$0xf] %vm1640_vm1, %v2079_v32  ;;  %v2084_v40 = vpack.c.bf16 %v1214_v33, %v1214_v33  ;;  %v824_v41 = vpop.f32.mrf.mxu0  ;;  %v1041_v42 = vadd.f32 %v2244_v35, %v2494_v53  ;;  %v1032_v43 = vpop.f32.mrf.mxu1 }
 0x107   : > { %1663 = vst.msk [vmem:[%s2505_s29 + $0x58] sm:$0xf] %vm1640_vm1, %v2032_v36  ;;  %v2030_v44 = vpack.c.bf16 %v1160_v37, %v1160_v37  ;;  %v1163_v45 = vmax.f32 %v833_v38, 0.0  ;;  %v2082_v46 = vpack.c.bf16 %v1212_v39, %v1212_v39  ;;  %v825_v47 = vadd.f32 %v2494_v53, %v824_v41 }
 0x108   : > { %1715 = vst.msk [vmem:[%s2505_s29 + $0x128] sm:$0xf] %vm1640_vm1, %v2084_v40  ;;  %v1215_v48 = vmax.f32 %v1041_v42, 0.0  ;;  %v2195_v49 = vpop.f32.mrf.mxu0  ;;  %v1033_v50 = vadd.f32 %v2494_v53, %v1032_v43  ;;  %v2247_v51 = vpop.f32.mrf.mxu1 }
 0x109   : > { %1661 = vst.msk [vmem:[%s2505_s29 + $0x50] sm:$0xf] %vm1640_vm1, %v2030_v44  ;;  %v2033_v52 = vpack.c.bf16 %v1163_v45, %v1163_v45  ;;  %1713 = vst.msk [vmem:[%s2505_s29 + $0x120] sm:$0xf] %vm1640_vm1, %v2082_v46  ;;  %v1161_v54 = vmax.f32 %v825_v47, 0.0  ;;  %v846_v55 = vadd.f32 %v2195_v49, %v2494_v53  ;;  %v1054_v56 = vadd.f32 %v2247_v51, %v2494_v53 }
 0x10a   : > { %v2085_v57 = vpack.c.bf16 %v1215_v48, %v1215_v48  ;;  %v1213_v58 = vmax.f32 %v1033_v50, 0.0  ;;  %v837_v59 = vpop.f32.mrf.mxu0  ;;  %v1045_v60 = vpop.f32.mrf.mxu1 }
 0x10b   : > { %1664 = vst.msk [vmem:[%s2505_s29 + $0x5c] sm:$0xf] %vm1640_vm1, %v2033_v52  ;;  %v2031_v61 = vpack.c.bf16 %v1161_v54, %v1161_v54  ;;  %v1166_v62 = vmax.f32 %v846_v55, 0.0  ;;  %v838_v63 = vadd.f32 %v2494_v53, %v837_v59  ;;  %v1218_v0 = vmax.f32 %v1054_v56, 0.0 }
 0x10c   : > { %1716 = vst.msk [vmem:[%s2505_s29 + $0x12c] sm:$0xf] %vm1640_vm1, %v2085_v57  ;;  %v2083_v1 = vpack.c.bf16 %v1213_v58, %v1213_v58  ;;  %v2196_v2 = vpop.f32.mrf.mxu0  ;;  %v1046_v3 = vadd.f32 %v2494_v53, %v1045_v60  ;;  %v2248_v4 = vpop.f32.mrf.mxu1 }
 0x10d   : > { %1662 = vst.msk [vmem:[%s2505_s29 + $0x54] sm:$0xf] %vm1640_vm1, %v2031_v61  ;;  %v2036_v5 = vpack.c.bf16 %v1166_v62, %v1166_v62  ;;  %v1164_v6 = vmax.f32 %v838_v63, 0.0  ;;  %v2088_v7 = vpack.c.bf16 %v1218_v0, %v1218_v0  ;;  %v849_v8 = vadd.f32 %v2196_v2, %v2494_v53 }
 0x10e   : > { %1714 = vst.msk [vmem:[%s2505_s29 + $0x124] sm:$0xf] %vm1640_vm1, %v2083_v1  ;;  %v1216_v9 = vmax.f32 %v1046_v3, 0.0  ;;  %v840_v10 = vpop.f32.mrf.mxu0  ;;  %v1057_v11 = vadd.f32 %v2248_v4, %v2494_v53  ;;  %v1048_v12 = vpop.f32.mrf.mxu1 }
 0x10f   : > { %1667 = vst.msk [vmem:[%s2505_s29 + $0x68] sm:$0xf] %vm1640_vm1, %v2036_v5  ;;  %v2034_v13 = vpack.c.bf16 %v1164_v6, %v1164_v6  ;;  %1719 = vst.msk [vmem:[%s2505_s29 + $0x138] sm:$0xf] %vm1640_vm1, %v2088_v7  ;;  %v1167_v14 = vmax.f32 %v849_v8, 0.0  ;;  %v841_v15 = vadd.f32 %v2494_v53, %v840_v10  ;;  %v1049_v16 = vadd.f32 %v2494_v53, %v1048_v12 }
 0x110   : > { %v2086_v17 = vpack.c.bf16 %v1216_v9, %v1216_v9  ;;  %v1219_v18 = vmax.f32 %v1057_v11, 0.0  ;;  %v2199_v19 = vpop.f32.mrf.mxu0  ;;  %v2251_v20 = vpop.f32.mrf.mxu1 }
 0x111   : > { %1665 = vst.msk [vmem:[%s2505_s29 + $0x60] sm:$0xf] %vm1640_vm1, %v2034_v13  ;;  %v2037_v21 = vpack.c.bf16 %v1167_v14, %v1167_v14  ;;  %v1165_v22 = vmax.f32 %v841_v15, 0.0  ;;  %v862_v23 = vadd.f32 %v2199_v19, %v2494_v53  ;;  %v1217_v24 = vmax.f32 %v1049_v16, 0.0 }
 0x112   : > { %1717 = vst.msk [vmem:[%s2505_s29 + $0x130] sm:$0xf] %vm1640_vm1, %v2086_v17  ;;  %v2089_v25 = vpack.c.bf16 %v1219_v18, %v1219_v18  ;;  %v853_v26 = vpop.f32.mrf.mxu0  ;;  %v1070_v27 = vadd.f32 %v2251_v20, %v2494_v53  ;;  %v1061_v28 = vpop.f32.mrf.mxu1 }
 0x113   : > { %1668 = vst.msk [vmem:[%s2505_s29 + $0x6c] sm:$0xf] %vm1640_vm1, %v2037_v21  ;;  %v2035_v29 = vpack.c.bf16 %v1165_v22, %v1165_v22  ;;  %v1170_v30 = vmax.f32 %v862_v23, 0.0  ;;  %v2087_v31 = vpack.c.bf16 %v1217_v24, %v1217_v24  ;;  %v854_v32 = vadd.f32 %v2494_v53, %v853_v26 }
 0x114   : > { %1720 = vst.msk [vmem:[%s2505_s29 + $0x13c] sm:$0xf] %vm1640_vm1, %v2089_v25  ;;  %v1222_v33 = vmax.f32 %v1070_v27, 0.0  ;;  %v2200_v34 = vpop.f32.mrf.mxu0  ;;  %v1062_v35 = vadd.f32 %v2494_v53, %v1061_v28  ;;  %v2252_v36 = vpop.f32.mrf.mxu1 }
 0x115   : > { %1666 = vst.msk [vmem:[%s2505_s29 + $0x64] sm:$0xf] %vm1640_vm1, %v2035_v29  ;;  %v2040_v37 = vpack.c.bf16 %v1170_v30, %v1170_v30  ;;  %1718 = vst.msk [vmem:[%s2505_s29 + $0x134] sm:$0xf] %vm1640_vm1, %v2087_v31  ;;  %v1168_v38 = vmax.f32 %v854_v32, 0.0  ;;  %v865_v39 = vadd.f32 %v2200_v34, %v2494_v53  ;;  %v1073_v40 = vadd.f32 %v2252_v36, %v2494_v53 }
 0x116   : > { %v2092_v41 = vpack.c.bf16 %v1222_v33, %v1222_v33  ;;  %v1220_v42 = vmax.f32 %v1062_v35, 0.0  ;;  %v856_v43 = vpop.f32.mrf.mxu0  ;;  %v1064_v44 = vpop.f32.mrf.mxu1 }
 0x117   : > { %1671 = vst.msk [vmem:[%s2505_s29 + $0x78] sm:$0xf] %vm1640_vm1, %v2040_v37  ;;  %v2038_v45 = vpack.c.bf16 %v1168_v38, %v1168_v38  ;;  %v1171_v46 = vmax.f32 %v865_v39, 0.0  ;;  %v857_v47 = vadd.f32 %v2494_v53, %v856_v43  ;;  %v1223_v48 = vmax.f32 %v1073_v40, 0.0 }
 0x118   : > { %1723 = vst.msk [vmem:[%s2505_s29 + $0x148] sm:$0xf] %vm1640_vm1, %v2092_v41  ;;  %v2090_v49 = vpack.c.bf16 %v1220_v42, %v1220_v42  ;;  %v2203_v50 = vpop.f32.mrf.mxu0  ;;  %v1065_v51 = vadd.f32 %v2494_v53, %v1064_v44  ;;  %v2255_v52 = vpop.f32.mrf.mxu1 }
 0x119   : > { %1669 = vst.msk [vmem:[%s2505_s29 + $0x70] sm:$0xf] %vm1640_vm1, %v2038_v45  ;;  %v2041_v54 = vpack.c.bf16 %v1171_v46, %v1171_v46  ;;  %v1169_v55 = vmax.f32 %v857_v47, 0.0  ;;  %v2093_v56 = vpack.c.bf16 %v1223_v48, %v1223_v48  ;;  %v878_v57 = vadd.f32 %v2203_v50, %v2494_v53 }
 0x11a   : > { %1721 = vst.msk [vmem:[%s2505_s29 + $0x140] sm:$0xf] %vm1640_vm1, %v2090_v49  ;;  %v1221_v58 = vmax.f32 %v1065_v51, 0.0  ;;  %v869_v59 = vpop.f32.mrf.mxu0  ;;  %v1086_v60 = vadd.f32 %v2255_v52, %v2494_v53  ;;  %v1077_v61 = vpop.f32.mrf.mxu1 }
 0x11b   : > { %1672 = vst.msk [vmem:[%s2505_s29 + $0x7c] sm:$0xf] %vm1640_vm1, %v2041_v54  ;;  %v2039_v62 = vpack.c.bf16 %v1169_v55, %v1169_v55  ;;  %1724 = vst.msk [vmem:[%s2505_s29 + $0x14c] sm:$0xf] %vm1640_vm1, %v2093_v56  ;;  %v1174_v63 = vmax.f32 %v878_v57, 0.0  ;;  %v870_v0 = vadd.f32 %v2494_v53, %v869_v59  ;;  %v1078_v1 = vadd.f32 %v2494_v53, %v1077_v61 }
 0x11c   : > { %v2091_v2 = vpack.c.bf16 %v1221_v58, %v1221_v58  ;;  %v1226_v3 = vmax.f32 %v1086_v60, 0.0  ;;  %v2204_v4 = vpop.f32.mrf.mxu0  ;;  %v2256_v5 = vpop.f32.mrf.mxu1 }
 0x11d   : > { %1670 = vst.msk [vmem:[%s2505_s29 + $0x74] sm:$0xf] %vm1640_vm1, %v2039_v62  ;;  %v2044_v6 = vpack.c.bf16 %v1174_v63, %v1174_v63  ;;  %v1172_v7 = vmax.f32 %v870_v0, 0.0  ;;  %v881_v8 = vadd.f32 %v2204_v4, %v2494_v53  ;;  %v1224_v9 = vmax.f32 %v1078_v1, 0.0 }
 0x11e   : > { %1722 = vst.msk [vmem:[%s2505_s29 + $0x144] sm:$0xf] %vm1640_vm1, %v2091_v2  ;;  %v2096_v10 = vpack.c.bf16 %v1226_v3, %v1226_v3  ;;  %v872_v11 = vpop.f32.mrf.mxu0  ;;  %v1089_v12 = vadd.f32 %v2256_v5, %v2494_v53  ;;  %v1080_v13 = vpop.f32.mrf.mxu1 }
 0x11f   : > { %1675 = vst.msk [vmem:[%s2505_s29 + $0x88] sm:$0xf] %vm1640_vm1, %v2044_v6  ;;  %v2042_v14 = vpack.c.bf16 %v1172_v7, %v1172_v7  ;;  %v1175_v15 = vmax.f32 %v881_v8, 0.0  ;;  %v2094_v16 = vpack.c.bf16 %v1224_v9, %v1224_v9  ;;  %v873_v17 = vadd.f32 %v2494_v53, %v872_v11 }
 0x120   : > { %1727 = vst.msk [vmem:[%s2505_s29 + $0x158] sm:$0xf] %vm1640_vm1, %v2096_v10  ;;  %v1227_v18 = vmax.f32 %v1089_v12, 0.0  ;;  %v2207_v19 = vpop.f32.mrf.mxu0  ;;  %v1081_v20 = vadd.f32 %v2494_v53, %v1080_v13  ;;  %v2259_v21 = vpop.f32.mrf.mxu1 }
 0x121   : > { %1673 = vst.msk [vmem:[%s2505_s29 + $0x80] sm:$0xf] %vm1640_vm1, %v2042_v14  ;;  %v2045_v22 = vpack.c.bf16 %v1175_v15, %v1175_v15  ;;  %1725 = vst.msk [vmem:[%s2505_s29 + $0x150] sm:$0xf] %vm1640_vm1, %v2094_v16  ;;  %v1173_v23 = vmax.f32 %v873_v17, 0.0  ;;  %v894_v24 = vadd.f32 %v2207_v19, %v2494_v53  ;;  %v1102_v25 = vadd.f32 %v2259_v21, %v2494_v53 }
 0x122   : > { %v2097_v26 = vpack.c.bf16 %v1227_v18, %v1227_v18  ;;  %v1225_v27 = vmax.f32 %v1081_v20, 0.0  ;;  %v885_v28 = vpop.f32.mrf.mxu0  ;;  %v1093_v29 = vpop.f32.mrf.mxu1 }
 0x123   : > { %1676 = vst.msk [vmem:[%s2505_s29 + $0x8c] sm:$0xf] %vm1640_vm1, %v2045_v22  ;;  %v2043_v30 = vpack.c.bf16 %v1173_v23, %v1173_v23  ;;  %v1178_v31 = vmax.f32 %v894_v24, 0.0  ;;  %v886_v32 = vadd.f32 %v2494_v53, %v885_v28  ;;  %v1230_v33 = vmax.f32 %v1102_v25, 0.0 }
 0x124   : > { %1728 = vst.msk [vmem:[%s2505_s29 + $0x15c] sm:$0xf] %vm1640_vm1, %v2097_v26  ;;  %v2095_v34 = vpack.c.bf16 %v1225_v27, %v1225_v27  ;;  %v2208_v35 = vpop.f32.mrf.mxu0  ;;  %v1094_v36 = vadd.f32 %v2494_v53, %v1093_v29  ;;  %v2260_v37 = vpop.f32.mrf.mxu1 }
 0x125   : > { %1674 = vst.msk [vmem:[%s2505_s29 + $0x84] sm:$0xf] %vm1640_vm1, %v2043_v30  ;;  %v2048_v38 = vpack.c.bf16 %v1178_v31, %v1178_v31  ;;  %v1176_v39 = vmax.f32 %v886_v32, 0.0  ;;  %v2100_v40 = vpack.c.bf16 %v1230_v33, %v1230_v33  ;;  %v897_v41 = vadd.f32 %v2208_v35, %v2494_v53 }
 0x126   : > { %1726 = vst.msk [vmem:[%s2505_s29 + $0x154] sm:$0xf] %vm1640_vm1, %v2095_v34  ;;  %v1228_v42 = vmax.f32 %v1094_v36, 0.0  ;;  %v888_v43 = vpop.f32.mrf.mxu0  ;;  %v1105_v44 = vadd.f32 %v2260_v37, %v2494_v53  ;;  %v1096_v45 = vpop.f32.mrf.mxu1 }
 0x127   : > { %1679 = vst.msk [vmem:[%s2505_s29 + $0x98] sm:$0xf] %vm1640_vm1, %v2048_v38  ;;  %v2046_v46 = vpack.c.bf16 %v1176_v39, %v1176_v39  ;;  %1731 = vst.msk [vmem:[%s2505_s29 + $0x168] sm:$0xf] %vm1640_vm1, %v2100_v40  ;;  %v1179_v47 = vmax.f32 %v897_v41, 0.0  ;;  %v889_v48 = vadd.f32 %v2494_v53, %v888_v43  ;;  %v1097_v49 = vadd.f32 %v2494_v53, %v1096_v45 }
 0x128   : > { %v2098_v50 = vpack.c.bf16 %v1228_v42, %v1228_v42  ;;  %v1231_v51 = vmax.f32 %v1105_v44, 0.0  ;;  %v2211_v52 = vpop.f32.mrf.mxu0  ;;  %v2263_v54 = vpop.f32.mrf.mxu1 }
 0x129   : > { %1677 = vst.msk [vmem:[%s2505_s29 + $0x90] sm:$0xf] %vm1640_vm1, %v2046_v46  ;;  %v2049_v55 = vpack.c.bf16 %v1179_v47, %v1179_v47  ;;  %v1177_v56 = vmax.f32 %v889_v48, 0.0  ;;  %v910_v57 = vadd.f32 %v2211_v52, %v2494_v53  ;;  %v1229_v58 = vmax.f32 %v1097_v49, 0.0 }
 0x12a   : > { %1729 = vst.msk [vmem:[%s2505_s29 + $0x160] sm:$0xf] %vm1640_vm1, %v2098_v50  ;;  %v2101_v59 = vpack.c.bf16 %v1231_v51, %v1231_v51  ;;  %v901_v60 = vpop.f32.mrf.mxu0  ;;  %v1118_v61 = vadd.f32 %v2263_v54, %v2494_v53  ;;  %v1109_v62 = vpop.f32.mrf.mxu1 }
 0x12b   : > { %1680 = vst.msk [vmem:[%s2505_s29 + $0x9c] sm:$0xf] %vm1640_vm1, %v2049_v55  ;;  %v2047_v63 = vpack.c.bf16 %v1177_v56, %v1177_v56  ;;  %v1182_v0 = vmax.f32 %v910_v57, 0.0  ;;  %v2099_v1 = vpack.c.bf16 %v1229_v58, %v1229_v58  ;;  %v902_v2 = vadd.f32 %v2494_v53, %v901_v60 }
 0x12c   : > { %1732 = vst.msk [vmem:[%s2505_s29 + $0x16c] sm:$0xf] %vm1640_vm1, %v2101_v59  ;;  %v1234_v3 = vmax.f32 %v1118_v61, 0.0  ;;  %v2212_v4 = vpop.f32.mrf.mxu0  ;;  %v1110_v5 = vadd.f32 %v2494_v53, %v1109_v62  ;;  %v2264_v6 = vpop.f32.mrf.mxu1 }
 0x12d   : > { %1678 = vst.msk [vmem:[%s2505_s29 + $0x94] sm:$0xf] %vm1640_vm1, %v2047_v63  ;;  %v2052_v7 = vpack.c.bf16 %v1182_v0, %v1182_v0  ;;  %1730 = vst.msk [vmem:[%s2505_s29 + $0x164] sm:$0xf] %vm1640_vm1, %v2099_v1  ;;  %v1180_v8 = vmax.f32 %v902_v2, 0.0  ;;  %v913_v9 = vadd.f32 %v2212_v4, %v2494_v53  ;;  %v1121_v10 = vadd.f32 %v2264_v6, %v2494_v53 }
 0x12e   : > { %v2104_v11 = vpack.c.bf16 %v1234_v3, %v1234_v3  ;;  %v1232_v12 = vmax.f32 %v1110_v5, 0.0  ;;  %v904_v13 = vpop.f32.mrf.mxu0  ;;  %v1112_v14 = vpop.f32.mrf.mxu1 }
 0x12f   : > { %1683 = vst.msk [vmem:[%s2505_s29 + $0xa8] sm:$0xf] %vm1640_vm1, %v2052_v7  ;;  %v2050_v15 = vpack.c.bf16 %v1180_v8, %v1180_v8  ;;  %v1183_v16 = vmax.f32 %v913_v9, 0.0  ;;  %v905_v17 = vadd.f32 %v2494_v53, %v904_v13  ;;  %v1235_v18 = vmax.f32 %v1121_v10, 0.0 }
 0x130   : > { %1735 = vst.msk [vmem:[%s2505_s29 + $0x178] sm:$0xf] %vm1640_vm1, %v2104_v11  ;;  %v2102_v19 = vpack.c.bf16 %v1232_v12, %v1232_v12  ;;  %v2215_v20 = vpop.f32.mrf.mxu0  ;;  %v1113_v21 = vadd.f32 %v2494_v53, %v1112_v14  ;;  %v2267_v22 = vpop.f32.mrf.mxu1 }
 0x131   : > { %1681 = vst.msk [vmem:[%s2505_s29 + $0xa0] sm:$0xf] %vm1640_vm1, %v2050_v15  ;;  %v2053_v23 = vpack.c.bf16 %v1183_v16, %v1183_v16  ;;  %v1181_v24 = vmax.f32 %v905_v17, 0.0  ;;  %v2105_v25 = vpack.c.bf16 %v1235_v18, %v1235_v18  ;;  %v926_v26 = vadd.f32 %v2215_v20, %v2494_v53 }
 0x132   : > { %1733 = vst.msk [vmem:[%s2505_s29 + $0x170] sm:$0xf] %vm1640_vm1, %v2102_v19  ;;  %v1233_v27 = vmax.f32 %v1113_v21, 0.0  ;;  %v917_v28 = vpop.f32.mrf.mxu0  ;;  %v1134_v29 = vadd.f32 %v2267_v22, %v2494_v53  ;;  %v1125_v30 = vpop.f32.mrf.mxu1 }
 0x133   : > { %1684 = vst.msk [vmem:[%s2505_s29 + $0xac] sm:$0xf] %vm1640_vm1, %v2053_v23  ;;  %v2051_v31 = vpack.c.bf16 %v1181_v24, %v1181_v24  ;;  %1736 = vst.msk [vmem:[%s2505_s29 + $0x17c] sm:$0xf] %vm1640_vm1, %v2105_v25  ;;  %v1186_v32 = vmax.f32 %v926_v26, 0.0  ;;  %v918_v33 = vadd.f32 %v2494_v53, %v917_v28  ;;  %v1126_v34 = vadd.f32 %v2494_v53, %v1125_v30 }
 0x134   : > { %v2103_v35 = vpack.c.bf16 %v1233_v27, %v1233_v27  ;;  %v1238_v36 = vmax.f32 %v1134_v29, 0.0  ;;  %v2216_v37 = vpop.f32.mrf.mxu0  ;;  %v2268_v38 = vpop.f32.mrf.mxu1 }
 0x135   : > { %1682 = vst.msk [vmem:[%s2505_s29 + $0xa4] sm:$0xf] %vm1640_vm1, %v2051_v31  ;;  %v2056_v39 = vpack.c.bf16 %v1186_v32, %v1186_v32  ;;  %v1184_v40 = vmax.f32 %v918_v33, 0.0  ;;  %v929_v41 = vadd.f32 %v2216_v37, %v2494_v53  ;;  %v1236_v42 = vmax.f32 %v1126_v34, 0.0 }
 0x136   : > { %1734 = vst.msk [vmem:[%s2505_s29 + $0x174] sm:$0xf] %vm1640_vm1, %v2103_v35  ;;  %v2108_v43 = vpack.c.bf16 %v1238_v36, %v1238_v36  ;;  %v920_v44 = vpop.f32.mrf.mxu0  ;;  %v1137_v45 = vadd.f32 %v2268_v38, %v2494_v53  ;;  %v1128_v46 = vpop.f32.mrf.mxu1 }
 0x137   : > { %1687 = vst.msk [vmem:[%s2505_s29 + $0xb8] sm:$0xf] %vm1640_vm1, %v2056_v39  ;;  %v2054_v47 = vpack.c.bf16 %v1184_v40, %v1184_v40  ;;  %v1187_v48 = vmax.f32 %v929_v41, 0.0  ;;  %v2106_v49 = vpack.c.bf16 %v1236_v42, %v1236_v42  ;;  %v921_v50 = vadd.f32 %v2494_v53, %v920_v44 }
 0x138   : > { %1739 = vst.msk [vmem:[%s2505_s29 + $0x188] sm:$0xf] %vm1640_vm1, %v2108_v43  ;;  %v1239_v51 = vmax.f32 %v1137_v45, 0.0  ;;  %v2219_v52 = vpop.f32.mrf.mxu0  ;;  %v1129_v54 = vadd.f32 %v2494_v53, %v1128_v46 }
 0x139   : > { %1685 = vst.msk [vmem:[%s2505_s29 + $0xb0] sm:$0xf] %vm1640_vm1, %v2054_v47  ;;  %v2057_v55 = vpack.c.bf16 %v1187_v48, %v1187_v48  ;;  %1737 = vst.msk [vmem:[%s2505_s29 + $0x180] sm:$0xf] %vm1640_vm1, %v2106_v49  ;;  %v1185_v56 = vmax.f32 %v921_v50, 0.0  ;;  %v942_v57 = vadd.f32 %v2219_v52, %v2494_v53 }
 0x13a   : > { %v2109_v58 = vpack.c.bf16 %v1239_v51, %v1239_v51  ;;  %v1237_v59 = vmax.f32 %v1129_v54, 0.0  ;;  %v933_v60 = vpop.f32.mrf.mxu0 }
 0x13b   : > { %1688 = vst.msk [vmem:[%s2505_s29 + $0xbc] sm:$0xf] %vm1640_vm1, %v2057_v55  ;;  %v2055_v61 = vpack.c.bf16 %v1185_v56, %v1185_v56  ;;  %v1190_v62 = vmax.f32 %v942_v57, 0.0  ;;  %v934_v63 = vadd.f32 %v2494_v53, %v933_v60 }
 0x13c   : > { %1740 = vst.msk [vmem:[%s2505_s29 + $0x18c] sm:$0xf] %vm1640_vm1, %v2109_v58  ;;  %v2107_v0 = vpack.c.bf16 %v1237_v59, %v1237_v59  ;;  %v2220_v1 = vpop.f32.mrf.mxu0 }
 0x13d   : > { %1686 = vst.msk [vmem:[%s2505_s29 + $0xb4] sm:$0xf] %vm1640_vm1, %v2055_v61  ;;  %v2060_v2 = vpack.c.bf16 %v1190_v62, %v1190_v62  ;;  %v1188_v3 = vmax.f32 %v934_v63, 0.0  ;;  %v945_v4 = vadd.f32 %v2220_v1, %v2494_v53 }
 0x13e   : > { %1738 = vst.msk [vmem:[%s2505_s29 + $0x184] sm:$0xf] %vm1640_vm1, %v2107_v0  ;;  %v936_v5 = vpop.f32.mrf.mxu0 }
 0x13f   : > { %1691 = vst.msk [vmem:[%s2505_s29 + $0xc8] sm:$0xf] %vm1640_vm1, %v2060_v2  ;;  %v2058_v6 = vpack.c.bf16 %v1188_v3, %v1188_v3  ;;  %v1191_v7 = vmax.f32 %v945_v4, 0.0  ;;  %v937_v8 = vadd.f32 %v2494_v53, %v936_v5 }
 0x141   : > { %1689 = vst.msk [vmem:[%s2505_s29 + $0xc0] sm:$0xf] %vm1640_vm1, %v2058_v6  ;;  %v2061_v9 = vpack.c.bf16 %v1191_v7, %v1191_v7  ;;  %v1189_v10 = vmax.f32 %v937_v8, 0.0 }
 0x143   : > { %1692 = vst.msk [vmem:[%s2505_s29 + $0xcc] sm:$0xf] %vm1640_vm1, %v2061_v9  ;;  %v2059_v11 = vpack.c.bf16 %v1189_v10, %v1189_v10 }
 0x145   : > { %1690 = vst.msk [vmem:[%s2505_s29 + $0xc4] sm:$0xf] %vm1640_vm1, %v2059_v11 }
 0x146 PF: > { %s13_s12 = sadd.s32 1, %s2342_s12  }
 0x147   : > { %p10_p4 = scmp.ge.s32.totalorder %s13_s12, 6  }
 0x149   :  { %12 = sbr.rel (!%p10_p4) target bundleno = 1 (0x1), region = 62 }

// kernel: encoder_forward.6
= control target key start
LH: loop header
LB: loop body
LE: loop exit
PB: predicated region body
PF: predicated region fallthrough
CT: control target
= control target key end

     0   :  { %s2327_s12 = smov 0   ;;  %s2738_s0 = inlined_call_operand.vmem [shape: bf16[800,512], index: 0, kind: input, shape index: {}]   ;;  %s2739_s1 = inlined_call_operand.vmem [shape: bf16[512,64], index: 1, kind: input, shape index: {}]   ;;  %s2740_s2 = inlined_call_operand.vmem [shape: f32[1,64], index: 2, kind: input, shape index: {}]   ;;  %s2741_s3 = inlined_call_operand.vmem [shape: bf16[800,64], index: 3, kind: output, shape index: {}]  }
   0x1 LB: > { %s1864_s13 = sadd.s32 4294967295, %s2304_s12   ;;  %p1868_p0 = scmp.ge.s32.totalorder %s2304_s12, 1  ;;  %s2304_s12 = sphi %s2327_s12, %s13_s12  }
   0x2   : > { %p139_p1 = scmp.lt.s32.totalorder %s2304_s12, 3 }
   0x4   : > { %p140_p2 = pnand %p1868_p0, %p139_p1 }
   0x5   : > { %s164_s7 = smul.u32 (!%p140_p2), 50, %s1864_s13 }
   0x6   : > { %143 = sbr.rel (%p140_p2) target bundleno = 474 (0x1da), region = 32 }
   0x7   : > { %p165_p3 = scmp.lt.s32.totalorder (!%p140_p2), %s164_s7, 99 }
   0xb   : > { %v2117_v0 = vld [vmem:[%s2739_s1 + $0x38] sm:$0xff]   ;;  %v2306_v1 = vmov 0   ;;  %v2119_v3 = vld [vmem:[%s2739_s1 + $0x30] sm:$0xff]   ;;  %v2121_v5 = vld [vmem:[%s2739_s1 + $0x28] sm:$0xff]   ;;  %s2743_s7 = smov (!%p165_p3, %s164_s7), 99  ;;  %vm1757_vm0 = vcmask 519168  }
   0xc   : > { %1041 = vmatprep.subr.bf16.mxu0 %v2306_v1  ;;  %1274 = vmatprep.subr.bf16.mxu1 %v2306_v1  ;;  %v2118_v2 = vld [vmem:[%s2739_s1 + $0xb8] sm:$0xff]   ;;  %v2120_v4 = vld [vmem:[%s2739_s1 + $0xb0] sm:$0xff]   ;;  %v2122_v6 = vld [vmem:[%s2739_s1 + $0xa8] sm:$0xff]   ;;  %s2057_s21 = sshll.u32 %s2743_s7, 4  ;;  %s1871_s9 = sshll.u32 %s2743_s7, 2 }
   0xd   : > { %1042 = vmatpush1.bf16.msra.mxu0 %v2117_v0  ;;  %1275 = vmatpush1.bf16.msra.mxu1 %v2118_v2  ;;  %v2123_v7 = vld [vmem:[%s2739_s1 + $0x20] sm:$0xff]   ;;  %v2125_v9 = vld [vmem:[%s2739_s1 + $0x18] sm:$0xff]   ;;  %v2127_v11 = vld [vmem:[%s2739_s1 + $0x10] sm:$0xff]   ;;  %s2410_s26 = scalar_lea.vmem %s2738_s0, %s2057_s21  ;;  %s2585_s11 = scalar_lea.vmem %s2741_s3, %s1871_s9 }
   0xe   : > { %1043 = vmatprep.subr.bf16.mxu0 %v2306_v1  ;;  %1276 = vmatprep.subr.bf16.mxu1 %v2306_v1  ;;  %v2124_v8 = vld [vmem:[%s2739_s1 + $0xa0] sm:$0xff]   ;;  %v2126_v10 = vld [vmem:[%s2739_s1 + $0x98] sm:$0xff]   ;;  %v2128_v12 = vld [vmem:[%s2739_s1 + $0x90] sm:$0xff]  }
   0xf   : > { %v2129_v13 = vld [vmem:[%s2739_s1 + $0x8] sm:$0xff]   ;;  %v2131_v15 = vld [vmem:[%s2739_s1] sm:$0xff]   ;;  %v2133_v17 = vld [vmem:[%s2739_s1 + $0x78] sm:$0xff]  }
  0x10   : > { %v2130_v14 = vld [vmem:[%s2739_s1 + $0x88] sm:$0xff]   ;;  %v2132_v16 = vld [vmem:[%s2739_s1 + $0x80] sm:$0xff]   ;;  %v2134_v18 = vld [vmem:[%s2739_s1 + $0xf8] sm:$0xff]  }
  0x11   : > { %1044 = vmatpush1.bf16.msra.mxu0 %v2119_v3  ;;  %1277 = vmatpush1.bf16.msra.mxu1 %v2120_v4  ;;  %v2151_v19 = vld [vmem:[%s2410_s26 + $0x4] ss:$16 sps:$4 sm:$0xff]   ;;  %v2154_v21 = vld [vmem:[%s2410_s26 + $0xc] ss:$16 sps:$4 sm:$0xff]   ;;  %v2149_v35 = vld [vmem:[%s2410_s26] ss:$16 sps:$4 sm:$0xff]  }
  0x12   : > { %1045 = vmatprep.subr.bf16.mxu0 %v2306_v1  ;;  %1278 = vmatprep.subr.bf16.mxu1 %v2306_v1  ;;  %v2135_v20 = vld [vmem:[%s2739_s1 + $0x70] sm:$0xff]   ;;  %v2137_v23 = vld [vmem:[%s2739_s1 + $0x68] sm:$0xff]   ;;  %v2139_v25 = vld [vmem:[%s2739_s1 + $0x60] sm:$0xff]  }
  0x13   : > { %v2136_v22 = vld [vmem:[%s2739_s1 + $0xf0] sm:$0xff]   ;;  %1073 = vmatprep.mubr.bf16.mxu0 %v2151_v19  ;;  %1306 = vmatprep.mubr.bf16.mxu1 %v2154_v21  ;;  %v2138_v24 = vld [vmem:[%s2739_s1 + $0xe8] sm:$0xff]   ;;  %v2140_v26 = vld [vmem:[%s2739_s1 + $0xe0] sm:$0xff]  }
  0x14   : > { %v2141_v27 = vld [vmem:[%s2739_s1 + $0x58] sm:$0xff]   ;;  %v2143_v29 = vld [vmem:[%s2739_s1 + $0x50] sm:$0xff]   ;;  %v2145_v31 = vld [vmem:[%s2739_s1 + $0x48] sm:$0xff]  }
  0x15   : > { %1046 = vmatpush1.bf16.msra.mxu0 %v2121_v5  ;;  %1279 = vmatpush1.bf16.msra.mxu1 %v2122_v6  ;;  %v2142_v28 = vld [vmem:[%s2739_s1 + $0xd8] sm:$0xff]   ;;  %v2144_v30 = vld [vmem:[%s2739_s1 + $0xd0] sm:$0xff]   ;;  %v2146_v32 = vld [vmem:[%s2739_s1 + $0xc8] sm:$0xff]  }
  0x16   : > { %1047 = vmatprep.subr.bf16.mxu0 %v2306_v1  ;;  %1280 = vmatprep.subr.bf16.mxu1 %v2306_v1  ;;  %v2147_v33 = vld [vmem:[%s2739_s1 + $0x40] sm:$0xff]   ;;  %v2152_v36 = vld [vmem:[%s2410_s26 + $0x8] ss:$16 sps:$4 sm:$0xff]   ;;  %v2157_v38 = vld [vmem:[%s2410_s26 + $0x2c] ss:$16 sps:$4 sm:$0xff]  }
  0x17   : > { %v2148_v34 = vld [vmem:[%s2739_s1 + $0xc0] sm:$0xff]   ;;  %v2160_v40 = vld [vmem:[%s2410_s26 + $0x28] ss:$16 sps:$4 sm:$0xff]   ;;  %v2163_v42 = vld [vmem:[%s2410_s26 + $0x4c] ss:$16 sps:$4 sm:$0xff]  }
  0x18   : > { %v2155_v37 = vld [vmem:[%s2410_s26 + $0x24] ss:$16 sps:$4 sm:$0xff]   ;;  %v2159_v39 = vld [vmem:[%s2410_s26 + $0x20] ss:$16 sps:$4 sm:$0xff]   ;;  %v2166_v44 = vld [vmem:[%s2410_s26 + $0x48] ss:$16 sps:$4 sm:$0xff]  }
  0x19   : > { %1048 = vmatpush1.bf16.msra.mxu0 %v2123_v7  ;;  %1281 = vmatpush1.bf16.msra.mxu1 %v2124_v8  ;;  %v2161_v41 = vld [vmem:[%s2410_s26 + $0x44] ss:$16 sps:$4 sm:$0xff]   ;;  %v2165_v43 = vld [vmem:[%s2410_s26 + $0x40] ss:$16 sps:$4 sm:$0xff]   ;;  %v2169_v46 = vld [vmem:[%s2410_s26 + $0x6c] ss:$16 sps:$4 sm:$0xff]  }
  0x1a   : > { %1049 = vmatprep.subr.bf16.mxu0 %v2306_v1  ;;  %1282 = vmatprep.subr.bf16.mxu1 %v2306_v1  ;;  %v2167_v45 = vld [vmem:[%s2410_s26 + $0x64] ss:$16 sps:$4 sm:$0xff]   ;;  %v2171_v47 = vld [vmem:[%s2410_s26 + $0x60] ss:$16 sps:$4 sm:$0xff]   ;;  %v2172_v48 = vld [vmem:[%s2410_s26 + $0x68] ss:$16 sps:$4 sm:$0xff]  }
  0x1b   : > { %v2173_v49 = vld [vmem:[%s2410_s26 + $0x84] ss:$16 sps:$4 sm:$0xff]   ;;  %v2175_v50 = vld [vmem:[%s2410_s26 + $0x8c] ss:$16 sps:$4 sm:$0xff]   ;;  %v2177_v51 = vld [vmem:[%s2410_s26 + $0x80] ss:$16 sps:$4 sm:$0xff]  }
  0x1c   : > { %v2178_v52 = vld [vmem:[%s2410_s26 + $0x88] ss:$16 sps:$4 sm:$0xff]   ;;  %v2179_v53 = vld [vmem:[%s2410_s26 + $0xa4] ss:$16 sps:$4 sm:$0xff]   ;;  %v2181_v54 = vld [vmem:[%s2410_s26 + $0xac] ss:$16 sps:$4 sm:$0xff]  }
  0x1d   : > { %1050 = vmatpush1.bf16.msra.mxu0 %v2125_v9  ;;  %1283 = vmatpush1.bf16.msra.mxu1 %v2126_v10  ;;  %v2183_v55 = vld [vmem:[%s2410_s26 + $0xa0] ss:$16 sps:$4 sm:$0xff]   ;;  %v2184_v56 = vld [vmem:[%s2410_s26 + $0xa8] ss:$16 sps:$4 sm:$0xff]   ;;  %v2185_v57 = vld [vmem:[%s2410_s26 + $0xc4] ss:$16 sps:$4 sm:$0xff]  }
  0x1e   : > { %1051 = vmatprep.subr.bf16.mxu0 %v2306_v1  ;;  %1284 = vmatprep.subr.bf16.mxu1 %v2306_v1  ;;  %v2187_v58 = vld [vmem:[%s2410_s26 + $0xcc] ss:$16 sps:$4 sm:$0xff]   ;;  %v2189_v59 = vld [vmem:[%s2410_s26 + $0xc0] ss:$16 sps:$4 sm:$0xff]   ;;  %v2190_v60 = vld [vmem:[%s2410_s26 + $0xc8] ss:$16 sps:$4 sm:$0xff]  }
  0x1f   : > { %v2191_v61 = vld [vmem:[%s2410_s26 + $0xe4] ss:$16 sps:$4 sm:$0xff]   ;;  %v2193_v62 = vld [vmem:[%s2410_s26 + $0xec] ss:$16 sps:$4 sm:$0xff]   ;;  %v2195_v63 = vld [vmem:[%s2410_s26 + $0xe0] ss:$16 sps:$4 sm:$0xff]  }
  0x20   : > { %v2196_v0 = vld [vmem:[%s2410_s26 + $0xe8] ss:$16 sps:$4 sm:$0xff]   ;;  %v2199_v2 = vld [vmem:[%s2410_s26 + $0x10c] ss:$16 sps:$4 sm:$0xff]   ;;  %v2201_v3 = vld [vmem:[%s2410_s26 + $0x100] ss:$16 sps:$4 sm:$0xff]  }
  0x21   : > { %1052 = vmatpush1.bf16.msra.mxu0 %v2127_v11  ;;  %1285 = vmatpush1.bf16.msra.mxu1 %v2128_v12  ;;  %v2202_v4 = vld [vmem:[%s2410_s26 + $0x108] ss:$16 sps:$4 sm:$0xff]   ;;  %v2203_v5 = vld [vmem:[%s2410_s26 + $0x124] ss:$16 sps:$4 sm:$0xff]   ;;  %v2205_v6 = vld [vmem:[%s2410_s26 + $0x12c] ss:$16 sps:$4 sm:$0xff]  }
  0x22   : > { %1053 = vmatprep.subr.bf16.mxu0 %v2306_v1  ;;  %1286 = vmatprep.subr.bf16.mxu1 %v2306_v1  ;;  %v2207_v7 = vld [vmem:[%s2410_s26 + $0x120] ss:$16 sps:$4 sm:$0xff]   ;;  %v2208_v8 = vld [vmem:[%s2410_s26 + $0x128] ss:$16 sps:$4 sm:$0xff]   ;;  %v2209_v9 = vld [vmem:[%s2410_s26 + $0x144] ss:$16 sps:$4 sm:$0xff]  }
  0x23   : > { %v2211_v10 = vld [vmem:[%s2410_s26 + $0x14c] ss:$16 sps:$4 sm:$0xff]   ;;  %v2213_v11 = vld [vmem:[%s2410_s26 + $0x140] ss:$16 sps:$4 sm:$0xff]   ;;  %v2214_v12 = vld [vmem:[%s2410_s26 + $0x148] ss:$16 sps:$4 sm:$0xff]  }
  0x24   : > { %v2225_v19 = vld [vmem:[%s2410_s26 + $0x180] ss:$16 sps:$4 sm:$0xff]   ;;  %v2227_v21 = vld [vmem:[%s2410_s26 + $0x1a4] ss:$16 sps:$4 sm:$0xff]  }
  0x25   : > { %1054 = vmatpush1.bf16.msra.mxu0 %v2129_v13  ;;  %1287 = vmatpush1.bf16.msra.mxu1 %v2130_v14  ;;  %v2215_v13 = vld [vmem:[%s2410_s26 + $0x164] ss:$16 sps:$4 sm:$0xff]   ;;  %v2217_v14 = vld [vmem:[%s2410_s26 + $0x16c] ss:$16 sps:$4 sm:$0xff]  }
  0x26   : > { %1055 = vmatprep.subr.bf16.mxu0 %v2306_v1  ;;  %1288 = vmatprep.subr.bf16.mxu1 %v2306_v1 }
  0x29   : > { %1056 = vmatpush1.bf16.msra.mxu0 %v2131_v15  ;;  %1289 = vmatpush1.bf16.msra.mxu1 %v2132_v16  ;;  %v2219_v15 = vld [vmem:[%s2410_s26 + $0x160] ss:$16 sps:$4 sm:$0xff]   ;;  %v2220_v16 = vld [vmem:[%s2410_s26 + $0x168] ss:$16 sps:$4 sm:$0xff]  }
  0x2a   : > { %1057 = vmatprep.subr.bf16.mxu0 %v2306_v1  ;;  %1290 = vmatprep.subr.bf16.mxu1 %v2306_v1 }
  0x2d   : > { %1058 = vmatpush2.bf16.msra.mxu0 %v2133_v17  ;;  %1291 = vmatpush2.bf16.msra.mxu1 %v2134_v18  ;;  %v2221_v17 = vld [vmem:[%s2410_s26 + $0x184] ss:$16 sps:$4 sm:$0xff]   ;;  %v2223_v18 = vld [vmem:[%s2410_s26 + $0x18c] ss:$16 sps:$4 sm:$0xff]  }
  0x2e   : > { %1059 = vmatprep.subr.bf16.mxu0 %v2306_v1  ;;  %1292 = vmatprep.subr.bf16.mxu1 %v2306_v1 }
  0x31   : > { %1060 = vmatpush2.bf16.msra.mxu0 %v2135_v20  ;;  %1293 = vmatpush2.bf16.msra.mxu1 %v2136_v22  ;;  %v2226_v20 = vld [vmem:[%s2410_s26 + $0x188] ss:$16 sps:$4 sm:$0xff]   ;;  %v2229_v22 = vld [vmem:[%s2410_s26 + $0x1ac] ss:$16 sps:$4 sm:$0xff]  }
  0x32   : > { %1061 = vmatprep.subr.bf16.mxu0 %v2306_v1  ;;  %1294 = vmatprep.subr.bf16.mxu1 %v2306_v1 }
  0x35   : > { %1062 = vmatpush2.bf16.msra.mxu0 %v2137_v23  ;;  %1295 = vmatpush2.bf16.msra.mxu1 %v2138_v24  ;;  %v2231_v23 = vld [vmem:[%s2410_s26 + $0x1a0] ss:$16 sps:$4 sm:$0xff]   ;;  %v2232_v24 = vld [vmem:[%s2410_s26 + $0x1a8] ss:$16 sps:$4 sm:$0xff]  }
  0x36   : > { %1063 = vmatprep.subr.bf16.mxu0 %v2306_v1  ;;  %1296 = vmatprep.subr.bf16.mxu1 %v2306_v1 }
  0x39   : > { %1064 = vmatpush2.bf16.msra.mxu0 %v2139_v25  ;;  %1297 = vmatpush2.bf16.msra.mxu1 %v2140_v26  ;;  %v2233_v25 = vld [vmem:[%s2410_s26 + $0x1c4] ss:$16 sps:$4 sm:$0xff]   ;;  %v2235_v26 = vld [vmem:[%s2410_s26 + $0x1cc] ss:$16 sps:$4 sm:$0xff]  }
  0x3a   : > { %1065 = vmatprep.subr.bf16.mxu0 %v2306_v1  ;;  %1298 = vmatprep.subr.bf16.mxu1 %v2306_v1 }
  0x3d   : > { %1066 = vmatpush2.bf16.msra.mxu0 %v2141_v27  ;;  %1299 = vmatpush2.bf16.msra.mxu1 %v2142_v28  ;;  %v2237_v27 = vld [vmem:[%s2410_s26 + $0x1c0] ss:$16 sps:$4 sm:$0xff]   ;;  %v2238_v28 = vld [vmem:[%s2410_s26 + $0x1c8] ss:$16 sps:$4 sm:$0xff]  }
  0x3e   : > { %1067 = vmatprep.subr.bf16.mxu0 %v2306_v1  ;;  %1300 = vmatprep.subr.bf16.mxu1 %v2306_v1 }
  0x41   : > { %1068 = vmatpush2.bf16.msra.mxu0 %v2143_v29  ;;  %1301 = vmatpush2.bf16.msra.mxu1 %v2144_v30  ;;  %v2239_v29 = vld [vmem:[%s2410_s26 + $0x1e4] ss:$16 sps:$4 sm:$0xff]   ;;  %v2241_v30 = vld [vmem:[%s2410_s26 + $0x1ec] ss:$16 sps:$4 sm:$0xff]  }
  0x42   : > { %1069 = vmatprep.subr.bf16.mxu0 %v2306_v1  ;;  %1302 = vmatprep.subr.bf16.mxu1 %v2306_v1 }
  0x45   : > { %1070 = vmatpush2.bf16.msra.mxu0 %v2145_v31  ;;  %1303 = vmatpush2.bf16.msra.mxu1 %v2146_v32  ;;  %v2243_v31 = vld [vmem:[%s2410_s26 + $0x1e0] ss:$16 sps:$4 sm:$0xff]   ;;  %v2244_v32 = vld [vmem:[%s2410_s26 + $0x1e8] ss:$16 sps:$4 sm:$0xff]  }
  0x46   : > { %1071 = vmatprep.subr.bf16.mxu0 %v2306_v1  ;;  %1304 = vmatprep.subr.bf16.mxu1 %v2306_v1  ;;  %v2197_v1 = vld [vmem:[%s2410_s26 + $0x104] ss:$16 sps:$4 sm:$0xff]  }
  0x49   : > { %1072 = vmatpush2.bf16.msra.mxu0 %v2147_v33  ;;  %1305 = vmatpush2.bf16.msra.mxu1 %v2148_v34  ;;  %v2245_v33 = vld [vmem:[%s2410_s26 + $0x204] ss:$16 sps:$4 sm:$0xff]   ;;  %v2247_v34 = vld [vmem:[%s2410_s26 + $0x20c] ss:$16 sps:$4 sm:$0xff]  }
  0x4c   : > { %1074 = vmatmul.mubr.bf16.vlgmr.msra.gmra.mxu0 %v2149_v35  ;;  %1307 = vmatmul.mubr.bf16.vlgmr.msra.gmra.mxu1 %v2152_v36  ;;  %v2249_v35 = vld [vmem:[%s2410_s26 + $0x200] ss:$16 sps:$4 sm:$0xff]   ;;  %v2250_v36 = vld [vmem:[%s2410_s26 + $0x208] ss:$16 sps:$4 sm:$0xff]  }
  0x4d   : > { %1081 = vmatprep.mubr.bf16.mxu0 %v2155_v37  ;;  %1314 = vmatprep.mubr.bf16.mxu1 %v2157_v38  ;;  %v2251_v37 = vld [vmem:[%s2410_s26 + $0x224] ss:$16 sps:$4 sm:$0xff]   ;;  %v2253_v38 = vld [vmem:[%s2410_s26 + $0x22c] ss:$16 sps:$4 sm:$0xff]  }
  0x54   : > { %1082 = vmatmul.mubr.bf16.gmra.mxu0 %v2159_v39  ;;  %1315 = vmatmul.mubr.bf16.gmra.mxu1 %v2160_v40  ;;  %v2255_v39 = vld [vmem:[%s2410_s26 + $0x220] ss:$16 sps:$4 sm:$0xff]   ;;  %v2256_v40 = vld [vmem:[%s2410_s26 + $0x228] ss:$16 sps:$4 sm:$0xff]  }
  0x55   : > { %1089 = vmatprep.mubr.bf16.mxu0 %v2161_v41  ;;  %1322 = vmatprep.mubr.bf16.mxu1 %v2163_v42  ;;  %v2257_v41 = vld [vmem:[%s2410_s26 + $0x244] ss:$16 sps:$4 sm:$0xff]   ;;  %v2259_v42 = vld [vmem:[%s2410_s26 + $0x24c] ss:$16 sps:$4 sm:$0xff]  }
  0x5c   : > { %1090 = vmatmul.mubr.bf16.gmra.mxu0 %v2165_v43  ;;  %1323 = vmatmul.mubr.bf16.gmra.mxu1 %v2166_v44  ;;  %v2261_v43 = vld [vmem:[%s2410_s26 + $0x240] ss:$16 sps:$4 sm:$0xff]   ;;  %v2262_v44 = vld [vmem:[%s2410_s26 + $0x248] ss:$16 sps:$4 sm:$0xff]  }
  0x5d   : > { %1097 = vmatprep.mubr.bf16.mxu0 %v2167_v45  ;;  %1330 = vmatprep.mubr.bf16.mxu1 %v2169_v46  ;;  %v2263_v45 = vld [vmem:[%s2410_s26 + $0x264] ss:$16 sps:$4 sm:$0xff]   ;;  %v2265_v46 = vld [vmem:[%s2410_s26 + $0x26c] ss:$16 sps:$4 sm:$0xff]  }
  0x64   : > { %1098 = vmatmul.mubr.bf16.gmra.mxu0 %v2171_v47  ;;  %1331 = vmatmul.mubr.bf16.gmra.mxu1 %v2172_v48  ;;  %v2267_v47 = vld [vmem:[%s2410_s26 + $0x260] ss:$16 sps:$4 sm:$0xff]   ;;  %v2268_v48 = vld [vmem:[%s2410_s26 + $0x268] ss:$16 sps:$4 sm:$0xff]  }
  0x65   : > { %1105 = vmatprep.mubr.bf16.mxu0 %v2173_v49  ;;  %1338 = vmatprep.mubr.bf16.mxu1 %v2175_v50  ;;  %v2269_v49 = vld [vmem:[%s2410_s26 + $0x284] ss:$16 sps:$4 sm:$0xff]   ;;  %v2271_v50 = vld [vmem:[%s2410_s26 + $0x28c] ss:$16 sps:$4 sm:$0xff]  }
  0x6c   : > { %1106 = vmatmul.mubr.bf16.gmra.mxu0 %v2177_v51  ;;  %1339 = vmatmul.mubr.bf16.gmra.mxu1 %v2178_v52  ;;  %v2273_v51 = vld [vmem:[%s2410_s26 + $0x280] ss:$16 sps:$4 sm:$0xff]   ;;  %v2274_v52 = vld [vmem:[%s2410_s26 + $0x288] ss:$16 sps:$4 sm:$0xff]  }
  0x6d   : > { %1113 = vmatprep.mubr.bf16.mxu0 %v2179_v53  ;;  %1346 = vmatprep.mubr.bf16.mxu1 %v2181_v54  ;;  %v2275_v53 = vld [vmem:[%s2410_s26 + $0x2a4] ss:$16 sps:$4 sm:$0xff]   ;;  %v2277_v54 = vld [vmem:[%s2410_s26 + $0x2ac] ss:$16 sps:$4 sm:$0xff]  }
  0x74   : > { %1114 = vmatmul.mubr.bf16.gmra.mxu0 %v2183_v55  ;;  %1347 = vmatmul.mubr.bf16.gmra.mxu1 %v2184_v56  ;;  %v2279_v55 = vld [vmem:[%s2410_s26 + $0x2a0] ss:$16 sps:$4 sm:$0xff]   ;;  %v2280_v56 = vld [vmem:[%s2410_s26 + $0x2a8] ss:$16 sps:$4 sm:$0xff]  }
  0x75   : > { %1121 = vmatprep.mubr.bf16.mxu0 %v2185_v57  ;;  %1354 = vmatprep.mubr.bf16.mxu1 %v2187_v58  ;;  %v2281_v57 = vld [vmem:[%s2410_s26 + $0x2c4] ss:$16 sps:$4 sm:$0xff]   ;;  %v2283_v58 = vld [vmem:[%s2410_s26 + $0x2cc] ss:$16 sps:$4 sm:$0xff]  }
  0x7c   : > { %1122 = vmatmul.mubr.bf16.gmra.mxu0 %v2189_v59  ;;  %1355 = vmatmul.mubr.bf16.gmra.mxu1 %v2190_v60  ;;  %v2285_v59 = vld [vmem:[%s2410_s26 + $0x2c0] ss:$16 sps:$4 sm:$0xff]   ;;  %v2286_v60 = vld [vmem:[%s2410_s26 + $0x2c8] ss:$16 sps:$4 sm:$0xff]  }
  0x7d   : > { %1129 = vmatprep.mubr.bf16.mxu0 %v2191_v61  ;;  %1362 = vmatprep.mubr.bf16.mxu1 %v2193_v62  ;;  %v2287_v61 = vld [vmem:[%s2410_s26 + $0x2e4] ss:$16 sps:$4 sm:$0xff]   ;;  %v2289_v62 = vld [vmem:[%s2410_s26 + $0x2ec] ss:$16 sps:$4 sm:$0xff]  }
  0x84   : > { %1130 = vmatmul.mubr.bf16.gmra.mxu0 %v2195_v63  ;;  %1363 = vmatmul.mubr.bf16.gmra.mxu1 %v2196_v0  ;;  %v2291_v63 = vld [vmem:[%s2410_s26 + $0x2e0] ss:$16 sps:$4 sm:$0xff]   ;;  %v2292_v0 = vld [vmem:[%s2410_s26 + $0x2e8] ss:$16 sps:$4 sm:$0xff]  }
  0x85   : > { %1137 = vmatprep.mubr.bf16.mxu0 %v2197_v1  ;;  %1370 = vmatprep.mubr.bf16.mxu1 %v2199_v2  ;;  %v2293_v1 = vld [vmem:[%s2410_s26 + $0x304] ss:$16 sps:$4 sm:$0xff]   ;;  %v2295_v2 = vld [vmem:[%s2410_s26 + $0x30c] ss:$16 sps:$4 sm:$0xff]  }
  0x8c   : > { %1138 = vmatmul.mubr.bf16.gmra.mxu0 %v2201_v3  ;;  %1371 = vmatmul.mubr.bf16.gmra.mxu1 %v2202_v4  ;;  %v275_v3 = vld [vmem:[%s2410_s26 + $0x308] sm:$0xff]  ;;  %v277_v4 = vld [vmem:[%s2410_s26 + $0x318] sm:$0xff] }
  0x8d   : > { %1145 = vmatprep.mubr.bf16.mxu0 %v2203_v5  ;;  %1378 = vmatprep.mubr.bf16.mxu1 %v2205_v6  ;;  %v2297_v5 = vld [vmem:[%s2410_s26 + $0x300] ss:$16 sps:$4 sm:$0xff]   ;;  %v1971_v6 = vcombine.low %v275_v3, %v277_v4 }
  0x94   : > { %1146 = vmatmul.mubr.bf16.gmra.mxu0 %v2207_v7  ;;  %1379 = vmatmul.mubr.bf16.gmra.mxu1 %v2208_v8  ;;  %v2577_v7 = vld [vmem:[%s2740_s2] ss:$0 sm:$0xff] }
  0x95   : > { %1153 = vmatprep.mubr.bf16.mxu0 %v2209_v9  ;;  %1386 = vmatprep.mubr.bf16.mxu1 %v2211_v10 }
  0x9c   : > { %1154 = vmatmul.mubr.bf16.gmra.mxu0 %v2213_v11  ;;  %1387 = vmatmul.mubr.bf16.gmra.mxu1 %v2214_v12 }
  0x9d   : > { %1161 = vmatprep.mubr.bf16.mxu0 %v2215_v13  ;;  %1394 = vmatprep.mubr.bf16.mxu1 %v2217_v14 }
  0xa4   : > { %1162 = vmatmul.mubr.bf16.gmra.mxu0 %v2219_v15  ;;  %1395 = vmatmul.mubr.bf16.gmra.mxu1 %v2220_v16 }
  0xa5   : > { %1169 = vmatprep.mubr.bf16.mxu0 %v2221_v17  ;;  %1402 = vmatprep.mubr.bf16.mxu1 %v2223_v18 }
  0xac   : > { %1170 = vmatmul.mubr.bf16.gmra.mxu0 %v2225_v19  ;;  %1403 = vmatmul.mubr.bf16.gmra.mxu1 %v2226_v20 }
  0xad   : > { %1177 = vmatprep.mubr.bf16.mxu0 %v2227_v21  ;;  %1410 = vmatprep.mubr.bf16.mxu1 %v2229_v22 }
  0xb4   : > { %1178 = vmatmul.mubr.bf16.gmra.mxu0 %v2231_v23  ;;  %1411 = vmatmul.mubr.bf16.gmra.mxu1 %v2232_v24 }
  0xb5   : > { %1185 = vmatprep.mubr.bf16.mxu0 %v2233_v25  ;;  %1418 = vmatprep.mubr.bf16.mxu1 %v2235_v26 }
  0xbc   : > { %1186 = vmatmul.mubr.bf16.gmra.mxu0 %v2237_v27  ;;  %1419 = vmatmul.mubr.bf16.gmra.mxu1 %v2238_v28 }
  0xbd   : > { %1193 = vmatprep.mubr.bf16.mxu0 %v2239_v29  ;;  %1426 = vmatprep.mubr.bf16.mxu1 %v2241_v30 }
  0xc4   : > { %1194 = vmatmul.mubr.bf16.gmra.mxu0 %v2243_v31  ;;  %1427 = vmatmul.mubr.bf16.gmra.mxu1 %v2244_v32 }
  0xc5   : > { %1201 = vmatprep.mubr.bf16.mxu0 %v2245_v33  ;;  %1434 = vmatprep.mubr.bf16.mxu1 %v2247_v34 }
  0xcc   : > { %1202 = vmatmul.mubr.bf16.gmra.mxu0 %v2249_v35  ;;  %1435 = vmatmul.mubr.bf16.gmra.mxu1 %v2250_v36 }
  0xcd   : > { %1209 = vmatprep.mubr.bf16.mxu0 %v2251_v37  ;;  %1442 = vmatprep.mubr.bf16.mxu1 %v2253_v38 }
  0xd4   : > { %1210 = vmatmul.mubr.bf16.gmra.mxu0 %v2255_v39  ;;  %1443 = vmatmul.mubr.bf16.gmra.mxu1 %v2256_v40 }
  0xd5   : > { %1217 = vmatprep.mubr.bf16.mxu0 %v2257_v41  ;;  %1450 = vmatprep.mubr.bf16.mxu1 %v2259_v42 }
  0xdc   : > { %1218 = vmatmul.mubr.bf16.gmra.mxu0 %v2261_v43  ;;  %1451 = vmatmul.mubr.bf16.gmra.mxu1 %v2262_v44 }
  0xdd   : > { %1225 = vmatprep.mubr.bf16.mxu0 %v2263_v45  ;;  %1458 = vmatprep.mubr.bf16.mxu1 %v2265_v46 }
  0xe4   : > { %1226 = vmatmul.mubr.bf16.gmra.mxu0 %v2267_v47  ;;  %1459 = vmatmul.mubr.bf16.gmra.mxu1 %v2268_v48 }
  0xe5   : > { %1233 = vmatprep.mubr.bf16.mxu0 %v2269_v49  ;;  %1466 = vmatprep.mubr.bf16.mxu1 %v2271_v50 }
  0xec   : > { %1234 = vmatmul.mubr.bf16.gmra.mxu0 %v2273_v51  ;;  %1467 = vmatmul.mubr.bf16.gmra.mxu1 %v2274_v52 }
  0xed   : > { %1241 = vmatprep.mubr.bf16.mxu0 %v2275_v53  ;;  %1474 = vmatprep.mubr.bf16.mxu1 %v2277_v54 }
  0xf4   : > { %1242 = vmatmul.mubr.bf16.gmra.mxu0 %v2279_v55  ;;  %1475 = vmatmul.mubr.bf16.gmra.mxu1 %v2280_v56 }
  0xf5   : > { %1249 = vmatprep.mubr.bf16.mxu0 %v2281_v57  ;;  %1482 = vmatprep.mubr.bf16.mxu1 %v2283_v58 }
  0xfc   : > { %1250 = vmatmul.mubr.bf16.gmra.mxu0 %v2285_v59  ;;  %1483 = vmatmul.mubr.bf16.gmra.mxu1 %v2286_v60 }
  0xfd   : > { %1257 = vmatprep.mubr.bf16.mxu0 %v2287_v61  ;;  %1490 = vmatprep.mubr.bf16.mxu1 %v2289_v62 }
 0x104   : > { %1258 = vmatmul.mubr.bf16.gmra.mxu0 %v2291_v63  ;;  %1491 = vmatmul.mubr.bf16.gmra.mxu1 %v2292_v0 }
 0x105   : > { %1265 = vmatprep.mubr.bf16.mxu0 %v2293_v1  ;;  %1498 = vmatprep.mubr.bf16.mxu1 %v2295_v2 }
 0x10c   : > { %v1075_v8 = vpop.f32.mrf.mxu0  ;;  %1266 = vmatmul.mubr.bf16.gmra.mxu0 %v2297_v5  ;;  %v1308_v10 = vpop.f32.mrf.mxu1  ;;  %1499 = vmatmul.mubr.bf16.gmra.mxu1 %v1971_v6 }
 0x10d   : > { %v1076_v9 = vadd.f32 %v2577_v7, %v1075_v8 }
 0x10e   : > { %v1077_v11 = vpop.f32.mrf.mxu0  ;;  %v1310_v13 = vpop.f32.mrf.mxu1 }
 0x10f   : > { %v1309_v12 = vadd.f32 %v1308_v10, %v1076_v9 }
 0x110   : > { %v1078_v14 = vpop.f32.mrf.mxu0  ;;  %v1311_v17 = vpop.f32.mrf.mxu1 }
 0x111   : > { %v1507_v15 = vmax.f32 %v1309_v12, 0.0  ;;  %v1079_v16 = vadd.f32 %v2577_v7, %v1078_v14 }
 0x112   : > { %v1080_v18 = vpop.f32.mrf.mxu0  ;;  %v1313_v21 = vpop.f32.mrf.mxu1 }
 0x113   : > { %v2058_v19 = vpack.c.bf16 %v1507_v15, %v1507_v15  ;;  %v1312_v20 = vadd.f32 %v1311_v17, %v1079_v16 }
 0x114   : > { %v1083_v22 = vpop.f32.mrf.mxu0  ;;  %v1316_v25 = vpop.f32.mrf.mxu1 }
 0x115   : > { %1758 = vst.msk [vmem:[%s2585_s11] sm:$0xf] %vm1757_vm0, %v2058_v19  ;;  %v1508_v23 = vmax.f32 %v1312_v20, 0.0  ;;  %v1084_v24 = vadd.f32 %v2577_v7, %v1083_v22 }
 0x116   : > { %v1085_v26 = vpop.f32.mrf.mxu0  ;;  %v1318_v29 = vpop.f32.mrf.mxu1 }
 0x117   : > { %v2059_v27 = vpack.c.bf16 %v1508_v23, %v1508_v23  ;;  %v1317_v28 = vadd.f32 %v1316_v25, %v1084_v24 }
 0x118   : > { %v1086_v30 = vpop.f32.mrf.mxu0  ;;  %v1319_v33 = vpop.f32.mrf.mxu1 }
 0x119   : > { %1759 = vst.msk [vmem:[%s2585_s11 + $0x4] sm:$0xf] %vm1757_vm0, %v2059_v27  ;;  %v1509_v31 = vmax.f32 %v1317_v28, 0.0  ;;  %v1087_v32 = vadd.f32 %v2577_v7, %v1086_v30 }
 0x11a   : > { %v1088_v34 = vpop.f32.mrf.mxu0  ;;  %v1321_v37 = vpop.f32.mrf.mxu1 }
 0x11b   : > { %v2060_v35 = vpack.c.bf16 %v1509_v31, %v1509_v31  ;;  %v1320_v36 = vadd.f32 %v1319_v33, %v1087_v32 }
 0x11c   : > { %v1091_v38 = vpop.f32.mrf.mxu0  ;;  %v1324_v41 = vpop.f32.mrf.mxu1 }
 0x11d   : > { %1760 = vst.msk [vmem:[%s2585_s11 + $0x8] sm:$0xf] %vm1757_vm0, %v2060_v35  ;;  %v1510_v39 = vmax.f32 %v1320_v36, 0.0  ;;  %v1092_v40 = vadd.f32 %v2577_v7, %v1091_v38 }
 0x11e   : > { %v1093_v42 = vpop.f32.mrf.mxu0  ;;  %v1326_v45 = vpop.f32.mrf.mxu1 }
 0x11f   : > { %v2061_v43 = vpack.c.bf16 %v1510_v39, %v1510_v39  ;;  %v1325_v44 = vadd.f32 %v1324_v41, %v1092_v40 }
 0x120   : > { %v1094_v46 = vpop.f32.mrf.mxu0  ;;  %v1327_v49 = vpop.f32.mrf.mxu1 }
 0x121   : > { %1761 = vst.msk [vmem:[%s2585_s11 + $0xc] sm:$0xf] %vm1757_vm0, %v2061_v43  ;;  %v1511_v47 = vmax.f32 %v1325_v44, 0.0  ;;  %v1095_v48 = vadd.f32 %v2577_v7, %v1094_v46 }
 0x122   : > { %v1096_v50 = vpop.f32.mrf.mxu0  ;;  %v1329_v53 = vpop.f32.mrf.mxu1 }
 0x123   : > { %v2062_v51 = vpack.c.bf16 %v1511_v47, %v1511_v47  ;;  %v1328_v52 = vadd.f32 %v1327_v49, %v1095_v48 }
 0x124   : > { %v1099_v54 = vpop.f32.mrf.mxu0  ;;  %v1332_v57 = vpop.f32.mrf.mxu1 }
 0x125   : > { %1762 = vst.msk [vmem:[%s2585_s11 + $0x10] sm:$0xf] %vm1757_vm0, %v2062_v51  ;;  %v1512_v55 = vmax.f32 %v1328_v52, 0.0  ;;  %v1100_v56 = vadd.f32 %v2577_v7, %v1099_v54 }
 0x126   : > { %v1101_v58 = vpop.f32.mrf.mxu0  ;;  %v1334_v61 = vpop.f32.mrf.mxu1 }
 0x127   : > { %v2063_v59 = vpack.c.bf16 %v1512_v55, %v1512_v55  ;;  %v1333_v60 = vadd.f32 %v1332_v57, %v1100_v56 }
 0x128   : > { %v1102_v62 = vpop.f32.mrf.mxu0  ;;  %v1335_v1 = vpop.f32.mrf.mxu1 }
 0x129   : > { %1763 = vst.msk [vmem:[%s2585_s11 + $0x14] sm:$0xf] %vm1757_vm0, %v2063_v59  ;;  %v1513_v63 = vmax.f32 %v1333_v60, 0.0  ;;  %v1103_v0 = vadd.f32 %v2577_v7, %v1102_v62 }
 0x12a   : > { %v1104_v2 = vpop.f32.mrf.mxu0  ;;  %v1337_v5 = vpop.f32.mrf.mxu1 }
 0x12b   : > { %v2064_v3 = vpack.c.bf16 %v1513_v63, %v1513_v63  ;;  %v1336_v4 = vadd.f32 %v1335_v1, %v1103_v0 }
 0x12c   : > { %v1107_v6 = vpop.f32.mrf.mxu0  ;;  %v1340_v10 = vpop.f32.mrf.mxu1 }
 0x12d   : > { %1764 = vst.msk [vmem:[%s2585_s11 + $0x18] sm:$0xf] %vm1757_vm0, %v2064_v3  ;;  %v1514_v8 = vmax.f32 %v1336_v4, 0.0  ;;  %v1108_v9 = vadd.f32 %v2577_v7, %v1107_v6 }
 0x12e   : > { %v1109_v11 = vpop.f32.mrf.mxu0  ;;  %v1342_v14 = vpop.f32.mrf.mxu1 }
 0x12f   : > { %v2065_v12 = vpack.c.bf16 %v1514_v8, %v1514_v8  ;;  %v1341_v13 = vadd.f32 %v1340_v10, %v1108_v9 }
 0x130   : > { %v1110_v15 = vpop.f32.mrf.mxu0  ;;  %v1343_v18 = vpop.f32.mrf.mxu1 }
 0x131   : > { %1765 = vst.msk [vmem:[%s2585_s11 + $0x1c] sm:$0xf] %vm1757_vm0, %v2065_v12  ;;  %v1515_v16 = vmax.f32 %v1341_v13, 0.0  ;;  %v1111_v17 = vadd.f32 %v2577_v7, %v1110_v15 }
 0x132   : > { %v1112_v19 = vpop.f32.mrf.mxu0  ;;  %v1345_v22 = vpop.f32.mrf.mxu1 }
 0x133   : > { %v2066_v20 = vpack.c.bf16 %v1515_v16, %v1515_v16  ;;  %v1344_v21 = vadd.f32 %v1343_v18, %v1111_v17 }
 0x134   : > { %v1115_v23 = vpop.f32.mrf.mxu0  ;;  %v1348_v26 = vpop.f32.mrf.mxu1 }
 0x135   : > { %1766 = vst.msk [vmem:[%s2585_s11 + $0x20] sm:$0xf] %vm1757_vm0, %v2066_v20  ;;  %v1516_v24 = vmax.f32 %v1344_v21, 0.0  ;;  %v1116_v25 = vadd.f32 %v2577_v7, %v1115_v23 }
 0x136   : > { %v1117_v27 = vpop.f32.mrf.mxu0  ;;  %v1350_v30 = vpop.f32.mrf.mxu1 }
 0x137   : > { %v2067_v28 = vpack.c.bf16 %v1516_v24, %v1516_v24  ;;  %v1349_v29 = vadd.f32 %v1348_v26, %v1116_v25 }
 0x138   : > { %v1118_v31 = vpop.f32.mrf.mxu0  ;;  %v1351_v34 = vpop.f32.mrf.mxu1 }
 0x139   : > { %1767 = vst.msk [vmem:[%s2585_s11 + $0x24] sm:$0xf] %vm1757_vm0, %v2067_v28  ;;  %v1517_v32 = vmax.f32 %v1349_v29, 0.0  ;;  %v1119_v33 = vadd.f32 %v2577_v7, %v1118_v31 }
 0x13a   : > { %v1120_v35 = vpop.f32.mrf.mxu0  ;;  %v1353_v38 = vpop.f32.mrf.mxu1 }
 0x13b   : > { %v2068_v36 = vpack.c.bf16 %v1517_v32, %v1517_v32  ;;  %v1352_v37 = vadd.f32 %v1351_v34, %v1119_v33 }
 0x13c   : > { %v1123_v39 = vpop.f32.mrf.mxu0  ;;  %v1356_v42 = vpop.f32.mrf.mxu1 }
 0x13d   : > { %1768 = vst.msk [vmem:[%s2585_s11 + $0x28] sm:$0xf] %vm1757_vm0, %v2068_v36  ;;  %v1518_v40 = vmax.f32 %v1352_v37, 0.0  ;;  %v1124_v41 = vadd.f32 %v2577_v7, %v1123_v39 }
 0x13e   : > { %v1125_v43 = vpop.f32.mrf.mxu0  ;;  %v1358_v46 = vpop.f32.mrf.mxu1 }
 0x13f   : > { %v2069_v44 = vpack.c.bf16 %v1518_v40, %v1518_v40  ;;  %v1357_v45 = vadd.f32 %v1356_v42, %v1124_v41 }
 0x140   : > { %v1126_v47 = vpop.f32.mrf.mxu0  ;;  %v1359_v50 = vpop.f32.mrf.mxu1 }
 0x141   : > { %1769 = vst.msk [vmem:[%s2585_s11 + $0x2c] sm:$0xf] %vm1757_vm0, %v2069_v44  ;;  %v1519_v48 = vmax.f32 %v1357_v45, 0.0  ;;  %v1127_v49 = vadd.f32 %v2577_v7, %v1126_v47 }
 0x142   : > { %v1128_v51 = vpop.f32.mrf.mxu0  ;;  %v1361_v54 = vpop.f32.mrf.mxu1 }
 0x143   : > { %v2070_v52 = vpack.c.bf16 %v1519_v48, %v1519_v48  ;;  %v1360_v53 = vadd.f32 %v1359_v50, %v1127_v49 }
 0x144   : > { %v1131_v55 = vpop.f32.mrf.mxu0  ;;  %v1364_v58 = vpop.f32.mrf.mxu1 }
 0x145   : > { %1770 = vst.msk [vmem:[%s2585_s11 + $0x30] sm:$0xf] %vm1757_vm0, %v2070_v52  ;;  %v1520_v56 = vmax.f32 %v1360_v53, 0.0  ;;  %v1132_v57 = vadd.f32 %v2577_v7, %v1131_v55 }
 0x146   : > { %v1133_v59 = vpop.f32.mrf.mxu0  ;;  %v1366_v62 = vpop.f32.mrf.mxu1 }
 0x147   : > { %v2071_v60 = vpack.c.bf16 %v1520_v56, %v1520_v56  ;;  %v1365_v61 = vadd.f32 %v1364_v58, %v1132_v57 }
 0x148   : > { %v1134_v63 = vpop.f32.mrf.mxu0  ;;  %v1367_v2 = vpop.f32.mrf.mxu1 }
 0x149   : > { %1771 = vst.msk [vmem:[%s2585_s11 + $0x34] sm:$0xf] %vm1757_vm0, %v2071_v60  ;;  %v1521_v0 = vmax.f32 %v1365_v61, 0.0  ;;  %v1135_v1 = vadd.f32 %v2577_v7, %v1134_v63 }
 0x14a   : > { %v1136_v3 = vpop.f32.mrf.mxu0  ;;  %v1369_v6 = vpop.f32.mrf.mxu1 }
 0x14b   : > { %v2072_v4 = vpack.c.bf16 %v1521_v0, %v1521_v0  ;;  %v1368_v5 = vadd.f32 %v1367_v2, %v1135_v1 }
 0x14c   : > { %v1139_v8 = vpop.f32.mrf.mxu0  ;;  %v1372_v11 = vpop.f32.mrf.mxu1 }
 0x14d   : > { %1772 = vst.msk [vmem:[%s2585_s11 + $0x38] sm:$0xf] %vm1757_vm0, %v2072_v4  ;;  %v1522_v9 = vmax.f32 %v1368_v5, 0.0  ;;  %v1140_v10 = vadd.f32 %v2577_v7, %v1139_v8 }
 0x14e   : > { %v1141_v12 = vpop.f32.mrf.mxu0  ;;  %v1374_v15 = vpop.f32.mrf.mxu1 }
 0x14f   : > { %v2073_v13 = vpack.c.bf16 %v1522_v9, %v1522_v9  ;;  %v1373_v14 = vadd.f32 %v1372_v11, %v1140_v10 }
 0x150   : > { %v1142_v16 = vpop.f32.mrf.mxu0  ;;  %v1375_v19 = vpop.f32.mrf.mxu1 }
 0x151   : > { %1773 = vst.msk [vmem:[%s2585_s11 + $0x3c] sm:$0xf] %vm1757_vm0, %v2073_v13  ;;  %v1523_v17 = vmax.f32 %v1373_v14, 0.0  ;;  %v1143_v18 = vadd.f32 %v2577_v7, %v1142_v16 }
 0x152   : > { %v1144_v20 = vpop.f32.mrf.mxu0  ;;  %v1377_v23 = vpop.f32.mrf.mxu1 }
 0x153   : > { %v2074_v21 = vpack.c.bf16 %v1523_v17, %v1523_v17  ;;  %v1376_v22 = vadd.f32 %v1375_v19, %v1143_v18 }
 0x154   : > { %v1147_v24 = vpop.f32.mrf.mxu0  ;;  %v1380_v27 = vpop.f32.mrf.mxu1 }
 0x155   : > { %1774 = vst.msk [vmem:[%s2585_s11 + $0x40] sm:$0xf] %vm1757_vm0, %v2074_v21  ;;  %v1524_v25 = vmax.f32 %v1376_v22, 0.0  ;;  %v1148_v26 = vadd.f32 %v2577_v7, %v1147_v24 }
 0x156   : > { %v1149_v28 = vpop.f32.mrf.mxu0  ;;  %v1382_v31 = vpop.f32.mrf.mxu1 }
 0x157   : > { %v2075_v29 = vpack.c.bf16 %v1524_v25, %v1524_v25  ;;  %v1381_v30 = vadd.f32 %v1380_v27, %v1148_v26 }
 0x158   : > { %v1150_v32 = vpop.f32.mrf.mxu0  ;;  %v1383_v35 = vpop.f32.mrf.mxu1 }
 0x159   : > { %1775 = vst.msk [vmem:[%s2585_s11 + $0x44] sm:$0xf] %vm1757_vm0, %v2075_v29  ;;  %v1525_v33 = vmax.f32 %v1381_v30, 0.0  ;;  %v1151_v34 = vadd.f32 %v2577_v7, %v1150_v32 }
 0x15a   : > { %v1152_v36 = vpop.f32.mrf.mxu0  ;;  %v1385_v39 = vpop.f32.mrf.mxu1 }
 0x15b   : > { %v2076_v37 = vpack.c.bf16 %v1525_v33, %v1525_v33  ;;  %v1384_v38 = vadd.f32 %v1383_v35, %v1151_v34 }
 0x15c   : > { %v1155_v40 = vpop.f32.mrf.mxu0  ;;  %v1388_v43 = vpop.f32.mrf.mxu1 }
 0x15d   : > { %1776 = vst.msk [vmem:[%s2585_s11 + $0x48] sm:$0xf] %vm1757_vm0, %v2076_v37  ;;  %v1526_v41 = vmax.f32 %v1384_v38, 0.0  ;;  %v1156_v42 = vadd.f32 %v2577_v7, %v1155_v40 }
 0x15e   : > { %v1157_v44 = vpop.f32.mrf.mxu0  ;;  %v1390_v47 = vpop.f32.mrf.mxu1 }
 0x15f   : > { %v2077_v45 = vpack.c.bf16 %v1526_v41, %v1526_v41  ;;  %v1389_v46 = vadd.f32 %v1388_v43, %v1156_v42 }
 0x160   : > { %v1158_v48 = vpop.f32.mrf.mxu0  ;;  %v1391_v51 = vpop.f32.mrf.mxu1 }
 0x161   : > { %1777 = vst.msk [vmem:[%s2585_s11 + $0x4c] sm:$0xf] %vm1757_vm0, %v2077_v45  ;;  %v1527_v49 = vmax.f32 %v1389_v46, 0.0  ;;  %v1159_v50 = vadd.f32 %v2577_v7, %v1158_v48 }
 0x162   : > { %v1160_v52 = vpop.f32.mrf.mxu0  ;;  %v1393_v55 = vpop.f32.mrf.mxu1 }
 0x163   : > { %v2078_v53 = vpack.c.bf16 %v1527_v49, %v1527_v49  ;;  %v1392_v54 = vadd.f32 %v1391_v51, %v1159_v50 }
 0x164   : > { %v1163_v56 = vpop.f32.mrf.mxu0  ;;  %v1396_v59 = vpop.f32.mrf.mxu1 }
 0x165   : > { %1778 = vst.msk [vmem:[%s2585_s11 + $0x50] sm:$0xf] %vm1757_vm0, %v2078_v53  ;;  %v1528_v57 = vmax.f32 %v1392_v54, 0.0  ;;  %v1164_v58 = vadd.f32 %v2577_v7, %v1163_v56 }
 0x166   : > { %v1165_v60 = vpop.f32.mrf.mxu0  ;;  %v1398_v63 = vpop.f32.mrf.mxu1 }
 0x167   : > { %v2079_v61 = vpack.c.bf16 %v1528_v57, %v1528_v57  ;;  %v1397_v62 = vadd.f32 %v1396_v59, %v1164_v58 }
 0x168   : > { %v1166_v0 = vpop.f32.mrf.mxu0  ;;  %v1399_v3 = vpop.f32.mrf.mxu1 }
 0x169   : > { %1779 = vst.msk [vmem:[%s2585_s11 + $0x54] sm:$0xf] %vm1757_vm0, %v2079_v61  ;;  %v1529_v1 = vmax.f32 %v1397_v62, 0.0  ;;  %v1167_v2 = vadd.f32 %v2577_v7, %v1166_v0 }
 0x16a   : > { %v1168_v4 = vpop.f32.mrf.mxu0  ;;  %v1401_v8 = vpop.f32.mrf.mxu1 }
 0x16b   : > { %v2080_v5 = vpack.c.bf16 %v1529_v1, %v1529_v1  ;;  %v1400_v6 = vadd.f32 %v1399_v3, %v1167_v2 }
 0x16c   : > { %v1171_v9 = vpop.f32.mrf.mxu0  ;;  %v1404_v12 = vpop.f32.mrf.mxu1 }
 0x16d   : > { %1780 = vst.msk [vmem:[%s2585_s11 + $0x58] sm:$0xf] %vm1757_vm0, %v2080_v5  ;;  %v1530_v10 = vmax.f32 %v1400_v6, 0.0  ;;  %v1172_v11 = vadd.f32 %v2577_v7, %v1171_v9 }
 0x16e   : > { %v1173_v13 = vpop.f32.mrf.mxu0  ;;  %v1406_v16 = vpop.f32.mrf.mxu1 }
 0x16f   : > { %v2081_v14 = vpack.c.bf16 %v1530_v10, %v1530_v10  ;;  %v1405_v15 = vadd.f32 %v1404_v12, %v1172_v11 }
 0x170   : > { %v1174_v17 = vpop.f32.mrf.mxu0  ;;  %v1407_v20 = vpop.f32.mrf.mxu1 }
 0x171   : > { %1781 = vst.msk [vmem:[%s2585_s11 + $0x5c] sm:$0xf] %vm1757_vm0, %v2081_v14  ;;  %v1531_v18 = vmax.f32 %v1405_v15, 0.0  ;;  %v1175_v19 = vadd.f32 %v2577_v7, %v1174_v17 }
 0x172   : > { %v1176_v21 = vpop.f32.mrf.mxu0  ;;  %v1409_v24 = vpop.f32.mrf.mxu1 }
 0x173   : > { %v2082_v22 = vpack.c.bf16 %v1531_v18, %v1531_v18  ;;  %v1408_v23 = vadd.f32 %v1407_v20, %v1175_v19 }
 0x174   : > { %v1179_v25 = vpop.f32.mrf.mxu0  ;;  %v1412_v28 = vpop.f32.mrf.mxu1 }
 0x175   : > { %1782 = vst.msk [vmem:[%s2585_s11 + $0x60] sm:$0xf] %vm1757_vm0, %v2082_v22  ;;  %v1532_v26 = vmax.f32 %v1408_v23, 0.0  ;;  %v1180_v27 = vadd.f32 %v2577_v7, %v1179_v25 }
 0x176   : > { %v1181_v29 = vpop.f32.mrf.mxu0  ;;  %v1414_v32 = vpop.f32.mrf.mxu1 }
 0x177   : > { %v2083_v30 = vpack.c.bf16 %v1532_v26, %v1532_v26  ;;  %v1413_v31 = vadd.f32 %v1412_v28, %v1180_v27 }
 0x178   : > { %v1182_v33 = vpop.f32.mrf.mxu0  ;;  %v1415_v36 = vpop.f32.mrf.mxu1 }
 0x179   : > { %1783 = vst.msk [vmem:[%s2585_s11 + $0x64] sm:$0xf] %vm1757_vm0, %v2083_v30  ;;  %v1533_v34 = vmax.f32 %v1413_v31, 0.0  ;;  %v1183_v35 = vadd.f32 %v2577_v7, %v1182_v33 }
 0x17a   : > { %v1184_v37 = vpop.f32.mrf.mxu0  ;;  %v1417_v40 = vpop.f32.mrf.mxu1 }
 0x17b   : > { %v2084_v38 = vpack.c.bf16 %v1533_v34, %v1533_v34  ;;  %v1416_v39 = vadd.f32 %v1415_v36, %v1183_v35 }
 0x17c   : > { %v1187_v41 = vpop.f32.mrf.mxu0  ;;  %v1420_v44 = vpop.f32.mrf.mxu1 }
 0x17d   : > { %1784 = vst.msk [vmem:[%s2585_s11 + $0x68] sm:$0xf] %vm1757_vm0, %v2084_v38  ;;  %v1534_v42 = vmax.f32 %v1416_v39, 0.0  ;;  %v1188_v43 = vadd.f32 %v2577_v7, %v1187_v41 }
 0x17e   : > { %v1189_v45 = vpop.f32.mrf.mxu0  ;;  %v1422_v48 = vpop.f32.mrf.mxu1 }
 0x17f   : > { %v2085_v46 = vpack.c.bf16 %v1534_v42, %v1534_v42  ;;  %v1421_v47 = vadd.f32 %v1420_v44, %v1188_v43 }
 0x180   : > { %v1190_v49 = vpop.f32.mrf.mxu0  ;;  %v1423_v52 = vpop.f32.mrf.mxu1 }
 0x181   : > { %1785 = vst.msk [vmem:[%s2585_s11 + $0x6c] sm:$0xf] %vm1757_vm0, %v2085_v46  ;;  %v1535_v50 = vmax.f32 %v1421_v47, 0.0  ;;  %v1191_v51 = vadd.f32 %v2577_v7, %v1190_v49 }
 0x182   : > { %v1192_v53 = vpop.f32.mrf.mxu0  ;;  %v1425_v56 = vpop.f32.mrf.mxu1 }
 0x183   : > { %v2086_v54 = vpack.c.bf16 %v1535_v50, %v1535_v50  ;;  %v1424_v55 = vadd.f32 %v1423_v52, %v1191_v51 }
 0x184   : > { %v1195_v57 = vpop.f32.mrf.mxu0  ;;  %v1428_v60 = vpop.f32.mrf.mxu1 }
 0x185   : > { %1786 = vst.msk [vmem:[%s2585_s11 + $0x70] sm:$0xf] %vm1757_vm0, %v2086_v54  ;;  %v1536_v58 = vmax.f32 %v1424_v55, 0.0  ;;  %v1196_v59 = vadd.f32 %v2577_v7, %v1195_v57 }
 0x186   : > { %v1197_v61 = vpop.f32.mrf.mxu0  ;;  %v1430_v0 = vpop.f32.mrf.mxu1 }
 0x187   : > { %v2087_v62 = vpack.c.bf16 %v1536_v58, %v1536_v58  ;;  %v1429_v63 = vadd.f32 %v1428_v60, %v1196_v59 }
 0x188   : > { %v1198_v1 = vpop.f32.mrf.mxu0  ;;  %v1431_v4 = vpop.f32.mrf.mxu1 }
 0x189   : > { %1787 = vst.msk [vmem:[%s2585_s11 + $0x74] sm:$0xf] %vm1757_vm0, %v2087_v62  ;;  %v1537_v2 = vmax.f32 %v1429_v63, 0.0  ;;  %v1199_v3 = vadd.f32 %v2577_v7, %v1198_v1 }
 0x18a   : > { %v1200_v5 = vpop.f32.mrf.mxu0  ;;  %v1433_v9 = vpop.f32.mrf.mxu1 }
 0x18b   : > { %v2088_v6 = vpack.c.bf16 %v1537_v2, %v1537_v2  ;;  %v1432_v8 = vadd.f32 %v1431_v4, %v1199_v3 }
 0x18c   : > { %v1203_v10 = vpop.f32.mrf.mxu0  ;;  %v1436_v13 = vpop.f32.mrf.mxu1 }
 0x18d   : > { %1788 = vst.msk [vmem:[%s2585_s11 + $0x78] sm:$0xf] %vm1757_vm0, %v2088_v6  ;;  %v1538_v11 = vmax.f32 %v1432_v8, 0.0  ;;  %v1204_v12 = vadd.f32 %v2577_v7, %v1203_v10 }
 0x18e   : > { %v1205_v14 = vpop.f32.mrf.mxu0  ;;  %v1438_v17 = vpop.f32.mrf.mxu1 }
 0x18f   : > { %v2089_v15 = vpack.c.bf16 %v1538_v11, %v1538_v11  ;;  %v1437_v16 = vadd.f32 %v1436_v13, %v1204_v12 }
 0x190   : > { %v1206_v18 = vpop.f32.mrf.mxu0  ;;  %v1439_v21 = vpop.f32.mrf.mxu1 }
 0x191   : > { %1789 = vst.msk [vmem:[%s2585_s11 + $0x7c] sm:$0xf] %vm1757_vm0, %v2089_v15  ;;  %v1539_v19 = vmax.f32 %v1437_v16, 0.0  ;;  %v1207_v20 = vadd.f32 %v2577_v7, %v1206_v18 }
 0x192   : > { %v1208_v22 = vpop.f32.mrf.mxu0  ;;  %v1441_v25 = vpop.f32.mrf.mxu1 }
 0x193   : > { %v2090_v23 = vpack.c.bf16 %v1539_v19, %v1539_v19  ;;  %v1440_v24 = vadd.f32 %v1439_v21, %v1207_v20 }
 0x194   : > { %v1211_v26 = vpop.f32.mrf.mxu0  ;;  %v1444_v29 = vpop.f32.mrf.mxu1 }
 0x195   : > { %1790 = vst.msk [vmem:[%s2585_s11 + $0x80] sm:$0xf] %vm1757_vm0, %v2090_v23  ;;  %v1540_v27 = vmax.f32 %v1440_v24, 0.0  ;;  %v1212_v28 = vadd.f32 %v2577_v7, %v1211_v26 }
 0x196   : > { %v1213_v30 = vpop.f32.mrf.mxu0  ;;  %v1446_v33 = vpop.f32.mrf.mxu1 }
 0x197   : > { %v2091_v31 = vpack.c.bf16 %v1540_v27, %v1540_v27  ;;  %v1445_v32 = vadd.f32 %v1444_v29, %v1212_v28 }
 0x198   : > { %v1214_v34 = vpop.f32.mrf.mxu0  ;;  %v1447_v37 = vpop.f32.mrf.mxu1 }
 0x199   : > { %1791 = vst.msk [vmem:[%s2585_s11 + $0x84] sm:$0xf] %vm1757_vm0, %v2091_v31  ;;  %v1541_v35 = vmax.f32 %v1445_v32, 0.0  ;;  %v1215_v36 = vadd.f32 %v2577_v7, %v1214_v34 }
 0x19a   : > { %v1216_v38 = vpop.f32.mrf.mxu0  ;;  %v1449_v41 = vpop.f32.mrf.mxu1 }
 0x19b   : > { %v2092_v39 = vpack.c.bf16 %v1541_v35, %v1541_v35  ;;  %v1448_v40 = vadd.f32 %v1447_v37, %v1215_v36 }
 0x19c   : > { %v1219_v42 = vpop.f32.mrf.mxu0  ;;  %v1452_v45 = vpop.f32.mrf.mxu1 }
 0x19d   : > { %1792 = vst.msk [vmem:[%s2585_s11 + $0x88] sm:$0xf] %vm1757_vm0, %v2092_v39  ;;  %v1542_v43 = vmax.f32 %v1448_v40, 0.0  ;;  %v1220_v44 = vadd.f32 %v2577_v7, %v1219_v42 }
 0x19e   : > { %v1221_v46 = vpop.f32.mrf.mxu0  ;;  %v1454_v49 = vpop.f32.mrf.mxu1 }
 0x19f   : > { %v2093_v47 = vpack.c.bf16 %v1542_v43, %v1542_v43  ;;  %v1453_v48 = vadd.f32 %v1452_v45, %v1220_v44 }
 0x1a0   : > { %v1222_v50 = vpop.f32.mrf.mxu0  ;;  %v1455_v53 = vpop.f32.mrf.mxu1 }
 0x1a1   : > { %1793 = vst.msk [vmem:[%s2585_s11 + $0x8c] sm:$0xf] %vm1757_vm0, %v2093_v47  ;;  %v1543_v51 = vmax.f32 %v1453_v48, 0.0  ;;  %v1223_v52 = vadd.f32 %v2577_v7, %v1222_v50 }
 0x1a2   : > { %v1224_v54 = vpop.f32.mrf.mxu0  ;;  %v1457_v57 = vpop.f32.mrf.mxu1 }
 0x1a3   : > { %v2094_v55 = vpack.c.bf16 %v1543_v51, %v1543_v51  ;;  %v1456_v56 = vadd.f32 %v1455_v53, %v1223_v52 }
 0x1a4   : > { %v1227_v58 = vpop.f32.mrf.mxu0  ;;  %v1460_v61 = vpop.f32.mrf.mxu1 }
 0x1a5   : > { %1794 = vst.msk [vmem:[%s2585_s11 + $0x90] sm:$0xf] %vm1757_vm0, %v2094_v55  ;;  %v1544_v59 = vmax.f32 %v1456_v56, 0.0  ;;  %v1228_v60 = vadd.f32 %v2577_v7, %v1227_v58 }
 0x1a6   : > { %v1229_v62 = vpop.f32.mrf.mxu0  ;;  %v1462_v1 = vpop.f32.mrf.mxu1 }
 0x1a7   : > { %v2095_v63 = vpack.c.bf16 %v1544_v59, %v1544_v59  ;;  %v1461_v0 = vadd.f32 %v1460_v61, %v1228_v60 }
 0x1a8   : > { %v1230_v2 = vpop.f32.mrf.mxu0  ;;  %v1463_v5 = vpop.f32.mrf.mxu1 }
 0x1a9   : > { %1795 = vst.msk [vmem:[%s2585_s11 + $0x94] sm:$0xf] %vm1757_vm0, %v2095_v63  ;;  %v1545_v3 = vmax.f32 %v1461_v0, 0.0  ;;  %v1231_v4 = vadd.f32 %v2577_v7, %v1230_v2 }
 0x1aa   : > { %v1232_v6 = vpop.f32.mrf.mxu0  ;;  %v1465_v10 = vpop.f32.mrf.mxu1 }
 0x1ab   : > { %v2096_v8 = vpack.c.bf16 %v1545_v3, %v1545_v3  ;;  %v1464_v9 = vadd.f32 %v1463_v5, %v1231_v4 }
 0x1ac   : > { %v1235_v11 = vpop.f32.mrf.mxu0  ;;  %v1468_v14 = vpop.f32.mrf.mxu1 }
 0x1ad   : > { %1796 = vst.msk [vmem:[%s2585_s11 + $0x98] sm:$0xf] %vm1757_vm0, %v2096_v8  ;;  %v1546_v12 = vmax.f32 %v1464_v9, 0.0  ;;  %v1236_v13 = vadd.f32 %v2577_v7, %v1235_v11 }
 0x1ae   : > { %v1237_v15 = vpop.f32.mrf.mxu0  ;;  %v1470_v18 = vpop.f32.mrf.mxu1 }
 0x1af   : > { %v2097_v16 = vpack.c.bf16 %v1546_v12, %v1546_v12  ;;  %v1469_v17 = vadd.f32 %v1468_v14, %v1236_v13 }
 0x1b0   : > { %v1238_v19 = vpop.f32.mrf.mxu0  ;;  %v1471_v22 = vpop.f32.mrf.mxu1 }
 0x1b1   : > { %1797 = vst.msk [vmem:[%s2585_s11 + $0x9c] sm:$0xf] %vm1757_vm0, %v2097_v16  ;;  %v1547_v20 = vmax.f32 %v1469_v17, 0.0  ;;  %v1239_v21 = vadd.f32 %v2577_v7, %v1238_v19 }
 0x1b2   : > { %v1240_v23 = vpop.f32.mrf.mxu0  ;;  %v1473_v26 = vpop.f32.mrf.mxu1 }
 0x1b3   : > { %v2098_v24 = vpack.c.bf16 %v1547_v20, %v1547_v20  ;;  %v1472_v25 = vadd.f32 %v1471_v22, %v1239_v21 }
 0x1b4   : > { %v1243_v27 = vpop.f32.mrf.mxu0  ;;  %v1476_v30 = vpop.f32.mrf.mxu1 }
 0x1b5   : > { %1798 = vst.msk [vmem:[%s2585_s11 + $0xa0] sm:$0xf] %vm1757_vm0, %v2098_v24  ;;  %v1548_v28 = vmax.f32 %v1472_v25, 0.0  ;;  %v1244_v29 = vadd.f32 %v2577_v7, %v1243_v27 }
 0x1b6   : > { %v1245_v31 = vpop.f32.mrf.mxu0  ;;  %v1478_v34 = vpop.f32.mrf.mxu1 }
 0x1b7   : > { %v2099_v32 = vpack.c.bf16 %v1548_v28, %v1548_v28  ;;  %v1477_v33 = vadd.f32 %v1476_v30, %v1244_v29 }
 0x1b8   : > { %v1246_v35 = vpop.f32.mrf.mxu0  ;;  %v1479_v38 = vpop.f32.mrf.mxu1 }
 0x1b9   : > { %1799 = vst.msk [vmem:[%s2585_s11 + $0xa4] sm:$0xf] %vm1757_vm0, %v2099_v32  ;;  %v1549_v36 = vmax.f32 %v1477_v33, 0.0  ;;  %v1247_v37 = vadd.f32 %v2577_v7, %v1246_v35 }
 0x1ba   : > { %v1248_v39 = vpop.f32.mrf.mxu0  ;;  %v1481_v42 = vpop.f32.mrf.mxu1 }
 0x1bb   : > { %v2100_v40 = vpack.c.bf16 %v1549_v36, %v1549_v36  ;;  %v1480_v41 = vadd.f32 %v1479_v38, %v1247_v37 }
 0x1bc   : > { %v1251_v43 = vpop.f32.mrf.mxu0  ;;  %v1484_v46 = vpop.f32.mrf.mxu1 }
 0x1bd   : > { %1800 = vst.msk [vmem:[%s2585_s11 + $0xa8] sm:$0xf] %vm1757_vm0, %v2100_v40  ;;  %v1550_v44 = vmax.f32 %v1480_v41, 0.0  ;;  %v1252_v45 = vadd.f32 %v2577_v7, %v1251_v43 }
 0x1be   : > { %v1253_v47 = vpop.f32.mrf.mxu0  ;;  %v1486_v50 = vpop.f32.mrf.mxu1 }
 0x1bf   : > { %v2101_v48 = vpack.c.bf16 %v1550_v44, %v1550_v44  ;;  %v1485_v49 = vadd.f32 %v1484_v46, %v1252_v45 }
 0x1c0   : > { %v1254_v51 = vpop.f32.mrf.mxu0  ;;  %v1487_v54 = vpop.f32.mrf.mxu1 }
 0x1c1   : > { %1801 = vst.msk [vmem:[%s2585_s11 + $0xac] sm:$0xf] %vm1757_vm0, %v2101_v48  ;;  %v1551_v52 = vmax.f32 %v1485_v49, 0.0  ;;  %v1255_v53 = vadd.f32 %v2577_v7, %v1254_v51 }
 0x1c2   : > { %v1256_v55 = vpop.f32.mrf.mxu0  ;;  %v1489_v58 = vpop.f32.mrf.mxu1 }
 0x1c3   : > { %v2102_v56 = vpack.c.bf16 %v1551_v52, %v1551_v52  ;;  %v1488_v57 = vadd.f32 %v1487_v54, %v1255_v53 }
 0x1c4   : > { %v1259_v59 = vpop.f32.mrf.mxu0  ;;  %v1492_v62 = vpop.f32.mrf.mxu1 }
 0x1c5   : > { %1802 = vst.msk [vmem:[%s2585_s11 + $0xb0] sm:$0xf] %vm1757_vm0, %v2102_v56  ;;  %v1552_v60 = vmax.f32 %v1488_v57, 0.0  ;;  %v1260_v61 = vadd.f32 %v2577_v7, %v1259_v59 }
 0x1c6   : > { %v1261_v63 = vpop.f32.mrf.mxu0  ;;  %v1494_v2 = vpop.f32.mrf.mxu1 }
 0x1c7   : > { %v2103_v0 = vpack.c.bf16 %v1552_v60, %v1552_v60  ;;  %v1493_v1 = vadd.f32 %v1492_v62, %v1260_v61 }
 0x1c8   : > { %v1262_v3 = vpop.f32.mrf.mxu0  ;;  %v1495_v6 = vpop.f32.mrf.mxu1 }
 0x1c9   : > { %1803 = vst.msk [vmem:[%s2585_s11 + $0xb4] sm:$0xf] %vm1757_vm0, %v2103_v0  ;;  %v1553_v4 = vmax.f32 %v1493_v1, 0.0  ;;  %v1263_v5 = vadd.f32 %v2577_v7, %v1262_v3 }
 0x1ca   : > { %v1264_v8 = vpop.f32.mrf.mxu0  ;;  %v1497_v11 = vpop.f32.mrf.mxu1 }
 0x1cb   : > { %v2104_v9 = vpack.c.bf16 %v1553_v4, %v1553_v4  ;;  %v1496_v10 = vadd.f32 %v1495_v6, %v1263_v5 }
 0x1cc   : > { %v1267_v12 = vpop.f32.mrf.mxu0  ;;  %v1500_v15 = vpop.f32.mrf.mxu1 }
 0x1cd   : > { %1804 = vst.msk [vmem:[%s2585_s11 + $0xb8] sm:$0xf] %vm1757_vm0, %v2104_v9  ;;  %v1554_v13 = vmax.f32 %v1496_v10, 0.0  ;;  %v1268_v14 = vadd.f32 %v2577_v7, %v1267_v12 }
 0x1ce   : > { %v1269_v16 = vpop.f32.mrf.mxu0  ;;  %v1502_v19 = vpop.f32.mrf.mxu1 }
 0x1cf   : > { %v2105_v17 = vpack.c.bf16 %v1554_v13, %v1554_v13  ;;  %v1501_v18 = vadd.f32 %v1500_v15, %v1268_v14 }
 0x1d0   : > { %v1270_v20 = vpop.f32.mrf.mxu0  ;;  %v1503_v23 = vpop.f32.mrf.mxu1 }
 0x1d1   : > { %1805 = vst.msk [vmem:[%s2585_s11 + $0xbc] sm:$0xf] %vm1757_vm0, %v2105_v17  ;;  %v1555_v21 = vmax.f32 %v1501_v18, 0.0  ;;  %v1271_v22 = vadd.f32 %v2577_v7, %v1270_v20 }
 0x1d2   : > { %v1272_v24 = vpop.f32.mrf.mxu0  ;;  %v1505_v27 = vpop.f32.mrf.mxu1 }
 0x1d3   : > { %v2106_v25 = vpack.c.bf16 %v1555_v21, %v1555_v21  ;;  %v1504_v26 = vadd.f32 %v1503_v23, %v1271_v22 }
 0x1d5   : > { %1806 = vst.msk [vmem:[%s2585_s11 + $0xc0] sm:$0xf] %vm1757_vm0, %v2106_v25  ;;  %v1556_v28 = vmax.f32 %v1504_v26, 0.0 }
 0x1d7   : > { %v2107_v29 = vpack.c.bf16 %v1556_v28, %v1556_v28 }
 0x1d9   : > { %1807 = vst.msk [vmem:[%s2585_s11 + $0xc4] sm:$0xf] %vm1757_vm0, %v2107_v29 }
 0x1da PF: > { %s13_s12 = sadd.s32 1, %s2304_s12  }
 0x1db   : > { %p10_p4 = scmp.ge.s32.totalorder %s13_s12, 4  }
 0x1dd   :  { %12 = sbr.rel (!%p10_p4) target bundleno = 1 (0x1), region = 62 }

// kernel: encoder_forward.7
= control target key start
LH: loop header
LB: loop body
LE: loop exit
PB: predicated region body
PF: predicated region fallthrough
CT: control target
= control target key end

     0   :  { %s3276_s1 = inlined_call_operand.vmem [shape: bf16[1024,128], index: 1, kind: input, shape index: {}]   ;;  %s3277_s0 = inlined_call_operand.vmem [shape: bf16[208,1024], index: 0, kind: input, shape index: {}]   ;;  %s3278_s2 = inlined_call_operand.vmem [shape: f32[1,128], index: 2, kind: input, shape index: {}]   ;;  %s3279_s3 = inlined_call_operand.vmem [shape: bf16[208,128], index: 3, kind: output, shape index: {}]  }
   0x1   :  { %v2540_v0 = vld [vmem:[%s3276_s1 + $0x78] sm:$0xff]   ;;  %v2544_v4 = vld [vmem:[%s3276_s1 + $0x70] sm:$0xff]   ;;  %v2548_v8 = vld [vmem:[%s3276_s1 + $0x68] sm:$0xff]  }
   0x2   :  { %v2541_v1 = vld [vmem:[%s3276_s1 + $0xf8] sm:$0xff]   ;;  %2164 = vmatprep.subr.bf16.mxu0 %v2540_v0  ;;  %v2545_v5 = vld [vmem:[%s3276_s1 + $0xf0] sm:$0xff]   ;;  %v2549_v9 = vld [vmem:[%s3276_s1 + $0xe8] sm:$0xff]  }
   0x3   :  { %v2542_v2 = vld [vmem:[%s3276_s1 + $0x38] sm:$0xff]   ;;  %2258 = vmatprep.subr.bf16.mxu1 %v2541_v1  ;;  %v2546_v6 = vld [vmem:[%s3276_s1 + $0x30] sm:$0xff]   ;;  %v2550_v10 = vld [vmem:[%s3276_s1 + $0x28] sm:$0xff]  }
   0x4   :  { %v2543_v3 = vld [vmem:[%s3276_s1 + $0xb8] sm:$0xff]   ;;  %2165 = vmatpush3.bf16.msra.mxu0 %v2542_v2  ;;  %v2547_v7 = vld [vmem:[%s3276_s1 + $0xb0] sm:$0xff]   ;;  %v2551_v11 = vld [vmem:[%s3276_s1 + $0xa8] sm:$0xff]  }
   0x5   :  { %2259 = vmatpush3.bf16.msra.mxu1 %v2543_v3  ;;  %2166 = vmatprep.subr.bf16.mxu0 %v2544_v4  ;;  %v2552_v12 = vld [vmem:[%s3276_s1 + $0x60] sm:$0xff]   ;;  %v2556_v16 = vld [vmem:[%s3276_s1 + $0x58] sm:$0xff]   ;;  %v2560_v20 = vld [vmem:[%s3276_s1 + $0x50] sm:$0xff]  }
   0x6   :  { %2260 = vmatprep.subr.bf16.mxu1 %v2545_v5  ;;  %v2553_v13 = vld [vmem:[%s3276_s1 + $0xe0] sm:$0xff]   ;;  %v2557_v17 = vld [vmem:[%s3276_s1 + $0xd8] sm:$0xff]   ;;  %v2561_v21 = vld [vmem:[%s3276_s1 + $0xd0] sm:$0xff]  }
   0x7   :  { %v2554_v14 = vld [vmem:[%s3276_s1 + $0x20] sm:$0xff]   ;;  %v2558_v18 = vld [vmem:[%s3276_s1 + $0x18] sm:$0xff]   ;;  %v2562_v22 = vld [vmem:[%s3276_s1 + $0x10] sm:$0xff]  }
   0x8   :  { %2167 = vmatpush3.bf16.msra.mxu0 %v2546_v6  ;;  %v2555_v15 = vld [vmem:[%s3276_s1 + $0xa0] sm:$0xff]   ;;  %v2559_v19 = vld [vmem:[%s3276_s1 + $0x98] sm:$0xff]   ;;  %v2563_v23 = vld [vmem:[%s3276_s1 + $0x90] sm:$0xff]  }
   0x9   :  { %2261 = vmatpush3.bf16.msra.mxu1 %v2547_v7  ;;  %2168 = vmatprep.subr.bf16.mxu0 %v2548_v8  ;;  %v2564_v24 = vld [vmem:[%s3276_s1 + $0x48] sm:$0xff]   ;;  %v2568_v28 = vld [vmem:[%s3276_s1 + $0x40] sm:$0xff]   ;;  %v2572_v40 = vld [vmem:[%s3276_s1 + $0x178] sm:$0xff]  }
   0xa   :  { %2262 = vmatprep.subr.bf16.mxu1 %v2549_v9  ;;  %v2565_v25 = vld [vmem:[%s3276_s1 + $0xc8] sm:$0xff]   ;;  %v2569_v29 = vld [vmem:[%s3276_s1 + $0xc0] sm:$0xff]   ;;  %v2573_v41 = vld [vmem:[%s3276_s1 + $0x138] sm:$0xff]  }
   0xb   :  { %v2566_v26 = vld [vmem:[%s3276_s1 + $0x8] sm:$0xff]   ;;  %v2570_v30 = vld [vmem:[%s3276_s1] sm:$0xff]   ;;  %v2574_v42 = vld [vmem:[%s3276_s1 + $0x1f8] sm:$0xff]  }
   0xc   :  { %2169 = vmatpush3.bf16.msra.mxu0 %v2550_v10  ;;  %v2567_v27 = vld [vmem:[%s3276_s1 + $0x88] sm:$0xff]   ;;  %v2571_v31 = vld [vmem:[%s3276_s1 + $0x80] sm:$0xff]   ;;  %v2575_v43 = vld [vmem:[%s3276_s1 + $0x1b8] sm:$0xff]  }
   0xd   :  { %2263 = vmatpush3.bf16.msra.mxu1 %v2551_v11  ;;  %2170 = vmatprep.subr.bf16.mxu0 %v2552_v12  ;;  %v15_v32 = vld [vmem:[%s3277_s0] sm:$0xff]  ;;  %v16_v34 = vld [vmem:[%s3277_s0 + $0x8] sm:$0xff]  ;;  %v2576_v50 = vld [vmem:[%s3276_s1 + $0x170] sm:$0xff]  }
   0xe   :  { %2264 = vmatprep.subr.bf16.mxu1 %v2553_v13  ;;  %v19_v33 = vld [vmem:[%s3277_s0 + $0x20] sm:$0xff]  ;;  %v20_v37 = vld [vmem:[%s3277_s0 + $0x28] sm:$0xff]  ;;  %v2577_v52 = vld [vmem:[%s3276_s1 + $0x130] sm:$0xff]  }
   0xf   :  { %v1867_v35 = vcombine.low %v15_v32, %v19_v33  ;;  %v1868_v36 = vcombine.high %v15_v32, %v19_v33  ;;  %v1869_v38 = vcombine.low %v16_v34, %v20_v37  ;;  %v1870_v39 = vcombine.high %v16_v34, %v20_v37  ;;  %v23_v44 = vld [vmem:[%s3277_s0 + $0x40] sm:$0xff]  ;;  %v24_v47 = vld [vmem:[%s3277_s0 + $0x48] sm:$0xff]  ;;  %v2578_v60 = vld [vmem:[%s3276_s1 + $0x1f0] sm:$0xff]  }
  0x10   :  { %2171 = vmatpush3.bf16.msra.mxu0 %v2554_v14  ;;  %v27_v45 = vld [vmem:[%s3277_s0 + $0x60] sm:$0xff]  ;;  %v28_v48 = vld [vmem:[%s3277_s0 + $0x68] sm:$0xff]  ;;  %v2579_v61 = vld [vmem:[%s3276_s1 + $0x1b0] sm:$0xff]  }
  0x11   :  { %2265 = vmatpush3.bf16.msra.mxu1 %v2555_v15  ;;  %2172 = vmatprep.subr.bf16.mxu0 %v2556_v16  ;;  %v1876_v46 = vcombine.high %v23_v44, %v27_v45  ;;  %v1878_v49 = vcombine.high %v24_v47, %v28_v48  ;;  %v1875_v51 = vcombine.low %v23_v44, %v27_v45  ;;  %v31_v53 = vld [vmem:[%s3277_s0 + $0x80] sm:$0xff]  ;;  %v32_v56 = vld [vmem:[%s3277_s0 + $0x88] sm:$0xff]  ;;  %v2593_v34 = vld [vmem:[%s3276_s1 + $0x110] sm:$0xff]  }
  0x12   :  { %2266 = vmatprep.subr.bf16.mxu1 %v2557_v17  ;;  %1190 = vmatprep.mubr.bf16.mxu0 %v1868_v36  ;;  %v1877_v54 = vcombine.low %v24_v47, %v28_v48  ;;  %v35_v55 = vld [vmem:[%s3277_s0 + $0xa0] sm:$0xff]  ;;  %v36_v57 = vld [vmem:[%s3277_s0 + $0xa8] sm:$0xff]  ;;  %v2594_v36 = vld [vmem:[%s3276_s1 + $0x1d0] sm:$0xff]  }
  0x13   :  { %1327 = vmatprep.mubr.bf16.mxu1 %v1870_v39  ;;  %v1884_v58 = vcombine.high %v31_v53, %v35_v55  ;;  %v1886_v59 = vcombine.high %v32_v56, %v36_v57  ;;  %v39_v62 = vld [vmem:[%s3277_s0 + $0xc0] sm:$0xff]  ;;  %v40_v0 = vld [vmem:[%s3277_s0 + $0xc8] sm:$0xff]  ;;  %v1883_v4 = vcombine.low %v31_v53, %v35_v55  ;;  %v1885_v6 = vcombine.low %v32_v56, %v36_v57  ;;  %v2595_v37 = vld [vmem:[%s3276_s1 + $0x190] sm:$0xff]  }
  0x14   :  { %2173 = vmatpush3.bf16.msra.mxu0 %v2558_v18  ;;  %v43_v63 = vld [vmem:[%s3277_s0 + $0xe0] sm:$0xff]  ;;  %v44_v1 = vld [vmem:[%s3277_s0 + $0xe8] sm:$0xff] }
  0x15   :  { %2267 = vmatpush3.bf16.msra.mxu1 %v2559_v19  ;;  %2174 = vmatprep.subr.bf16.mxu0 %v2560_v20  ;;  %v2580_v2 = vld [vmem:[%s3276_s1 + $0x168] sm:$0xff]   ;;  %v1892_v7 = vcombine.high %v39_v62, %v43_v63  ;;  %v1894_v9 = vcombine.high %v40_v0, %v44_v1  ;;  %v47_v10 = vld [vmem:[%s3277_s0 + $0x100] sm:$0xff]  ;;  %v1891_v18 = vcombine.low %v39_v62, %v43_v63 }
  0x16   :  { %2268 = vmatprep.subr.bf16.mxu1 %v2561_v21  ;;  %v2581_v3 = vld [vmem:[%s3276_s1 + $0x128] sm:$0xff]   ;;  %v51_v11 = vld [vmem:[%s3277_s0 + $0x120] sm:$0xff]  ;;  %v1893_v19 = vcombine.low %v40_v0, %v44_v1 }
  0x17   :  { %v2582_v5 = vld [vmem:[%s3276_s1 + $0x1e8] sm:$0xff]   ;;  %v2584_v12 = vld [vmem:[%s3276_s1 + $0x160] sm:$0xff]   ;;  %v1900_v20 = vcombine.high %v47_v10, %v51_v11 }
  0x18   :  { %2175 = vmatpush3.bf16.msra.mxu0 %v2562_v22  ;;  %v2583_v8 = vld [vmem:[%s3276_s1 + $0x1a8] sm:$0xff]   ;;  %v2585_v15 = vld [vmem:[%s3276_s1 + $0x120] sm:$0xff]   ;;  %v2588_v22 = vld [vmem:[%s3276_s1 + $0x158] sm:$0xff]  }
  0x19   :  { %2269 = vmatpush3.bf16.msra.mxu1 %v2563_v23  ;;  %2176 = vmatprep.subr.bf16.mxu0 %v2564_v24  ;;  %v48_v13 = vld [vmem:[%s3277_s0 + $0x108] sm:$0xff]  ;;  %v2586_v16 = vld [vmem:[%s3276_s1 + $0x1e0] sm:$0xff]   ;;  %v2589_v23 = vld [vmem:[%s3276_s1 + $0x118] sm:$0xff]  }
  0x1a   :  { %2270 = vmatprep.subr.bf16.mxu1 %v2565_v25  ;;  %v52_v14 = vld [vmem:[%s3277_s0 + $0x128] sm:$0xff]  ;;  %v2587_v17 = vld [vmem:[%s3276_s1 + $0x1a0] sm:$0xff]   ;;  %v2590_v24 = vld [vmem:[%s3276_s1 + $0x1d8] sm:$0xff]  }
  0x1b   :  { %v1902_v21 = vcombine.high %v48_v13, %v52_v14  ;;  %v55_v25 = vld [vmem:[%s3277_s0 + $0x140] sm:$0xff]  ;;  %v1901_v32 = vcombine.low %v48_v13, %v52_v14  ;;  %v2597_v44 = vld [vmem:[%s3276_s1 + $0x108] sm:$0xff]  }
  0x1c   :  { %2177 = vmatpush3.bf16.msra.mxu0 %v2566_v26  ;;  %v59_v26 = vld [vmem:[%s3277_s0 + $0x160] sm:$0xff]  ;;  %v2598_v47 = vld [vmem:[%s3276_s1 + $0x1c8] sm:$0xff]  }
  0x1d   :  { %2271 = vmatpush3.bf16.msra.mxu1 %v2567_v27  ;;  %2178 = vmatprep.subr.bf16.mxu0 %v2568_v28  ;;  %v2591_v27 = vld [vmem:[%s3276_s1 + $0x198] sm:$0xff]   ;;  %v56_v28 = vld [vmem:[%s3277_s0 + $0x148] sm:$0xff]  ;;  %v1908_v33 = vcombine.high %v55_v25, %v59_v26  ;;  %v67_v39 = vld [vmem:[%s3277_s0 + $0x1a0] sm:$0xff] }
  0x1e   :  { %2272 = vmatprep.subr.bf16.mxu1 %v2569_v29  ;;  %v60_v29 = vld [vmem:[%s3277_s0 + $0x168] sm:$0xff]  ;;  %v2601_v55 = vld [vmem:[%s3276_s1 + $0x100] sm:$0xff]  }
  0x1f   :  { %v1909_v45 = vcombine.low %v56_v28, %v60_v29  ;;  %v72_v53 = vld [vmem:[%s3277_s0 + $0x1c8] sm:$0xff]  ;;  %v2602_v56 = vld [vmem:[%s3276_s1 + $0x1c0] sm:$0xff]  }
  0x20   :  { %2179 = vmatpush3.bf16.msra.mxu0 %v2570_v30  ;;  %v1899_v30 = vcombine.low %v47_v10, %v51_v11  ;;  %v2603_v57 = vld [vmem:[%s3276_s1 + $0x180] sm:$0xff]   ;;  %v80_v0 = vld [vmem:[%s3277_s0 + $0x208] sm:$0xff] }
  0x21   :  { %2273 = vmatpush3.bf16.msra.mxu1 %v2571_v31  ;;  %2352 = vmatprep.subr.bf16.mxu0 %v2572_v40  ;;  %v2592_v31 = vld [vmem:[%s3276_s1 + $0x150] sm:$0xff]   ;;  %v2596_v40 = vld [vmem:[%s3276_s1 + $0x148] sm:$0xff]   ;;  %v79_v62 = vld [vmem:[%s3277_s0 + $0x200] sm:$0xff] }
  0x22   :  { %2446 = vmatprep.subr.bf16.mxu1 %v2574_v42  ;;  %v68_v42 = vld [vmem:[%s3277_s0 + $0x1a8] sm:$0xff]  ;;  %v83_v63 = vld [vmem:[%s3277_s0 + $0x220] sm:$0xff] }
  0x23   :  { %1191 = vmatmul.mubr.bf16.vlgmr.msra.gmra.mxu0 %v1867_v35  ;;  %v1910_v35 = vcombine.high %v56_v28, %v60_v29  ;;  %v84_v1 = vld [vmem:[%s3277_s0 + $0x228] sm:$0xff]  ;;  %v1931_v10 = vcombine.low %v79_v62, %v83_v63  ;;  %v95_v14 = vld [vmem:[%s3277_s0 + $0x280] sm:$0xff] }
  0x24   :  { %1328 = vmatmul.mubr.bf16.vlgmr.msra.gmra.mxu1 %v1869_v38  ;;  %2353 = vmatpush3.bf16.msra.mxu0 %v2573_v41  ;;  %v63_v38 = vld [vmem:[%s3277_s0 + $0x180] sm:$0xff]  ;;  %v64_v41 = vld [vmem:[%s3277_s0 + $0x188] sm:$0xff]  ;;  %v1933_v11 = vcombine.low %v80_v0, %v84_v1 }
  0x25   :  { %2447 = vmatpush3.bf16.msra.mxu1 %v2575_v43  ;;  %1198 = vmatprep.mubr.bf16.mxu0 %v1876_v46  ;;  %v1907_v43 = vcombine.low %v55_v25, %v59_v26  ;;  %v1916_v46 = vcombine.high %v63_v38, %v67_v39  ;;  %v1918_v48 = vcombine.high %v64_v41, %v68_v42  ;;  %v108_v25 = vld [vmem:[%s3277_s0 + $0x2e8] sm:$0xff] }
  0x26   :  { %1335 = vmatprep.mubr.bf16.mxu1 %v1878_v49  ;;  %2354 = vmatprep.subr.bf16.mxu0 %v2576_v50  ;;  %v2599_v49 = vld [vmem:[%s3276_s1 + $0x188] sm:$0xff]   ;;  %v71_v50 = vld [vmem:[%s3277_s0 + $0x1c0] sm:$0xff] }
  0x27   :  { %2448 = vmatprep.subr.bf16.mxu1 %v2578_v60 }
  0x28   :  { %2355 = vmatpush3.bf16.msra.mxu0 %v2577_v52  ;;  %v2600_v52 = vld [vmem:[%s3276_s1 + $0x140] sm:$0xff]  }
  0x29   :  { %2449 = vmatpush3.bf16.msra.mxu1 %v2579_v61  ;;  %2356 = vmatprep.subr.bf16.mxu0 %v2580_v2 }
  0x2a   :  { %2450 = vmatprep.subr.bf16.mxu1 %v2582_v5  ;;  %v1934_v5 = vcombine.high %v80_v0, %v84_v1  ;;  %v42_v0 = vld [vmem:[%s3277_s0 + $0xd8] sm:$0xff] }
  0x2b   :  { %1199 = vmatmul.mubr.bf16.gmra.mxu0 %v1875_v51  ;;  %v75_v51 = vld [vmem:[%s3277_s0 + $0x1e0] sm:$0xff]  ;;  %v46_v1 = vld [vmem:[%s3277_s0 + $0xf8] sm:$0xff] }
  0x2c   :  { %1336 = vmatmul.mubr.bf16.gmra.mxu1 %v1877_v54  ;;  %1206 = vmatprep.mubr.bf16.mxu0 %v1884_v58  ;;  %v76_v54 = vld [vmem:[%s3277_s0 + $0x1e8] sm:$0xff]  ;;  %v1915_v58 = vcombine.low %v63_v38, %v67_v39  ;;  %v1924_v60 = vcombine.high %v71_v50, %v75_v51  ;;  %v1923_v2 = vcombine.low %v71_v50, %v75_v51  ;;  %v17_v38 = vld [vmem:[%s3277_s0 + $0x10] sm:$0xff] }
  0x2d   :  { %1343 = vmatprep.mubr.bf16.mxu1 %v1886_v59  ;;  %2357 = vmatpush3.bf16.msra.mxu0 %v2581_v3  ;;  %v1917_v59 = vcombine.low %v64_v41, %v68_v42  ;;  %v1926_v61 = vcombine.high %v72_v53, %v76_v54  ;;  %v1925_v3 = vcombine.low %v72_v53, %v76_v54  ;;  %v21_v39 = vld [vmem:[%s3277_s0 + $0x30] sm:$0xff]  ;;  %v22_v41 = vld [vmem:[%s3277_s0 + $0x38] sm:$0xff] }
  0x2e   :  { %2451 = vmatpush3.bf16.msra.mxu1 %v2583_v8  ;;  %2358 = vmatprep.subr.bf16.mxu0 %v2584_v12  ;;  %v88_v8 = vld [vmem:[%s3277_s0 + $0x248] sm:$0xff]  ;;  %v1871_v50 = vcombine.low %v17_v38, %v21_v39  ;;  %v33_v54 = vld [vmem:[%s3277_s0 + $0x90] sm:$0xff] }
  0x2f   :  { %2452 = vmatprep.subr.bf16.mxu1 %v2586_v16  ;;  %v96_v16 = vld [vmem:[%s3277_s0 + $0x288] sm:$0xff] }
  0x31   :  { %2359 = vmatpush3.bf16.msra.mxu0 %v2585_v15  ;;  %v99_v15 = vld [vmem:[%s3277_s0 + $0x2a0] sm:$0xff] }
  0x32   :  { %2453 = vmatpush3.bf16.msra.mxu1 %v2587_v17  ;;  %2360 = vmatprep.subr.bf16.mxu0 %v2588_v22  ;;  %v100_v17 = vld [vmem:[%s3277_s0 + $0x2a8] sm:$0xff]  ;;  %v103_v22 = vld [vmem:[%s3277_s0 + $0x2c0] sm:$0xff]  ;;  %v1947_v26 = vcombine.low %v95_v14, %v99_v15 }
  0x33   :  { %1207 = vmatmul.mubr.bf16.gmra.mxu0 %v1883_v4  ;;  %2454 = vmatprep.subr.bf16.mxu1 %v2590_v24  ;;  %v1932_v4 = vcombine.high %v79_v62, %v83_v63  ;;  %v104_v24 = vld [vmem:[%s3277_s0 + $0x2c8] sm:$0xff]  ;;  %v41_v62 = vld [vmem:[%s3277_s0 + $0xd0] sm:$0xff] }
  0x34   :  { %1344 = vmatmul.mubr.bf16.gmra.mxu1 %v1885_v6  ;;  %1214 = vmatprep.mubr.bf16.mxu0 %v1892_v7  ;;  %v87_v6 = vld [vmem:[%s3277_s0 + $0x240] sm:$0xff]  ;;  %v1958_v29 = vcombine.high %v104_v24, %v108_v25  ;;  %v45_v63 = vld [vmem:[%s3277_s0 + $0xf0] sm:$0xff] }
  0x35   :  { %1351 = vmatprep.mubr.bf16.mxu1 %v1894_v9  ;;  %2361 = vmatpush3.bf16.msra.mxu0 %v2589_v23  ;;  %v91_v7 = vld [vmem:[%s3277_s0 + $0x260] sm:$0xff]  ;;  %v92_v9 = vld [vmem:[%s3277_s0 + $0x268] sm:$0xff] }
  0x36   :  { %2455 = vmatpush3.bf16.msra.mxu1 %v2591_v27  ;;  %2362 = vmatprep.subr.bf16.mxu0 %v2592_v31  ;;  %v1940_v12 = vcombine.high %v87_v6, %v91_v7  ;;  %v1942_v13 = vcombine.high %v88_v8, %v92_v9  ;;  %v107_v23 = vld [vmem:[%s3277_s0 + $0x2e0] sm:$0xff]  ;;  %v1949_v27 = vcombine.low %v96_v16, %v100_v17 }
  0x37   :  { %2456 = vmatprep.subr.bf16.mxu1 %v2594_v36  ;;  %v1956_v28 = vcombine.high %v103_v22, %v107_v23  ;;  %v115_v31 = vld [vmem:[%s3277_s0 + $0x320] sm:$0xff] }
  0x39   :  { %2363 = vmatpush3.bf16.msra.mxu0 %v2593_v34  ;;  %v1955_v34 = vcombine.low %v103_v22, %v107_v23  ;;  %v65_v22 = vld [vmem:[%s3277_s0 + $0x190] sm:$0xff] }
  0x3a   :  { %2457 = vmatpush3.bf16.msra.mxu1 %v2595_v37  ;;  %2364 = vmatprep.subr.bf16.mxu0 %v2596_v40  ;;  %v18_v40 = vld [vmem:[%s3277_s0 + $0x18] sm:$0xff]  ;;  %v69_v23 = vld [vmem:[%s3277_s0 + $0x1b0] sm:$0xff] }
  0x3b   :  { %1215 = vmatmul.mubr.bf16.gmra.mxu0 %v1891_v18  ;;  %2458 = vmatprep.subr.bf16.mxu1 %v2598_v47  ;;  %v1939_v18 = vcombine.low %v87_v6, %v91_v7  ;;  %v29_v47 = vld [vmem:[%s3277_s0 + $0x70] sm:$0xff]  ;;  %v1873_v51 = vcombine.low %v18_v40, %v22_v41 }
  0x3c   :  { %1352 = vmatmul.mubr.bf16.gmra.mxu1 %v1893_v19  ;;  %1222 = vmatprep.mubr.bf16.mxu0 %v1900_v20  ;;  %v1941_v19 = vcombine.low %v88_v8, %v92_v9  ;;  %v1948_v20 = vcombine.high %v95_v14, %v99_v15  ;;  %v49_v6 = vld [vmem:[%s3277_s0 + $0x110] sm:$0xff]  ;;  %v50_v8 = vld [vmem:[%s3277_s0 + $0x118] sm:$0xff] }
  0x3d   :  { %1359 = vmatprep.mubr.bf16.mxu1 %v1902_v21  ;;  %2365 = vmatpush3.bf16.msra.mxu0 %v2597_v44  ;;  %v1950_v21 = vcombine.high %v96_v16, %v100_v17  ;;  %v1872_v44 = vcombine.high %v17_v38, %v21_v39  ;;  %v53_v7 = vld [vmem:[%s3277_s0 + $0x130] sm:$0xff]  ;;  %v54_v9 = vld [vmem:[%s3277_s0 + $0x138] sm:$0xff] }
  0x3e   :  { %2459 = vmatpush3.bf16.msra.mxu1 %v2599_v49  ;;  %2366 = vmatprep.subr.bf16.mxu0 %v2600_v52  ;;  %v30_v49 = vld [vmem:[%s3277_s0 + $0x78] sm:$0xff]  ;;  %v57_v14 = vld [vmem:[%s3277_s0 + $0x150] sm:$0xff] }
  0x3f   :  { %2460 = vmatprep.subr.bf16.mxu1 %v2602_v56  ;;  %v34_v56 = vld [vmem:[%s3277_s0 + $0x98] sm:$0xff]  ;;  %v61_v15 = vld [vmem:[%s3277_s0 + $0x170] sm:$0xff] }
  0x40   :  { %v58_v16 = vld [vmem:[%s3277_s0 + $0x158] sm:$0xff]  ;;  %v81_v38 = vld [vmem:[%s3277_s0 + $0x210] sm:$0xff] }
  0x41   :  { %2367 = vmatpush3.bf16.msra.mxu0 %v2601_v55  ;;  %v37_v55 = vld [vmem:[%s3277_s0 + $0xb0] sm:$0xff]  ;;  %v62_v17 = vld [vmem:[%s3277_s0 + $0x178] sm:$0xff] }
  0x42   :  { %2461 = vmatpush3.bf16.msra.mxu1 %v2603_v57  ;;  %v38_v57 = vld [vmem:[%s3277_s0 + $0xb8] sm:$0xff]  ;;  %v85_v39 = vld [vmem:[%s3277_s0 + $0x230] sm:$0xff] }
  0x43   :  { %1223 = vmatmul.mubr.bf16.gmra.mxu0 %v1899_v30  ;;  %v111_v30 = vld [vmem:[%s3277_s0 + $0x300] sm:$0xff] }
  0x44   :  { %1360 = vmatmul.mubr.bf16.gmra.mxu1 %v1901_v32  ;;  %1230 = vmatprep.mubr.bf16.mxu0 %v1908_v33  ;;  %v112_v32 = vld [vmem:[%s3277_s0 + $0x308] sm:$0xff]  ;;  %v1964_v36 = vcombine.high %v111_v30, %v115_v31  ;;  %v1963_v42 = vcombine.low %v111_v30, %v115_v31  ;;  %v73_v30 = vld [vmem:[%s3277_s0 + $0x1d0] sm:$0xff] }
  0x45   :  { %1367 = vmatprep.mubr.bf16.mxu1 %v1910_v35  ;;  %v116_v33 = vld [vmem:[%s3277_s0 + $0x328] sm:$0xff]  ;;  %v1957_v35 = vcombine.low %v104_v24, %v108_v25  ;;  %v66_v24 = vld [vmem:[%s3277_s0 + $0x198] sm:$0xff]  ;;  %v77_v31 = vld [vmem:[%s3277_s0 + $0x1f0] sm:$0xff] }
  0x46   :  { %v1966_v37 = vcombine.high %v112_v32, %v116_v33  ;;  %v70_v25 = vld [vmem:[%s3277_s0 + $0x1b8] sm:$0xff] }
  0x4b   :  { %1231 = vmatmul.mubr.bf16.gmra.mxu0 %v1907_v43  ;;  %v1965_v43 = vcombine.low %v112_v32, %v116_v33  ;;  %v74_v32 = vld [vmem:[%s3277_s0 + $0x1d8] sm:$0xff] }
  0x4c   :  { %1368 = vmatmul.mubr.bf16.gmra.mxu1 %v1909_v45  ;;  %1238 = vmatprep.mubr.bf16.mxu0 %v1916_v46  ;;  %v1874_v45 = vcombine.high %v18_v40, %v22_v41  ;;  %v25_v46 = vld [vmem:[%s3277_s0 + $0x50] sm:$0xff]  ;;  %v78_v33 = vld [vmem:[%s3277_s0 + $0x1f8] sm:$0xff] }
  0x4d   :  { %1375 = vmatprep.mubr.bf16.mxu1 %v1918_v48  ;;  %v26_v48 = vld [vmem:[%s3277_s0 + $0x58] sm:$0xff]  ;;  %v1880_v52 = vcombine.high %v25_v46, %v29_v47 }
  0x4e   :  { %v1882_v53 = vcombine.high %v26_v48, %v30_v49  ;;  %v82_v40 = vld [vmem:[%s3277_s0 + $0x218] sm:$0xff] }
  0x4f   :  { %v86_v41 = vld [vmem:[%s3277_s0 + $0x238] sm:$0xff] }
  0x53   :  { %1239 = vmatmul.mubr.bf16.gmra.mxu0 %v1915_v58  ;;  %v1879_v58 = vcombine.low %v25_v46, %v29_v47  ;;  %v89_v46 = vld [vmem:[%s3277_s0 + $0x250] sm:$0xff] }
  0x54   :  { %1376 = vmatmul.mubr.bf16.gmra.mxu1 %v1917_v59  ;;  %1246 = vmatprep.mubr.bf16.mxu0 %v1924_v60  ;;  %v1881_v59 = vcombine.low %v26_v48, %v30_v49  ;;  %v1888_v60 = vcombine.high %v33_v54, %v37_v55  ;;  %v93_v47 = vld [vmem:[%s3277_s0 + $0x270] sm:$0xff]  ;;  %v90_v48 = vld [vmem:[%s3277_s0 + $0x258] sm:$0xff] }
  0x55   :  { %1383 = vmatprep.mubr.bf16.mxu1 %v1926_v61  ;;  %v1890_v61 = vcombine.high %v34_v56, %v38_v57  ;;  %v94_v49 = vld [vmem:[%s3277_s0 + $0x278] sm:$0xff] }
  0x5b   :  { %1247 = vmatmul.mubr.bf16.gmra.mxu0 %v1923_v2  ;;  %v1887_v2 = vcombine.low %v33_v54, %v37_v55  ;;  %v97_v54 = vld [vmem:[%s3277_s0 + $0x290] sm:$0xff] }
  0x5c   :  { %1384 = vmatmul.mubr.bf16.gmra.mxu1 %v1925_v3  ;;  %1254 = vmatprep.mubr.bf16.mxu0 %v1932_v4  ;;  %v1889_v3 = vcombine.low %v34_v56, %v38_v57  ;;  %v1896_v4 = vcombine.high %v41_v62, %v45_v63  ;;  %v101_v55 = vld [vmem:[%s3277_s0 + $0x2b0] sm:$0xff]  ;;  %v98_v56 = vld [vmem:[%s3277_s0 + $0x298] sm:$0xff] }
  0x5d   :  { %1391 = vmatprep.mubr.bf16.mxu1 %v1934_v5  ;;  %v1898_v5 = vcombine.high %v42_v0, %v46_v1  ;;  %v102_v57 = vld [vmem:[%s3277_s0 + $0x2b8] sm:$0xff] }
  0x63   :  { %1255 = vmatmul.mubr.bf16.gmra.mxu0 %v1931_v10  ;;  %v1895_v10 = vcombine.low %v41_v62, %v45_v63  ;;  %v105_v62 = vld [vmem:[%s3277_s0 + $0x2d0] sm:$0xff] }
  0x64   :  { %1392 = vmatmul.mubr.bf16.gmra.mxu1 %v1933_v11  ;;  %1262 = vmatprep.mubr.bf16.mxu0 %v1940_v12  ;;  %v1897_v11 = vcombine.low %v42_v0, %v46_v1  ;;  %v1904_v12 = vcombine.high %v49_v6, %v53_v7  ;;  %v109_v63 = vld [vmem:[%s3277_s0 + $0x2f0] sm:$0xff]  ;;  %v106_v0 = vld [vmem:[%s3277_s0 + $0x2d8] sm:$0xff] }
  0x65   :  { %1399 = vmatprep.mubr.bf16.mxu1 %v1942_v13  ;;  %v1906_v13 = vcombine.high %v50_v8, %v54_v9  ;;  %v110_v1 = vld [vmem:[%s3277_s0 + $0x2f8] sm:$0xff] }
  0x6b   :  { %1263 = vmatmul.mubr.bf16.gmra.mxu0 %v1939_v18  ;;  %v1903_v18 = vcombine.low %v49_v6, %v53_v7  ;;  %v113_v6 = vld [vmem:[%s3277_s0 + $0x310] sm:$0xff] }
  0x6c   :  { %1400 = vmatmul.mubr.bf16.gmra.mxu1 %v1941_v19  ;;  %1270 = vmatprep.mubr.bf16.mxu0 %v1948_v20  ;;  %v1905_v19 = vcombine.low %v50_v8, %v54_v9  ;;  %v1912_v20 = vcombine.high %v57_v14, %v61_v15  ;;  %v117_v7 = vld [vmem:[%s3277_s0 + $0x330] sm:$0xff]  ;;  %v114_v8 = vld [vmem:[%s3277_s0 + $0x318] sm:$0xff] }
  0x6d   :  { %1407 = vmatprep.mubr.bf16.mxu1 %v1950_v21  ;;  %v1914_v21 = vcombine.high %v58_v16, %v62_v17  ;;  %v118_v9 = vld [vmem:[%s3277_s0 + $0x338] sm:$0xff] }
  0x73   :  { %1271 = vmatmul.mubr.bf16.gmra.mxu0 %v1947_v26  ;;  %v1911_v26 = vcombine.low %v57_v14, %v61_v15 }
  0x74   :  { %1408 = vmatmul.mubr.bf16.gmra.mxu1 %v1949_v27  ;;  %1278 = vmatprep.mubr.bf16.mxu0 %v1956_v28  ;;  %v1913_v27 = vcombine.low %v58_v16, %v62_v17  ;;  %v1920_v28 = vcombine.high %v65_v22, %v69_v23  ;;  %v3131_v16 = vld [vmem:[%s3278_s2] ss:$0 sm:$0xff] }
  0x75   :  { %1415 = vmatprep.mubr.bf16.mxu1 %v1958_v29  ;;  %v1922_v29 = vcombine.high %v66_v24, %v70_v25 }
  0x7b   :  { %1279 = vmatmul.mubr.bf16.gmra.mxu0 %v1955_v34  ;;  %v1919_v34 = vcombine.low %v65_v22, %v69_v23  ;;  %v1967_v22 = vcombine.low %v113_v6, %v117_v7 }
  0x7c   :  { %1416 = vmatmul.mubr.bf16.gmra.mxu1 %v1957_v35  ;;  %1286 = vmatprep.mubr.bf16.mxu0 %v1964_v36  ;;  %v1921_v35 = vcombine.low %v66_v24, %v70_v25  ;;  %v1928_v36 = vcombine.high %v73_v30, %v77_v31  ;;  %v1969_v25 = vcombine.low %v114_v8, %v118_v9 }
  0x7d   :  { %1423 = vmatprep.mubr.bf16.mxu1 %v1966_v37  ;;  %v1930_v37 = vcombine.high %v74_v32, %v78_v33 }
  0x83   :  { %1287 = vmatmul.mubr.bf16.gmra.mxu0 %v1963_v42  ;;  %v1927_v42 = vcombine.low %v73_v30, %v77_v31 }
  0x84   :  { %1424 = vmatmul.mubr.bf16.gmra.mxu1 %v1965_v43  ;;  %1464 = vmatprep.mubr.bf16.mxu0 %v1872_v44  ;;  %v1929_v43 = vcombine.low %v74_v32, %v78_v33  ;;  %v1936_v44 = vcombine.high %v81_v38, %v85_v39 }
  0x85   :  { %1601 = vmatprep.mubr.bf16.mxu1 %v1874_v45  ;;  %v1938_v45 = vcombine.high %v82_v40, %v86_v41 }
  0x8b   :  { %1465 = vmatmul.mubr.bf16.vlgmr.msra.gmra.mxu0 %v1871_v50  ;;  %v1935_v50 = vcombine.low %v81_v38, %v85_v39 }
  0x8c   :  { %1602 = vmatmul.mubr.bf16.vlgmr.msra.gmra.mxu1 %v1873_v51  ;;  %1472 = vmatprep.mubr.bf16.mxu0 %v1880_v52  ;;  %v1937_v51 = vcombine.low %v82_v40, %v86_v41  ;;  %v1944_v52 = vcombine.high %v89_v46, %v93_v47 }
  0x8d   :  { %1609 = vmatprep.mubr.bf16.mxu1 %v1882_v53  ;;  %v1946_v53 = vcombine.high %v90_v48, %v94_v49 }
  0x93   :  { %1473 = vmatmul.mubr.bf16.gmra.mxu0 %v1879_v58  ;;  %v1943_v58 = vcombine.low %v89_v46, %v93_v47 }
  0x94   :  { %1610 = vmatmul.mubr.bf16.gmra.mxu1 %v1881_v59  ;;  %1480 = vmatprep.mubr.bf16.mxu0 %v1888_v60  ;;  %v1945_v59 = vcombine.low %v90_v48, %v94_v49  ;;  %v1952_v60 = vcombine.high %v97_v54, %v101_v55 }
  0x95   :  { %1617 = vmatprep.mubr.bf16.mxu1 %v1890_v61  ;;  %v1954_v61 = vcombine.high %v98_v56, %v102_v57 }
  0x9b   :  { %1481 = vmatmul.mubr.bf16.gmra.mxu0 %v1887_v2  ;;  %v1951_v2 = vcombine.low %v97_v54, %v101_v55 }
  0x9c   :  { %1618 = vmatmul.mubr.bf16.gmra.mxu1 %v1889_v3  ;;  %1488 = vmatprep.mubr.bf16.mxu0 %v1896_v4  ;;  %v1953_v3 = vcombine.low %v98_v56, %v102_v57  ;;  %v1960_v4 = vcombine.high %v105_v62, %v109_v63 }
  0x9d   :  { %1625 = vmatprep.mubr.bf16.mxu1 %v1898_v5  ;;  %v1962_v5 = vcombine.high %v106_v0, %v110_v1 }
  0xa3   :  { %1489 = vmatmul.mubr.bf16.gmra.mxu0 %v1895_v10  ;;  %v1959_v10 = vcombine.low %v105_v62, %v109_v63 }
  0xa4   :  { %1626 = vmatmul.mubr.bf16.gmra.mxu1 %v1897_v11  ;;  %1496 = vmatprep.mubr.bf16.mxu0 %v1904_v12  ;;  %v1961_v11 = vcombine.low %v106_v0, %v110_v1  ;;  %v1968_v12 = vcombine.high %v113_v6, %v117_v7 }
  0xa5   :  { %1633 = vmatprep.mubr.bf16.mxu1 %v1906_v13  ;;  %v1970_v13 = vcombine.high %v114_v8, %v118_v9 }
  0xab   :  { %1497 = vmatmul.mubr.bf16.gmra.mxu0 %v1903_v18 }
  0xac   :  { %1634 = vmatmul.mubr.bf16.gmra.mxu1 %v1905_v19  ;;  %1504 = vmatprep.mubr.bf16.mxu0 %v1912_v20 }
  0xad   :  { %1641 = vmatprep.mubr.bf16.mxu1 %v1914_v21 }
  0xb3   :  { %1505 = vmatmul.mubr.bf16.gmra.mxu0 %v1911_v26 }
  0xb4   :  { %1642 = vmatmul.mubr.bf16.gmra.mxu1 %v1913_v27  ;;  %1512 = vmatprep.mubr.bf16.mxu0 %v1920_v28 }
  0xb5   :  { %1649 = vmatprep.mubr.bf16.mxu1 %v1922_v29 }
  0xbb   :  { %1513 = vmatmul.mubr.bf16.gmra.mxu0 %v1919_v34 }
  0xbc   :  { %1650 = vmatmul.mubr.bf16.gmra.mxu1 %v1921_v35  ;;  %1520 = vmatprep.mubr.bf16.mxu0 %v1928_v36 }
  0xbd   :  { %1657 = vmatprep.mubr.bf16.mxu1 %v1930_v37 }
  0xc3   :  { %1521 = vmatmul.mubr.bf16.gmra.mxu0 %v1927_v42 }
  0xc4   :  { %1658 = vmatmul.mubr.bf16.gmra.mxu1 %v1929_v43  ;;  %1528 = vmatprep.mubr.bf16.mxu0 %v1936_v44 }
  0xc5   :  { %1665 = vmatprep.mubr.bf16.mxu1 %v1938_v45 }
  0xcb   :  { %1529 = vmatmul.mubr.bf16.gmra.mxu0 %v1935_v50 }
  0xcc   :  { %1666 = vmatmul.mubr.bf16.gmra.mxu1 %v1937_v51  ;;  %1536 = vmatprep.mubr.bf16.mxu0 %v1944_v52 }
  0xcd   :  { %1673 = vmatprep.mubr.bf16.mxu1 %v1946_v53 }
  0xd3   :  { %1537 = vmatmul.mubr.bf16.gmra.mxu0 %v1943_v58 }
  0xd4   :  { %1674 = vmatmul.mubr.bf16.gmra.mxu1 %v1945_v59  ;;  %1544 = vmatprep.mubr.bf16.mxu0 %v1952_v60 }
  0xd5   :  { %1681 = vmatprep.mubr.bf16.mxu1 %v1954_v61 }
  0xdb   :  { %1545 = vmatmul.mubr.bf16.gmra.mxu0 %v1951_v2 }
  0xdc   :  { %1682 = vmatmul.mubr.bf16.gmra.mxu1 %v1953_v3  ;;  %1552 = vmatprep.mubr.bf16.mxu0 %v1960_v4 }
  0xdd   :  { %1689 = vmatprep.mubr.bf16.mxu1 %v1962_v5 }
  0xe3   :  { %v2180_v14 = vpop.f32.mrf.mxu0  ;;  %1553 = vmatmul.mubr.bf16.gmra.mxu0 %v1959_v10 }
  0xe4   :  { %v2274_v15 = vpop.f32.mrf.mxu1  ;;  %1690 = vmatmul.mubr.bf16.gmra.mxu1 %v1961_v11  ;;  %1560 = vmatprep.mubr.bf16.mxu0 %v1968_v12 }
  0xe5   :  { %v2181_v17 = vpop.f32.mrf.mxu0  ;;  %1697 = vmatprep.mubr.bf16.mxu1 %v1970_v13 }
  0xe6   :  { %v2182_v18 = vadd.f32 %v2181_v17, %v2180_v14  ;;  %v2275_v19 = vpop.f32.mrf.mxu1 }
  0xe7   :  { %v2276_v20 = vadd.f32 %v2275_v19, %v2274_v15  ;;  %v2183_v21 = vpop.f32.mrf.mxu0 }
  0xe8   :  { %v1193_v23 = vadd.f32 %v2182_v18, %v3131_v16  ;;  %v2277_v24 = vpop.f32.mrf.mxu1 }
  0xe9   :  { %v2184_v26 = vpop.f32.mrf.mxu0 }
  0xea   :  { %v3134_v27 = vadd.f32 %v2276_v20, %v1193_v23  ;;  %v2185_v28 = vadd.f32 %v2184_v26, %v2183_v21  ;;  %v2278_v29 = vpop.f32.mrf.mxu1 }
  0xeb   :  { %v2279_v30 = vadd.f32 %v2278_v29, %v2277_v24  ;;  %v2186_v31 = vpop.f32.mrf.mxu0  ;;  %1561 = vmatmul.mubr.bf16.gmra.mxu0 %v1967_v22 }
  0xec   :  { %v1196_v32 = vadd.f32 %v2185_v28, %v3131_v16  ;;  %v2280_v33 = vpop.f32.mrf.mxu1  ;;  %1698 = vmatmul.mubr.bf16.gmra.mxu1 %v1969_v25 }
  0xed   :  { %v2187_v34 = vpop.f32.mrf.mxu0 }
  0xee   :  { %v3137_v35 = vadd.f32 %v2279_v30, %v1196_v32  ;;  %v2188_v36 = vadd.f32 %v2187_v34, %v2186_v31  ;;  %v2281_v37 = vpop.f32.mrf.mxu1 }
  0xef   :  { %v2282_v38 = vadd.f32 %v2281_v37, %v2280_v33  ;;  %v2189_v39 = vpop.f32.mrf.mxu0 }
  0xf0   :  { %v1201_v40 = vadd.f32 %v2188_v36, %v3131_v16  ;;  %v2283_v41 = vpop.f32.mrf.mxu1 }
  0xf1   :  { %v2190_v42 = vpop.f32.mrf.mxu0 }
  0xf2   :  { %v3140_v43 = vadd.f32 %v2282_v38, %v1201_v40  ;;  %v2191_v44 = vadd.f32 %v2190_v42, %v2189_v39  ;;  %v2284_v45 = vpop.f32.mrf.mxu1 }
  0xf3   :  { %v2285_v46 = vadd.f32 %v2284_v45, %v2283_v41  ;;  %v2192_v47 = vpop.f32.mrf.mxu0 }
  0xf4   :  { %v1204_v48 = vadd.f32 %v2191_v44, %v3131_v16  ;;  %v2286_v49 = vpop.f32.mrf.mxu1 }
  0xf5   :  { %v2193_v50 = vpop.f32.mrf.mxu0 }
  0xf6   :  { %v3143_v51 = vadd.f32 %v2285_v46, %v1204_v48  ;;  %v2194_v52 = vadd.f32 %v2193_v50, %v2192_v47  ;;  %v2287_v53 = vpop.f32.mrf.mxu1 }
  0xf7   :  { %v2288_v54 = vadd.f32 %v2287_v53, %v2286_v49  ;;  %v2195_v55 = vpop.f32.mrf.mxu0 }
  0xf8   :  { %v1209_v56 = vadd.f32 %v2194_v52, %v3131_v16  ;;  %v2289_v57 = vpop.f32.mrf.mxu1 }
  0xf9   :  { %v2196_v58 = vpop.f32.mrf.mxu0 }
  0xfa   :  { %v3146_v59 = vadd.f32 %v2288_v54, %v1209_v56  ;;  %v2197_v60 = vadd.f32 %v2196_v58, %v2195_v55  ;;  %v2290_v61 = vpop.f32.mrf.mxu1 }
  0xfb   :  { %v2291_v62 = vadd.f32 %v2290_v61, %v2289_v57  ;;  %v2198_v63 = vpop.f32.mrf.mxu0 }
  0xfc   :  { %v1212_v0 = vadd.f32 %v2197_v60, %v3131_v16  ;;  %v2292_v1 = vpop.f32.mrf.mxu1 }
  0xfd   :  { %v2199_v2 = vpop.f32.mrf.mxu0 }
  0xfe   :  { %v3149_v3 = vadd.f32 %v2291_v62, %v1212_v0  ;;  %v2200_v4 = vadd.f32 %v2199_v2, %v2198_v63  ;;  %v2293_v5 = vpop.f32.mrf.mxu1 }
  0xff   :  { %v2294_v6 = vadd.f32 %v2293_v5, %v2292_v1  ;;  %v2201_v7 = vpop.f32.mrf.mxu0 }
 0x100   :  { %v1217_v8 = vadd.f32 %v2200_v4, %v3131_v16  ;;  %v2295_v9 = vpop.f32.mrf.mxu1 }
 0x101   :  { %v2202_v10 = vpop.f32.mrf.mxu0 }
 0x102   :  { %v3152_v11 = vadd.f32 %v2294_v6, %v1217_v8  ;;  %v2203_v12 = vadd.f32 %v2202_v10, %v2201_v7  ;;  %v2296_v13 = vpop.f32.mrf.mxu1 }
 0x103   :  { %v2297_v14 = vadd.f32 %v2296_v13, %v2295_v9  ;;  %v2204_v15 = vpop.f32.mrf.mxu0 }
 0x104   :  { %v1220_v17 = vadd.f32 %v2203_v12, %v3131_v16  ;;  %v2298_v18 = vpop.f32.mrf.mxu1 }
 0x105   :  { %v2205_v19 = vpop.f32.mrf.mxu0 }
 0x106   :  { %v3155_v20 = vadd.f32 %v2297_v14, %v1220_v17  ;;  %v2206_v21 = vadd.f32 %v2205_v19, %v2204_v15  ;;  %v2299_v22 = vpop.f32.mrf.mxu1 }
 0x107   :  { %v2300_v23 = vadd.f32 %v2299_v22, %v2298_v18  ;;  %v2207_v24 = vpop.f32.mrf.mxu0 }
 0x108   :  { %v1225_v25 = vadd.f32 %v2206_v21, %v3131_v16  ;;  %v2301_v26 = vpop.f32.mrf.mxu1 }
 0x109   :  { %v2208_v28 = vpop.f32.mrf.mxu0 }
 0x10a   :  { %v3158_v29 = vadd.f32 %v2300_v23, %v1225_v25  ;;  %v2209_v30 = vadd.f32 %v2208_v28, %v2207_v24  ;;  %v2302_v31 = vpop.f32.mrf.mxu1 }
 0x10b   :  { %v2303_v32 = vadd.f32 %v2302_v31, %v2301_v26  ;;  %v2210_v33 = vpop.f32.mrf.mxu0 }
 0x10c   :  { %v1228_v34 = vadd.f32 %v2209_v30, %v3131_v16  ;;  %v2304_v36 = vpop.f32.mrf.mxu1 }
 0x10d   :  { %v2211_v37 = vpop.f32.mrf.mxu0 }
 0x10e   :  { %v3161_v38 = vadd.f32 %v2303_v32, %v1228_v34  ;;  %v2212_v39 = vadd.f32 %v2211_v37, %v2210_v33  ;;  %v2305_v40 = vpop.f32.mrf.mxu1 }
 0x10f   :  { %v2306_v41 = vadd.f32 %v2305_v40, %v2304_v36  ;;  %v2213_v42 = vpop.f32.mrf.mxu0 }
 0x110   :  { %v1233_v44 = vadd.f32 %v2212_v39, %v3131_v16  ;;  %v2307_v45 = vpop.f32.mrf.mxu1 }
 0x111   :  { %v2214_v46 = vpop.f32.mrf.mxu0 }
 0x112   :  { %v3164_v47 = vadd.f32 %v2306_v41, %v1233_v44  ;;  %v2215_v48 = vadd.f32 %v2214_v46, %v2213_v42  ;;  %v2308_v49 = vpop.f32.mrf.mxu1 }
 0x113   :  { %v2309_v50 = vadd.f32 %v2308_v49, %v2307_v45  ;;  %v2216_v52 = vpop.f32.mrf.mxu0 }
 0x114   :  { %v1236_v53 = vadd.f32 %v2215_v48, %v3131_v16  ;;  %v2310_v54 = vpop.f32.mrf.mxu1 }
 0x115   :  { %v2217_v55 = vpop.f32.mrf.mxu0 }
 0x116   :  { %v3167_v56 = vadd.f32 %v2309_v50, %v1236_v53  ;;  %v2218_v57 = vadd.f32 %v2217_v55, %v2216_v52  ;;  %v2311_v58 = vpop.f32.mrf.mxu1 }
 0x117   :  { %v2312_v60 = vadd.f32 %v2311_v58, %v2310_v54  ;;  %v2219_v61 = vpop.f32.mrf.mxu0 }
 0x118   :  { %v1241_v62 = vadd.f32 %v2218_v57, %v3131_v16  ;;  %v2313_v63 = vpop.f32.mrf.mxu1 }
 0x119   :  { %v2220_v0 = vpop.f32.mrf.mxu0 }
 0x11a   :  { %v3170_v1 = vadd.f32 %v2312_v60, %v1241_v62  ;;  %v2221_v2 = vadd.f32 %v2220_v0, %v2219_v61  ;;  %v2314_v4 = vpop.f32.mrf.mxu1 }
 0x11b   :  { %v2315_v5 = vadd.f32 %v2314_v4, %v2313_v63  ;;  %v2222_v6 = vpop.f32.mrf.mxu0 }
 0x11c   :  { %v1244_v7 = vadd.f32 %v2221_v2, %v3131_v16  ;;  %v2316_v8 = vpop.f32.mrf.mxu1 }
 0x11d   :  { %v2223_v9 = vpop.f32.mrf.mxu0 }
 0x11e   :  { %v3173_v10 = vadd.f32 %v2315_v5, %v1244_v7  ;;  %v2224_v12 = vadd.f32 %v2223_v9, %v2222_v6  ;;  %v2317_v13 = vpop.f32.mrf.mxu1 }
 0x11f   :  { %v2318_v14 = vadd.f32 %v2317_v13, %v2316_v8  ;;  %v2225_v15 = vpop.f32.mrf.mxu0 }
 0x120   :  { %v1249_v17 = vadd.f32 %v2224_v12, %v3131_v16  ;;  %v2319_v18 = vpop.f32.mrf.mxu1 }
 0x121   :  { %v2226_v19 = vpop.f32.mrf.mxu0 }
 0x122   :  { %v3176_v21 = vadd.f32 %v2318_v14, %v1249_v17  ;;  %v2227_v22 = vadd.f32 %v2226_v19, %v2225_v15  ;;  %v2320_v23 = vpop.f32.mrf.mxu1 }
 0x123   :  { %v2321_v24 = vadd.f32 %v2320_v23, %v2319_v18  ;;  %v2228_v25 = vpop.f32.mrf.mxu0 }
 0x124   :  { %v1252_v26 = vadd.f32 %v2227_v22, %v3131_v16  ;;  %v2322_v28 = vpop.f32.mrf.mxu1 }
 0x125   :  { %v2229_v30 = vpop.f32.mrf.mxu0 }
 0x126   :  { %v3179_v31 = vadd.f32 %v2321_v24, %v1252_v26  ;;  %v2230_v32 = vadd.f32 %v2229_v30, %v2228_v25  ;;  %v2323_v33 = vpop.f32.mrf.mxu1 }
 0x127   :  { %v2324_v34 = vadd.f32 %v2323_v33, %v2322_v28  ;;  %v2231_v36 = vpop.f32.mrf.mxu0 }
 0x128   :  { %v1257_v37 = vadd.f32 %v2230_v32, %v3131_v16  ;;  %v2325_v39 = vpop.f32.mrf.mxu1 }
 0x129   :  { %v2232_v40 = vpop.f32.mrf.mxu0 }
 0x12a   :  { %v3182_v41 = vadd.f32 %v2324_v34, %v1257_v37  ;;  %v2233_v42 = vadd.f32 %v2232_v40, %v2231_v36  ;;  %v2326_v44 = vpop.f32.mrf.mxu1 }
 0x12b   :  { %v2327_v45 = vadd.f32 %v2326_v44, %v2325_v39  ;;  %v2234_v46 = vpop.f32.mrf.mxu0 }
 0x12c   :  { %v1260_v48 = vadd.f32 %v2233_v42, %v3131_v16  ;;  %v2328_v49 = vpop.f32.mrf.mxu1 }
 0x12d   :  { %v2235_v50 = vpop.f32.mrf.mxu0 }
 0x12e   :  { %v3185_v52 = vadd.f32 %v2327_v45, %v1260_v48  ;;  %v2236_v53 = vadd.f32 %v2235_v50, %v2234_v46  ;;  %v2329_v54 = vpop.f32.mrf.mxu1 }
 0x12f   :  { %v2330_v55 = vadd.f32 %v2329_v54, %v2328_v49  ;;  %v2237_v57 = vpop.f32.mrf.mxu0 }
 0x130   :  { %v1265_v58 = vadd.f32 %v2236_v53, %v3131_v16  ;;  %v2331_v60 = vpop.f32.mrf.mxu1 }
 0x131   :  { %v2238_v61 = vpop.f32.mrf.mxu0 }
 0x132   :  { %v3188_v62 = vadd.f32 %v2330_v55, %v1265_v58  ;;  %v2239_v63 = vadd.f32 %v2238_v61, %v2237_v57  ;;  %v2332_v0 = vpop.f32.mrf.mxu1 }
 0x133   :  { %v2333_v2 = vadd.f32 %v2332_v0, %v2331_v60  ;;  %v2240_v4 = vpop.f32.mrf.mxu0 }
 0x134   :  { %v1268_v5 = vadd.f32 %v2239_v63, %v3131_v16  ;;  %v2334_v6 = vpop.f32.mrf.mxu1 }
 0x135   :  { %v2241_v7 = vpop.f32.mrf.mxu0 }
 0x136   :  { %v3191_v8 = vadd.f32 %v2333_v2, %v1268_v5  ;;  %v2242_v9 = vadd.f32 %v2241_v7, %v2240_v4  ;;  %v2335_v12 = vpop.f32.mrf.mxu1 }
 0x137   :  { %v2336_v13 = vadd.f32 %v2335_v12, %v2334_v6  ;;  %v2243_v14 = vpop.f32.mrf.mxu0 }
 0x138   :  { %v1273_v15 = vadd.f32 %v2242_v9, %v3131_v16  ;;  %v2337_v17 = vpop.f32.mrf.mxu1 }
 0x139   :  { %v2244_v18 = vpop.f32.mrf.mxu0 }
 0x13a   :  { %v3194_v19 = vadd.f32 %v2336_v13, %v1273_v15  ;;  %v2245_v22 = vadd.f32 %v2244_v18, %v2243_v14  ;;  %v2338_v23 = vpop.f32.mrf.mxu1 }
 0x13b   :  { %v2339_v24 = vadd.f32 %v2338_v23, %v2337_v17  ;;  %v2246_v25 = vpop.f32.mrf.mxu0 }
 0x13c   :  { %v1276_v26 = vadd.f32 %v2245_v22, %v3131_v16  ;;  %v2340_v28 = vpop.f32.mrf.mxu1 }
 0x13d   :  { %v2247_v30 = vpop.f32.mrf.mxu0 }
 0x13e   :  { %v3197_v32 = vadd.f32 %v2339_v24, %v1276_v26  ;;  %v2248_v33 = vadd.f32 %v2247_v30, %v2246_v25  ;;  %v2341_v34 = vpop.f32.mrf.mxu1 }
 0x13f   :  { %v2342_v36 = vadd.f32 %v2341_v34, %v2340_v28  ;;  %v2249_v37 = vpop.f32.mrf.mxu0 }
 0x140   :  { %v1281_v39 = vadd.f32 %v2248_v33, %v3131_v16  ;;  %v2343_v40 = vpop.f32.mrf.mxu1 }
 0x141   :  { %v2250_v42 = vpop.f32.mrf.mxu0 }
 0x142   :  { %v3200_v44 = vadd.f32 %v2342_v36, %v1281_v39  ;;  %v2251_v45 = vadd.f32 %v2250_v42, %v2249_v37  ;;  %v2344_v46 = vpop.f32.mrf.mxu1 }
 0x143   :  { %v2345_v48 = vadd.f32 %v2344_v46, %v2343_v40  ;;  %v2252_v49 = vpop.f32.mrf.mxu0 }
 0x144   :  { %v1284_v50 = vadd.f32 %v2251_v45, %v3131_v16  ;;  %v2346_v53 = vpop.f32.mrf.mxu1 }
 0x145   :  { %v2253_v54 = vpop.f32.mrf.mxu0 }
 0x146   :  { %v3203_v55 = vadd.f32 %v2345_v48, %v1284_v50  ;;  %v2254_v57 = vadd.f32 %v2253_v54, %v2252_v49  ;;  %v2347_v58 = vpop.f32.mrf.mxu1 }
 0x147   :  { %v2348_v60 = vadd.f32 %v2347_v58, %v2346_v53  ;;  %v2255_v61 = vpop.f32.mrf.mxu0 }
 0x148   :  { %v1289_v63 = vadd.f32 %v2254_v57, %v3131_v16  ;;  %v2349_v0 = vpop.f32.mrf.mxu1 }
 0x149   :  { %v2256_v2 = vpop.f32.mrf.mxu0 }
 0x14a   :  { %v3206_v4 = vadd.f32 %v2348_v60, %v1289_v63  ;;  %v2257_v5 = vadd.f32 %v2256_v2, %v2255_v61  ;;  %v2350_v6 = vpop.f32.mrf.mxu1 }
 0x14b   :  { %v2351_v7 = vadd.f32 %v2350_v6, %v2349_v0  ;;  %v2368_v9 = vpop.f32.mrf.mxu0 }
 0x14c   :  { %v1292_v12 = vadd.f32 %v2257_v5, %v3131_v16  ;;  %v2462_v13 = vpop.f32.mrf.mxu1 }
 0x14d   :  { %v2369_v14 = vpop.f32.mrf.mxu0 }
 0x14e   :  { %v3209_v15 = vadd.f32 %v2351_v7, %v1292_v12  ;;  %v2370_v17 = vadd.f32 %v2369_v14, %v2368_v9  ;;  %v2463_v18 = vpop.f32.mrf.mxu1 }
 0x14f   :  { %v2371_v22 = vpop.f32.mrf.mxu0  ;;  %v2464_v26 = vadd.f32 %v2463_v18, %v2462_v13 }
 0x150   :  { %v1467_v23 = vadd.f32 %v2370_v17, %v3134_v27  ;;  %v2465_v24 = vpop.f32.mrf.mxu1 }
 0x151   :  { %v2372_v25 = vpop.f32.mrf.mxu0 }
 0x152   :  { %v2373_v28 = vadd.f32 %v2372_v25, %v2371_v22  ;;  %v2466_v30 = vpop.f32.mrf.mxu1  ;;  %v1604_v34 = vadd.f32 %v2464_v26, %v1467_v23 }
 0x153   :  { %v2374_v33 = vpop.f32.mrf.mxu0  ;;  %v2467_v37 = vadd.f32 %v2466_v30, %v2465_v24 }
 0x154   :  { %v1470_v36 = vadd.f32 %v2373_v28, %v3137_v35  ;;  %v2468_v16 = vpop.f32.mrf.mxu1  ;;  %v1706_v48 = vmax.f32 %v1604_v34, 0.0 }
 0x155   :  { %v2375_v39 = vpop.f32.mrf.mxu0 }
 0x156   :  { %v1607_v40 = vadd.f32 %v2467_v37, %v1470_v36  ;;  %v2376_v42 = vadd.f32 %v2375_v39, %v2374_v33  ;;  %v2469_v45 = vpop.f32.mrf.mxu1 }
 0x157   :  { %v2377_v46 = vpop.f32.mrf.mxu0  ;;  %v2470_v57 = vadd.f32 %v2469_v45, %v2468_v16 }
 0x158   :  { %v1707_v49 = vmax.f32 %v1607_v40, 0.0  ;;  %v1475_v27 = vadd.f32 %v2376_v42, %v3140_v43  ;;  %v2471_v50 = vpop.f32.mrf.mxu1 }
 0x159   :  { %v2378_v53 = vpop.f32.mrf.mxu0 }
 0x15a   :  { %v2090_v54 = vpack.c.bf16 %v1707_v49, %v1706_v48  ;;  %v2379_v58 = vadd.f32 %v2378_v53, %v2377_v46  ;;  %v2472_v60 = vpop.f32.mrf.mxu1  ;;  %v1612_v35 = vadd.f32 %v2470_v57, %v1475_v27 }
 0x15b   :  { %v2380_v61 = vpop.f32.mrf.mxu0  ;;  %v2473_v0 = vadd.f32 %v2472_v60, %v2471_v50 }
 0x15c   :  { %2091 = vst [vmem:[%s3279_s3] sm:$0xff] %v2090_v54   ;;  %v1478_v63 = vadd.f32 %v2379_v58, %v3143_v51  ;;  %v2474_v2 = vpop.f32.mrf.mxu1  ;;  %v1708_v12 = vmax.f32 %v1612_v35, 0.0 }
 0x15d   :  { %v2381_v5 = vpop.f32.mrf.mxu0 }
 0x15e   :  { %v1615_v6 = vadd.f32 %v2473_v0, %v1478_v63  ;;  %v2382_v7 = vadd.f32 %v2381_v5, %v2380_v61  ;;  %v2475_v43 = vpop.f32.mrf.mxu1 }
 0x15f   :  { %v2383_v9 = vpop.f32.mrf.mxu0  ;;  %v2476_v23 = vadd.f32 %v2475_v43, %v2474_v2 }
 0x160   :  { %v1709_v13 = vmax.f32 %v1615_v6, 0.0  ;;  %v1483_v14 = vadd.f32 %v2382_v7, %v3146_v59  ;;  %v2477_v17 = vpop.f32.mrf.mxu1 }
 0x161   :  { %v2384_v18 = vpop.f32.mrf.mxu0 }
 0x162   :  { %v2095_v22 = vpack.c.bf16 %v1709_v13, %v1708_v12  ;;  %v2385_v24 = vadd.f32 %v2384_v18, %v2383_v9  ;;  %v2478_v25 = vpop.f32.mrf.mxu1  ;;  %v1620_v51 = vadd.f32 %v2476_v23, %v1483_v14 }
 0x163   :  { %v2386_v26 = vpop.f32.mrf.mxu0  ;;  %v2479_v30 = vadd.f32 %v2478_v25, %v2477_v17 }
 0x164   :  { %2152 = vst [vmem:[%s3279_s3 + $0x8] sm:$0xff] %v2095_v22   ;;  %v1486_v28 = vadd.f32 %v2385_v24, %v3149_v3  ;;  %v2480_v33 = vpop.f32.mrf.mxu1  ;;  %v1710_v39 = vmax.f32 %v1620_v51, 0.0 }
 0x165   :  { %v2387_v34 = vpop.f32.mrf.mxu0 }
 0x166   :  { %v1623_v36 = vadd.f32 %v2479_v30, %v1486_v28  ;;  %v2388_v37 = vadd.f32 %v2387_v34, %v2386_v26  ;;  %v2481_v59 = vpop.f32.mrf.mxu1 }
 0x167   :  { %v2389_v16 = vpop.f32.mrf.mxu0  ;;  %v2482_v49 = vadd.f32 %v2481_v59, %v2480_v33 }
 0x168   :  { %v1711_v40 = vmax.f32 %v1623_v36, 0.0  ;;  %v1491_v42 = vadd.f32 %v2388_v37, %v3152_v11  ;;  %v2483_v45 = vpop.f32.mrf.mxu1 }
 0x169   :  { %v2390_v46 = vpop.f32.mrf.mxu0 }
 0x16a   :  { %v2100_v48 = vpack.c.bf16 %v1711_v40, %v1710_v39  ;;  %v2391_v27 = vadd.f32 %v2390_v46, %v2389_v16  ;;  %v2484_v50 = vpop.f32.mrf.mxu1  ;;  %v1628_v3 = vadd.f32 %v2482_v49, %v1491_v42 }
 0x16b   :  { %v2392_v53 = vpop.f32.mrf.mxu0  ;;  %v2485_v57 = vadd.f32 %v2484_v50, %v2483_v45 }
 0x16c   :  { %2153 = vst [vmem:[%s3279_s3 + $0x10] sm:$0xff] %v2100_v48   ;;  %v1494_v54 = vadd.f32 %v2391_v27, %v3155_v20  ;;  %v2486_v58 = vpop.f32.mrf.mxu1  ;;  %v1712_v0 = vmax.f32 %v1628_v3, 0.0 }
 0x16d   :  { %v2393_v60 = vpop.f32.mrf.mxu0 }
 0x16e   :  { %v1631_v61 = vadd.f32 %v2485_v57, %v1494_v54  ;;  %v2394_v35 = vadd.f32 %v2393_v60, %v2392_v53  ;;  %v2487_v11 = vpop.f32.mrf.mxu1 }
 0x16f   :  { %v2395_v63 = vpop.f32.mrf.mxu0  ;;  %v2488_v9 = vadd.f32 %v2487_v11, %v2486_v58 }
 0x170   :  { %v1713_v2 = vmax.f32 %v1631_v61, 0.0  ;;  %v1499_v5 = vadd.f32 %v2394_v35, %v3158_v29  ;;  %v2489_v6 = vpop.f32.mrf.mxu1 }
 0x171   :  { %v2396_v7 = vpop.f32.mrf.mxu0 }
 0x172   :  { %v2105_v43 = vpack.c.bf16 %v1713_v2, %v1712_v0  ;;  %v2397_v12 = vadd.f32 %v2396_v7, %v2395_v63  ;;  %v2490_v13 = vpop.f32.mrf.mxu1  ;;  %v1636_v20 = vadd.f32 %v2488_v9, %v1499_v5 }
 0x173   :  { %v2398_v14 = vpop.f32.mrf.mxu0  ;;  %v2491_v18 = vadd.f32 %v2490_v13, %v2489_v6 }
 0x174   :  { %2154 = vst [vmem:[%s3279_s3 + $0x18] sm:$0xff] %v2105_v43   ;;  %v1502_v17 = vadd.f32 %v2397_v12, %v3161_v38  ;;  %v2492_v22 = vpop.f32.mrf.mxu1  ;;  %v1714_v51 = vmax.f32 %v1636_v20, 0.0 }
 0x175   :  { %v2399_v23 = vpop.f32.mrf.mxu0 }
 0x176   :  { %v1639_v24 = vadd.f32 %v2491_v18, %v1502_v17  ;;  %v2400_v25 = vadd.f32 %v2399_v23, %v2398_v14  ;;  %v2493_v29 = vpop.f32.mrf.mxu1 }
 0x177   :  { %v2401_v26 = vpop.f32.mrf.mxu0  ;;  %v2494_v37 = vadd.f32 %v2493_v29, %v2492_v22 }
 0x178   :  { %v1715_v28 = vmax.f32 %v1639_v24, 0.0  ;;  %v1507_v30 = vadd.f32 %v2400_v25, %v3164_v47  ;;  %v2495_v33 = vpop.f32.mrf.mxu1 }
 0x179   :  { %v2402_v34 = vpop.f32.mrf.mxu0 }
 0x17a   :  { %v2110_v36 = vpack.c.bf16 %v1715_v28, %v1714_v51  ;;  %v2403_v59 = vadd.f32 %v2402_v34, %v2401_v26  ;;  %v2496_v16 = vpop.f32.mrf.mxu1  ;;  %v1644_v38 = vadd.f32 %v2494_v37, %v1507_v30 }
 0x17b   :  { %v2404_v39 = vpop.f32.mrf.mxu0  ;;  %v2497_v42 = vadd.f32 %v2496_v16, %v2495_v33 }
 0x17c   :  { %2155 = vst [vmem:[%s3279_s3 + $0x20] sm:$0xff] %v2110_v36   ;;  %v1510_v40 = vadd.f32 %v2403_v59, %v3167_v56  ;;  %v2498_v45 = vpop.f32.mrf.mxu1  ;;  %v1716_v50 = vmax.f32 %v1644_v38, 0.0 }
 0x17d   :  { %v2405_v46 = vpop.f32.mrf.mxu0 }
 0x17e   :  { %v1647_v48 = vadd.f32 %v2497_v42, %v1510_v40  ;;  %v2406_v49 = vadd.f32 %v2405_v46, %v2404_v39  ;;  %v2499_v47 = vpop.f32.mrf.mxu1 }
 0x17f   :  { %v2407_v27 = vpop.f32.mrf.mxu0  ;;  %v2500_v60 = vadd.f32 %v2499_v47, %v2498_v45 }
 0x180   :  { %v1717_v53 = vmax.f32 %v1647_v48, 0.0  ;;  %v1515_v3 = vadd.f32 %v2406_v49, %v3170_v1  ;;  %v2501_v54 = vpop.f32.mrf.mxu1 }
 0x181   :  { %v2408_v57 = vpop.f32.mrf.mxu0 }
 0x182   :  { %v2115_v58 = vpack.c.bf16 %v1717_v53, %v1716_v50  ;;  %v2409_v61 = vadd.f32 %v2408_v57, %v2407_v27  ;;  %v2502_v35 = vpop.f32.mrf.mxu1  ;;  %v1652_v56 = vadd.f32 %v2500_v60, %v1515_v3 }
 0x183   :  { %v2410_v11 = vpop.f32.mrf.mxu0  ;;  %v2503_v0 = vadd.f32 %v2502_v35, %v2501_v54 }
 0x184   :  { %2156 = vst [vmem:[%s3279_s3 + $0x28] sm:$0xff] %v2115_v58   ;;  %v1518_v63 = vadd.f32 %v2409_v61, %v3173_v10  ;;  %v2504_v2 = vpop.f32.mrf.mxu1  ;;  %v1718_v9 = vmax.f32 %v1652_v56, 0.0 }
 0x185   :  { %v2411_v5 = vpop.f32.mrf.mxu0 }
 0x186   :  { %v1655_v6 = vadd.f32 %v2503_v0, %v1518_v63  ;;  %v2412_v7 = vadd.f32 %v2411_v5, %v2410_v11  ;;  %v2505_v1 = vpop.f32.mrf.mxu1 }
 0x187   :  { %v2413_v43 = vpop.f32.mrf.mxu0  ;;  %v2506_v18 = vadd.f32 %v2505_v1, %v2504_v2 }
 0x188   :  { %v1719_v12 = vmax.f32 %v1655_v6, 0.0  ;;  %v1523_v13 = vadd.f32 %v2412_v7, %v3176_v21  ;;  %v2507_v14 = vpop.f32.mrf.mxu1 }
 0x189   :  { %v2414_v20 = vpop.f32.mrf.mxu0 }
 0x18a   :  { %v2120_v17 = vpack.c.bf16 %v1719_v12, %v1718_v9  ;;  %v2415_v22 = vadd.f32 %v2414_v20, %v2413_v43  ;;  %v2508_v23 = vpop.f32.mrf.mxu1  ;;  %v1660_v10 = vadd.f32 %v2506_v18, %v1523_v13 }
 0x18b   :  { %v2416_v24 = vpop.f32.mrf.mxu0  ;;  %v2509_v29 = vadd.f32 %v2508_v23, %v2507_v14 }
 0x18c   :  { %2157 = vst [vmem:[%s3279_s3 + $0x30] sm:$0xff] %v2120_v17   ;;  %v1526_v25 = vadd.f32 %v2415_v22, %v3179_v31  ;;  %v2510_v26 = vpop.f32.mrf.mxu1  ;;  %v1720_v34 = vmax.f32 %v1660_v10, 0.0 }
 0x18d   :  { %v2417_v51 = vpop.f32.mrf.mxu0 }
 0x18e   :  { %v1663_v28 = vadd.f32 %v2509_v29, %v1526_v25  ;;  %v2418_v30 = vadd.f32 %v2417_v51, %v2416_v24  ;;  %v2511_v21 = vpop.f32.mrf.mxu1 }
 0x18f   :  { %v2419_v33 = vpop.f32.mrf.mxu0  ;;  %v2512_v38 = vadd.f32 %v2511_v21, %v2510_v26 }
 0x190   :  { %v1721_v36 = vmax.f32 %v1663_v28, 0.0  ;;  %v1531_v37 = vadd.f32 %v2418_v30, %v3182_v41  ;;  %v2513_v59 = vpop.f32.mrf.mxu1 }
 0x191   :  { %v2420_v16 = vpop.f32.mrf.mxu0 }
 0x192   :  { %v2125_v39 = vpack.c.bf16 %v1721_v36, %v1720_v34  ;;  %v2421_v40 = vadd.f32 %v2420_v16, %v2419_v33  ;;  %v2514_v42 = vpop.f32.mrf.mxu1  ;;  %v1668_v31 = vadd.f32 %v2512_v38, %v1531_v37 }
 0x193   :  { %v2422_v45 = vpop.f32.mrf.mxu0  ;;  %v2515_v48 = vadd.f32 %v2514_v42, %v2513_v59 }
 0x194   :  { %2158 = vst [vmem:[%s3279_s3 + $0x38] sm:$0xff] %v2125_v39   ;;  %v1534_v46 = vadd.f32 %v2421_v40, %v3185_v52  ;;  %v2516_v49 = vpop.f32.mrf.mxu1  ;;  %v1722_v3 = vmax.f32 %v1668_v31, 0.0 }
 0x195   :  { %v2423_v47 = vpop.f32.mrf.mxu0 }
 0x196   :  { %v1671_v27 = vadd.f32 %v2515_v48, %v1534_v46  ;;  %v2424_v50 = vadd.f32 %v2423_v47, %v2422_v45  ;;  %v2517_v41 = vpop.f32.mrf.mxu1 }
 0x197   :  { %v2425_v53 = vpop.f32.mrf.mxu0  ;;  %v2518_v35 = vadd.f32 %v2517_v41, %v2516_v49 }
 0x198   :  { %v1723_v54 = vmax.f32 %v1671_v27, 0.0  ;;  %v1539_v57 = vadd.f32 %v2424_v50, %v3188_v62  ;;  %v2519_v58 = vpop.f32.mrf.mxu1 }
 0x199   :  { %v2426_v60 = vpop.f32.mrf.mxu0 }
 0x19a   :  { %v2130_v61 = vpack.c.bf16 %v1723_v54, %v1722_v3  ;;  %v2427_v11 = vadd.f32 %v2426_v60, %v2425_v53  ;;  %v2520_v56 = vpop.f32.mrf.mxu1  ;;  %v1676_v52 = vadd.f32 %v2518_v35, %v1539_v57 }
 0x19b   :  { %v2428_v63 = vpop.f32.mrf.mxu0  ;;  %v2521_v2 = vadd.f32 %v2520_v56, %v2519_v58 }
 0x19c   :  { %2159 = vst [vmem:[%s3279_s3 + $0x40] sm:$0xff] %v2130_v61   ;;  %v1542_v0 = vadd.f32 %v2427_v11, %v3191_v8  ;;  %v2522_v5 = vpop.f32.mrf.mxu1  ;;  %v1724_v9 = vmax.f32 %v1676_v52, 0.0 }
 0x19d   :  { %v2429_v6 = vpop.f32.mrf.mxu0 }
 0x19e   :  { %v1679_v7 = vadd.f32 %v2521_v2, %v1542_v0  ;;  %v2430_v1 = vadd.f32 %v2429_v6, %v2428_v63  ;;  %v2523_v62 = vpop.f32.mrf.mxu1 }
 0x19f   :  { %v2431_v43 = vpop.f32.mrf.mxu0  ;;  %v2524_v18 = vadd.f32 %v2523_v62, %v2522_v5 }
 0x1a0   :  { %v1725_v12 = vmax.f32 %v1679_v7, 0.0  ;;  %v1547_v13 = vadd.f32 %v2430_v1, %v3194_v19  ;;  %v2525_v14 = vpop.f32.mrf.mxu1 }
 0x1a1   :  { %v2432_v20 = vpop.f32.mrf.mxu0 }
 0x1a2   :  { %v2135_v17 = vpack.c.bf16 %v1725_v12, %v1724_v9  ;;  %v2433_v22 = vadd.f32 %v2432_v20, %v2431_v43  ;;  %v2526_v23 = vpop.f32.mrf.mxu1  ;;  %v1684_v8 = vadd.f32 %v2524_v18, %v1547_v13 }
 0x1a3   :  { %v2434_v24 = vpop.f32.mrf.mxu0  ;;  %v2527_v25 = vadd.f32 %v2526_v23, %v2525_v14 }
 0x1a4   :  { %2160 = vst [vmem:[%s3279_s3 + $0x48] sm:$0xff] %v2135_v17   ;;  %v1550_v10 = vadd.f32 %v2433_v22, %v3197_v32  ;;  %v2528_v29 = vpop.f32.mrf.mxu1  ;;  %v1726_v21 = vmax.f32 %v1684_v8, 0.0 }
 0x1a5   :  { %v2435_v26 = vpop.f32.mrf.mxu0 }
 0x1a6   :  { %v1687_v51 = vadd.f32 %v2527_v25, %v1550_v10  ;;  %v2436_v28 = vadd.f32 %v2435_v26, %v2434_v24  ;;  %v2529_v19 = vpop.f32.mrf.mxu1 }
 0x1a7   :  { %v2437_v30 = vpop.f32.mrf.mxu0  ;;  %v2530_v16 = vadd.f32 %v2529_v19, %v2528_v29 }
 0x1a8   :  { %v1727_v33 = vmax.f32 %v1687_v51, 0.0  ;;  %v1555_v34 = vadd.f32 %v2436_v28, %v3200_v44  ;;  %v2531_v36 = vpop.f32.mrf.mxu1 }
 0x1a9   :  { %v2438_v37 = vpop.f32.mrf.mxu0 }
 0x1aa   :  { %v2140_v59 = vpack.c.bf16 %v1727_v33, %v1726_v21  ;;  %v2439_v39 = vadd.f32 %v2438_v37, %v2437_v30  ;;  %v2532_v38 = vpop.f32.mrf.mxu1  ;;  %v1692_v32 = vadd.f32 %v2530_v16, %v1555_v34 }
 0x1ab   :  { %v2440_v40 = vpop.f32.mrf.mxu0  ;;  %v2533_v45 = vadd.f32 %v2532_v38, %v2531_v36 }
 0x1ac   :  { %2161 = vst [vmem:[%s3279_s3 + $0x50] sm:$0xff] %v2140_v59   ;;  %v1558_v42 = vadd.f32 %v2439_v39, %v3203_v55  ;;  %v2534_v31 = vpop.f32.mrf.mxu1  ;;  %v1728_v27 = vmax.f32 %v1692_v32, 0.0 }
 0x1ad   :  { %v2441_v46 = vpop.f32.mrf.mxu0 }
 0x1ae   :  { %v1695_v48 = vadd.f32 %v2533_v45, %v1558_v42  ;;  %v2442_v49 = vadd.f32 %v2441_v46, %v2440_v40  ;;  %v2535_v44 = vpop.f32.mrf.mxu1 }
 0x1af   :  { %v2443_v47 = vpop.f32.mrf.mxu0  ;;  %v2536_v57 = vadd.f32 %v2535_v44, %v2534_v31 }
 0x1b0   :  { %v1729_v50 = vmax.f32 %v1695_v48, 0.0  ;;  %v1563_v41 = vadd.f32 %v2442_v49, %v3206_v4  ;;  %v2537_v53 = vpop.f32.mrf.mxu1 }
 0x1b1   :  { %v2444_v3 = vpop.f32.mrf.mxu0 }
 0x1b2   :  { %v2145_v54 = vpack.c.bf16 %v1729_v50, %v1728_v27  ;;  %v2445_v58 = vadd.f32 %v2444_v3, %v2443_v47  ;;  %v2538_v60 = vpop.f32.mrf.mxu1  ;;  %v1700_v55 = vadd.f32 %v2536_v57, %v1563_v41 }
 0x1b3   :  { %v2539_v35 = vadd.f32 %v2538_v60, %v2537_v53 }
 0x1b4   :  { %2162 = vst [vmem:[%s3279_s3 + $0x58] sm:$0xff] %v2145_v54   ;;  %v1566_v61 = vadd.f32 %v2445_v58, %v3209_v15  ;;  %v1730_v56 = vmax.f32 %v1700_v55, 0.0 }
 0x1b6   :  { %v1703_v11 = vadd.f32 %v2539_v35, %v1566_v61 }
 0x1b8   :  { %v1731_v63 = vmax.f32 %v1703_v11, 0.0 }
 0x1ba   :  { %v2150_v52 = vpack.c.bf16 %v1731_v63, %v1730_v56 }
 0x1bc   :  { %2163 = vst [vmem:[%s3279_s3 + $0x60] sm:$0xff] %v2150_v52  }

// kernel: encoder_forward.8
= control target key start
LH: loop header
LB: loop body
LE: loop exit
PB: predicated region body
PF: predicated region fallthrough
CT: control target
= control target key end

     0   :  { %s4584_s1 = inlined_call_operand.vmem [shape: bf16[2048,256], index: 1, kind: input, shape index: {}]   ;;  %s4585_s0 = inlined_call_operand.vmem [shape: bf16[64,2048], index: 0, kind: input, shape index: {}]   ;;  %s4586_s2 = inlined_call_operand.vmem [shape: f32[1,256], index: 2, kind: input, shape index: {}]   ;;  %s4587_s3 = inlined_call_operand.vmem [shape: bf16[64,256], index: 3, kind: output, shape index: {}]  }
   0x1   :  { %v2942_v0 = vld [vmem:[%s4584_s1 + $0x74] ss:$8 sps:$4 sm:$0xff]   ;;  %v2946_v2 = vld [vmem:[%s4584_s1 + $0x70] ss:$8 sps:$4 sm:$0xff]   ;;  %v2948_v4 = vld [vmem:[%s4584_s1 + $0x64] ss:$8 sps:$4 sm:$0xff]  }
   0x2   :  { %v2944_v1 = vld [vmem:[%s4584_s1 + $0x174] ss:$8 sps:$4 sm:$0xff]   ;;  %1946 = vmatprep.subr.bf16.mxu0 %v2942_v0  ;;  %v2947_v3 = vld [vmem:[%s4584_s1 + $0x170] ss:$8 sps:$4 sm:$0xff]   ;;  %v2950_v5 = vld [vmem:[%s4584_s1 + $0x164] ss:$8 sps:$4 sm:$0xff]  }
   0x3   :  { %2019 = vmatprep.subr.bf16.mxu1 %v2944_v1  ;;  %1947 = vmatpush1.bf16.msra.mxu0 %v2946_v2  ;;  %v2952_v6 = vld [vmem:[%s4584_s1 + $0x60] ss:$8 sps:$4 sm:$0xff]   ;;  %v2954_v8 = vld [vmem:[%s4584_s1 + $0x54] ss:$8 sps:$4 sm:$0xff]   ;;  %v2958_v10 = vld [vmem:[%s4584_s1 + $0x50] ss:$8 sps:$4 sm:$0xff]  }
   0x4   :  { %2020 = vmatpush1.bf16.msra.mxu1 %v2947_v3  ;;  %1948 = vmatprep.subr.bf16.mxu0 %v2948_v4  ;;  %v2953_v7 = vld [vmem:[%s4584_s1 + $0x160] ss:$8 sps:$4 sm:$0xff]   ;;  %v2956_v9 = vld [vmem:[%s4584_s1 + $0x154] ss:$8 sps:$4 sm:$0xff]   ;;  %v2959_v11 = vld [vmem:[%s4584_s1 + $0x150] ss:$8 sps:$4 sm:$0xff]  }
   0x5   :  { %2021 = vmatprep.subr.bf16.mxu1 %v2950_v5  ;;  %v2960_v12 = vld [vmem:[%s4584_s1 + $0x44] ss:$8 sps:$4 sm:$0xff]   ;;  %v2964_v14 = vld [vmem:[%s4584_s1 + $0x40] ss:$8 sps:$4 sm:$0xff]   ;;  %v2966_v16 = vld [vmem:[%s4584_s1 + $0x34] ss:$8 sps:$4 sm:$0xff]  }
   0x6   :  { %v2962_v13 = vld [vmem:[%s4584_s1 + $0x144] ss:$8 sps:$4 sm:$0xff]   ;;  %v2965_v15 = vld [vmem:[%s4584_s1 + $0x140] ss:$8 sps:$4 sm:$0xff]   ;;  %v2968_v17 = vld [vmem:[%s4584_s1 + $0x134] ss:$8 sps:$4 sm:$0xff]  }
   0x7   :  { %1949 = vmatpush1.bf16.msra.mxu0 %v2952_v6  ;;  %v2970_v18 = vld [vmem:[%s4584_s1 + $0x30] ss:$8 sps:$4 sm:$0xff]   ;;  %v2972_v20 = vld [vmem:[%s4584_s1 + $0x24] ss:$8 sps:$4 sm:$0xff]   ;;  %v2976_v22 = vld [vmem:[%s4584_s1 + $0x20] ss:$8 sps:$4 sm:$0xff]  }
   0x8   :  { %2022 = vmatpush1.bf16.msra.mxu1 %v2953_v7  ;;  %1950 = vmatprep.subr.bf16.mxu0 %v2954_v8  ;;  %v2971_v19 = vld [vmem:[%s4584_s1 + $0x130] ss:$8 sps:$4 sm:$0xff]   ;;  %v2974_v21 = vld [vmem:[%s4584_s1 + $0x124] ss:$8 sps:$4 sm:$0xff]   ;;  %v2977_v23 = vld [vmem:[%s4584_s1 + $0x120] ss:$8 sps:$4 sm:$0xff]  }
   0x9   :  { %2023 = vmatprep.subr.bf16.mxu1 %v2956_v9  ;;  %v2978_v24 = vld [vmem:[%s4584_s1 + $0x14] ss:$8 sps:$4 sm:$0xff]   ;;  %v2982_v26 = vld [vmem:[%s4584_s1 + $0x10] ss:$8 sps:$4 sm:$0xff]   ;;  %v2984_v28 = vld [vmem:[%s4584_s1 + $0x4] ss:$8 sps:$4 sm:$0xff]  }
   0xa   :  { %v2980_v25 = vld [vmem:[%s4584_s1 + $0x114] ss:$8 sps:$4 sm:$0xff]   ;;  %v2983_v27 = vld [vmem:[%s4584_s1 + $0x110] ss:$8 sps:$4 sm:$0xff]   ;;  %v2986_v29 = vld [vmem:[%s4584_s1 + $0x104] ss:$8 sps:$4 sm:$0xff]  }
   0xb   :  { %1951 = vmatpush1.bf16.msra.mxu0 %v2958_v10  ;;  %v2988_v30 = vld [vmem:[%s4584_s1] ss:$8 sps:$4 sm:$0xff]   ;;  %v2990_v32 = vld [vmem:[%s4584_s1 + $0xf4] ss:$8 sps:$4 sm:$0xff]   ;;  %v2994_v34 = vld [vmem:[%s4584_s1 + $0xf0] ss:$8 sps:$4 sm:$0xff]  }
   0xc   :  { %2024 = vmatpush1.bf16.msra.mxu1 %v2959_v11  ;;  %1952 = vmatprep.subr.bf16.mxu0 %v2960_v12  ;;  %v2989_v31 = vld [vmem:[%s4584_s1 + $0x100] ss:$8 sps:$4 sm:$0xff]   ;;  %v2992_v33 = vld [vmem:[%s4584_s1 + $0x1f4] ss:$8 sps:$4 sm:$0xff]   ;;  %v2995_v35 = vld [vmem:[%s4584_s1 + $0x1f0] ss:$8 sps:$4 sm:$0xff]  }
   0xd   :  { %2025 = vmatprep.subr.bf16.mxu1 %v2962_v13  ;;  %v2996_v36 = vld [vmem:[%s4584_s1 + $0xe4] ss:$8 sps:$4 sm:$0xff]   ;;  %v3000_v38 = vld [vmem:[%s4584_s1 + $0xe0] ss:$8 sps:$4 sm:$0xff]   ;;  %v3002_v40 = vld [vmem:[%s4584_s1 + $0xd4] ss:$8 sps:$4 sm:$0xff]  }
   0xe   :  { %v2998_v37 = vld [vmem:[%s4584_s1 + $0x1e4] ss:$8 sps:$4 sm:$0xff]   ;;  %v3001_v39 = vld [vmem:[%s4584_s1 + $0x1e0] ss:$8 sps:$4 sm:$0xff]   ;;  %v3004_v41 = vld [vmem:[%s4584_s1 + $0x1d4] ss:$8 sps:$4 sm:$0xff]  }
   0xf   :  { %1953 = vmatpush1.bf16.msra.mxu0 %v2964_v14  ;;  %v3006_v42 = vld [vmem:[%s4584_s1 + $0xd0] ss:$8 sps:$4 sm:$0xff]   ;;  %v3008_v44 = vld [vmem:[%s4584_s1 + $0xc4] ss:$8 sps:$4 sm:$0xff]   ;;  %v3012_v46 = vld [vmem:[%s4584_s1 + $0xc0] ss:$8 sps:$4 sm:$0xff]  }
  0x10   :  { %2026 = vmatpush1.bf16.msra.mxu1 %v2965_v15  ;;  %1954 = vmatprep.subr.bf16.mxu0 %v2966_v16  ;;  %v3007_v43 = vld [vmem:[%s4584_s1 + $0x1d0] ss:$8 sps:$4 sm:$0xff]   ;;  %v3010_v45 = vld [vmem:[%s4584_s1 + $0x1c4] ss:$8 sps:$4 sm:$0xff]   ;;  %v3013_v47 = vld [vmem:[%s4584_s1 + $0x1c0] ss:$8 sps:$4 sm:$0xff]  }
  0x11   :  { %2027 = vmatprep.subr.bf16.mxu1 %v2968_v17  ;;  %v14_v48 = vld [vmem:[%s4585_s0] sm:$0xff]  ;;  %v15_v50 = vld [vmem:[%s4585_s0 + $0x8] sm:$0xff]  ;;  %v3014_v52 = vld [vmem:[%s4584_s1 + $0xb4] ss:$8 sps:$4 sm:$0xff]  }
  0x12   :  { %v22_v49 = vld [vmem:[%s4585_s0 + $0x40] sm:$0xff]  ;;  %v23_v51 = vld [vmem:[%s4585_s0 + $0x48] sm:$0xff]  ;;  %v3016_v54 = vld [vmem:[%s4584_s1 + $0x1b4] ss:$8 sps:$4 sm:$0xff]  }
  0x13   :  { %1955 = vmatpush1.bf16.msra.mxu0 %v2970_v18  ;;  %v2607_v53 = vcombine.high %v14_v48, %v22_v49  ;;  %v2609_v55 = vcombine.high %v15_v50, %v23_v51  ;;  %v3018_v56 = vld [vmem:[%s4584_s1 + $0xb0] ss:$8 sps:$4 sm:$0xff]   ;;  %v3020_v58 = vld [vmem:[%s4584_s1 + $0xa4] ss:$8 sps:$4 sm:$0xff]   ;;  %v3024_v60 = vld [vmem:[%s4584_s1 + $0xa0] ss:$8 sps:$4 sm:$0xff]   ;;  %v2606_v8 = vcombine.low %v14_v48, %v22_v49  ;;  %v2608_v9 = vcombine.low %v15_v50, %v23_v51 }
  0x14   :  { %2028 = vmatpush1.bf16.msra.mxu1 %v2971_v19  ;;  %1956 = vmatprep.subr.bf16.mxu0 %v2972_v20  ;;  %v3019_v57 = vld [vmem:[%s4584_s1 + $0x1b0] ss:$8 sps:$4 sm:$0xff]   ;;  %v3022_v59 = vld [vmem:[%s4584_s1 + $0x1a4] ss:$8 sps:$4 sm:$0xff]   ;;  %v3025_v61 = vld [vmem:[%s4584_s1 + $0x1a0] ss:$8 sps:$4 sm:$0xff]  }
  0x15   :  { %2029 = vmatprep.subr.bf16.mxu1 %v2974_v21  ;;  %1978 = vmatprep.mubr.bf16.mxu0 %v2607_v53  ;;  %v3026_v62 = vld [vmem:[%s4584_s1 + $0x94] ss:$8 sps:$4 sm:$0xff]   ;;  %v3030_v0 = vld [vmem:[%s4584_s1 + $0x90] ss:$8 sps:$4 sm:$0xff]   ;;  %v3032_v2 = vld [vmem:[%s4584_s1 + $0x84] ss:$8 sps:$4 sm:$0xff]  }
  0x16   :  { %2051 = vmatprep.mubr.bf16.mxu1 %v2609_v55  ;;  %v3028_v63 = vld [vmem:[%s4584_s1 + $0x194] ss:$8 sps:$4 sm:$0xff]   ;;  %v3031_v1 = vld [vmem:[%s4584_s1 + $0x190] ss:$8 sps:$4 sm:$0xff]   ;;  %v3034_v3 = vld [vmem:[%s4584_s1 + $0x184] ss:$8 sps:$4 sm:$0xff]  }
  0x17   :  { %1957 = vmatpush1.bf16.msra.mxu0 %v2976_v22  ;;  %v3036_v4 = vld [vmem:[%s4584_s1 + $0x80] ss:$8 sps:$4 sm:$0xff]   ;;  %v3040_v6 = vld [vmem:[%s4584_s1 + $0x274] ss:$8 sps:$4 sm:$0xff]   ;;  %v3038_v10 = vld [vmem:[%s4584_s1 + $0x270] ss:$8 sps:$4 sm:$0xff]  }
  0x18   :  { %2030 = vmatpush1.bf16.msra.mxu1 %v2977_v23  ;;  %1958 = vmatprep.subr.bf16.mxu0 %v2978_v24  ;;  %v3037_v5 = vld [vmem:[%s4584_s1 + $0x180] ss:$8 sps:$4 sm:$0xff]   ;;  %v3043_v7 = vld [vmem:[%s4584_s1 + $0x374] ss:$8 sps:$4 sm:$0xff]   ;;  %v3041_v11 = vld [vmem:[%s4584_s1 + $0x370] ss:$8 sps:$4 sm:$0xff]  }
  0x19   :  { %2031 = vmatprep.subr.bf16.mxu1 %v2980_v25  ;;  %v3046_v12 = vld [vmem:[%s4584_s1 + $0x264] ss:$8 sps:$4 sm:$0xff]   ;;  %v3044_v14 = vld [vmem:[%s4584_s1 + $0x260] ss:$8 sps:$4 sm:$0xff]   ;;  %v3052_v16 = vld [vmem:[%s4584_s1 + $0x254] ss:$8 sps:$4 sm:$0xff]  }
  0x1a   :  { %v3049_v13 = vld [vmem:[%s4584_s1 + $0x364] ss:$8 sps:$4 sm:$0xff]   ;;  %v3047_v15 = vld [vmem:[%s4584_s1 + $0x360] ss:$8 sps:$4 sm:$0xff]   ;;  %v3055_v17 = vld [vmem:[%s4584_s1 + $0x354] ss:$8 sps:$4 sm:$0xff]  }
  0x1b   :  { %1959 = vmatpush1.bf16.msra.mxu0 %v2982_v26  ;;  %v30_v18 = vld [vmem:[%s4585_s0 + $0x80] sm:$0xff]  ;;  %v31_v20 = vld [vmem:[%s4585_s0 + $0x88] sm:$0xff]  ;;  %v3050_v24 = vld [vmem:[%s4584_s1 + $0x250] ss:$8 sps:$4 sm:$0xff]  }
  0x1c   :  { %2032 = vmatpush1.bf16.msra.mxu1 %v2983_v27  ;;  %1960 = vmatprep.subr.bf16.mxu0 %v2984_v28  ;;  %v38_v19 = vld [vmem:[%s4585_s0 + $0xc0] sm:$0xff]  ;;  %v39_v22 = vld [vmem:[%s4585_s0 + $0xc8] sm:$0xff]  ;;  %v3053_v25 = vld [vmem:[%s4584_s1 + $0x350] ss:$8 sps:$4 sm:$0xff]  }
  0x1d   :  { %2033 = vmatprep.subr.bf16.mxu1 %v2986_v29  ;;  %v2623_v21 = vcombine.high %v30_v18, %v38_v19  ;;  %v2625_v23 = vcombine.high %v31_v20, %v39_v22  ;;  %v2622_v26 = vcombine.low %v30_v18, %v38_v19  ;;  %v2624_v27 = vcombine.low %v31_v20, %v39_v22  ;;  %v3058_v28 = vld [vmem:[%s4584_s1 + $0x244] ss:$8 sps:$4 sm:$0xff]   ;;  %v3068_v51 = vld [vmem:[%s4584_s1 + $0x220] ss:$8 sps:$4 sm:$0xff]   ;;  %v3079_v55 = vld [vmem:[%s4584_s1 + $0x314] ss:$8 sps:$4 sm:$0xff]  }
  0x1e   :  { %v3061_v29 = vld [vmem:[%s4584_s1 + $0x344] ss:$8 sps:$4 sm:$0xff]   ;;  %v3104_v20 = vld [vmem:[%s4584_s1 + $0x2c0] ss:$8 sps:$4 sm:$0xff]   ;;  %v3112_v22 = vld [vmem:[%s4584_s1 + $0x2b4] ss:$8 sps:$4 sm:$0xff]  }
  0x1f   :  { %1961 = vmatpush1.bf16.msra.mxu0 %v2988_v30  ;;  %v3056_v30 = vld [vmem:[%s4584_s1 + $0x240] ss:$8 sps:$4 sm:$0xff]   ;;  %v3106_v18 = vld [vmem:[%s4584_s1 + $0x2c4] ss:$8 sps:$4 sm:$0xff]  }
  0x20   :  { %2034 = vmatpush1.bf16.msra.mxu1 %v2989_v31  ;;  %1962 = vmatprep.subr.bf16.mxu0 %v2990_v32  ;;  %v3059_v31 = vld [vmem:[%s4584_s1 + $0x340] ss:$8 sps:$4 sm:$0xff]   ;;  %v3109_v19 = vld [vmem:[%s4584_s1 + $0x3c4] ss:$8 sps:$4 sm:$0xff]  }
  0x21   :  { %2035 = vmatprep.subr.bf16.mxu1 %v2992_v33  ;;  %v46_v32 = vld [vmem:[%s4585_s0 + $0x100] sm:$0xff]  ;;  %v63_v49 = vld [vmem:[%s4585_s0 + $0x188] sm:$0xff] }
  0x22   :  { %v54_v33 = vld [vmem:[%s4585_s0 + $0x140] sm:$0xff]  ;;  %v71_v50 = vld [vmem:[%s4585_s0 + $0x1c8] sm:$0xff] }
  0x23   :  { %1963 = vmatpush2.bf16.msra.mxu0 %v2994_v34  ;;  %v47_v34 = vld [vmem:[%s4585_s0 + $0x108] sm:$0xff]  ;;  %v2657_v53 = vcombine.high %v63_v49, %v71_v50 }
  0x24   :  { %2036 = vmatpush2.bf16.msra.mxu1 %v2995_v35  ;;  %1964 = vmatprep.subr.bf16.mxu0 %v2996_v36  ;;  %v55_v35 = vld [vmem:[%s4585_s0 + $0x148] sm:$0xff]  ;;  %v3064_v36 = vld [vmem:[%s4584_s1 + $0x234] ss:$8 sps:$4 sm:$0xff]  }
  0x25   :  { %2037 = vmatprep.subr.bf16.mxu1 %v2998_v37  ;;  %v2639_v37 = vcombine.high %v46_v32, %v54_v33 }
  0x27   :  { %1965 = vmatpush2.bf16.msra.mxu0 %v3000_v38  ;;  %v2641_v38 = vcombine.high %v47_v34, %v55_v35 }
  0x28   :  { %2038 = vmatpush2.bf16.msra.mxu1 %v3001_v39  ;;  %1966 = vmatprep.subr.bf16.mxu0 %v3002_v40  ;;  %v3067_v39 = vld [vmem:[%s4584_s1 + $0x334] ss:$8 sps:$4 sm:$0xff]   ;;  %v3062_v40 = vld [vmem:[%s4584_s1 + $0x230] ss:$8 sps:$4 sm:$0xff]  }
  0x29   :  { %2039 = vmatprep.subr.bf16.mxu1 %v3004_v41  ;;  %v3065_v41 = vld [vmem:[%s4584_s1 + $0x330] ss:$8 sps:$4 sm:$0xff]  }
  0x2b   :  { %1967 = vmatpush2.bf16.msra.mxu0 %v3006_v42  ;;  %v2638_v42 = vcombine.low %v46_v32, %v54_v33  ;;  %v3122_v32 = vld [vmem:[%s4584_s1 + $0x290] ss:$8 sps:$4 sm:$0xff]  }
  0x2c   :  { %2040 = vmatpush2.bf16.msra.mxu1 %v3007_v43  ;;  %1968 = vmatprep.subr.bf16.mxu0 %v3008_v44  ;;  %v2640_v43 = vcombine.low %v47_v34, %v55_v35  ;;  %v3070_v44 = vld [vmem:[%s4584_s1 + $0x224] ss:$8 sps:$4 sm:$0xff]   ;;  %v3125_v33 = vld [vmem:[%s4584_s1 + $0x390] ss:$8 sps:$4 sm:$0xff]  }
  0x2d   :  { %2041 = vmatprep.subr.bf16.mxu1 %v3010_v45  ;;  %v3073_v45 = vld [vmem:[%s4584_s1 + $0x324] ss:$8 sps:$4 sm:$0xff]  }
  0x2e   :  { %v3130_v34 = vld [vmem:[%s4584_s1 + $0x284] ss:$8 sps:$4 sm:$0xff]  }
  0x2f   :  { %1969 = vmatpush2.bf16.msra.mxu0 %v3012_v46  ;;  %v62_v46 = vld [vmem:[%s4585_s0 + $0x180] sm:$0xff] }
  0x30   :  { %2042 = vmatpush2.bf16.msra.mxu1 %v3013_v47  ;;  %1970 = vmatprep.subr.bf16.mxu0 %v3014_v52  ;;  %v70_v47 = vld [vmem:[%s4585_s0 + $0x1c0] sm:$0xff] }
  0x31   :  { %2043 = vmatprep.subr.bf16.mxu1 %v3016_v54  ;;  %v2655_v48 = vcombine.high %v62_v46, %v70_v47  ;;  %v3071_v52 = vld [vmem:[%s4584_s1 + $0x320] ss:$8 sps:$4 sm:$0xff]   ;;  %v3076_v54 = vld [vmem:[%s4584_s1 + $0x214] ss:$8 sps:$4 sm:$0xff]   ;;  %v3133_v35 = vld [vmem:[%s4584_s1 + $0x384] ss:$8 sps:$4 sm:$0xff]  }
  0x33   :  { %1971 = vmatpush2.bf16.msra.mxu0 %v3018_v56  ;;  %v3074_v56 = vld [vmem:[%s4584_s1 + $0x210] ss:$8 sps:$4 sm:$0xff]  }
  0x34   :  { %2044 = vmatpush2.bf16.msra.mxu1 %v3019_v57  ;;  %1972 = vmatprep.subr.bf16.mxu0 %v3020_v58  ;;  %v3077_v57 = vld [vmem:[%s4584_s1 + $0x310] ss:$8 sps:$4 sm:$0xff]   ;;  %v2654_v58 = vcombine.low %v62_v46, %v70_v47 }
  0x35   :  { %2045 = vmatprep.subr.bf16.mxu1 %v3022_v59  ;;  %v2656_v59 = vcombine.low %v63_v49, %v71_v50  ;;  %v33_v46 = vld [vmem:[%s4585_s0 + $0x98] sm:$0xff]  ;;  %v3145_v49 = vld [vmem:[%s4584_s1 + $0x564] ss:$8 sps:$4 sm:$0xff]  }
  0x36   :  { %v41_v47 = vld [vmem:[%s4585_s0 + $0xd8] sm:$0xff] }
  0x37   :  { %1973 = vmatpush2.bf16.msra.mxu0 %v3024_v60  ;;  %v3082_v60 = vld [vmem:[%s4584_s1 + $0x204] ss:$8 sps:$4 sm:$0xff]  }
  0x38   :  { %2046 = vmatpush2.bf16.msra.mxu1 %v3025_v61  ;;  %1974 = vmatprep.subr.bf16.mxu0 %v3026_v62  ;;  %v3085_v61 = vld [vmem:[%s4584_s1 + $0x304] ss:$8 sps:$4 sm:$0xff]   ;;  %v3080_v62 = vld [vmem:[%s4584_s1 + $0x200] ss:$8 sps:$4 sm:$0xff]  }
  0x39   :  { %2047 = vmatprep.subr.bf16.mxu1 %v3028_v63  ;;  %v3083_v63 = vld [vmem:[%s4584_s1 + $0x300] ss:$8 sps:$4 sm:$0xff]  }
  0x3b   :  { %1975 = vmatpush2.bf16.msra.mxu0 %v3030_v0  ;;  %v3685_v0 = vld [vmem:[%s4585_s0 + $0x10] sm:$0xff] }
  0x3c   :  { %2048 = vmatpush2.bf16.msra.mxu1 %v3031_v1  ;;  %1976 = vmatprep.subr.bf16.mxu0 %v3032_v2  ;;  %v3690_v1 = vld [vmem:[%s4585_s0 + $0x50] sm:$0xff]  ;;  %v3695_v2 = vld [vmem:[%s4585_s0 + $0x18] sm:$0xff] }
  0x3d   :  { %2049 = vmatprep.subr.bf16.mxu1 %v3034_v3  ;;  %v3700_v3 = vld [vmem:[%s4585_s0 + $0x58] sm:$0xff] }
  0x3f   :  { %1977 = vmatpush2.bf16.msra.mxu0 %v3036_v4  ;;  %v3088_v4 = vld [vmem:[%s4584_s1 + $0x2f4] ss:$8 sps:$4 sm:$0xff]  }
  0x40   :  { %2050 = vmatpush2.bf16.msra.mxu1 %v3037_v5  ;;  %2092 = vmatprep.subr.bf16.mxu0 %v3040_v6  ;;  %v2611_v5 = vcombine.high %v3685_v0, %v3690_v1  ;;  %v3091_v6 = vld [vmem:[%s4584_s1 + $0x3f4] ss:$8 sps:$4 sm:$0xff]  }
  0x41   :  { %2165 = vmatprep.subr.bf16.mxu1 %v3043_v7  ;;  %v2613_v7 = vcombine.high %v3695_v2, %v3700_v3 }
  0x42   :  { %1979 = vmatmul.mubr.bf16.vlgmr.msra.gmra.mxu0 %v2606_v8  ;;  %v3086_v8 = vld [vmem:[%s4584_s1 + $0x2f0] ss:$8 sps:$4 sm:$0xff]  }
  0x43   :  { %2052 = vmatmul.mubr.bf16.vlgmr.msra.gmra.mxu1 %v2608_v9  ;;  %2093 = vmatpush1.bf16.msra.mxu0 %v3038_v10  ;;  %v3089_v9 = vld [vmem:[%s4584_s1 + $0x3f0] ss:$8 sps:$4 sm:$0xff]   ;;  %v3094_v10 = vld [vmem:[%s4584_s1 + $0x2e4] ss:$8 sps:$4 sm:$0xff]  }
  0x44   :  { %2166 = vmatpush1.bf16.msra.mxu1 %v3041_v11  ;;  %2094 = vmatprep.subr.bf16.mxu0 %v3046_v12  ;;  %v3097_v11 = vld [vmem:[%s4584_s1 + $0x3e4] ss:$8 sps:$4 sm:$0xff]   ;;  %v3092_v12 = vld [vmem:[%s4584_s1 + $0x2e0] ss:$8 sps:$4 sm:$0xff]  }
  0x45   :  { %2167 = vmatprep.subr.bf16.mxu1 %v3049_v13  ;;  %1988 = vmatprep.mubr.bf16.mxu0 %v2623_v21  ;;  %v3095_v13 = vld [vmem:[%s4584_s1 + $0x3e0] ss:$8 sps:$4 sm:$0xff]  }
  0x46   :  { %2061 = vmatprep.mubr.bf16.mxu1 %v2625_v23  ;;  %v3107_v21 = vld [vmem:[%s4584_s1 + $0x3c0] ss:$8 sps:$4 sm:$0xff]   ;;  %v3115_v23 = vld [vmem:[%s4584_s1 + $0x3b4] ss:$8 sps:$4 sm:$0xff]  }
  0x47   :  { %2095 = vmatpush1.bf16.msra.mxu0 %v3044_v14  ;;  %v3100_v14 = vld [vmem:[%s4584_s1 + $0x2d4] ss:$8 sps:$4 sm:$0xff]  }
  0x48   :  { %2168 = vmatpush1.bf16.msra.mxu1 %v3047_v15  ;;  %2096 = vmatprep.subr.bf16.mxu0 %v3052_v16  ;;  %v3103_v15 = vld [vmem:[%s4584_s1 + $0x3d4] ss:$8 sps:$4 sm:$0xff]   ;;  %v3098_v16 = vld [vmem:[%s4584_s1 + $0x2d0] ss:$8 sps:$4 sm:$0xff]  }
  0x49   :  { %2169 = vmatprep.subr.bf16.mxu1 %v3055_v17  ;;  %v3101_v17 = vld [vmem:[%s4584_s1 + $0x3d0] ss:$8 sps:$4 sm:$0xff]  }
  0x4a   :  { %1989 = vmatmul.mubr.bf16.gmra.mxu0 %v2622_v26  ;;  %v3118_v26 = vld [vmem:[%s4584_s1 + $0x2a4] ss:$8 sps:$4 sm:$0xff]  }
  0x4b   :  { %2062 = vmatmul.mubr.bf16.gmra.mxu1 %v2624_v27  ;;  %2097 = vmatpush1.bf16.msra.mxu0 %v3050_v24  ;;  %v3110_v24 = vld [vmem:[%s4584_s1 + $0x2b0] ss:$8 sps:$4 sm:$0xff]   ;;  %v3121_v27 = vld [vmem:[%s4584_s1 + $0x3a4] ss:$8 sps:$4 sm:$0xff]  }
  0x4c   :  { %2170 = vmatpush1.bf16.msra.mxu1 %v3053_v25  ;;  %2098 = vmatprep.subr.bf16.mxu0 %v3058_v28  ;;  %v3113_v25 = vld [vmem:[%s4584_s1 + $0x3b0] ss:$8 sps:$4 sm:$0xff]   ;;  %v3116_v28 = vld [vmem:[%s4584_s1 + $0x2a0] ss:$8 sps:$4 sm:$0xff]  }
  0x4d   :  { %2171 = vmatprep.subr.bf16.mxu1 %v3061_v29  ;;  %1998 = vmatprep.mubr.bf16.mxu0 %v2639_v37  ;;  %v3119_v29 = vld [vmem:[%s4584_s1 + $0x3a0] ss:$8 sps:$4 sm:$0xff]  }
  0x4e   :  { %2071 = vmatprep.mubr.bf16.mxu1 %v2641_v38  ;;  %v3131_v37 = vld [vmem:[%s4584_s1 + $0x380] ss:$8 sps:$4 sm:$0xff]   ;;  %v3136_v38 = vld [vmem:[%s4584_s1 + $0x474] ss:$8 sps:$4 sm:$0xff]  }
  0x4f   :  { %2099 = vmatpush1.bf16.msra.mxu0 %v3056_v30  ;;  %v3124_v30 = vld [vmem:[%s4584_s1 + $0x294] ss:$8 sps:$4 sm:$0xff]  }
  0x50   :  { %2172 = vmatpush1.bf16.msra.mxu1 %v3059_v31  ;;  %2100 = vmatprep.subr.bf16.mxu0 %v3064_v36  ;;  %v3127_v31 = vld [vmem:[%s4584_s1 + $0x394] ss:$8 sps:$4 sm:$0xff]   ;;  %v3128_v36 = vld [vmem:[%s4584_s1 + $0x280] ss:$8 sps:$4 sm:$0xff]  }
  0x51   :  { %2173 = vmatprep.subr.bf16.mxu1 %v3067_v39  ;;  %v3139_v39 = vld [vmem:[%s4584_s1 + $0x574] ss:$8 sps:$4 sm:$0xff]  }
  0x52   :  { %1999 = vmatmul.mubr.bf16.gmra.mxu0 %v2638_v42  ;;  %v32_v42 = vld [vmem:[%s4585_s0 + $0x90] sm:$0xff] }
  0x53   :  { %2072 = vmatmul.mubr.bf16.gmra.mxu1 %v2640_v43  ;;  %2101 = vmatpush1.bf16.msra.mxu0 %v3062_v40  ;;  %v3134_v40 = vld [vmem:[%s4584_s1 + $0x470] ss:$8 sps:$4 sm:$0xff]  }
  0x54   :  { %2174 = vmatpush1.bf16.msra.mxu1 %v3065_v41  ;;  %2102 = vmatprep.subr.bf16.mxu0 %v3070_v44  ;;  %v3137_v41 = vld [vmem:[%s4584_s1 + $0x570] ss:$8 sps:$4 sm:$0xff]   ;;  %v2610_v44 = vcombine.low %v3685_v0, %v3690_v1  ;;  %v3154_v0 = vld [vmem:[%s4584_s1 + $0x444] ss:$8 sps:$4 sm:$0xff]  }
  0x55   :  { %2175 = vmatprep.subr.bf16.mxu1 %v3073_v45  ;;  %2008 = vmatprep.mubr.bf16.mxu0 %v2655_v48  ;;  %v40_v43 = vld [vmem:[%s4585_s0 + $0xd0] sm:$0xff]  ;;  %v2612_v45 = vcombine.low %v3695_v2, %v3700_v3  ;;  %v3142_v48 = vld [vmem:[%s4584_s1 + $0x464] ss:$8 sps:$4 sm:$0xff]  }
  0x56   :  { %2081 = vmatprep.mubr.bf16.mxu1 %v2657_v53  ;;  %v2627_v50 = vcombine.high %v32_v42, %v40_v43  ;;  %v3143_v53 = vld [vmem:[%s4584_s1 + $0x560] ss:$8 sps:$4 sm:$0xff]   ;;  %v3157_v1 = vld [vmem:[%s4584_s1 + $0x544] ss:$8 sps:$4 sm:$0xff]  }
  0x57   :  { %2103 = vmatpush1.bf16.msra.mxu0 %v3068_v51  ;;  %v2629_v51 = vcombine.high %v33_v46, %v41_v47 }
  0x58   :  { %2176 = vmatpush1.bf16.msra.mxu1 %v3071_v52  ;;  %2104 = vmatprep.subr.bf16.mxu0 %v3076_v54  ;;  %v3140_v52 = vld [vmem:[%s4584_s1 + $0x460] ss:$8 sps:$4 sm:$0xff]   ;;  %v3148_v54 = vld [vmem:[%s4584_s1 + $0x454] ss:$8 sps:$4 sm:$0xff]  }
  0x59   :  { %2177 = vmatprep.subr.bf16.mxu1 %v3079_v55  ;;  %v3151_v55 = vld [vmem:[%s4584_s1 + $0x554] ss:$8 sps:$4 sm:$0xff]  }
  0x5a   :  { %2009 = vmatmul.mubr.bf16.gmra.mxu0 %v2654_v58  ;;  %v48_v58 = vld [vmem:[%s4585_s0 + $0x110] sm:$0xff] }
  0x5b   :  { %2082 = vmatmul.mubr.bf16.gmra.mxu1 %v2656_v59  ;;  %2105 = vmatpush1.bf16.msra.mxu0 %v3074_v56  ;;  %v3146_v56 = vld [vmem:[%s4584_s1 + $0x450] ss:$8 sps:$4 sm:$0xff]  }
  0x5c   :  { %2178 = vmatpush1.bf16.msra.mxu1 %v3077_v57  ;;  %2106 = vmatprep.subr.bf16.mxu0 %v3082_v60  ;;  %v3149_v57 = vld [vmem:[%s4584_s1 + $0x550] ss:$8 sps:$4 sm:$0xff]   ;;  %v2626_v60 = vcombine.low %v32_v42, %v40_v43  ;;  %v3190_v42 = vld [vmem:[%s4584_s1 + $0x4e4] ss:$8 sps:$4 sm:$0xff]  }
  0x5d   :  { %2179 = vmatprep.subr.bf16.mxu1 %v3085_v61  ;;  %2124 = vmatprep.mubr.bf16.mxu0 %v2611_v5  ;;  %v56_v59 = vld [vmem:[%s4585_s0 + $0x150] sm:$0xff]  ;;  %v2628_v61 = vcombine.low %v33_v46, %v41_v47  ;;  %v3155_v5 = vld [vmem:[%s4584_s1 + $0x540] ss:$8 sps:$4 sm:$0xff]   ;;  %v3193_v43 = vld [vmem:[%s4584_s1 + $0x5e4] ss:$8 sps:$4 sm:$0xff]  }
  0x5e   :  { %2197 = vmatprep.mubr.bf16.mxu1 %v2613_v7  ;;  %v2643_v2 = vcombine.high %v48_v58, %v56_v59  ;;  %v3163_v7 = vld [vmem:[%s4584_s1 + $0x534] ss:$8 sps:$4 sm:$0xff]  }
  0x5f   :  { %2107 = vmatpush1.bf16.msra.mxu0 %v3080_v62  ;;  %v49_v62 = vld [vmem:[%s4585_s0 + $0x118] sm:$0xff] }
  0x60   :  { %2180 = vmatpush1.bf16.msra.mxu1 %v3083_v63  ;;  %2108 = vmatprep.subr.bf16.mxu0 %v3088_v4  ;;  %v57_v63 = vld [vmem:[%s4585_s0 + $0x158] sm:$0xff]  ;;  %v3152_v4 = vld [vmem:[%s4584_s1 + $0x440] ss:$8 sps:$4 sm:$0xff]  }
  0x61   :  { %2181 = vmatprep.subr.bf16.mxu1 %v3091_v6  ;;  %v2645_v3 = vcombine.high %v49_v62, %v57_v63  ;;  %v3160_v6 = vld [vmem:[%s4584_s1 + $0x434] ss:$8 sps:$4 sm:$0xff]  }
  0x62   :  { %v3196_v46 = vld [vmem:[%s4584_s1 + $0x4d4] ss:$8 sps:$4 sm:$0xff]  }
  0x63   :  { %2109 = vmatpush2.bf16.msra.mxu0 %v3086_v8  ;;  %v3158_v8 = vld [vmem:[%s4584_s1 + $0x430] ss:$8 sps:$4 sm:$0xff]   ;;  %v3199_v47 = vld [vmem:[%s4584_s1 + $0x5d4] ss:$8 sps:$4 sm:$0xff]  }
  0x64   :  { %2182 = vmatpush2.bf16.msra.mxu1 %v3089_v9  ;;  %2110 = vmatprep.subr.bf16.mxu0 %v3094_v10  ;;  %v64_v9 = vld [vmem:[%s4585_s0 + $0x190] sm:$0xff] }
  0x65   :  { %2183 = vmatprep.subr.bf16.mxu1 %v3097_v11  ;;  %v72_v10 = vld [vmem:[%s4585_s0 + $0x1d0] sm:$0xff]  ;;  %v2642_v11 = vcombine.low %v48_v58, %v56_v59  ;;  %v3214_v58 = vld [vmem:[%s4584_s1 + $0x4a4] ss:$8 sps:$4 sm:$0xff]  }
  0x66   :  { %v3217_v59 = vld [vmem:[%s4584_s1 + $0x5a4] ss:$8 sps:$4 sm:$0xff]  }
  0x67   :  { %2111 = vmatpush2.bf16.msra.mxu0 %v3092_v12  ;;  %v2644_v12 = vcombine.low %v49_v62, %v57_v63  ;;  %v3220_v62 = vld [vmem:[%s4584_s1 + $0x494] ss:$8 sps:$4 sm:$0xff]  }
  0x68   :  { %2184 = vmatpush2.bf16.msra.mxu1 %v3095_v13  ;;  %2112 = vmatprep.subr.bf16.mxu0 %v3100_v14  ;;  %v65_v13 = vld [vmem:[%s4585_s0 + $0x198] sm:$0xff] }
  0x69   :  { %2185 = vmatprep.subr.bf16.mxu1 %v3103_v15  ;;  %v73_v14 = vld [vmem:[%s4585_s0 + $0x1d8] sm:$0xff] }
  0x6a   :  { %v3161_v15 = vld [vmem:[%s4584_s1 + $0x530] ss:$8 sps:$4 sm:$0xff]   ;;  %v3223_v63 = vld [vmem:[%s4584_s1 + $0x594] ss:$8 sps:$4 sm:$0xff]  }
  0x6b   :  { %2113 = vmatpush2.bf16.msra.mxu0 %v3098_v16  ;;  %v3166_v16 = vld [vmem:[%s4584_s1 + $0x424] ss:$8 sps:$4 sm:$0xff]  }
  0x6c   :  { %2186 = vmatpush2.bf16.msra.mxu1 %v3101_v17  ;;  %2114 = vmatprep.subr.bf16.mxu0 %v3106_v18  ;;  %v3169_v17 = vld [vmem:[%s4584_s1 + $0x524] ss:$8 sps:$4 sm:$0xff]   ;;  %v2659_v18 = vcombine.high %v64_v9, %v72_v10 }
  0x6d   :  { %2187 = vmatprep.subr.bf16.mxu1 %v3109_v19  ;;  %v2661_v19 = vcombine.high %v65_v13, %v73_v14 }
  0x6f   :  { %2115 = vmatpush2.bf16.msra.mxu0 %v3104_v20  ;;  %v3164_v20 = vld [vmem:[%s4584_s1 + $0x420] ss:$8 sps:$4 sm:$0xff]  }
  0x70   :  { %2188 = vmatpush2.bf16.msra.mxu1 %v3107_v21  ;;  %2116 = vmatprep.subr.bf16.mxu0 %v3112_v22  ;;  %v3167_v21 = vld [vmem:[%s4584_s1 + $0x520] ss:$8 sps:$4 sm:$0xff]   ;;  %v3172_v22 = vld [vmem:[%s4584_s1 + $0x414] ss:$8 sps:$4 sm:$0xff]  }
  0x71   :  { %2189 = vmatprep.subr.bf16.mxu1 %v3115_v23  ;;  %v3175_v23 = vld [vmem:[%s4584_s1 + $0x514] ss:$8 sps:$4 sm:$0xff]  }
  0x73   :  { %2117 = vmatpush2.bf16.msra.mxu0 %v3110_v24  ;;  %v3923_v24 = vld [vmem:[%s4585_s0 + $0x20] sm:$0xff] }
  0x74   :  { %2190 = vmatpush2.bf16.msra.mxu1 %v3113_v25  ;;  %2118 = vmatprep.subr.bf16.mxu0 %v3118_v26  ;;  %v3928_v25 = vld [vmem:[%s4585_s0 + $0x60] sm:$0xff]  ;;  %v2658_v26 = vcombine.low %v64_v9, %v72_v10 }
  0x75   :  { %2191 = vmatprep.subr.bf16.mxu1 %v3121_v27  ;;  %v2660_v27 = vcombine.low %v65_v13, %v73_v14  ;;  %v2614_v9 = vcombine.low %v3923_v24, %v3928_v25  ;;  %v43_v13 = vld [vmem:[%s4585_s0 + $0xe8] sm:$0xff]  ;;  %v3230_v14 = vld [vmem:[%s4584_s1 + $0x670] ss:$8 sps:$4 sm:$0xff]  }
  0x77   :  { %2119 = vmatpush2.bf16.msra.mxu0 %v3116_v28  ;;  %v3933_v28 = vld [vmem:[%s4585_s0 + $0x28] sm:$0xff] }
  0x78   :  { %2192 = vmatpush2.bf16.msra.mxu1 %v3119_v29  ;;  %2120 = vmatprep.subr.bf16.mxu0 %v3124_v30  ;;  %v3938_v29 = vld [vmem:[%s4585_s0 + $0x68] sm:$0xff]  ;;  %v3170_v30 = vld [vmem:[%s4584_s1 + $0x410] ss:$8 sps:$4 sm:$0xff]  }
  0x79   :  { %2193 = vmatprep.subr.bf16.mxu1 %v3127_v31  ;;  %v3173_v31 = vld [vmem:[%s4584_s1 + $0x510] ss:$8 sps:$4 sm:$0xff]   ;;  %v2616_v10 = vcombine.low %v3933_v28, %v3938_v29 }
  0x7b   :  { %2121 = vmatpush2.bf16.msra.mxu0 %v3122_v32  ;;  %v3178_v32 = vld [vmem:[%s4584_s1 + $0x404] ss:$8 sps:$4 sm:$0xff]  }
  0x7c   :  { %2194 = vmatpush2.bf16.msra.mxu1 %v3125_v33  ;;  %2122 = vmatprep.subr.bf16.mxu0 %v3130_v34  ;;  %v3181_v33 = vld [vmem:[%s4584_s1 + $0x504] ss:$8 sps:$4 sm:$0xff]   ;;  %v2615_v34 = vcombine.high %v3923_v24, %v3928_v25 }
  0x7d   :  { %2195 = vmatprep.subr.bf16.mxu1 %v3133_v35  ;;  %v2617_v35 = vcombine.high %v3933_v28, %v3938_v29  ;;  %v50_v24 = vld [vmem:[%s4585_s0 + $0x120] sm:$0xff]  ;;  %v51_v28 = vld [vmem:[%s4585_s0 + $0x128] sm:$0xff] }
  0x7e   :  { %v59_v29 = vld [vmem:[%s4585_s0 + $0x168] sm:$0xff] }
  0x7f   :  { %2123 = vmatpush2.bf16.msra.mxu0 %v3128_v36  ;;  %v3176_v36 = vld [vmem:[%s4584_s1 + $0x400] ss:$8 sps:$4 sm:$0xff]  }
  0x80   :  { %2196 = vmatpush2.bf16.msra.mxu1 %v3131_v37  ;;  %2238 = vmatprep.subr.bf16.mxu0 %v3136_v38  ;;  %v3179_v37 = vld [vmem:[%s4584_s1 + $0x500] ss:$8 sps:$4 sm:$0xff]   ;;  %v3184_v38 = vld [vmem:[%s4584_s1 + $0x4f4] ss:$8 sps:$4 sm:$0xff]  }
  0x81   :  { %2311 = vmatprep.subr.bf16.mxu1 %v3139_v39  ;;  %v3187_v39 = vld [vmem:[%s4584_s1 + $0x5f4] ss:$8 sps:$4 sm:$0xff]  }
  0x82   :  { %2125 = vmatmul.mubr.bf16.vlgmr.msra.gmra.mxu0 %v2610_v44  ;;  %v3188_v44 = vld [vmem:[%s4584_s1 + $0x4e0] ss:$8 sps:$4 sm:$0xff]  }
  0x83   :  { %2198 = vmatmul.mubr.bf16.vlgmr.msra.gmra.mxu1 %v2612_v45  ;;  %2239 = vmatpush1.bf16.msra.mxu0 %v3134_v40  ;;  %v3182_v40 = vld [vmem:[%s4584_s1 + $0x4f0] ss:$8 sps:$4 sm:$0xff]   ;;  %v3191_v45 = vld [vmem:[%s4584_s1 + $0x5e0] ss:$8 sps:$4 sm:$0xff]  }
  0x84   :  { %2312 = vmatpush1.bf16.msra.mxu1 %v3137_v41  ;;  %2240 = vmatprep.subr.bf16.mxu0 %v3142_v48  ;;  %v3185_v41 = vld [vmem:[%s4584_s1 + $0x5f0] ss:$8 sps:$4 sm:$0xff]  }
  0x85   :  { %2313 = vmatprep.subr.bf16.mxu1 %v3145_v49  ;;  %2134 = vmatprep.mubr.bf16.mxu0 %v2627_v50  ;;  %v3194_v48 = vld [vmem:[%s4584_s1 + $0x4d0] ss:$8 sps:$4 sm:$0xff]   ;;  %v3202_v50 = vld [vmem:[%s4584_s1 + $0x4c4] ss:$8 sps:$4 sm:$0xff]  }
  0x86   :  { %2207 = vmatprep.mubr.bf16.mxu1 %v2629_v51  ;;  %v3197_v49 = vld [vmem:[%s4584_s1 + $0x5d0] ss:$8 sps:$4 sm:$0xff]   ;;  %v3205_v51 = vld [vmem:[%s4584_s1 + $0x5c4] ss:$8 sps:$4 sm:$0xff]  }
  0x87   :  { %2241 = vmatpush1.bf16.msra.mxu0 %v3140_v52  ;;  %v3200_v52 = vld [vmem:[%s4584_s1 + $0x4c0] ss:$8 sps:$4 sm:$0xff]  }
  0x88   :  { %2314 = vmatpush1.bf16.msra.mxu1 %v3143_v53  ;;  %2242 = vmatprep.subr.bf16.mxu0 %v3148_v54  ;;  %v3203_v53 = vld [vmem:[%s4584_s1 + $0x5c0] ss:$8 sps:$4 sm:$0xff]   ;;  %v3208_v54 = vld [vmem:[%s4584_s1 + $0x4b4] ss:$8 sps:$4 sm:$0xff]  }
  0x89   :  { %2315 = vmatprep.subr.bf16.mxu1 %v3151_v55  ;;  %v3211_v55 = vld [vmem:[%s4584_s1 + $0x5b4] ss:$8 sps:$4 sm:$0xff]  }
  0x8a   :  { %2135 = vmatmul.mubr.bf16.gmra.mxu0 %v2626_v60  ;;  %v3212_v60 = vld [vmem:[%s4584_s1 + $0x4a0] ss:$8 sps:$4 sm:$0xff]  }
  0x8b   :  { %2208 = vmatmul.mubr.bf16.gmra.mxu1 %v2628_v61  ;;  %2243 = vmatpush1.bf16.msra.mxu0 %v3146_v56  ;;  %v3206_v56 = vld [vmem:[%s4584_s1 + $0x4b0] ss:$8 sps:$4 sm:$0xff]   ;;  %v3215_v61 = vld [vmem:[%s4584_s1 + $0x5a0] ss:$8 sps:$4 sm:$0xff]  }
  0x8c   :  { %2316 = vmatpush1.bf16.msra.mxu1 %v3149_v57  ;;  %2244 = vmatprep.subr.bf16.mxu0 %v3154_v0  ;;  %v3209_v57 = vld [vmem:[%s4584_s1 + $0x5b0] ss:$8 sps:$4 sm:$0xff]  }
  0x8d   :  { %2317 = vmatprep.subr.bf16.mxu1 %v3157_v1  ;;  %2144 = vmatprep.mubr.bf16.mxu0 %v2643_v2  ;;  %v3218_v0 = vld [vmem:[%s4584_s1 + $0x490] ss:$8 sps:$4 sm:$0xff]   ;;  %v3226_v2 = vld [vmem:[%s4584_s1 + $0x484] ss:$8 sps:$4 sm:$0xff]  }
  0x8e   :  { %2217 = vmatprep.mubr.bf16.mxu1 %v2645_v3  ;;  %v3221_v1 = vld [vmem:[%s4584_s1 + $0x590] ss:$8 sps:$4 sm:$0xff]   ;;  %v3229_v3 = vld [vmem:[%s4584_s1 + $0x584] ss:$8 sps:$4 sm:$0xff]  }
  0x8f   :  { %2245 = vmatpush1.bf16.msra.mxu0 %v3152_v4  ;;  %v3224_v4 = vld [vmem:[%s4584_s1 + $0x480] ss:$8 sps:$4 sm:$0xff]  }
  0x90   :  { %2318 = vmatpush1.bf16.msra.mxu1 %v3155_v5  ;;  %2246 = vmatprep.subr.bf16.mxu0 %v3160_v6  ;;  %v3227_v5 = vld [vmem:[%s4584_s1 + $0x580] ss:$8 sps:$4 sm:$0xff]   ;;  %v3232_v6 = vld [vmem:[%s4584_s1 + $0x674] ss:$8 sps:$4 sm:$0xff]  }
  0x91   :  { %2319 = vmatprep.subr.bf16.mxu1 %v3163_v7  ;;  %v3235_v7 = vld [vmem:[%s4584_s1 + $0x774] ss:$8 sps:$4 sm:$0xff]  }
  0x92   :  { %2145 = vmatmul.mubr.bf16.gmra.mxu0 %v2642_v11  ;;  %v42_v11 = vld [vmem:[%s4585_s0 + $0xe0] sm:$0xff] }
  0x93   :  { %2218 = vmatmul.mubr.bf16.gmra.mxu1 %v2644_v12  ;;  %2247 = vmatpush1.bf16.msra.mxu0 %v3158_v8  ;;  %v34_v8 = vld [vmem:[%s4585_s0 + $0xa0] sm:$0xff]  ;;  %v35_v12 = vld [vmem:[%s4585_s0 + $0xa8] sm:$0xff] }
  0x94   :  { %2320 = vmatpush1.bf16.msra.mxu1 %v3161_v15  ;;  %2248 = vmatprep.subr.bf16.mxu0 %v3166_v16  ;;  %v3233_v15 = vld [vmem:[%s4584_s1 + $0x770] ss:$8 sps:$4 sm:$0xff]   ;;  %v3238_v16 = vld [vmem:[%s4584_s1 + $0x664] ss:$8 sps:$4 sm:$0xff]   ;;  %v2630_v25 = vcombine.low %v34_v8, %v42_v11 }
  0x95   :  { %2321 = vmatprep.subr.bf16.mxu1 %v3169_v17  ;;  %2154 = vmatprep.mubr.bf16.mxu0 %v2659_v18  ;;  %v3241_v17 = vld [vmem:[%s4584_s1 + $0x764] ss:$8 sps:$4 sm:$0xff]   ;;  %v2631_v18 = vcombine.high %v34_v8, %v42_v11  ;;  %v3278_v8 = vld [vmem:[%s4584_s1 + $0x6f0] ss:$8 sps:$4 sm:$0xff]  }
  0x96   :  { %2227 = vmatprep.mubr.bf16.mxu1 %v2661_v19  ;;  %v2633_v19 = vcombine.high %v35_v12, %v43_v13  ;;  %v3289_v11 = vld [vmem:[%s4584_s1 + $0x7e4] ss:$8 sps:$4 sm:$0xff]  }
  0x97   :  { %2249 = vmatpush1.bf16.msra.mxu0 %v3164_v20  ;;  %v3236_v20 = vld [vmem:[%s4584_s1 + $0x660] ss:$8 sps:$4 sm:$0xff]  }
  0x98   :  { %2322 = vmatpush1.bf16.msra.mxu1 %v3167_v21  ;;  %2250 = vmatprep.subr.bf16.mxu0 %v3172_v22  ;;  %v3239_v21 = vld [vmem:[%s4584_s1 + $0x760] ss:$8 sps:$4 sm:$0xff]   ;;  %v3244_v22 = vld [vmem:[%s4584_s1 + $0x654] ss:$8 sps:$4 sm:$0xff]  }
  0x99   :  { %2323 = vmatprep.subr.bf16.mxu1 %v3175_v23  ;;  %v3247_v23 = vld [vmem:[%s4584_s1 + $0x754] ss:$8 sps:$4 sm:$0xff]  }
  0x9a   :  { %2155 = vmatmul.mubr.bf16.gmra.mxu0 %v2658_v26  ;;  %v2632_v26 = vcombine.low %v35_v12, %v43_v13  ;;  %v3284_v12 = vld [vmem:[%s4584_s1 + $0x6e0] ss:$8 sps:$4 sm:$0xff]  }
  0x9b   :  { %2228 = vmatmul.mubr.bf16.gmra.mxu1 %v2660_v27  ;;  %2251 = vmatpush1.bf16.msra.mxu0 %v3170_v30  ;;  %v58_v27 = vld [vmem:[%s4585_s0 + $0x160] sm:$0xff]  ;;  %v3242_v30 = vld [vmem:[%s4584_s1 + $0x650] ss:$8 sps:$4 sm:$0xff]  }
  0x9c   :  { %2324 = vmatpush1.bf16.msra.mxu1 %v3173_v31  ;;  %2252 = vmatprep.subr.bf16.mxu0 %v3178_v32  ;;  %v3245_v31 = vld [vmem:[%s4584_s1 + $0x750] ss:$8 sps:$4 sm:$0xff]   ;;  %v3250_v32 = vld [vmem:[%s4584_s1 + $0x644] ss:$8 sps:$4 sm:$0xff]   ;;  %v3287_v13 = vld [vmem:[%s4584_s1 + $0x7e0] ss:$8 sps:$4 sm:$0xff]  }
  0x9d   :  { %2325 = vmatprep.subr.bf16.mxu1 %v3181_v33  ;;  %2270 = vmatprep.mubr.bf16.mxu0 %v2615_v34  ;;  %v3253_v33 = vld [vmem:[%s4584_s1 + $0x744] ss:$8 sps:$4 sm:$0xff]   ;;  %v2647_v34 = vcombine.high %v50_v24, %v58_v27 }
  0x9e   :  { %2343 = vmatprep.mubr.bf16.mxu1 %v2617_v35  ;;  %v2649_v35 = vcombine.high %v51_v28, %v59_v29 }
  0x9f   :  { %2253 = vmatpush1.bf16.msra.mxu0 %v3176_v36  ;;  %v3248_v36 = vld [vmem:[%s4584_s1 + $0x640] ss:$8 sps:$4 sm:$0xff]  }
  0xa0   :  { %2326 = vmatpush1.bf16.msra.mxu1 %v3179_v37  ;;  %2254 = vmatprep.subr.bf16.mxu0 %v3184_v38  ;;  %v3251_v37 = vld [vmem:[%s4584_s1 + $0x740] ss:$8 sps:$4 sm:$0xff]   ;;  %v3256_v38 = vld [vmem:[%s4584_s1 + $0x634] ss:$8 sps:$4 sm:$0xff]  }
  0xa1   :  { %2327 = vmatprep.subr.bf16.mxu1 %v3187_v39  ;;  %v3259_v39 = vld [vmem:[%s4584_s1 + $0x734] ss:$8 sps:$4 sm:$0xff]  }
  0xa3   :  { %2255 = vmatpush2.bf16.msra.mxu0 %v3182_v40  ;;  %v66_v40 = vld [vmem:[%s4585_s0 + $0x1a0] sm:$0xff] }
  0xa4   :  { %2328 = vmatpush2.bf16.msra.mxu1 %v3185_v41  ;;  %2256 = vmatprep.subr.bf16.mxu0 %v3190_v42  ;;  %v2646_v41 = vcombine.low %v50_v24, %v58_v27  ;;  %v2648_v42 = vcombine.low %v51_v28, %v59_v29  ;;  %v3302_v24 = vld [vmem:[%s4584_s1 + $0x6b0] ss:$8 sps:$4 sm:$0xff]   ;;  %v3313_v27 = vld [vmem:[%s4584_s1 + $0x7a4] ss:$8 sps:$4 sm:$0xff]   ;;  %v3308_v28 = vld [vmem:[%s4584_s1 + $0x6a0] ss:$8 sps:$4 sm:$0xff]  }
  0xa5   :  { %2329 = vmatprep.subr.bf16.mxu1 %v3193_v43  ;;  %v74_v43 = vld [vmem:[%s4585_s0 + $0x1e0] sm:$0xff] }
  0xa6   :  { %v3311_v29 = vld [vmem:[%s4584_s1 + $0x7a0] ss:$8 sps:$4 sm:$0xff]  }
  0xa7   :  { %2257 = vmatpush2.bf16.msra.mxu0 %v3188_v44  ;;  %v67_v44 = vld [vmem:[%s4585_s0 + $0x1a8] sm:$0xff] }
  0xa8   :  { %2330 = vmatpush2.bf16.msra.mxu1 %v3191_v45  ;;  %2258 = vmatprep.subr.bf16.mxu0 %v3196_v46  ;;  %v75_v45 = vld [vmem:[%s4585_s0 + $0x1e8] sm:$0xff]  ;;  %v3254_v46 = vld [vmem:[%s4584_s1 + $0x630] ss:$8 sps:$4 sm:$0xff]  }
  0xa9   :  { %2331 = vmatprep.subr.bf16.mxu1 %v3199_v47  ;;  %v3257_v47 = vld [vmem:[%s4584_s1 + $0x730] ss:$8 sps:$4 sm:$0xff]  }
  0xab   :  { %2259 = vmatpush2.bf16.msra.mxu0 %v3194_v48  ;;  %v3262_v48 = vld [vmem:[%s4584_s1 + $0x624] ss:$8 sps:$4 sm:$0xff]  }
  0xac   :  { %2332 = vmatpush2.bf16.msra.mxu1 %v3197_v49  ;;  %2260 = vmatprep.subr.bf16.mxu0 %v3202_v50  ;;  %v3265_v49 = vld [vmem:[%s4584_s1 + $0x724] ss:$8 sps:$4 sm:$0xff]   ;;  %v2663_v50 = vcombine.high %v66_v40, %v74_v43 }
  0xad   :  { %2333 = vmatprep.subr.bf16.mxu1 %v3205_v51  ;;  %v2665_v51 = vcombine.high %v67_v44, %v75_v45 }
  0xaf   :  { %2261 = vmatpush2.bf16.msra.mxu0 %v3200_v52  ;;  %v3260_v52 = vld [vmem:[%s4584_s1 + $0x620] ss:$8 sps:$4 sm:$0xff]  }
  0xb0   :  { %2334 = vmatpush2.bf16.msra.mxu1 %v3203_v53  ;;  %2262 = vmatprep.subr.bf16.mxu0 %v3208_v54  ;;  %v3263_v53 = vld [vmem:[%s4584_s1 + $0x720] ss:$8 sps:$4 sm:$0xff]   ;;  %v3268_v54 = vld [vmem:[%s4584_s1 + $0x614] ss:$8 sps:$4 sm:$0xff]  }
  0xb1   :  { %2335 = vmatprep.subr.bf16.mxu1 %v3211_v55  ;;  %v3271_v55 = vld [vmem:[%s4584_s1 + $0x714] ss:$8 sps:$4 sm:$0xff]  }
  0xb3   :  { %2263 = vmatpush2.bf16.msra.mxu0 %v3206_v56  ;;  %v4179_v56 = vld [vmem:[%s4585_s0 + $0x30] sm:$0xff] }
  0xb4   :  { %2336 = vmatpush2.bf16.msra.mxu1 %v3209_v57  ;;  %2264 = vmatprep.subr.bf16.mxu0 %v3214_v58  ;;  %v2662_v57 = vcombine.low %v66_v40, %v74_v43  ;;  %v2664_v58 = vcombine.low %v67_v44, %v75_v45  ;;  %v334_v40 = vld [vmem:[%s4586_s2] sm:$0x3]  ;;  %v44_v43 = vld [vmem:[%s4585_s0 + $0xf0] sm:$0xff]  ;;  %v37_v44 = vld [vmem:[%s4585_s0 + $0xb8] sm:$0xff] }
  0xb5   :  { %2337 = vmatprep.subr.bf16.mxu1 %v3217_v59  ;;  %v4184_v59 = vld [vmem:[%s4585_s0 + $0x70] sm:$0xff]  ;;  %v45_v45 = vld [vmem:[%s4585_s0 + $0xf8] sm:$0xff] }
  0xb7   :  { %2265 = vmatpush2.bf16.msra.mxu0 %v3212_v60  ;;  %v4189_v60 = vld [vmem:[%s4585_s0 + $0x38] sm:$0xff] }
  0xb8   :  { %2338 = vmatpush2.bf16.msra.mxu1 %v3215_v61  ;;  %2266 = vmatprep.subr.bf16.mxu0 %v3220_v62  ;;  %v4194_v61 = vld [vmem:[%s4585_s0 + $0x78] sm:$0xff] }
  0xb9   :  { %2339 = vmatprep.subr.bf16.mxu1 %v3223_v63  ;;  %v3266_v62 = vld [vmem:[%s4584_s1 + $0x610] ss:$8 sps:$4 sm:$0xff]  }
  0xba   :  { %v3269_v63 = vld [vmem:[%s4584_s1 + $0x710] ss:$8 sps:$4 sm:$0xff]  }
  0xbb   :  { %2267 = vmatpush2.bf16.msra.mxu0 %v3218_v0  ;;  %v3274_v0 = vld [vmem:[%s4584_s1 + $0x604] ss:$8 sps:$4 sm:$0xff]  }
  0xbc   :  { %2340 = vmatpush2.bf16.msra.mxu1 %v3221_v1  ;;  %2268 = vmatprep.subr.bf16.mxu0 %v3226_v2  ;;  %v3277_v1 = vld [vmem:[%s4584_s1 + $0x704] ss:$8 sps:$4 sm:$0xff]   ;;  %v2619_v2 = vcombine.high %v4179_v56, %v4184_v59 }
  0xbd   :  { %2341 = vmatprep.subr.bf16.mxu1 %v3229_v3  ;;  %v2621_v3 = vcombine.high %v4189_v60, %v4194_v61 }
  0xbf   :  { %2269 = vmatpush2.bf16.msra.mxu0 %v3224_v4  ;;  %v3272_v4 = vld [vmem:[%s4584_s1 + $0x600] ss:$8 sps:$4 sm:$0xff]  }
  0xc0   :  { %2342 = vmatpush2.bf16.msra.mxu1 %v3227_v5  ;;  %2384 = vmatprep.subr.bf16.mxu0 %v3232_v6  ;;  %v3275_v5 = vld [vmem:[%s4584_s1 + $0x700] ss:$8 sps:$4 sm:$0xff]   ;;  %v3280_v6 = vld [vmem:[%s4584_s1 + $0x6f4] ss:$8 sps:$4 sm:$0xff]  }
  0xc1   :  { %2457 = vmatprep.subr.bf16.mxu1 %v3235_v7  ;;  %v3283_v7 = vld [vmem:[%s4584_s1 + $0x7f4] ss:$8 sps:$4 sm:$0xff]  }
  0xc2   :  { %2271 = vmatmul.mubr.bf16.vlgmr.msra.gmra.mxu0 %v2614_v9  ;;  %v3281_v9 = vld [vmem:[%s4584_s1 + $0x7f0] ss:$8 sps:$4 sm:$0xff]  }
  0xc3   :  { %2344 = vmatmul.mubr.bf16.vlgmr.msra.gmra.mxu1 %v2616_v10  ;;  %2385 = vmatpush1.bf16.msra.mxu0 %v3230_v14  ;;  %v3286_v10 = vld [vmem:[%s4584_s1 + $0x6e4] ss:$8 sps:$4 sm:$0xff]   ;;  %v3292_v14 = vld [vmem:[%s4584_s1 + $0x6d4] ss:$8 sps:$4 sm:$0xff]  }
  0xc4   :  { %2458 = vmatpush1.bf16.msra.mxu1 %v3233_v15  ;;  %2386 = vmatprep.subr.bf16.mxu0 %v3238_v16  ;;  %v3295_v15 = vld [vmem:[%s4584_s1 + $0x7d4] ss:$8 sps:$4 sm:$0xff]   ;;  %v3290_v16 = vld [vmem:[%s4584_s1 + $0x6d0] ss:$8 sps:$4 sm:$0xff]  }
  0xc5   :  { %2459 = vmatprep.subr.bf16.mxu1 %v3241_v17  ;;  %2280 = vmatprep.mubr.bf16.mxu0 %v2631_v18  ;;  %v3293_v17 = vld [vmem:[%s4584_s1 + $0x7d0] ss:$8 sps:$4 sm:$0xff]   ;;  %v3298_v18 = vld [vmem:[%s4584_s1 + $0x6c4] ss:$8 sps:$4 sm:$0xff]  }
  0xc6   :  { %2353 = vmatprep.mubr.bf16.mxu1 %v2633_v19  ;;  %v3301_v19 = vld [vmem:[%s4584_s1 + $0x7c4] ss:$8 sps:$4 sm:$0xff]  }
  0xc7   :  { %2387 = vmatpush1.bf16.msra.mxu0 %v3236_v20  ;;  %v3296_v20 = vld [vmem:[%s4584_s1 + $0x6c0] ss:$8 sps:$4 sm:$0xff]  }
  0xc8   :  { %2460 = vmatpush1.bf16.msra.mxu1 %v3239_v21  ;;  %2388 = vmatprep.subr.bf16.mxu0 %v3244_v22  ;;  %v3299_v21 = vld [vmem:[%s4584_s1 + $0x7c0] ss:$8 sps:$4 sm:$0xff]   ;;  %v3304_v22 = vld [vmem:[%s4584_s1 + $0x6b4] ss:$8 sps:$4 sm:$0xff]  }
  0xc9   :  { %2461 = vmatprep.subr.bf16.mxu1 %v3247_v23  ;;  %v3307_v23 = vld [vmem:[%s4584_s1 + $0x7b4] ss:$8 sps:$4 sm:$0xff]  }
  0xca   :  { %2281 = vmatmul.mubr.bf16.gmra.mxu0 %v2630_v25  ;;  %v3305_v25 = vld [vmem:[%s4584_s1 + $0x7b0] ss:$8 sps:$4 sm:$0xff]  }
  0xcb   :  { %2354 = vmatmul.mubr.bf16.gmra.mxu1 %v2632_v26  ;;  %2389 = vmatpush1.bf16.msra.mxu0 %v3242_v30  ;;  %v3310_v26 = vld [vmem:[%s4584_s1 + $0x6a4] ss:$8 sps:$4 sm:$0xff]   ;;  %v336_v30 = vlaneseq }
  0xcc   :  { %2462 = vmatpush1.bf16.msra.mxu1 %v3245_v31  ;;  %2390 = vmatprep.subr.bf16.mxu0 %v3250_v32  ;;  %v3316_v31 = vld [vmem:[%s4584_s1 + $0x694] ss:$8 sps:$4 sm:$0xff]  }
  0xcd   :  { %2463 = vmatprep.subr.bf16.mxu1 %v3253_v33  ;;  %2290 = vmatprep.mubr.bf16.mxu0 %v2647_v34  ;;  %v3319_v32 = vld [vmem:[%s4584_s1 + $0x794] ss:$8 sps:$4 sm:$0xff]   ;;  %v3314_v33 = vld [vmem:[%s4584_s1 + $0x690] ss:$8 sps:$4 sm:$0xff]  }
  0xce   :  { %2363 = vmatprep.mubr.bf16.mxu1 %v2649_v35  ;;  %v3317_v34 = vld [vmem:[%s4584_s1 + $0x790] ss:$8 sps:$4 sm:$0xff]   ;;  %v337_v35 = vshrl.u32 %v336_v30, 7 }
  0xcf   :  { %2391 = vmatpush1.bf16.msra.mxu0 %v3248_v36  ;;  %v3322_v36 = vld [vmem:[%s4584_s1 + $0x684] ss:$8 sps:$4 sm:$0xff]  }
  0xd0   :  { %2464 = vmatpush1.bf16.msra.mxu1 %v3251_v37  ;;  %2392 = vmatprep.subr.bf16.mxu0 %v3256_v38  ;;  %v3325_v37 = vld [vmem:[%s4584_s1 + $0x784] ss:$8 sps:$4 sm:$0xff]   ;;  %v3320_v38 = vld [vmem:[%s4584_s1 + $0x680] ss:$8 sps:$4 sm:$0xff]  }
  0xd1   :  { %2465 = vmatprep.subr.bf16.mxu1 %v3259_v39  ;;  %v3323_v39 = vld [vmem:[%s4584_s1 + $0x780] ss:$8 sps:$4 sm:$0xff]  }
  0xd2   :  { %2291 = vmatmul.mubr.bf16.gmra.mxu0 %v2646_v41  ;;  %v338_v41 = vsub.s32 0, %v337_v35 }
  0xd3   :  { %2364 = vmatmul.mubr.bf16.gmra.mxu1 %v2648_v42  ;;  %2393 = vmatpush1.bf16.msra.mxu0 %v3254_v46  ;;  %v36_v42 = vld [vmem:[%s4585_s0 + $0xb0] sm:$0xff]  ;;  %v342_v46 = vsub.s32 1, %v337_v35 }
  0xd4   :  { %2466 = vmatpush1.bf16.msra.mxu1 %v3257_v47  ;;  %2394 = vmatprep.subr.bf16.mxu0 %v3262_v48  ;;  %v2618_v47 = vcombine.low %v4179_v56, %v4184_v59  ;;  %v2620_v48 = vcombine.low %v4189_v60, %v4194_v61  ;;  %v52_v56 = vld [vmem:[%s4585_s0 + $0x130] sm:$0xff]  ;;  %v53_v60 = vld [vmem:[%s4585_s0 + $0x138] sm:$0xff] }
  0xd5   :  { %2467 = vmatprep.subr.bf16.mxu1 %v3265_v49  ;;  %2300 = vmatprep.mubr.bf16.mxu0 %v2663_v50  ;;  %v4333_v49 = vrot.slane %v334_v40, %v338_v41  ;;  %v2635_v50 = vcombine.high %v36_v42, %v44_v43  ;;  %v60_v59 = vld [vmem:[%s4585_s0 + $0x170] sm:$0xff]  ;;  %v61_v61 = vld [vmem:[%s4585_s0 + $0x178] sm:$0xff] }
  0xd6   :  { %2373 = vmatprep.mubr.bf16.mxu1 %v2665_v51  ;;  %v2637_v51 = vcombine.high %v37_v44, %v45_v45 }
  0xd7   :  { %2395 = vmatpush1.bf16.msra.mxu0 %v3260_v52  ;;  %v4335_v52 = vrot.slane %v334_v40, %v342_v46 }
  0xd8   :  { %2468 = vmatpush1.bf16.msra.mxu1 %v3263_v53  ;;  %2396 = vmatprep.subr.bf16.mxu0 %v3268_v54 }
  0xd9   :  { %2469 = vmatprep.subr.bf16.mxu1 %v3271_v55 }
  0xda   :  { %2301 = vmatmul.mubr.bf16.gmra.mxu0 %v2662_v57 }
  0xdb   :  { %2374 = vmatmul.mubr.bf16.gmra.mxu1 %v2664_v58  ;;  %2397 = vmatpush1.bf16.msra.mxu0 %v3266_v62 }
  0xdc   :  { %2470 = vmatpush1.bf16.msra.mxu1 %v3269_v63  ;;  %2398 = vmatprep.subr.bf16.mxu0 %v3274_v0 }
  0xdd   :  { %2471 = vmatprep.subr.bf16.mxu1 %v3277_v1  ;;  %2416 = vmatprep.mubr.bf16.mxu0 %v2619_v2  ;;  %v2634_v2 = vcombine.low %v36_v42, %v44_v43 }
  0xde   :  { %2489 = vmatprep.mubr.bf16.mxu1 %v2621_v3  ;;  %v2636_v3 = vcombine.low %v37_v44, %v45_v45 }
  0xdf   :  { %2399 = vmatpush1.bf16.msra.mxu0 %v3272_v4 }
  0xe0   :  { %2472 = vmatpush1.bf16.msra.mxu1 %v3275_v5  ;;  %2400 = vmatprep.subr.bf16.mxu0 %v3280_v6  ;;  %v2651_v6 = vcombine.high %v52_v56, %v60_v59 }
  0xe1   :  { %2473 = vmatprep.subr.bf16.mxu1 %v3283_v7  ;;  %v2653_v7 = vcombine.high %v53_v60, %v61_v61 }
  0xe3   :  { %2401 = vmatpush2.bf16.msra.mxu0 %v3278_v8 }
  0xe4   :  { %2474 = vmatpush2.bf16.msra.mxu1 %v3281_v9  ;;  %2402 = vmatprep.subr.bf16.mxu0 %v3286_v10 }
  0xe5   :  { %2475 = vmatprep.subr.bf16.mxu1 %v3289_v11 }
  0xe7   :  { %2403 = vmatpush2.bf16.msra.mxu0 %v3284_v12 }
  0xe8   :  { %2476 = vmatpush2.bf16.msra.mxu1 %v3287_v13  ;;  %2404 = vmatprep.subr.bf16.mxu0 %v3292_v14 }
  0xe9   :  { %2477 = vmatprep.subr.bf16.mxu1 %v3295_v15  ;;  %v68_v15 = vld [vmem:[%s4585_s0 + $0x1b0] sm:$0xff] }
  0xeb   :  { %2405 = vmatpush2.bf16.msra.mxu0 %v3290_v16 }
  0xec   :  { %2478 = vmatpush2.bf16.msra.mxu1 %v3293_v17  ;;  %2406 = vmatprep.subr.bf16.mxu0 %v3298_v18  ;;  %v76_v17 = vld [vmem:[%s4585_s0 + $0x1f0] sm:$0xff]  ;;  %v69_v18 = vld [vmem:[%s4585_s0 + $0x1b8] sm:$0xff] }
  0xed   :  { %2479 = vmatprep.subr.bf16.mxu1 %v3301_v19  ;;  %v77_v19 = vld [vmem:[%s4585_s0 + $0x1f8] sm:$0xff]  ;;  %v2666_v44 = vcombine.low %v68_v15, %v76_v17 }
  0xee   :  { %v2668_v45 = vcombine.low %v69_v18, %v77_v19 }
  0xef   :  { %2407 = vmatpush2.bf16.msra.mxu0 %v3296_v20 }
  0xf0   :  { %2480 = vmatpush2.bf16.msra.mxu1 %v3299_v21  ;;  %2408 = vmatprep.subr.bf16.mxu0 %v3304_v22 }
  0xf1   :  { %2481 = vmatprep.subr.bf16.mxu1 %v3307_v23 }
  0xf3   :  { %2409 = vmatpush2.bf16.msra.mxu0 %v3302_v24  ;;  %v2650_v24 = vcombine.low %v52_v56, %v60_v59 }
  0xf4   :  { %2482 = vmatpush2.bf16.msra.mxu1 %v3305_v25  ;;  %2410 = vmatprep.subr.bf16.mxu0 %v3310_v26  ;;  %v2652_v25 = vcombine.low %v53_v60, %v61_v61 }
  0xf5   :  { %2483 = vmatprep.subr.bf16.mxu1 %v3313_v27 }
  0xf7   :  { %2411 = vmatpush2.bf16.msra.mxu0 %v3308_v28  ;;  %v2667_v28 = vcombine.high %v68_v15, %v76_v17 }
  0xf8   :  { %2484 = vmatpush2.bf16.msra.mxu1 %v3311_v29  ;;  %2412 = vmatprep.subr.bf16.mxu0 %v3316_v31  ;;  %v2669_v29 = vcombine.high %v69_v18, %v77_v19 }
  0xf9   :  { %2485 = vmatprep.subr.bf16.mxu1 %v3319_v32 }
  0xfb   :  { %2413 = vmatpush2.bf16.msra.mxu0 %v3314_v33 }
  0xfc   :  { %2486 = vmatpush2.bf16.msra.mxu1 %v3317_v34  ;;  %2414 = vmatprep.subr.bf16.mxu0 %v3322_v36 }
  0xfd   :  { %2487 = vmatprep.subr.bf16.mxu1 %v3325_v37 }
  0xff   :  { %2415 = vmatpush2.bf16.msra.mxu0 %v3320_v38 }
 0x100   :  { %2488 = vmatpush2.bf16.msra.mxu1 %v3323_v39 }
 0x102   :  { %v1980_v53 = vpop.f32.mrf.mxu0  ;;  %2417 = vmatmul.mubr.bf16.vlgmr.msra.gmra.mxu0 %v2618_v47 }
 0x103   :  { %v2053_v54 = vpop.f32.mrf.mxu1  ;;  %2490 = vmatmul.mubr.bf16.vlgmr.msra.gmra.mxu1 %v2620_v48  ;;  %v1981_v55 = vadd.f32 %v1980_v53, %v4333_v49  ;;  %2426 = vmatprep.mubr.bf16.mxu0 %v2635_v50 }
 0x104   :  { %2499 = vmatprep.mubr.bf16.mxu1 %v2637_v51  ;;  %v1982_v57 = vpop.f32.mrf.mxu0 }
 0x105   :  { %v2055_v58 = vpop.f32.mrf.mxu1  ;;  %v4350_v62 = vadd.f32 %v2053_v54, %v1981_v55  ;;  %v1983_v63 = vadd.f32 %v1982_v57, %v4335_v52 }
 0x106   :  { %v1984_v0 = vpop.f32.mrf.mxu0 }
 0x107   :  { %v2057_v1 = vpop.f32.mrf.mxu1  ;;  %v4353_v4 = vadd.f32 %v2055_v58, %v1983_v63  ;;  %v1985_v5 = vadd.f32 %v1984_v0, %v4333_v49 }
 0x108   :  { %v1986_v8 = vpop.f32.mrf.mxu0 }
 0x109   :  { %v2059_v9 = vpop.f32.mrf.mxu1  ;;  %v4356_v10 = vadd.f32 %v2057_v1, %v1985_v5  ;;  %v1987_v11 = vadd.f32 %v1986_v8, %v4335_v52 }
 0x10a   :  { %2427 = vmatmul.mubr.bf16.gmra.mxu0 %v2634_v2  ;;  %v1990_v12 = vpop.f32.mrf.mxu0 }
 0x10b   :  { %2500 = vmatmul.mubr.bf16.gmra.mxu1 %v2636_v3  ;;  %v2063_v13 = vpop.f32.mrf.mxu1  ;;  %v4359_v14 = vadd.f32 %v2059_v9, %v1987_v11  ;;  %2436 = vmatprep.mubr.bf16.mxu0 %v2651_v6  ;;  %v1991_v16 = vadd.f32 %v1990_v12, %v4333_v49 }
 0x10c   :  { %2509 = vmatprep.mubr.bf16.mxu1 %v2653_v7  ;;  %v1992_v20 = vpop.f32.mrf.mxu0 }
 0x10d   :  { %v2065_v21 = vpop.f32.mrf.mxu1  ;;  %v1993_v22 = vadd.f32 %v1992_v20, %v4335_v52  ;;  %v4375_v23 = vadd.f32 %v2063_v13, %v1991_v16 }
 0x10e   :  { %v1994_v26 = vpop.f32.mrf.mxu0 }
 0x10f   :  { %v2067_v27 = vpop.f32.mrf.mxu1  ;;  %v1995_v30 = vadd.f32 %v1994_v26, %v4333_v49  ;;  %v4378_v31 = vadd.f32 %v2065_v21, %v1993_v22 }
 0x110   :  { %v1996_v32 = vpop.f32.mrf.mxu0 }
 0x111   :  { %v2069_v33 = vpop.f32.mrf.mxu1  ;;  %v1997_v34 = vadd.f32 %v1996_v32, %v4335_v52  ;;  %v4381_v35 = vadd.f32 %v2067_v27, %v1995_v30 }
 0x112   :  { %2437 = vmatmul.mubr.bf16.gmra.mxu0 %v2650_v24  ;;  %v2000_v36 = vpop.f32.mrf.mxu0 }
 0x113   :  { %2510 = vmatmul.mubr.bf16.gmra.mxu1 %v2652_v25  ;;  %v2073_v37 = vpop.f32.mrf.mxu1  ;;  %2446 = vmatprep.mubr.bf16.mxu0 %v2667_v28  ;;  %v2001_v38 = vadd.f32 %v2000_v36, %v4333_v49  ;;  %v4384_v39 = vadd.f32 %v2069_v33, %v1997_v34 }
 0x114   :  { %2519 = vmatprep.mubr.bf16.mxu1 %v2669_v29  ;;  %v2002_v40 = vpop.f32.mrf.mxu0 }
 0x115   :  { %v2075_v41 = vpop.f32.mrf.mxu1  ;;  %v2003_v42 = vadd.f32 %v2002_v40, %v4335_v52  ;;  %v4387_v43 = vadd.f32 %v2073_v37, %v2001_v38 }
 0x116   :  { %v2004_v46 = vpop.f32.mrf.mxu0 }
 0x117   :  { %v2077_v47 = vpop.f32.mrf.mxu1  ;;  %v2005_v48 = vadd.f32 %v2004_v46, %v4333_v49  ;;  %v4390_v50 = vadd.f32 %v2075_v41, %v2003_v42 }
 0x118   :  { %v2006_v51 = vpop.f32.mrf.mxu0 }
 0x119   :  { %v2079_v53 = vpop.f32.mrf.mxu1  ;;  %v2007_v54 = vadd.f32 %v2006_v51, %v4335_v52  ;;  %v4393_v55 = vadd.f32 %v2077_v47, %v2005_v48 }
 0x11a   :  { %2447 = vmatmul.mubr.bf16.gmra.mxu0 %v2666_v44  ;;  %v2010_v56 = vpop.f32.mrf.mxu0 }
 0x11b   :  { %2520 = vmatmul.mubr.bf16.gmra.mxu1 %v2668_v45  ;;  %v2083_v57 = vpop.f32.mrf.mxu1  ;;  %v2011_v58 = vadd.f32 %v2010_v56, %v4333_v49  ;;  %v4396_v59 = vadd.f32 %v2079_v53, %v2007_v54 }
 0x11c   :  { %v2012_v60 = vpop.f32.mrf.mxu0 }
 0x11d   :  { %v2085_v61 = vpop.f32.mrf.mxu1  ;;  %v2013_v63 = vadd.f32 %v2012_v60, %v4335_v52  ;;  %v4399_v0 = vadd.f32 %v2083_v57, %v2011_v58 }
 0x11e   :  { %v2014_v1 = vpop.f32.mrf.mxu0 }
 0x11f   :  { %v2087_v2 = vpop.f32.mrf.mxu1  ;;  %v2015_v3 = vadd.f32 %v2014_v1, %v4333_v49  ;;  %v4402_v5 = vadd.f32 %v2085_v61, %v2013_v63 }
 0x120   :  { %v2016_v6 = vpop.f32.mrf.mxu0 }
 0x121   :  { %4588 = vst [vmem:[#allocation2_spill] sm:$0xff] %v4402_v5  ;;  %v2089_v7 = vpop.f32.mrf.mxu1  ;;  %v2017_v8 = vadd.f32 %v2016_v6, %v4335_v52  ;;  %v4405_v9 = vadd.f32 %v2087_v2, %v2015_v3 }
 0x123   :  { %4589 = vst [vmem:[#allocation3_spill] sm:$0xff] %v4405_v9  ;;  %v4407_v11 = vadd.f32 %v2089_v7, %v2017_v8 }
 0x125   :  { %4590 = vst [vmem:[#allocation4_spill] sm:$0xff] %v4407_v11 }
 0x142   :  { %v2126_v12 = vpop.f32.mrf.mxu0 }
 0x143   :  { %v2199_v13 = vpop.f32.mrf.mxu1 }
 0x144   :  { %v2128_v15 = vpop.f32.mrf.mxu0 }
 0x145   :  { %v4409_v16 = vpop.f32.mrf.mxu1 }
 0x146   :  { %v2130_v17 = vpop.f32.mrf.mxu0 }
 0x147   :  { %v4411_v18 = vpop.f32.mrf.mxu1 }
 0x148   :  { %v2132_v19 = vpop.f32.mrf.mxu0 }
 0x149   :  { %v4413_v49 = vpop.f32.mrf.mxu1 }
 0x14a   :  { %v2136_v20 = vpop.f32.mrf.mxu0 }
 0x14b   :  { %v4415_v21 = vpop.f32.mrf.mxu1 }
 0x14c   :  { %v2138_v22 = vpop.f32.mrf.mxu0 }
 0x14d   :  { %v4417_v52 = vpop.f32.mrf.mxu1 }
 0x14e   :  { %v4419_v24 = vpop.f32.mrf.mxu0 }
 0x14f   :  { %v4421_v25 = vpop.f32.mrf.mxu1 }
 0x150   :  { %v4423_v26 = vpop.f32.mrf.mxu0 }
 0x151   :  { %v4425_v27 = vpop.f32.mrf.mxu1 }
 0x152   :  { %v4427_v28 = vpop.f32.mrf.mxu0 }
 0x153   :  { %v4429_v29 = vpop.f32.mrf.mxu1 }
 0x154   :  { %v4431_v30 = vpop.f32.mrf.mxu0 }
 0x155   :  { %v4433_v32 = vpop.f32.mrf.mxu1 }
 0x156   :  { %v4435_v33 = vpop.f32.mrf.mxu0 }
 0x157   :  { %v4437_v34 = vpop.f32.mrf.mxu1 }
 0x158   :  { %v4439_v36 = vpop.f32.mrf.mxu0 }
 0x159   :  { %v4441_v37 = vpop.f32.mrf.mxu1 }
 0x15a   :  { %4591 = vst [vmem:[#allocation5_spill] sm:$0xff] %v4441_v37  ;;  %v4443_v38 = vpop.f32.mrf.mxu0  ;;  %v2127_v37 = vadd.f32 %v2126_v12, %v4350_v62  ;;  %v2137_v62 = vadd.f32 %v2136_v20, %v4375_v23 }
 0x15b   :  { %v4445_v40 = vpop.f32.mrf.mxu1 }
 0x15c   :  { %4592 = vst [vmem:[#allocation6_spill] sm:$0xff] %v4445_v40  ;;  %v4447_v41 = vpop.f32.mrf.mxu0 }
 0x15d   :  { %4593 = vst [vmem:[#allocation7_spill] sm:$0xff] %v4447_v41  ;;  %v4449_v42 = vpop.f32.mrf.mxu1 }
 0x15e   :  { %4594 = vst [vmem:[#allocation8_spill] sm:$0xff] %v4449_v42  ;;  %v4451_v44 = vpop.f32.mrf.mxu0 }
 0x15f   :  { %4595 = vst [vmem:[#allocation9_spill] sm:$0xff] %v4451_v44  ;;  %v4453_v45 = vpop.f32.mrf.mxu1 }
 0x160   :  { %4596 = vst [vmem:[#allocation10_spill] sm:$0xff] %v4453_v45  ;;  %v4455_v46 = vpop.f32.mrf.mxu0 }
 0x161   :  { %4597 = vst [vmem:[#allocation11_spill] sm:$0xff] %v4455_v46  ;;  %v4457_v47 = vpop.f32.mrf.mxu1 }
 0x162   :  { %4598 = vst [vmem:[#allocation12_spill] sm:$0xff] %v4457_v47 }
 0x182   :  { %v2272_v48 = vpop.f32.mrf.mxu0 }
 0x183   :  { %v2345_v51 = vpop.f32.mrf.mxu1 }
 0x184   :  { %v2274_v53 = vpop.f32.mrf.mxu0 }
 0x185   :  { %v2347_v54 = vpop.f32.mrf.mxu1 }
 0x186   :  { %v2276_v56 = vpop.f32.mrf.mxu0 }
 0x187   :  { %v2349_v57 = vpop.f32.mrf.mxu1 }
 0x188   :  { %v2278_v58 = vpop.f32.mrf.mxu0 }
 0x189   :  { %v2351_v60 = vpop.f32.mrf.mxu1 }
 0x18a   :  { %v2282_v61 = vpop.f32.mrf.mxu0 }
 0x18b   :  { %v2355_v63 = vpop.f32.mrf.mxu1 }
 0x18c   :  { %v2284_v1 = vpop.f32.mrf.mxu0 }
 0x18d   :  { %v4459_v2 = vpop.f32.mrf.mxu1 }
 0x18e   :  { %v2286_v3 = vpop.f32.mrf.mxu0 }
 0x18f   :  { %v4461_v6 = vpop.f32.mrf.mxu1 }
 0x190   :  { %v4463_v7 = vpop.f32.mrf.mxu0 }
 0x191   :  { %v4465_v8 = vpop.f32.mrf.mxu1 }
 0x192   :  { %4599 = vst [vmem:[#allocation13_spill] sm:$0xff] %v4465_v8  ;;  %v4467_v47 = vpop.f32.mrf.mxu0 }
 0x193   :  { %v4469_v45 = vpop.f32.mrf.mxu1 }
 0x194   :  { %4600 = vst [vmem:[#allocation14_spill] sm:$0xff] %v4469_v45  ;;  %v4471_v46 = vpop.f32.mrf.mxu0 }
 0x195   :  { %4601 = vst [vmem:[#allocation15_spill] sm:$0xff] %v4471_v46  ;;  %v4473_v11 = vpop.f32.mrf.mxu1  ;;  %v2200_v46 = vadd.f32 %v2199_v13, %v2127_v37 }
 0x196   :  { %4602 = vst [vmem:[#allocation16_spill] sm:$0xff] %v4473_v11  ;;  %v4475_v42 = vpop.f32.mrf.mxu0  ;;  %v2129_v11 = vadd.f32 %v2128_v15, %v4353_v4 }
 0x197   :  { %4603 = vst [vmem:[#allocation17_spill] sm:$0xff] %v4475_v42  ;;  %v4477_v44 = vpop.f32.mrf.mxu1  ;;  %v2131_v42 = vadd.f32 %v2130_v17, %v4356_v10 }
 0x198   :  { %4604 = vst [vmem:[#allocation18_spill] sm:$0xff] %v4477_v44  ;;  %v4479_v9 = vpop.f32.mrf.mxu0 }
 0x199   :  { %4605 = vst [vmem:[#allocation19_spill] sm:$0xff] %v4479_v9  ;;  %v4481_v40 = vpop.f32.mrf.mxu1  ;;  %v2204_v12 = vadd.f32 %v4411_v18, %v2131_v42 }
 0x19a   :  { %4606 = vst [vmem:[#allocation20_spill] sm:$0xff] %v4481_v40  ;;  %v4483_v41 = vpop.f32.mrf.mxu0  ;;  %v2202_v40 = vadd.f32 %v4409_v16, %v2129_v11  ;;  %v2210_v11 = vadd.f32 %v4415_v21, %v2137_v62 }
 0x19b   :  { %4607 = vst [vmem:[#allocation21_spill] sm:$0xff] %v4483_v41  ;;  %v4485_v5 = vpop.f32.mrf.mxu1  ;;  %v2133_v41 = vadd.f32 %v2132_v19, %v4359_v14  ;;  %v2277_v17 = vadd.f32 %v2276_v56, %v2204_v12  ;;  %v2141_v14 = vadd.f32 %v4419_v24, %v4381_v35  ;;  %v2147_v35 = vadd.f32 %v4427_v28, %v4387_v43 }
 0x19c   :  { %4608 = vst [vmem:[#allocation22_spill] sm:$0xff] %v4485_v5  ;;  %v4488_v8 = vpop.f32.mrf.mxu0  ;;  %v2273_v5 = vadd.f32 %v2272_v48, %v2200_v46  ;;  %v2283_v37 = vadd.f32 %v2282_v61, %v2210_v11  ;;  %v2151_v28 = vadd.f32 %v4435_v33, %v4393_v55  ;;  %v2153_v12 = vadd.f32 %v4439_v36, %v4396_v59  ;;  %v4611_v59 = vld [vmem:[#allocation15_spill] sm:$0xff] }
 0x19d   :  { %4609 = vst [vmem:[#allocation23_spill] sm:$0xff] %v4488_v8  ;;  %v4490_v45 = vpop.f32.mrf.mxu1  ;;  %v2275_v8 = vadd.f32 %v2274_v53, %v2202_v40  ;;  %v2206_v10 = vadd.f32 %v4413_v49, %v2133_v41  ;;  %v2214_v21 = vadd.f32 %v4421_v25, %v2141_v14  ;;  %v2220_v43 = vadd.f32 %v4429_v29, %v2147_v35 }
 0x19e   :  { %4610 = vst [vmem:[#allocation24_spill] sm:$0xff] %v4490_v45  ;;  %v4494_v44 = vpop.f32.mrf.mxu0  ;;  %v2139_v45 = vadd.f32 %v2138_v22, %v4378_v31  ;;  %v2346_v15 = vadd.f32 %v2345_v51, %v2273_v5  ;;  %v2143_v22 = vadd.f32 %v4423_v26, %v4384_v39  ;;  %v2350_v5 = vadd.f32 %v2349_v57, %v2277_v17 }
 0x19f   :  { %v4496_v9 = vpop.f32.mrf.mxu1  ;;  %v2348_v19 = vadd.f32 %v2347_v54, %v2275_v8  ;;  %v2279_v18 = vadd.f32 %v2278_v58, %v2206_v10  ;;  %v2149_v39 = vadd.f32 %v4431_v30, %v4390_v50  ;;  %v2356_v26 = vadd.f32 %v2355_v63, %v2283_v37  ;;  %v4615_v37 = vld [vmem:[#allocation7_spill] sm:$0xff] }
 0x1a0   :  { %v4503_v4 = vpop.f32.mrf.mxu0  ;;  %v2212_v31 = vadd.f32 %v4417_v52, %v2139_v45  ;;  %v2216_v45 = vadd.f32 %v4425_v27, %v2143_v22  ;;  %v2287_v54 = vadd.f32 %v2286_v3, %v2214_v21  ;;  %v2293_v29 = vadd.f32 %v4467_v47, %v2220_v43  ;;  %v4612_v47 = vld [vmem:[#allocation13_spill] sm:$0xff]  ;;  %v4614_v22 = vld [vmem:[#allocation2_spill] sm:$0xff] }
 0x1a1   :  { %v4505_v13 = vpop.f32.mrf.mxu1  ;;  %v2352_v51 = vadd.f32 %v2351_v60, %v2279_v18  ;;  %v2222_v3 = vadd.f32 %v4433_v32, %v2149_v39  ;;  %v2224_v11 = vadd.f32 %v4437_v34, %v2151_v28  ;;  %v2157_v32 = vadd.f32 %v4443_v38, %v4399_v0  ;;  %v4617_v34 = vld [vmem:[#allocation17_spill] sm:$0xff]  ;;  %v4624_v28 = vld [vmem:[#allocation4_spill] sm:$0xff] }
 0x1a2   :  { %v2285_v24 = vadd.f32 %v2284_v1, %v2212_v31  ;;  %v2289_v62 = vadd.f32 %v4463_v7, %v2216_v45  ;;  %v2360_v10 = vadd.f32 %v4461_v6, %v2287_v54  ;;  %v4621_v45 = vld [vmem:[#allocation16_spill] sm:$0xff] }
 0x1a3   :  { %v2295_v36 = vadd.f32 %v4611_v59, %v2222_v3 }
 0x1a4   :  { %v2358_v60 = vadd.f32 %v4459_v2, %v2285_v24 }
 0x1a5   :  { %v2368_v39 = vadd.f32 %v4621_v45, %v2295_v36 }
 0x1c2   :  { %v2418_v16 = vpop.f32.mrf.mxu0 }
 0x1c3   :  { %v2491_v23 = vpop.f32.mrf.mxu1  ;;  %v2419_v20 = vadd.f32 %v2418_v16, %v2346_v15  ;;  %v2362_v16 = vadd.f32 %v4612_v47, %v2289_v62  ;;  %v4631_v47 = vld [vmem:[#allocation12_spill] sm:$0xff] }
 0x1c4   :  { %v2420_v40 = vpop.f32.mrf.mxu0 }
 0x1c5   :  { %v2493_v49 = vpop.f32.mrf.mxu1  ;;  %v2492_v41 = vadd.f32 %v2491_v23, %v2419_v20  ;;  %v2421_v42 = vadd.f32 %v2420_v40, %v2348_v19  ;;  %v4613_v20 = vld [vmem:[#allocation5_spill] sm:$0xff]  ;;  %v2159_v40 = vadd.f32 %v4615_v37, %v4614_v22 }
 0x1c6   :  { %v2422_v46 = vpop.f32.mrf.mxu0  ;;  %v2226_v31 = vadd.f32 %v4613_v20, %v2153_v12 }
 0x1c7   :  { %v2495_v48 = vpop.f32.mrf.mxu1  ;;  %v2494_v53 = vadd.f32 %v2493_v49, %v2421_v42  ;;  %v2423_v52 = vadd.f32 %v2422_v46, %v2350_v5  ;;  %v2530_v58 = vmax.f32 %v2492_v41, 0.0  ;;  %v4616_v49 = vld [vmem:[#allocation14_spill] sm:$0xff]  ;;  %v2297_v41 = vadd.f32 %v4617_v34, %v2224_v11 }
 0x1c8   :  { %v2424_v56 = vpop.f32.mrf.mxu0  ;;  %v2366_v5 = vadd.f32 %v4616_v49, %v2293_v29  ;;  %v4618_v46 = vld [vmem:[#allocation6_spill] sm:$0xff] }
 0x1c9   :  { %v2497_v57 = vpop.f32.mrf.mxu1  ;;  %v2531_v25 = vmax.f32 %v2494_v53, 0.0  ;;  %v2496_v61 = vadd.f32 %v2495_v48, %v2423_v52  ;;  %v2425_v8 = vadd.f32 %v2424_v56, %v2352_v51  ;;  %v2230_v48 = vadd.f32 %v4618_v46, %v2157_v32  ;;  %v4619_v51 = vld [vmem:[#allocation3_spill] sm:$0xff]  ;;  %v4620_v53 = vld [vmem:[#allocation9_spill] sm:$0xff]  ;;  %v4630_v32 = vld [vmem:[#allocation20_spill] sm:$0xff] }
 0x1ca   :  { %v2428_v1 = vpop.f32.mrf.mxu0  ;;  %v2161_v52 = vadd.f32 %v4620_v53, %v4619_v51  ;;  %v4622_v56 = vld [vmem:[#allocation19_spill] sm:$0xff] }
 0x1cb   :  { %v2501_v27 = vpop.f32.mrf.mxu1  ;;  %v2934_v50 = vpack.c.bf16 %v2531_v25, %v2530_v58  ;;  %v2498_v30 = vadd.f32 %v2497_v57, %v2425_v8  ;;  %v2429_v63 = vadd.f32 %v2428_v1, %v2356_v26  ;;  %v2532_v33 = vmax.f32 %v2496_v61, 0.0  ;;  %v4623_v8 = vld [vmem:[#allocation8_spill] sm:$0xff] }
 0x1cc   :  { %v2430_v15 = vpop.f32.mrf.mxu0  ;;  %v2299_v57 = vadd.f32 %v4622_v56, %v2226_v31  ;;  %v2232_v43 = vadd.f32 %v4623_v8, %v2159_v40 }
 0x1cd   :  { %v2503_v55 = vpop.f32.mrf.mxu1  ;;  %2594 = vst [vmem:[%s4587_s3] sm:$0xff] %v2934_v50  ;;  %v2533_v2 = vmax.f32 %v2498_v30, 0.0  ;;  %v2502_v7 = vadd.f32 %v2501_v27, %v2429_v63  ;;  %v2431_v17 = vadd.f32 %v2430_v15, %v2358_v60  ;;  %v4625_v60 = vld [vmem:[#allocation11_spill] sm:$0xff]  ;;  %v4626_v27 = vld [vmem:[#allocation18_spill] sm:$0xff]  ;;  %v4627_v50 = vld [vmem:[#allocation21_spill] sm:$0xff] }
 0x1ce   :  { %v2432_v6 = vpop.f32.mrf.mxu0  ;;  %v2163_v1 = vadd.f32 %v4625_v60, %v4624_v28  ;;  %v2370_v62 = vadd.f32 %v4626_v27, %v2297_v41  ;;  %v2303_v30 = vadd.f32 %v4627_v50, %v2230_v48  ;;  %v2372_v59 = vadd.f32 %v4630_v32, %v2299_v57 }
 0x1cf   :  { %v2505_v14 = vpop.f32.mrf.mxu1  ;;  %v2935_v23 = vpack.c.bf16 %v2533_v2, %v2532_v33  ;;  %v2504_v19 = vadd.f32 %v2503_v55, %v2431_v17  ;;  %v2433_v18 = vadd.f32 %v2432_v6, %v2360_v10  ;;  %v2534_v38 = vmax.f32 %v2502_v7, 0.0  ;;  %v4628_v55 = vld [vmem:[#allocation10_spill] sm:$0xff]  ;;  %v4629_v2 = vld [vmem:[#allocation23_spill] sm:$0xff] }
 0x1d0   :  { %v2434_v42 = vpop.f32.mrf.mxu0  ;;  %v2234_v33 = vadd.f32 %v4628_v55, %v2161_v52  ;;  %v2305_v7 = vadd.f32 %v4629_v2, %v2232_v43 }
 0x1d1   :  { %v2507_v0 = vpop.f32.mrf.mxu1  ;;  %2595 = vst [vmem:[%s4587_s3 + $0x8] sm:$0xff] %v2935_v23  ;;  %v2535_v21 = vmax.f32 %v2504_v19, 0.0  ;;  %v2506_v35 = vadd.f32 %v2505_v14, %v2433_v18  ;;  %v2435_v24 = vadd.f32 %v2434_v42, %v2362_v16  ;;  %v2236_v16 = vadd.f32 %v4631_v47, %v2163_v1  ;;  %v4632_v23 = vld [vmem:[#allocation22_spill] sm:$0xff] }
 0x1d2   :  { %v2438_v26 = vpop.f32.mrf.mxu0  ;;  %v2376_v19 = vadd.f32 %v4632_v23, %v2303_v30  ;;  %v2307_v18 = vadd.f32 %v4494_v44, %v2234_v33 }
 0x1d3   :  { %v2511_v54 = vpop.f32.mrf.mxu1  ;;  %v2936_v58 = vpack.c.bf16 %v2535_v21, %v2534_v38  ;;  %v2508_v25 = vadd.f32 %v2507_v0, %v2435_v24  ;;  %v2439_v61 = vadd.f32 %v2438_v26, %v2366_v5  ;;  %v2536_v12 = vmax.f32 %v2506_v35, 0.0  ;;  %v4633_v5 = vld [vmem:[#allocation24_spill] sm:$0xff] }
 0x1d4   :  { %v2440_v63 = vpop.f32.mrf.mxu0  ;;  %v2378_v34 = vadd.f32 %v4633_v5, %v2305_v7  ;;  %v2309_v0 = vadd.f32 %v4503_v4, %v2236_v16  ;;  %v2380_v44 = vadd.f32 %v4496_v9, %v2307_v18 }
 0x1d5   :  { %v2513_v3 = vpop.f32.mrf.mxu1  ;;  %2596 = vst [vmem:[%s4587_s3 + $0x10] sm:$0xff] %v2936_v58  ;;  %v2537_v10 = vmax.f32 %v2508_v25, 0.0  ;;  %v2512_v29 = vadd.f32 %v2511_v54, %v2439_v61  ;;  %v2441_v15 = vadd.f32 %v2440_v63, %v2368_v39 }
 0x1d6   :  { %v2442_v17 = vpop.f32.mrf.mxu0  ;;  %v2382_v26 = vadd.f32 %v4505_v13, %v2309_v0 }
 0x1d7   :  { %v2515_v11 = vpop.f32.mrf.mxu1  ;;  %v2937_v36 = vpack.c.bf16 %v2537_v10, %v2536_v12  ;;  %v2514_v6 = vadd.f32 %v2513_v3, %v2441_v15  ;;  %v2443_v14 = vadd.f32 %v2442_v17, %v2370_v62  ;;  %v2538_v22 = vmax.f32 %v2512_v29, 0.0 }
 0x1d8   :  { %v2444_v20 = vpop.f32.mrf.mxu0 }
 0x1d9   :  { %v2517_v31 = vpop.f32.mrf.mxu1  ;;  %2597 = vst [vmem:[%s4587_s3 + $0x18] sm:$0xff] %v2937_v36  ;;  %v2539_v37 = vmax.f32 %v2514_v6, 0.0  ;;  %v2516_v40 = vadd.f32 %v2515_v11, %v2443_v14  ;;  %v2445_v49 = vadd.f32 %v2444_v20, %v2372_v59 }
 0x1da   :  { %v2448_v41 = vpop.f32.mrf.mxu0 }
 0x1db   :  { %v2521_v42 = vpop.f32.mrf.mxu1  ;;  %v2938_v38 = vpack.c.bf16 %v2539_v37, %v2538_v22  ;;  %v2518_v21 = vadd.f32 %v2517_v31, %v2445_v49  ;;  %v2449_v35 = vadd.f32 %v2448_v41, %v2376_v19  ;;  %v2540_v48 = vmax.f32 %v2516_v40, 0.0 }
 0x1dc   :  { %v2450_v24 = vpop.f32.mrf.mxu0 }
 0x1dd   :  { %v2523_v46 = vpop.f32.mrf.mxu1  ;;  %2598 = vst [vmem:[%s4587_s3 + $0x20] sm:$0xff] %v2938_v38  ;;  %v2541_v51 = vmax.f32 %v2518_v21, 0.0  ;;  %v2522_v53 = vadd.f32 %v2521_v42, %v2449_v35  ;;  %v2451_v52 = vadd.f32 %v2450_v24, %v2378_v34 }
 0x1de   :  { %v2452_v45 = vpop.f32.mrf.mxu0 }
 0x1df   :  { %v2525_v39 = vpop.f32.mrf.mxu1  ;;  %v2939_v4 = vpack.c.bf16 %v2541_v51, %v2540_v48  ;;  %v2524_v54 = vadd.f32 %v2523_v46, %v2451_v52  ;;  %v2453_v56 = vadd.f32 %v2452_v45, %v2380_v44  ;;  %v2542_v9 = vmax.f32 %v2522_v53, 0.0 }
 0x1e0   :  { %v2454_v57 = vpop.f32.mrf.mxu0 }
 0x1e1   :  { %2599 = vst [vmem:[%s4587_s3 + $0x28] sm:$0xff] %v2939_v4  ;;  %v2543_v58 = vmax.f32 %v2524_v54, 0.0  ;;  %v2526_v25 = vadd.f32 %v2525_v39, %v2453_v56  ;;  %v2455_v61 = vadd.f32 %v2454_v57, %v2382_v26  ;;  %v2527_v8 = vpop.f32.mrf.mxu1 }
 0x1e3   :  { %v2940_v43 = vpack.c.bf16 %v2543_v58, %v2542_v9  ;;  %v2528_v28 = vadd.f32 %v2527_v8, %v2455_v61  ;;  %v2544_v13 = vmax.f32 %v2526_v25, 0.0 }
 0x1e5   :  { %2600 = vst [vmem:[%s4587_s3 + $0x30] sm:$0xff] %v2940_v43  ;;  %v2545_v60 = vmax.f32 %v2528_v28, 0.0 }
 0x1e7   :  { %v2941_v1 = vpack.c.bf16 %v2545_v60, %v2544_v13 }
 0x1e9   :  { %2601 = vst [vmem:[%s4587_s3 + $0x38] sm:$0xff] %v2941_v1 }

// kernel: encoder_forward.9
= control target key start
LH: loop header
LB: loop body
LE: loop exit
PB: predicated region body
PF: predicated region fallthrough
CT: control target
= control target key end

     0   :  { %vm4547_vm0 = vcmask 523264   ;;  %s7562_s1 = inlined_call_operand.vmem [shape: bf16[6400,64], index: 1, kind: input, shape index: {}]   ;;  %s7563_s0 = inlined_call_operand.vmem [shape: bf16[16,6400], index: 0, kind: input, shape index: {}]   ;;  %s7564_s2 = inlined_call_operand.vmem [shape: f32[1,64], index: 2, kind: input, shape index: {}]   ;;  %s7565_s3 = inlined_call_operand.vmem [shape: f32[16,64], index: 3, kind: output, shape index: {}]  }
   0x1   :  { %v5555_v0 = vld [vmem:[%s7562_s1 + $0x78] sm:$0xff]   ;;  %v5559_v4 = vld [vmem:[%s7562_s1 + $0x70] sm:$0xff]   ;;  %v5563_v8 = vld [vmem:[%s7562_s1 + $0x68] sm:$0xff]  }
   0x2   :  { %v5556_v1 = vld [vmem:[%s7562_s1 + $0x38] sm:$0xff]   ;;  %5005 = vmatprep.subr.bf16.mxu0 %v5555_v0  ;;  %v5560_v5 = vld [vmem:[%s7562_s1 + $0x30] sm:$0xff]   ;;  %v5564_v9 = vld [vmem:[%s7562_s1 + $0x28] sm:$0xff]  }
   0x3   :  { %v5557_v2 = vld [vmem:[%s7562_s1 + $0xf8] sm:$0xff]   ;;  %5006 = vmatpush3.bf16.msra.mxu0 %v5556_v1  ;;  %v5561_v6 = vld [vmem:[%s7562_s1 + $0xf0] sm:$0xff]   ;;  %v5565_v10 = vld [vmem:[%s7562_s1 + $0xe8] sm:$0xff]  }
   0x4   :  { %v5558_v3 = vld [vmem:[%s7562_s1 + $0xb8] sm:$0xff]   ;;  %5027 = vmatprep.subr.bf16.mxu1 %v5557_v2  ;;  %5007 = vmatprep.subr.bf16.mxu0 %v5559_v4  ;;  %v5562_v7 = vld [vmem:[%s7562_s1 + $0xb0] sm:$0xff]   ;;  %v5566_v11 = vld [vmem:[%s7562_s1 + $0xa8] sm:$0xff]  }
   0x5   :  { %5028 = vmatpush3.bf16.msra.mxu1 %v5558_v3  ;;  %v5567_v12 = vld [vmem:[%s7562_s1 + $0x60] sm:$0xff]   ;;  %v5571_v16 = vld [vmem:[%s7562_s1 + $0x58] sm:$0xff]   ;;  %v5575_v20 = vld [vmem:[%s7562_s1 + $0x50] sm:$0xff]  }
   0x6   :  { %5029 = vmatprep.subr.bf16.mxu1 %v5561_v6  ;;  %v5568_v13 = vld [vmem:[%s7562_s1 + $0x20] sm:$0xff]   ;;  %v5572_v17 = vld [vmem:[%s7562_s1 + $0x18] sm:$0xff]   ;;  %v5576_v21 = vld [vmem:[%s7562_s1 + $0x10] sm:$0xff]  }
   0x7   :  { %5008 = vmatpush3.bf16.msra.mxu0 %v5560_v5  ;;  %v5569_v14 = vld [vmem:[%s7562_s1 + $0xe0] sm:$0xff]   ;;  %v5573_v18 = vld [vmem:[%s7562_s1 + $0xd8] sm:$0xff]   ;;  %v5577_v22 = vld [vmem:[%s7562_s1 + $0xd0] sm:$0xff]  }
   0x8   :  { %5009 = vmatprep.subr.bf16.mxu0 %v5563_v8  ;;  %v5570_v15 = vld [vmem:[%s7562_s1 + $0xa0] sm:$0xff]   ;;  %v5574_v19 = vld [vmem:[%s7562_s1 + $0x98] sm:$0xff]   ;;  %v5578_v23 = vld [vmem:[%s7562_s1 + $0x90] sm:$0xff]  }
   0x9   :  { %5030 = vmatpush3.bf16.msra.mxu1 %v5562_v7  ;;  %v5579_v24 = vld [vmem:[%s7562_s1 + $0x48] sm:$0xff]   ;;  %v5583_v28 = vld [vmem:[%s7562_s1 + $0x40] sm:$0xff]   ;;  %v5590_v34 = vld [vmem:[%s7562_s1 + $0x178] sm:$0xff]  }
   0xa   :  { %5031 = vmatprep.subr.bf16.mxu1 %v5565_v10  ;;  %v5580_v25 = vld [vmem:[%s7562_s1 + $0x8] sm:$0xff]   ;;  %v5584_v29 = vld [vmem:[%s7562_s1] sm:$0xff]   ;;  %v5594_v37 = vld [vmem:[%s7562_s1 + $0x138] sm:$0xff]  }
   0xb   :  { %5010 = vmatpush3.bf16.msra.mxu0 %v5564_v9  ;;  %v5581_v26 = vld [vmem:[%s7562_s1 + $0xc8] sm:$0xff]   ;;  %v5585_v30 = vld [vmem:[%s7562_s1 + $0xc0] sm:$0xff]   ;;  %v5595_v38 = vld [vmem:[%s7562_s1 + $0x1f8] sm:$0xff]  }
   0xc   :  { %5011 = vmatprep.subr.bf16.mxu0 %v5567_v12  ;;  %v5582_v27 = vld [vmem:[%s7562_s1 + $0x88] sm:$0xff]   ;;  %v5589_v33 = vld [vmem:[%s7562_s1 + $0x80] sm:$0xff]   ;;  %v5596_v39 = vld [vmem:[%s7562_s1 + $0x1b8] sm:$0xff]  }
   0xd   :  { %5032 = vmatpush3.bf16.msra.mxu1 %v5566_v11  ;;  %v5586_v31 = vld [vmem:[%s7563_s0] ss:$200 sps:$4 sm:$0xff]   ;;  %v5588_v32 = vld [vmem:[%s7563_s0 + $0x4] ss:$200 sps:$4 sm:$0xff]   ;;  %v5597_v40 = vld [vmem:[%s7562_s1 + $0x170] sm:$0xff]  }
   0xe   :  { %5033 = vmatprep.subr.bf16.mxu1 %v5569_v14  ;;  %3554 = vmatprep.mubr.bf16.mxu0 %v5588_v32  ;;  %v5591_v35 = vld [vmem:[%s7563_s0 + $0x8] ss:$200 sps:$4 sm:$0xff]   ;;  %v5593_v36 = vld [vmem:[%s7563_s0 + $0xc] ss:$200 sps:$4 sm:$0xff]   ;;  %v5605_v48 = vld [vmem:[%s7562_s1 + $0x160] sm:$0xff]  }
   0xf   :  { %5012 = vmatpush3.bf16.msra.mxu0 %v5568_v13  ;;  %3595 = vmatprep.mubr.bf16.mxu1 %v5593_v36  ;;  %v5598_v41 = vld [vmem:[%s7562_s1 + $0x130] sm:$0xff]   ;;  %v5601_v44 = vld [vmem:[%s7562_s1 + $0x168] sm:$0xff]   ;;  %v5606_v49 = vld [vmem:[%s7562_s1 + $0x120] sm:$0xff]  }
  0x10   :  { %5013 = vmatprep.subr.bf16.mxu0 %v5571_v16  ;;  %v5599_v42 = vld [vmem:[%s7562_s1 + $0x1f0] sm:$0xff]   ;;  %v5602_v45 = vld [vmem:[%s7562_s1 + $0x128] sm:$0xff]   ;;  %v5607_v50 = vld [vmem:[%s7562_s1 + $0x1e0] sm:$0xff]  }
  0x11   :  { %5034 = vmatpush3.bf16.msra.mxu1 %v5570_v15  ;;  %v5600_v43 = vld [vmem:[%s7562_s1 + $0x1b0] sm:$0xff]   ;;  %v5603_v46 = vld [vmem:[%s7562_s1 + $0x1e8] sm:$0xff]   ;;  %v5608_v51 = vld [vmem:[%s7562_s1 + $0x1a0] sm:$0xff]  }
  0x12   :  { %5035 = vmatprep.subr.bf16.mxu1 %v5573_v18  ;;  %v5604_v47 = vld [vmem:[%s7562_s1 + $0x1a8] sm:$0xff]   ;;  %v5609_v52 = vld [vmem:[%s7562_s1 + $0x158] sm:$0xff]   ;;  %v5613_v56 = vld [vmem:[%s7562_s1 + $0x150] sm:$0xff]  }
  0x13   :  { %5014 = vmatpush3.bf16.msra.mxu0 %v5572_v17  ;;  %v5610_v53 = vld [vmem:[%s7562_s1 + $0x118] sm:$0xff]   ;;  %v5614_v57 = vld [vmem:[%s7562_s1 + $0x110] sm:$0xff]   ;;  %v5617_v60 = vld [vmem:[%s7562_s1 + $0x148] sm:$0xff]  }
  0x14   :  { %5015 = vmatprep.subr.bf16.mxu0 %v5575_v20  ;;  %v5611_v54 = vld [vmem:[%s7562_s1 + $0x1d8] sm:$0xff]   ;;  %v5615_v58 = vld [vmem:[%s7562_s1 + $0x1d0] sm:$0xff]   ;;  %v5618_v61 = vld [vmem:[%s7562_s1 + $0x108] sm:$0xff]  }
  0x15   :  { %5036 = vmatpush3.bf16.msra.mxu1 %v5574_v19  ;;  %v5612_v55 = vld [vmem:[%s7562_s1 + $0x198] sm:$0xff]   ;;  %v5616_v59 = vld [vmem:[%s7562_s1 + $0x190] sm:$0xff]   ;;  %v5619_v62 = vld [vmem:[%s7562_s1 + $0x1c8] sm:$0xff]  }
  0x16   :  { %5037 = vmatprep.subr.bf16.mxu1 %v5577_v22  ;;  %v5620_v63 = vld [vmem:[%s7562_s1 + $0x188] sm:$0xff]   ;;  %v5621_v0 = vld [vmem:[%s7562_s1 + $0x140] sm:$0xff]   ;;  %v5624_v3 = vld [vmem:[%s7563_s0 + $0x10] ss:$200 sps:$4 sm:$0xff]  }
  0x17   :  { %5016 = vmatpush3.bf16.msra.mxu0 %v5576_v21  ;;  %v5622_v1 = vld [vmem:[%s7562_s1 + $0x100] sm:$0xff]   ;;  %v5626_v4 = vld [vmem:[%s7563_s0 + $0x14] ss:$200 sps:$4 sm:$0xff]   ;;  %v5639_v16 = vld [vmem:[%s7562_s1 + $0x268] sm:$0xff]  }
  0x18   :  { %5017 = vmatprep.subr.bf16.mxu0 %v5579_v24  ;;  %v5623_v2 = vld [vmem:[%s7562_s1 + $0x1c0] sm:$0xff]   ;;  %v5628_v6 = vld [vmem:[%s7562_s1 + $0x278] sm:$0xff]   ;;  %v5635_v12 = vld [vmem:[%s7562_s1 + $0x270] sm:$0xff]  }
  0x19   :  { %5038 = vmatpush3.bf16.msra.mxu1 %v5578_v23  ;;  %v5627_v5 = vld [vmem:[%s7562_s1 + $0x180] sm:$0xff]   ;;  %v5632_v9 = vld [vmem:[%s7562_s1 + $0x238] sm:$0xff]   ;;  %v5636_v13 = vld [vmem:[%s7562_s1 + $0x230] sm:$0xff]  }
  0x1a   :  { %5039 = vmatprep.subr.bf16.mxu1 %v5581_v26  ;;  %v5629_v7 = vld [vmem:[%s7563_s0 + $0x18] ss:$200 sps:$4 sm:$0xff]   ;;  %v5631_v8 = vld [vmem:[%s7563_s0 + $0x1c] ss:$200 sps:$4 sm:$0xff]   ;;  %v5637_v14 = vld [vmem:[%s7562_s1 + $0x2f0] sm:$0xff]  }
  0x1b   :  { %5018 = vmatpush3.bf16.msra.mxu0 %v5580_v25  ;;  %v5633_v10 = vld [vmem:[%s7562_s1 + $0x2f8] sm:$0xff]   ;;  %v5638_v15 = vld [vmem:[%s7562_s1 + $0x2b0] sm:$0xff]   ;;  %v5640_v17 = vld [vmem:[%s7562_s1 + $0x228] sm:$0xff]  }
  0x1c   :  { %5019 = vmatprep.subr.bf16.mxu0 %v5583_v28  ;;  %v5634_v11 = vld [vmem:[%s7562_s1 + $0x2b8] sm:$0xff]   ;;  %v5641_v18 = vld [vmem:[%s7562_s1 + $0x2e8] sm:$0xff]   ;;  %v5643_v20 = vld [vmem:[%s7562_s1 + $0x260] sm:$0xff]  }
  0x1d   :  { %5040 = vmatpush3.bf16.msra.mxu1 %v5582_v27  ;;  %v5642_v19 = vld [vmem:[%s7562_s1 + $0x2a8] sm:$0xff]   ;;  %v5644_v21 = vld [vmem:[%s7562_s1 + $0x220] sm:$0xff]   ;;  %v5647_v24 = vld [vmem:[%s7562_s1 + $0x258] sm:$0xff]  }
  0x1e   :  { %5041 = vmatprep.subr.bf16.mxu1 %v5585_v30  ;;  %v5645_v22 = vld [vmem:[%s7562_s1 + $0x2e0] sm:$0xff]   ;;  %v5648_v25 = vld [vmem:[%s7562_s1 + $0x218] sm:$0xff]   ;;  %v5651_v28 = vld [vmem:[%s7562_s1 + $0x250] sm:$0xff]  }
  0x1f   :  { %5020 = vmatpush3.bf16.msra.mxu0 %v5584_v29  ;;  %v5646_v23 = vld [vmem:[%s7562_s1 + $0x2a0] sm:$0xff]   ;;  %v5649_v26 = vld [vmem:[%s7562_s1 + $0x2d8] sm:$0xff]   ;;  %v5652_v29 = vld [vmem:[%s7562_s1 + $0x210] sm:$0xff]  }
  0x20   :  { %5049 = vmatprep.subr.bf16.mxu0 %v5590_v34  ;;  %v5650_v27 = vld [vmem:[%s7562_s1 + $0x298] sm:$0xff]   ;;  %v5653_v30 = vld [vmem:[%s7562_s1 + $0x2d0] sm:$0xff]   ;;  %v5655_v32 = vld [vmem:[%s7562_s1 + $0x248] sm:$0xff]  }
  0x21   :  { %5042 = vmatpush3.bf16.msra.mxu1 %v5589_v33  ;;  %v5656_v33 = vld [vmem:[%s7562_s1 + $0x208] sm:$0xff]   ;;  %v5659_v36 = vld [vmem:[%s7562_s1 + $0x240] sm:$0xff]  }
  0x22   :  { %3555 = vmatmul.mubr.bf16.vlgmr.msra.gmra.mxu0 %v5586_v31  ;;  %5071 = vmatprep.subr.bf16.mxu1 %v5595_v38  ;;  %v5654_v31 = vld [vmem:[%s7562_s1 + $0x290] sm:$0xff]   ;;  %v5657_v34 = vld [vmem:[%s7562_s1 + $0x2c8] sm:$0xff]   ;;  %v5661_v38 = vld [vmem:[%s7562_s1 + $0x2c0] sm:$0xff]  }
  0x23   :  { %5050 = vmatpush3.bf16.msra.mxu0 %v5594_v37  ;;  %3636 = vmatprep.mubr.bf16.mxu0 %v5626_v4  ;;  %v5660_v37 = vld [vmem:[%s7562_s1 + $0x200] sm:$0xff]   ;;  %v5693_v4 = vld [vmem:[%s7562_s1 + $0x348] sm:$0xff]  }
  0x24   :  { %3596 = vmatmul.mubr.bf16.vlgmr.msra.gmra.mxu1 %v5591_v35  ;;  %5051 = vmatprep.subr.bf16.mxu0 %v5597_v40  ;;  %v5658_v35 = vld [vmem:[%s7562_s1 + $0x288] sm:$0xff]  }
  0x25   :  { %5072 = vmatpush3.bf16.msra.mxu1 %v5596_v39  ;;  %3677 = vmatprep.mubr.bf16.mxu1 %v5631_v8  ;;  %v5662_v39 = vld [vmem:[%s7563_s0 + $0x20] ss:$200 sps:$4 sm:$0xff]   ;;  %v5664_v40 = vld [vmem:[%s7563_s0 + $0x24] ss:$200 sps:$4 sm:$0xff]  }
  0x26   :  { %5073 = vmatprep.subr.bf16.mxu1 %v5599_v42  ;;  %v5666_v42 = vld [vmem:[%s7562_s1 + $0x378] sm:$0xff]   ;;  %v5697_v8 = vld [vmem:[%s7562_s1 + $0x340] sm:$0xff]  }
  0x27   :  { %5052 = vmatpush3.bf16.msra.mxu0 %v5598_v41  ;;  %v5665_v41 = vld [vmem:[%s7562_s1 + $0x280] sm:$0xff]  }
  0x28   :  { %5053 = vmatprep.subr.bf16.mxu0 %v5601_v44  ;;  %v5669_v44 = vld [vmem:[%s7563_s0 + $0x2c] ss:$200 sps:$4 sm:$0xff]  }
  0x29   :  { %5074 = vmatpush3.bf16.msra.mxu1 %v5600_v43  ;;  %v5667_v43 = vld [vmem:[%s7563_s0 + $0x28] ss:$200 sps:$4 sm:$0xff]  }
  0x2a   :  { %5075 = vmatprep.subr.bf16.mxu1 %v5603_v46  ;;  %v5671_v46 = vld [vmem:[%s7562_s1 + $0x3f8] sm:$0xff]  }
  0x2b   :  { %5054 = vmatpush3.bf16.msra.mxu0 %v5602_v45  ;;  %v5670_v45 = vld [vmem:[%s7562_s1 + $0x338] sm:$0xff]  }
  0x2c   :  { %5055 = vmatprep.subr.bf16.mxu0 %v5605_v48  ;;  %v5673_v48 = vld [vmem:[%s7562_s1 + $0x370] sm:$0xff]  }
  0x2d   :  { %5076 = vmatpush3.bf16.msra.mxu1 %v5604_v47  ;;  %v5672_v47 = vld [vmem:[%s7562_s1 + $0x3b8] sm:$0xff]  }
  0x2e   :  { %5077 = vmatprep.subr.bf16.mxu1 %v5607_v50  ;;  %v5675_v50 = vld [vmem:[%s7562_s1 + $0x3f0] sm:$0xff]  }
  0x2f   :  { %5056 = vmatpush3.bf16.msra.mxu0 %v5606_v49  ;;  %v5674_v49 = vld [vmem:[%s7562_s1 + $0x330] sm:$0xff]  }
  0x30   :  { %5057 = vmatprep.subr.bf16.mxu0 %v5609_v52  ;;  %v5677_v52 = vld [vmem:[%s7562_s1 + $0x368] sm:$0xff]  }
  0x31   :  { %5078 = vmatpush3.bf16.msra.mxu1 %v5608_v51  ;;  %v5676_v51 = vld [vmem:[%s7562_s1 + $0x3b0] sm:$0xff]  }
  0x32   :  { %5079 = vmatprep.subr.bf16.mxu1 %v5611_v54  ;;  %v5679_v54 = vld [vmem:[%s7562_s1 + $0x3e8] sm:$0xff]  }
  0x33   :  { %5058 = vmatpush3.bf16.msra.mxu0 %v5610_v53  ;;  %v5678_v53 = vld [vmem:[%s7562_s1 + $0x328] sm:$0xff]  }
  0x34   :  { %5059 = vmatprep.subr.bf16.mxu0 %v5613_v56  ;;  %v5681_v56 = vld [vmem:[%s7562_s1 + $0x360] sm:$0xff]  }
  0x35   :  { %5080 = vmatpush3.bf16.msra.mxu1 %v5612_v55  ;;  %v5680_v55 = vld [vmem:[%s7562_s1 + $0x3a8] sm:$0xff]  }
  0x36   :  { %5081 = vmatprep.subr.bf16.mxu1 %v5615_v58  ;;  %v5683_v58 = vld [vmem:[%s7562_s1 + $0x3e0] sm:$0xff]  }
  0x37   :  { %5060 = vmatpush3.bf16.msra.mxu0 %v5614_v57  ;;  %v5682_v57 = vld [vmem:[%s7562_s1 + $0x320] sm:$0xff]  }
  0x38   :  { %5061 = vmatprep.subr.bf16.mxu0 %v5617_v60  ;;  %v5685_v60 = vld [vmem:[%s7562_s1 + $0x358] sm:$0xff]  }
  0x39   :  { %5082 = vmatpush3.bf16.msra.mxu1 %v5616_v59  ;;  %v5684_v59 = vld [vmem:[%s7562_s1 + $0x3a0] sm:$0xff]  }
  0x3a   :  { %5083 = vmatprep.subr.bf16.mxu1 %v5619_v62  ;;  %v5687_v62 = vld [vmem:[%s7562_s1 + $0x3d8] sm:$0xff]  }
  0x3b   :  { %5062 = vmatpush3.bf16.msra.mxu0 %v5618_v61  ;;  %v5686_v61 = vld [vmem:[%s7562_s1 + $0x318] sm:$0xff]  }
  0x3c   :  { %5063 = vmatprep.subr.bf16.mxu0 %v5621_v0  ;;  %v5689_v0 = vld [vmem:[%s7562_s1 + $0x350] sm:$0xff]  }
  0x3d   :  { %5084 = vmatpush3.bf16.msra.mxu1 %v5620_v63  ;;  %v5688_v63 = vld [vmem:[%s7562_s1 + $0x398] sm:$0xff]  }
  0x3e   :  { %5085 = vmatprep.subr.bf16.mxu1 %v5623_v2  ;;  %v5691_v2 = vld [vmem:[%s7562_s1 + $0x3d0] sm:$0xff]  }
  0x3f   :  { %5064 = vmatpush3.bf16.msra.mxu0 %v5622_v1  ;;  %v5690_v1 = vld [vmem:[%s7562_s1 + $0x310] sm:$0xff]  }
  0x40   :  { %5093 = vmatprep.subr.bf16.mxu0 %v5628_v6  ;;  %v5695_v6 = vld [vmem:[%s7562_s1 + $0x3c8] sm:$0xff]  }
  0x41   :  { %5086 = vmatpush3.bf16.msra.mxu1 %v5627_v5  ;;  %v5694_v5 = vld [vmem:[%s7562_s1 + $0x308] sm:$0xff]  }
  0x42   :  { %3637 = vmatmul.mubr.bf16.vlgmr.msra.gmra.mxu0 %v5624_v3  ;;  %5115 = vmatprep.subr.bf16.mxu1 %v5633_v10  ;;  %v5692_v3 = vld [vmem:[%s7562_s1 + $0x390] sm:$0xff]   ;;  %v5699_v10 = vld [vmem:[%s7562_s1 + $0x3c0] sm:$0xff]  }
  0x43   :  { %5094 = vmatpush3.bf16.msra.mxu0 %v5632_v9  ;;  %3718 = vmatprep.mubr.bf16.mxu0 %v5664_v40  ;;  %v5698_v9 = vld [vmem:[%s7562_s1 + $0x300] sm:$0xff]   ;;  %v5731_v40 = vld [vmem:[%s7562_s1 + $0x448] sm:$0xff]  }
  0x44   :  { %3678 = vmatmul.mubr.bf16.vlgmr.msra.gmra.mxu1 %v5629_v7  ;;  %5095 = vmatprep.subr.bf16.mxu0 %v5635_v12  ;;  %v5696_v7 = vld [vmem:[%s7562_s1 + $0x388] sm:$0xff]   ;;  %v5702_v12 = vld [vmem:[%s7563_s0 + $0x34] ss:$200 sps:$4 sm:$0xff]  }
  0x45   :  { %5116 = vmatpush3.bf16.msra.mxu1 %v5634_v11  ;;  %3759 = vmatprep.mubr.bf16.mxu1 %v5669_v44  ;;  %v5700_v11 = vld [vmem:[%s7563_s0 + $0x30] ss:$200 sps:$4 sm:$0xff]   ;;  %v5735_v44 = vld [vmem:[%s7562_s1 + $0x440] sm:$0xff]  }
  0x46   :  { %5117 = vmatprep.subr.bf16.mxu1 %v5637_v14  ;;  %v5704_v14 = vld [vmem:[%s7562_s1 + $0x478] sm:$0xff]  }
  0x47   :  { %5096 = vmatpush3.bf16.msra.mxu0 %v5636_v13  ;;  %v5703_v13 = vld [vmem:[%s7562_s1 + $0x380] sm:$0xff]  }
  0x48   :  { %5097 = vmatprep.subr.bf16.mxu0 %v5639_v16  ;;  %v5707_v16 = vld [vmem:[%s7563_s0 + $0x3c] ss:$200 sps:$4 sm:$0xff]  }
  0x49   :  { %5118 = vmatpush3.bf16.msra.mxu1 %v5638_v15  ;;  %v5705_v15 = vld [vmem:[%s7563_s0 + $0x38] ss:$200 sps:$4 sm:$0xff]  }
  0x4a   :  { %5119 = vmatprep.subr.bf16.mxu1 %v5641_v18  ;;  %v5709_v18 = vld [vmem:[%s7562_s1 + $0x4f8] sm:$0xff]  }
  0x4b   :  { %5098 = vmatpush3.bf16.msra.mxu0 %v5640_v17  ;;  %v5708_v17 = vld [vmem:[%s7562_s1 + $0x438] sm:$0xff]  }
  0x4c   :  { %5099 = vmatprep.subr.bf16.mxu0 %v5643_v20  ;;  %v5711_v20 = vld [vmem:[%s7562_s1 + $0x470] sm:$0xff]  }
  0x4d   :  { %5120 = vmatpush3.bf16.msra.mxu1 %v5642_v19  ;;  %v5710_v19 = vld [vmem:[%s7562_s1 + $0x4b8] sm:$0xff]  }
  0x4e   :  { %5121 = vmatprep.subr.bf16.mxu1 %v5645_v22  ;;  %v5713_v22 = vld [vmem:[%s7562_s1 + $0x4f0] sm:$0xff]  }
  0x4f   :  { %5100 = vmatpush3.bf16.msra.mxu0 %v5644_v21  ;;  %v5712_v21 = vld [vmem:[%s7562_s1 + $0x430] sm:$0xff]  }
  0x50   :  { %5101 = vmatprep.subr.bf16.mxu0 %v5647_v24  ;;  %v5715_v24 = vld [vmem:[%s7562_s1 + $0x468] sm:$0xff]  }
  0x51   :  { %5122 = vmatpush3.bf16.msra.mxu1 %v5646_v23  ;;  %v5714_v23 = vld [vmem:[%s7562_s1 + $0x4b0] sm:$0xff]  }
  0x52   :  { %5123 = vmatprep.subr.bf16.mxu1 %v5649_v26  ;;  %v5717_v26 = vld [vmem:[%s7562_s1 + $0x4e8] sm:$0xff]  }
  0x53   :  { %5102 = vmatpush3.bf16.msra.mxu0 %v5648_v25  ;;  %v5716_v25 = vld [vmem:[%s7562_s1 + $0x428] sm:$0xff]  }
  0x54   :  { %5103 = vmatprep.subr.bf16.mxu0 %v5651_v28  ;;  %v5719_v28 = vld [vmem:[%s7562_s1 + $0x460] sm:$0xff]  }
  0x55   :  { %5124 = vmatpush3.bf16.msra.mxu1 %v5650_v27  ;;  %v5718_v27 = vld [vmem:[%s7562_s1 + $0x4a8] sm:$0xff]  }
  0x56   :  { %5125 = vmatprep.subr.bf16.mxu1 %v5653_v30  ;;  %v5721_v30 = vld [vmem:[%s7562_s1 + $0x4e0] sm:$0xff]  }
  0x57   :  { %5104 = vmatpush3.bf16.msra.mxu0 %v5652_v29  ;;  %v5720_v29 = vld [vmem:[%s7562_s1 + $0x420] sm:$0xff]  }
  0x58   :  { %5105 = vmatprep.subr.bf16.mxu0 %v5655_v32  ;;  %v5723_v32 = vld [vmem:[%s7562_s1 + $0x458] sm:$0xff]  }
  0x59   :  { %5126 = vmatpush3.bf16.msra.mxu1 %v5654_v31  ;;  %v5722_v31 = vld [vmem:[%s7562_s1 + $0x4a0] sm:$0xff]  }
  0x5a   :  { %5127 = vmatprep.subr.bf16.mxu1 %v5657_v34  ;;  %v5725_v34 = vld [vmem:[%s7562_s1 + $0x4d8] sm:$0xff]  }
  0x5b   :  { %5106 = vmatpush3.bf16.msra.mxu0 %v5656_v33  ;;  %v5724_v33 = vld [vmem:[%s7562_s1 + $0x418] sm:$0xff]  }
  0x5c   :  { %5107 = vmatprep.subr.bf16.mxu0 %v5659_v36  ;;  %v5727_v36 = vld [vmem:[%s7562_s1 + $0x450] sm:$0xff]  }
  0x5d   :  { %5128 = vmatpush3.bf16.msra.mxu1 %v5658_v35  ;;  %v5726_v35 = vld [vmem:[%s7562_s1 + $0x498] sm:$0xff]  }
  0x5e   :  { %5129 = vmatprep.subr.bf16.mxu1 %v5661_v38  ;;  %v5729_v38 = vld [vmem:[%s7562_s1 + $0x4d0] sm:$0xff]  }
  0x5f   :  { %5108 = vmatpush3.bf16.msra.mxu0 %v5660_v37  ;;  %v5728_v37 = vld [vmem:[%s7562_s1 + $0x410] sm:$0xff]  }
  0x60   :  { %5137 = vmatprep.subr.bf16.mxu0 %v5666_v42  ;;  %v5733_v42 = vld [vmem:[%s7562_s1 + $0x4c8] sm:$0xff]  }
  0x61   :  { %5130 = vmatpush3.bf16.msra.mxu1 %v5665_v41  ;;  %v5732_v41 = vld [vmem:[%s7562_s1 + $0x408] sm:$0xff]  }
  0x62   :  { %3719 = vmatmul.mubr.bf16.vlgmr.msra.gmra.mxu0 %v5662_v39  ;;  %5159 = vmatprep.subr.bf16.mxu1 %v5671_v46  ;;  %v5730_v39 = vld [vmem:[%s7562_s1 + $0x490] sm:$0xff]   ;;  %v5737_v46 = vld [vmem:[%s7562_s1 + $0x4c0] sm:$0xff]  }
  0x63   :  { %5138 = vmatpush3.bf16.msra.mxu0 %v5670_v45  ;;  %3800 = vmatprep.mubr.bf16.mxu0 %v5702_v12  ;;  %v5736_v45 = vld [vmem:[%s7562_s1 + $0x400] sm:$0xff]   ;;  %v5769_v12 = vld [vmem:[%s7562_s1 + $0x548] sm:$0xff]  }
  0x64   :  { %3760 = vmatmul.mubr.bf16.vlgmr.msra.gmra.mxu1 %v5667_v43  ;;  %5139 = vmatprep.subr.bf16.mxu0 %v5673_v48  ;;  %v5734_v43 = vld [vmem:[%s7562_s1 + $0x488] sm:$0xff]  }
  0x65   :  { %5160 = vmatpush3.bf16.msra.mxu1 %v5672_v47  ;;  %3841 = vmatprep.mubr.bf16.mxu1 %v5707_v16  ;;  %v5738_v47 = vld [vmem:[%s7563_s0 + $0x40] ss:$200 sps:$4 sm:$0xff]   ;;  %v5740_v48 = vld [vmem:[%s7563_s0 + $0x44] ss:$200 sps:$4 sm:$0xff]  }
  0x66   :  { %5161 = vmatprep.subr.bf16.mxu1 %v5675_v50  ;;  %v5742_v50 = vld [vmem:[%s7562_s1 + $0x578] sm:$0xff]   ;;  %v5773_v16 = vld [vmem:[%s7562_s1 + $0x540] sm:$0xff]  }
  0x67   :  { %5140 = vmatpush3.bf16.msra.mxu0 %v5674_v49  ;;  %v5741_v49 = vld [vmem:[%s7562_s1 + $0x480] sm:$0xff]  }
  0x68   :  { %5141 = vmatprep.subr.bf16.mxu0 %v5677_v52  ;;  %v5745_v52 = vld [vmem:[%s7563_s0 + $0x4c] ss:$200 sps:$4 sm:$0xff]  }
  0x69   :  { %5162 = vmatpush3.bf16.msra.mxu1 %v5676_v51  ;;  %v5743_v51 = vld [vmem:[%s7563_s0 + $0x48] ss:$200 sps:$4 sm:$0xff]  }
  0x6a   :  { %5163 = vmatprep.subr.bf16.mxu1 %v5679_v54  ;;  %v5747_v54 = vld [vmem:[%s7562_s1 + $0x5f8] sm:$0xff]  }
  0x6b   :  { %5142 = vmatpush3.bf16.msra.mxu0 %v5678_v53  ;;  %v5746_v53 = vld [vmem:[%s7562_s1 + $0x538] sm:$0xff]  }
  0x6c   :  { %5143 = vmatprep.subr.bf16.mxu0 %v5681_v56  ;;  %v5749_v56 = vld [vmem:[%s7562_s1 + $0x570] sm:$0xff]  }
  0x6d   :  { %5164 = vmatpush3.bf16.msra.mxu1 %v5680_v55  ;;  %v5748_v55 = vld [vmem:[%s7562_s1 + $0x5b8] sm:$0xff]  }
  0x6e   :  { %5165 = vmatprep.subr.bf16.mxu1 %v5683_v58  ;;  %v5751_v58 = vld [vmem:[%s7562_s1 + $0x5f0] sm:$0xff]  }
  0x6f   :  { %5144 = vmatpush3.bf16.msra.mxu0 %v5682_v57  ;;  %v5750_v57 = vld [vmem:[%s7562_s1 + $0x530] sm:$0xff]  }
  0x70   :  { %5145 = vmatprep.subr.bf16.mxu0 %v5685_v60  ;;  %v5753_v60 = vld [vmem:[%s7562_s1 + $0x568] sm:$0xff]  }
  0x71   :  { %5166 = vmatpush3.bf16.msra.mxu1 %v5684_v59  ;;  %v5752_v59 = vld [vmem:[%s7562_s1 + $0x5b0] sm:$0xff]  }
  0x72   :  { %5167 = vmatprep.subr.bf16.mxu1 %v5687_v62  ;;  %v5755_v62 = vld [vmem:[%s7562_s1 + $0x5e8] sm:$0xff]  }
  0x73   :  { %5146 = vmatpush3.bf16.msra.mxu0 %v5686_v61  ;;  %v5754_v61 = vld [vmem:[%s7562_s1 + $0x528] sm:$0xff]  }
  0x74   :  { %5147 = vmatprep.subr.bf16.mxu0 %v5689_v0  ;;  %v5757_v0 = vld [vmem:[%s7562_s1 + $0x560] sm:$0xff]  }
  0x75   :  { %5168 = vmatpush3.bf16.msra.mxu1 %v5688_v63  ;;  %v5756_v63 = vld [vmem:[%s7562_s1 + $0x5a8] sm:$0xff]  }
  0x76   :  { %5169 = vmatprep.subr.bf16.mxu1 %v5691_v2  ;;  %v5759_v2 = vld [vmem:[%s7562_s1 + $0x5e0] sm:$0xff]  }
  0x77   :  { %5148 = vmatpush3.bf16.msra.mxu0 %v5690_v1  ;;  %v5758_v1 = vld [vmem:[%s7562_s1 + $0x520] sm:$0xff]  }
  0x78   :  { %5149 = vmatprep.subr.bf16.mxu0 %v5693_v4  ;;  %v5761_v4 = vld [vmem:[%s7562_s1 + $0x558] sm:$0xff]  }
  0x79   :  { %5170 = vmatpush3.bf16.msra.mxu1 %v5692_v3  ;;  %v5760_v3 = vld [vmem:[%s7562_s1 + $0x5a0] sm:$0xff]  }
  0x7a   :  { %5171 = vmatprep.subr.bf16.mxu1 %v5695_v6  ;;  %v5763_v6 = vld [vmem:[%s7562_s1 + $0x5d8] sm:$0xff]  }
  0x7b   :  { %5150 = vmatpush3.bf16.msra.mxu0 %v5694_v5  ;;  %v5762_v5 = vld [vmem:[%s7562_s1 + $0x518] sm:$0xff]  }
  0x7c   :  { %5151 = vmatprep.subr.bf16.mxu0 %v5697_v8  ;;  %v5765_v8 = vld [vmem:[%s7562_s1 + $0x550] sm:$0xff]  }
  0x7d   :  { %5172 = vmatpush3.bf16.msra.mxu1 %v5696_v7  ;;  %v5764_v7 = vld [vmem:[%s7562_s1 + $0x598] sm:$0xff]  }
  0x7e   :  { %5173 = vmatprep.subr.bf16.mxu1 %v5699_v10  ;;  %v5767_v10 = vld [vmem:[%s7562_s1 + $0x5d0] sm:$0xff]  }
  0x7f   :  { %5152 = vmatpush3.bf16.msra.mxu0 %v5698_v9  ;;  %v5766_v9 = vld [vmem:[%s7562_s1 + $0x510] sm:$0xff]  }
  0x80   :  { %5181 = vmatprep.subr.bf16.mxu0 %v5704_v14  ;;  %v5771_v14 = vld [vmem:[%s7562_s1 + $0x5c8] sm:$0xff]  }
  0x81   :  { %5174 = vmatpush3.bf16.msra.mxu1 %v5703_v13  ;;  %v5770_v13 = vld [vmem:[%s7562_s1 + $0x508] sm:$0xff]  }
  0x82   :  { %3801 = vmatmul.mubr.bf16.vlgmr.msra.gmra.mxu0 %v5700_v11  ;;  %5203 = vmatprep.subr.bf16.mxu1 %v5709_v18  ;;  %v5768_v11 = vld [vmem:[%s7562_s1 + $0x590] sm:$0xff]   ;;  %v5775_v18 = vld [vmem:[%s7562_s1 + $0x5c0] sm:$0xff]  }
  0x83   :  { %5182 = vmatpush3.bf16.msra.mxu0 %v5708_v17  ;;  %3882 = vmatprep.mubr.bf16.mxu0 %v5740_v48  ;;  %v5774_v17 = vld [vmem:[%s7562_s1 + $0x500] sm:$0xff]   ;;  %v5807_v48 = vld [vmem:[%s7562_s1 + $0x648] sm:$0xff]  }
  0x84   :  { %3842 = vmatmul.mubr.bf16.vlgmr.msra.gmra.mxu1 %v5705_v15  ;;  %5183 = vmatprep.subr.bf16.mxu0 %v5711_v20  ;;  %v5772_v15 = vld [vmem:[%s7562_s1 + $0x588] sm:$0xff]   ;;  %v5778_v20 = vld [vmem:[%s7563_s0 + $0x54] ss:$200 sps:$4 sm:$0xff]  }
  0x85   :  { %5204 = vmatpush3.bf16.msra.mxu1 %v5710_v19  ;;  %3923 = vmatprep.mubr.bf16.mxu1 %v5745_v52  ;;  %v5776_v19 = vld [vmem:[%s7563_s0 + $0x50] ss:$200 sps:$4 sm:$0xff]   ;;  %v5811_v52 = vld [vmem:[%s7562_s1 + $0x640] sm:$0xff]  }
  0x86   :  { %5205 = vmatprep.subr.bf16.mxu1 %v5713_v22  ;;  %v5780_v22 = vld [vmem:[%s7562_s1 + $0x678] sm:$0xff]  }
  0x87   :  { %5184 = vmatpush3.bf16.msra.mxu0 %v5712_v21  ;;  %v5779_v21 = vld [vmem:[%s7562_s1 + $0x580] sm:$0xff]  }
  0x88   :  { %5185 = vmatprep.subr.bf16.mxu0 %v5715_v24  ;;  %v5783_v24 = vld [vmem:[%s7563_s0 + $0x5c] ss:$200 sps:$4 sm:$0xff]  }
  0x89   :  { %5206 = vmatpush3.bf16.msra.mxu1 %v5714_v23  ;;  %v5781_v23 = vld [vmem:[%s7563_s0 + $0x58] ss:$200 sps:$4 sm:$0xff]  }
  0x8a   :  { %5207 = vmatprep.subr.bf16.mxu1 %v5717_v26  ;;  %v5785_v26 = vld [vmem:[%s7562_s1 + $0x6f8] sm:$0xff]  }
  0x8b   :  { %5186 = vmatpush3.bf16.msra.mxu0 %v5716_v25  ;;  %v5784_v25 = vld [vmem:[%s7562_s1 + $0x638] sm:$0xff]  }
  0x8c   :  { %5187 = vmatprep.subr.bf16.mxu0 %v5719_v28  ;;  %v5787_v28 = vld [vmem:[%s7562_s1 + $0x670] sm:$0xff]  }
  0x8d   :  { %5208 = vmatpush3.bf16.msra.mxu1 %v5718_v27  ;;  %v5786_v27 = vld [vmem:[%s7562_s1 + $0x6b8] sm:$0xff]  }
  0x8e   :  { %5209 = vmatprep.subr.bf16.mxu1 %v5721_v30  ;;  %v5789_v30 = vld [vmem:[%s7562_s1 + $0x6f0] sm:$0xff]  }
  0x8f   :  { %5188 = vmatpush3.bf16.msra.mxu0 %v5720_v29  ;;  %v5788_v29 = vld [vmem:[%s7562_s1 + $0x630] sm:$0xff]  }
  0x90   :  { %5189 = vmatprep.subr.bf16.mxu0 %v5723_v32  ;;  %v5791_v32 = vld [vmem:[%s7562_s1 + $0x668] sm:$0xff]  }
  0x91   :  { %5210 = vmatpush3.bf16.msra.mxu1 %v5722_v31  ;;  %v5790_v31 = vld [vmem:[%s7562_s1 + $0x6b0] sm:$0xff]  }
  0x92   :  { %5211 = vmatprep.subr.bf16.mxu1 %v5725_v34  ;;  %v5793_v34 = vld [vmem:[%s7562_s1 + $0x6e8] sm:$0xff]  }
  0x93   :  { %5190 = vmatpush3.bf16.msra.mxu0 %v5724_v33  ;;  %v5792_v33 = vld [vmem:[%s7562_s1 + $0x628] sm:$0xff]  }
  0x94   :  { %5191 = vmatprep.subr.bf16.mxu0 %v5727_v36  ;;  %v5795_v36 = vld [vmem:[%s7562_s1 + $0x660] sm:$0xff]  }
  0x95   :  { %5212 = vmatpush3.bf16.msra.mxu1 %v5726_v35  ;;  %v5794_v35 = vld [vmem:[%s7562_s1 + $0x6a8] sm:$0xff]  }
  0x96   :  { %5213 = vmatprep.subr.bf16.mxu1 %v5729_v38  ;;  %v5797_v38 = vld [vmem:[%s7562_s1 + $0x6e0] sm:$0xff]  }
  0x97   :  { %5192 = vmatpush3.bf16.msra.mxu0 %v5728_v37  ;;  %v5796_v37 = vld [vmem:[%s7562_s1 + $0x620] sm:$0xff]  }
  0x98   :  { %5193 = vmatprep.subr.bf16.mxu0 %v5731_v40  ;;  %v5799_v40 = vld [vmem:[%s7562_s1 + $0x658] sm:$0xff]  }
  0x99   :  { %5214 = vmatpush3.bf16.msra.mxu1 %v5730_v39  ;;  %v5798_v39 = vld [vmem:[%s7562_s1 + $0x6a0] sm:$0xff]  }
  0x9a   :  { %5215 = vmatprep.subr.bf16.mxu1 %v5733_v42  ;;  %v5801_v42 = vld [vmem:[%s7562_s1 + $0x6d8] sm:$0xff]  }
  0x9b   :  { %5194 = vmatpush3.bf16.msra.mxu0 %v5732_v41  ;;  %v5800_v41 = vld [vmem:[%s7562_s1 + $0x618] sm:$0xff]  }
  0x9c   :  { %5195 = vmatprep.subr.bf16.mxu0 %v5735_v44  ;;  %v5803_v44 = vld [vmem:[%s7562_s1 + $0x650] sm:$0xff]  }
  0x9d   :  { %5216 = vmatpush3.bf16.msra.mxu1 %v5734_v43  ;;  %v5802_v43 = vld [vmem:[%s7562_s1 + $0x698] sm:$0xff]  }
  0x9e   :  { %5217 = vmatprep.subr.bf16.mxu1 %v5737_v46  ;;  %v5805_v46 = vld [vmem:[%s7562_s1 + $0x6d0] sm:$0xff]  }
  0x9f   :  { %5196 = vmatpush3.bf16.msra.mxu0 %v5736_v45  ;;  %v5804_v45 = vld [vmem:[%s7562_s1 + $0x610] sm:$0xff]  }
  0xa0   :  { %5225 = vmatprep.subr.bf16.mxu0 %v5742_v50  ;;  %v5809_v50 = vld [vmem:[%s7562_s1 + $0x6c8] sm:$0xff]  }
  0xa1   :  { %5218 = vmatpush3.bf16.msra.mxu1 %v5741_v49  ;;  %v5808_v49 = vld [vmem:[%s7562_s1 + $0x608] sm:$0xff]  }
  0xa2   :  { %3883 = vmatmul.mubr.bf16.vlgmr.msra.gmra.mxu0 %v5738_v47  ;;  %5247 = vmatprep.subr.bf16.mxu1 %v5747_v54  ;;  %v5806_v47 = vld [vmem:[%s7562_s1 + $0x690] sm:$0xff]   ;;  %v5813_v54 = vld [vmem:[%s7562_s1 + $0x6c0] sm:$0xff]  }
  0xa3   :  { %5226 = vmatpush3.bf16.msra.mxu0 %v5746_v53  ;;  %3964 = vmatprep.mubr.bf16.mxu0 %v5778_v20  ;;  %v5812_v53 = vld [vmem:[%s7562_s1 + $0x600] sm:$0xff]   ;;  %v5845_v20 = vld [vmem:[%s7562_s1 + $0x748] sm:$0xff]  }
  0xa4   :  { %3924 = vmatmul.mubr.bf16.vlgmr.msra.gmra.mxu1 %v5743_v51  ;;  %5227 = vmatprep.subr.bf16.mxu0 %v5749_v56  ;;  %v5810_v51 = vld [vmem:[%s7562_s1 + $0x688] sm:$0xff]  }
  0xa5   :  { %5248 = vmatpush3.bf16.msra.mxu1 %v5748_v55  ;;  %4005 = vmatprep.mubr.bf16.mxu1 %v5783_v24  ;;  %v5814_v55 = vld [vmem:[%s7563_s0 + $0x60] ss:$200 sps:$4 sm:$0xff]   ;;  %v5816_v56 = vld [vmem:[%s7563_s0 + $0x64] ss:$200 sps:$4 sm:$0xff]  }
  0xa6   :  { %5249 = vmatprep.subr.bf16.mxu1 %v5751_v58  ;;  %v5818_v58 = vld [vmem:[%s7562_s1 + $0x778] sm:$0xff]   ;;  %v5849_v24 = vld [vmem:[%s7562_s1 + $0x740] sm:$0xff]  }
  0xa7   :  { %5228 = vmatpush3.bf16.msra.mxu0 %v5750_v57  ;;  %v5817_v57 = vld [vmem:[%s7562_s1 + $0x680] sm:$0xff]  }
  0xa8   :  { %5229 = vmatprep.subr.bf16.mxu0 %v5753_v60  ;;  %v5821_v60 = vld [vmem:[%s7563_s0 + $0x6c] ss:$200 sps:$4 sm:$0xff]  }
  0xa9   :  { %5250 = vmatpush3.bf16.msra.mxu1 %v5752_v59  ;;  %v5819_v59 = vld [vmem:[%s7563_s0 + $0x68] ss:$200 sps:$4 sm:$0xff]  }
  0xaa   :  { %5251 = vmatprep.subr.bf16.mxu1 %v5755_v62  ;;  %v5823_v62 = vld [vmem:[%s7562_s1 + $0x7f8] sm:$0xff]  }
  0xab   :  { %5230 = vmatpush3.bf16.msra.mxu0 %v5754_v61  ;;  %v5822_v61 = vld [vmem:[%s7562_s1 + $0x738] sm:$0xff]  }
  0xac   :  { %5231 = vmatprep.subr.bf16.mxu0 %v5757_v0  ;;  %v5825_v0 = vld [vmem:[%s7562_s1 + $0x770] sm:$0xff]  }
  0xad   :  { %5252 = vmatpush3.bf16.msra.mxu1 %v5756_v63  ;;  %v5824_v63 = vld [vmem:[%s7562_s1 + $0x7b8] sm:$0xff]  }
  0xae   :  { %5253 = vmatprep.subr.bf16.mxu1 %v5759_v2  ;;  %v5827_v2 = vld [vmem:[%s7562_s1 + $0x7f0] sm:$0xff]  }
  0xaf   :  { %5232 = vmatpush3.bf16.msra.mxu0 %v5758_v1  ;;  %v5826_v1 = vld [vmem:[%s7562_s1 + $0x730] sm:$0xff]  }
  0xb0   :  { %5233 = vmatprep.subr.bf16.mxu0 %v5761_v4  ;;  %v5829_v4 = vld [vmem:[%s7562_s1 + $0x768] sm:$0xff]  }
  0xb1   :  { %5254 = vmatpush3.bf16.msra.mxu1 %v5760_v3  ;;  %v5828_v3 = vld [vmem:[%s7562_s1 + $0x7b0] sm:$0xff]  }
  0xb2   :  { %5255 = vmatprep.subr.bf16.mxu1 %v5763_v6  ;;  %v5831_v6 = vld [vmem:[%s7562_s1 + $0x7e8] sm:$0xff]  }
  0xb3   :  { %5234 = vmatpush3.bf16.msra.mxu0 %v5762_v5  ;;  %v5830_v5 = vld [vmem:[%s7562_s1 + $0x728] sm:$0xff]  }
  0xb4   :  { %5235 = vmatprep.subr.bf16.mxu0 %v5765_v8  ;;  %v5833_v8 = vld [vmem:[%s7562_s1 + $0x760] sm:$0xff]  }
  0xb5   :  { %5256 = vmatpush3.bf16.msra.mxu1 %v5764_v7  ;;  %v5832_v7 = vld [vmem:[%s7562_s1 + $0x7a8] sm:$0xff]  }
  0xb6   :  { %5257 = vmatprep.subr.bf16.mxu1 %v5767_v10  ;;  %v5835_v10 = vld [vmem:[%s7562_s1 + $0x7e0] sm:$0xff]  }
  0xb7   :  { %5236 = vmatpush3.bf16.msra.mxu0 %v5766_v9  ;;  %v5834_v9 = vld [vmem:[%s7562_s1 + $0x720] sm:$0xff]  }
  0xb8   :  { %5237 = vmatprep.subr.bf16.mxu0 %v5769_v12  ;;  %v5837_v12 = vld [vmem:[%s7562_s1 + $0x758] sm:$0xff]  }
  0xb9   :  { %5258 = vmatpush3.bf16.msra.mxu1 %v5768_v11  ;;  %v5836_v11 = vld [vmem:[%s7562_s1 + $0x7a0] sm:$0xff]  }
  0xba   :  { %5259 = vmatprep.subr.bf16.mxu1 %v5771_v14  ;;  %v5839_v14 = vld [vmem:[%s7562_s1 + $0x7d8] sm:$0xff]  }
  0xbb   :  { %5238 = vmatpush3.bf16.msra.mxu0 %v5770_v13  ;;  %v5838_v13 = vld [vmem:[%s7562_s1 + $0x718] sm:$0xff]  }
  0xbc   :  { %5239 = vmatprep.subr.bf16.mxu0 %v5773_v16  ;;  %v5841_v16 = vld [vmem:[%s7562_s1 + $0x750] sm:$0xff]  }
  0xbd   :  { %5260 = vmatpush3.bf16.msra.mxu1 %v5772_v15  ;;  %v5840_v15 = vld [vmem:[%s7562_s1 + $0x798] sm:$0xff]  }
  0xbe   :  { %5261 = vmatprep.subr.bf16.mxu1 %v5775_v18  ;;  %v5843_v18 = vld [vmem:[%s7562_s1 + $0x7d0] sm:$0xff]  }
  0xbf   :  { %5240 = vmatpush3.bf16.msra.mxu0 %v5774_v17  ;;  %v5842_v17 = vld [vmem:[%s7562_s1 + $0x710] sm:$0xff]  }
  0xc0   :  { %5269 = vmatprep.subr.bf16.mxu0 %v5780_v22  ;;  %v5847_v22 = vld [vmem:[%s7562_s1 + $0x7c8] sm:$0xff]  }
  0xc1   :  { %5262 = vmatpush3.bf16.msra.mxu1 %v5779_v21  ;;  %v5846_v21 = vld [vmem:[%s7562_s1 + $0x708] sm:$0xff]  }
  0xc2   :  { %3965 = vmatmul.mubr.bf16.vlgmr.msra.gmra.mxu0 %v5776_v19  ;;  %5291 = vmatprep.subr.bf16.mxu1 %v5785_v26  ;;  %v5844_v19 = vld [vmem:[%s7562_s1 + $0x790] sm:$0xff]   ;;  %v5851_v26 = vld [vmem:[%s7562_s1 + $0x7c0] sm:$0xff]  }
  0xc3   :  { %5270 = vmatpush3.bf16.msra.mxu0 %v5784_v25  ;;  %4046 = vmatprep.mubr.bf16.mxu0 %v5816_v56  ;;  %v5850_v25 = vld [vmem:[%s7562_s1 + $0x700] sm:$0xff]   ;;  %v5883_v56 = vld [vmem:[%s7562_s1 + $0x848] sm:$0xff]  }
  0xc4   :  { %4006 = vmatmul.mubr.bf16.vlgmr.msra.gmra.mxu1 %v5781_v23  ;;  %5271 = vmatprep.subr.bf16.mxu0 %v5787_v28  ;;  %v5848_v23 = vld [vmem:[%s7562_s1 + $0x788] sm:$0xff]   ;;  %v5854_v28 = vld [vmem:[%s7563_s0 + $0x74] ss:$200 sps:$4 sm:$0xff]  }
  0xc5   :  { %5292 = vmatpush3.bf16.msra.mxu1 %v5786_v27  ;;  %4087 = vmatprep.mubr.bf16.mxu1 %v5821_v60  ;;  %v5852_v27 = vld [vmem:[%s7563_s0 + $0x70] ss:$200 sps:$4 sm:$0xff]   ;;  %v5887_v60 = vld [vmem:[%s7562_s1 + $0x840] sm:$0xff]  }
  0xc6   :  { %5293 = vmatprep.subr.bf16.mxu1 %v5789_v30  ;;  %v5856_v30 = vld [vmem:[%s7562_s1 + $0x878] sm:$0xff]  }
  0xc7   :  { %5272 = vmatpush3.bf16.msra.mxu0 %v5788_v29  ;;  %v5855_v29 = vld [vmem:[%s7562_s1 + $0x780] sm:$0xff]  }
  0xc8   :  { %5273 = vmatprep.subr.bf16.mxu0 %v5791_v32  ;;  %v5859_v32 = vld [vmem:[%s7563_s0 + $0x7c] ss:$200 sps:$4 sm:$0xff]  }
  0xc9   :  { %5294 = vmatpush3.bf16.msra.mxu1 %v5790_v31  ;;  %v5857_v31 = vld [vmem:[%s7563_s0 + $0x78] ss:$200 sps:$4 sm:$0xff]  }
  0xca   :  { %5295 = vmatprep.subr.bf16.mxu1 %v5793_v34  ;;  %v5861_v34 = vld [vmem:[%s7562_s1 + $0x8f8] sm:$0xff]  }
  0xcb   :  { %5274 = vmatpush3.bf16.msra.mxu0 %v5792_v33  ;;  %v5860_v33 = vld [vmem:[%s7562_s1 + $0x838] sm:$0xff]  }
  0xcc   :  { %5275 = vmatprep.subr.bf16.mxu0 %v5795_v36  ;;  %v5863_v36 = vld [vmem:[%s7562_s1 + $0x870] sm:$0xff]  }
  0xcd   :  { %5296 = vmatpush3.bf16.msra.mxu1 %v5794_v35  ;;  %v5862_v35 = vld [vmem:[%s7562_s1 + $0x8b8] sm:$0xff]  }
  0xce   :  { %5297 = vmatprep.subr.bf16.mxu1 %v5797_v38  ;;  %v5865_v38 = vld [vmem:[%s7562_s1 + $0x8f0] sm:$0xff]  }
  0xcf   :  { %5276 = vmatpush3.bf16.msra.mxu0 %v5796_v37  ;;  %v5864_v37 = vld [vmem:[%s7562_s1 + $0x830] sm:$0xff]  }
  0xd0   :  { %5277 = vmatprep.subr.bf16.mxu0 %v5799_v40  ;;  %v5867_v40 = vld [vmem:[%s7562_s1 + $0x868] sm:$0xff]  }
  0xd1   :  { %5298 = vmatpush3.bf16.msra.mxu1 %v5798_v39  ;;  %v5866_v39 = vld [vmem:[%s7562_s1 + $0x8b0] sm:$0xff]  }
  0xd2   :  { %5299 = vmatprep.subr.bf16.mxu1 %v5801_v42  ;;  %v5869_v42 = vld [vmem:[%s7562_s1 + $0x8e8] sm:$0xff]  }
  0xd3   :  { %5278 = vmatpush3.bf16.msra.mxu0 %v5800_v41  ;;  %v5868_v41 = vld [vmem:[%s7562_s1 + $0x828] sm:$0xff]  }
  0xd4   :  { %5279 = vmatprep.subr.bf16.mxu0 %v5803_v44  ;;  %v5871_v44 = vld [vmem:[%s7562_s1 + $0x860] sm:$0xff]  }
  0xd5   :  { %5300 = vmatpush3.bf16.msra.mxu1 %v5802_v43  ;;  %v5870_v43 = vld [vmem:[%s7562_s1 + $0x8a8] sm:$0xff]  }
  0xd6   :  { %5301 = vmatprep.subr.bf16.mxu1 %v5805_v46  ;;  %v5873_v46 = vld [vmem:[%s7562_s1 + $0x8e0] sm:$0xff]  }
  0xd7   :  { %5280 = vmatpush3.bf16.msra.mxu0 %v5804_v45  ;;  %v5872_v45 = vld [vmem:[%s7562_s1 + $0x820] sm:$0xff]  }
  0xd8   :  { %5281 = vmatprep.subr.bf16.mxu0 %v5807_v48  ;;  %v5875_v48 = vld [vmem:[%s7562_s1 + $0x858] sm:$0xff]  }
  0xd9   :  { %5302 = vmatpush3.bf16.msra.mxu1 %v5806_v47  ;;  %v5874_v47 = vld [vmem:[%s7562_s1 + $0x8a0] sm:$0xff]  }
  0xda   :  { %5303 = vmatprep.subr.bf16.mxu1 %v5809_v50  ;;  %v5877_v50 = vld [vmem:[%s7562_s1 + $0x8d8] sm:$0xff]  }
  0xdb   :  { %5282 = vmatpush3.bf16.msra.mxu0 %v5808_v49  ;;  %v5876_v49 = vld [vmem:[%s7562_s1 + $0x818] sm:$0xff]  }
  0xdc   :  { %5283 = vmatprep.subr.bf16.mxu0 %v5811_v52  ;;  %v5879_v52 = vld [vmem:[%s7562_s1 + $0x850] sm:$0xff]  }
  0xdd   :  { %5304 = vmatpush3.bf16.msra.mxu1 %v5810_v51  ;;  %v5878_v51 = vld [vmem:[%s7562_s1 + $0x898] sm:$0xff]  }
  0xde   :  { %5305 = vmatprep.subr.bf16.mxu1 %v5813_v54  ;;  %v5881_v54 = vld [vmem:[%s7562_s1 + $0x8d0] sm:$0xff]  }
  0xdf   :  { %5284 = vmatpush3.bf16.msra.mxu0 %v5812_v53  ;;  %v5880_v53 = vld [vmem:[%s7562_s1 + $0x810] sm:$0xff]  }
  0xe0   :  { %5313 = vmatprep.subr.bf16.mxu0 %v5818_v58  ;;  %v5885_v58 = vld [vmem:[%s7562_s1 + $0x8c8] sm:$0xff]  }
  0xe1   :  { %5306 = vmatpush3.bf16.msra.mxu1 %v5817_v57  ;;  %v5884_v57 = vld [vmem:[%s7562_s1 + $0x808] sm:$0xff]  }
  0xe2   :  { %4047 = vmatmul.mubr.bf16.vlgmr.msra.gmra.mxu0 %v5814_v55  ;;  %5335 = vmatprep.subr.bf16.mxu1 %v5823_v62  ;;  %v5882_v55 = vld [vmem:[%s7562_s1 + $0x890] sm:$0xff]   ;;  %v5889_v62 = vld [vmem:[%s7562_s1 + $0x8c0] sm:$0xff]  }
  0xe3   :  { %5314 = vmatpush3.bf16.msra.mxu0 %v5822_v61  ;;  %4128 = vmatprep.mubr.bf16.mxu0 %v5854_v28  ;;  %v5888_v61 = vld [vmem:[%s7562_s1 + $0x800] sm:$0xff]   ;;  %v5921_v28 = vld [vmem:[%s7562_s1 + $0x948] sm:$0xff]  }
  0xe4   :  { %4088 = vmatmul.mubr.bf16.vlgmr.msra.gmra.mxu1 %v5819_v59  ;;  %5315 = vmatprep.subr.bf16.mxu0 %v5825_v0  ;;  %v5886_v59 = vld [vmem:[%s7562_s1 + $0x888] sm:$0xff]  }
  0xe5   :  { %5336 = vmatpush3.bf16.msra.mxu1 %v5824_v63  ;;  %4169 = vmatprep.mubr.bf16.mxu1 %v5859_v32  ;;  %v5890_v63 = vld [vmem:[%s7563_s0 + $0x80] ss:$200 sps:$4 sm:$0xff]   ;;  %v5892_v0 = vld [vmem:[%s7563_s0 + $0x84] ss:$200 sps:$4 sm:$0xff]  }
  0xe6   :  { %5337 = vmatprep.subr.bf16.mxu1 %v5827_v2  ;;  %v5894_v2 = vld [vmem:[%s7562_s1 + $0x978] sm:$0xff]   ;;  %v5925_v32 = vld [vmem:[%s7562_s1 + $0x940] sm:$0xff]  }
  0xe7   :  { %5316 = vmatpush3.bf16.msra.mxu0 %v5826_v1  ;;  %v5893_v1 = vld [vmem:[%s7562_s1 + $0x880] sm:$0xff]  }
  0xe8   :  { %5317 = vmatprep.subr.bf16.mxu0 %v5829_v4  ;;  %v5897_v4 = vld [vmem:[%s7563_s0 + $0x8c] ss:$200 sps:$4 sm:$0xff]  }
  0xe9   :  { %5338 = vmatpush3.bf16.msra.mxu1 %v5828_v3  ;;  %v5895_v3 = vld [vmem:[%s7563_s0 + $0x88] ss:$200 sps:$4 sm:$0xff]  }
  0xea   :  { %5339 = vmatprep.subr.bf16.mxu1 %v5831_v6  ;;  %v5899_v6 = vld [vmem:[%s7562_s1 + $0x9f8] sm:$0xff]  }
  0xeb   :  { %5318 = vmatpush3.bf16.msra.mxu0 %v5830_v5  ;;  %v5898_v5 = vld [vmem:[%s7562_s1 + $0x938] sm:$0xff]  }
  0xec   :  { %5319 = vmatprep.subr.bf16.mxu0 %v5833_v8  ;;  %v5901_v8 = vld [vmem:[%s7562_s1 + $0x970] sm:$0xff]  }
  0xed   :  { %5340 = vmatpush3.bf16.msra.mxu1 %v5832_v7  ;;  %v5900_v7 = vld [vmem:[%s7562_s1 + $0x9b8] sm:$0xff]  }
  0xee   :  { %5341 = vmatprep.subr.bf16.mxu1 %v5835_v10  ;;  %v5903_v10 = vld [vmem:[%s7562_s1 + $0x9f0] sm:$0xff]  }
  0xef   :  { %5320 = vmatpush3.bf16.msra.mxu0 %v5834_v9  ;;  %v5902_v9 = vld [vmem:[%s7562_s1 + $0x930] sm:$0xff]  }
  0xf0   :  { %5321 = vmatprep.subr.bf16.mxu0 %v5837_v12  ;;  %v5905_v12 = vld [vmem:[%s7562_s1 + $0x968] sm:$0xff]  }
  0xf1   :  { %5342 = vmatpush3.bf16.msra.mxu1 %v5836_v11  ;;  %v5904_v11 = vld [vmem:[%s7562_s1 + $0x9b0] sm:$0xff]  }
  0xf2   :  { %5343 = vmatprep.subr.bf16.mxu1 %v5839_v14  ;;  %v5907_v14 = vld [vmem:[%s7562_s1 + $0x9e8] sm:$0xff]  }
  0xf3   :  { %5322 = vmatpush3.bf16.msra.mxu0 %v5838_v13  ;;  %v5906_v13 = vld [vmem:[%s7562_s1 + $0x928] sm:$0xff]  }
  0xf4   :  { %5323 = vmatprep.subr.bf16.mxu0 %v5841_v16  ;;  %v5909_v16 = vld [vmem:[%s7562_s1 + $0x960] sm:$0xff]  }
  0xf5   :  { %5344 = vmatpush3.bf16.msra.mxu1 %v5840_v15  ;;  %v5908_v15 = vld [vmem:[%s7562_s1 + $0x9a8] sm:$0xff]  }
  0xf6   :  { %5345 = vmatprep.subr.bf16.mxu1 %v5843_v18  ;;  %v5911_v18 = vld [vmem:[%s7562_s1 + $0x9e0] sm:$0xff]  }
  0xf7   :  { %5324 = vmatpush3.bf16.msra.mxu0 %v5842_v17  ;;  %v5910_v17 = vld [vmem:[%s7562_s1 + $0x920] sm:$0xff]  }
  0xf8   :  { %5325 = vmatprep.subr.bf16.mxu0 %v5845_v20  ;;  %v5913_v20 = vld [vmem:[%s7562_s1 + $0x958] sm:$0xff]  }
  0xf9   :  { %5346 = vmatpush3.bf16.msra.mxu1 %v5844_v19  ;;  %v5912_v19 = vld [vmem:[%s7562_s1 + $0x9a0] sm:$0xff]  }
  0xfa   :  { %5347 = vmatprep.subr.bf16.mxu1 %v5847_v22  ;;  %v5915_v22 = vld [vmem:[%s7562_s1 + $0x9d8] sm:$0xff]  }
  0xfb   :  { %5326 = vmatpush3.bf16.msra.mxu0 %v5846_v21  ;;  %v5914_v21 = vld [vmem:[%s7562_s1 + $0x918] sm:$0xff]  }
  0xfc   :  { %5327 = vmatprep.subr.bf16.mxu0 %v5849_v24  ;;  %v5917_v24 = vld [vmem:[%s7562_s1 + $0x950] sm:$0xff]  }
  0xfd   :  { %5348 = vmatpush3.bf16.msra.mxu1 %v5848_v23  ;;  %v5916_v23 = vld [vmem:[%s7562_s1 + $0x998] sm:$0xff]  }
  0xfe   :  { %5349 = vmatprep.subr.bf16.mxu1 %v5851_v26  ;;  %v5919_v26 = vld [vmem:[%s7562_s1 + $0x9d0] sm:$0xff]  }
  0xff   :  { %5328 = vmatpush3.bf16.msra.mxu0 %v5850_v25  ;;  %v5918_v25 = vld [vmem:[%s7562_s1 + $0x910] sm:$0xff]  }
 0x100   :  { %5357 = vmatprep.subr.bf16.mxu0 %v5856_v30  ;;  %v5923_v30 = vld [vmem:[%s7562_s1 + $0x9c8] sm:$0xff]  }
 0x101   :  { %5350 = vmatpush3.bf16.msra.mxu1 %v5855_v29  ;;  %v5922_v29 = vld [vmem:[%s7562_s1 + $0x908] sm:$0xff]  }
 0x102   :  { %4129 = vmatmul.mubr.bf16.vlgmr.msra.gmra.mxu0 %v5852_v27  ;;  %5379 = vmatprep.subr.bf16.mxu1 %v5861_v34  ;;  %v5920_v27 = vld [vmem:[%s7562_s1 + $0x990] sm:$0xff]   ;;  %v5927_v34 = vld [vmem:[%s7562_s1 + $0x9c0] sm:$0xff]  }
 0x103   :  { %5358 = vmatpush3.bf16.msra.mxu0 %v5860_v33  ;;  %4210 = vmatprep.mubr.bf16.mxu0 %v5892_v0  ;;  %v5926_v33 = vld [vmem:[%s7562_s1 + $0x900] sm:$0xff]   ;;  %v5959_v0 = vld [vmem:[%s7562_s1 + $0xa48] sm:$0xff]  }
 0x104   :  { %4170 = vmatmul.mubr.bf16.vlgmr.msra.gmra.mxu1 %v5857_v31  ;;  %5359 = vmatprep.subr.bf16.mxu0 %v5863_v36  ;;  %v5924_v31 = vld [vmem:[%s7562_s1 + $0x988] sm:$0xff]   ;;  %v5930_v36 = vld [vmem:[%s7563_s0 + $0x94] ss:$200 sps:$4 sm:$0xff]  }
 0x105   :  { %5380 = vmatpush3.bf16.msra.mxu1 %v5862_v35  ;;  %4251 = vmatprep.mubr.bf16.mxu1 %v5897_v4  ;;  %v5928_v35 = vld [vmem:[%s7563_s0 + $0x90] ss:$200 sps:$4 sm:$0xff]   ;;  %v5963_v4 = vld [vmem:[%s7562_s1 + $0xa40] sm:$0xff]  }
 0x106   :  { %5381 = vmatprep.subr.bf16.mxu1 %v5865_v38  ;;  %v5932_v38 = vld [vmem:[%s7562_s1 + $0xa78] sm:$0xff]  }
 0x107   :  { %5360 = vmatpush3.bf16.msra.mxu0 %v5864_v37  ;;  %v5931_v37 = vld [vmem:[%s7562_s1 + $0x980] sm:$0xff]  }
 0x108   :  { %5361 = vmatprep.subr.bf16.mxu0 %v5867_v40  ;;  %v5935_v40 = vld [vmem:[%s7563_s0 + $0x9c] ss:$200 sps:$4 sm:$0xff]  }
 0x109   :  { %5382 = vmatpush3.bf16.msra.mxu1 %v5866_v39  ;;  %v5933_v39 = vld [vmem:[%s7563_s0 + $0x98] ss:$200 sps:$4 sm:$0xff]  }
 0x10a   :  { %5383 = vmatprep.subr.bf16.mxu1 %v5869_v42  ;;  %v5937_v42 = vld [vmem:[%s7562_s1 + $0xaf8] sm:$0xff]  }
 0x10b   :  { %5362 = vmatpush3.bf16.msra.mxu0 %v5868_v41  ;;  %v5936_v41 = vld [vmem:[%s7562_s1 + $0xa38] sm:$0xff]  }
 0x10c   :  { %5363 = vmatprep.subr.bf16.mxu0 %v5871_v44  ;;  %v5939_v44 = vld [vmem:[%s7562_s1 + $0xa70] sm:$0xff]  }
 0x10d   :  { %5384 = vmatpush3.bf16.msra.mxu1 %v5870_v43  ;;  %v5938_v43 = vld [vmem:[%s7562_s1 + $0xab8] sm:$0xff]  }
 0x10e   :  { %5385 = vmatprep.subr.bf16.mxu1 %v5873_v46  ;;  %v5941_v46 = vld [vmem:[%s7562_s1 + $0xaf0] sm:$0xff]  }
 0x10f   :  { %5364 = vmatpush3.bf16.msra.mxu0 %v5872_v45  ;;  %v5940_v45 = vld [vmem:[%s7562_s1 + $0xa30] sm:$0xff]  }
 0x110   :  { %5365 = vmatprep.subr.bf16.mxu0 %v5875_v48  ;;  %v5943_v48 = vld [vmem:[%s7562_s1 + $0xa68] sm:$0xff]  }
 0x111   :  { %5386 = vmatpush3.bf16.msra.mxu1 %v5874_v47  ;;  %v5942_v47 = vld [vmem:[%s7562_s1 + $0xab0] sm:$0xff]  }
 0x112   :  { %5387 = vmatprep.subr.bf16.mxu1 %v5877_v50  ;;  %v5945_v50 = vld [vmem:[%s7562_s1 + $0xae8] sm:$0xff]  }
 0x113   :  { %5366 = vmatpush3.bf16.msra.mxu0 %v5876_v49  ;;  %v5944_v49 = vld [vmem:[%s7562_s1 + $0xa28] sm:$0xff]  }
 0x114   :  { %5367 = vmatprep.subr.bf16.mxu0 %v5879_v52  ;;  %v5947_v52 = vld [vmem:[%s7562_s1 + $0xa60] sm:$0xff]  }
 0x115   :  { %5388 = vmatpush3.bf16.msra.mxu1 %v5878_v51  ;;  %v5946_v51 = vld [vmem:[%s7562_s1 + $0xaa8] sm:$0xff]  }
 0x116   :  { %5389 = vmatprep.subr.bf16.mxu1 %v5881_v54  ;;  %v5949_v54 = vld [vmem:[%s7562_s1 + $0xae0] sm:$0xff]  }
 0x117   :  { %5368 = vmatpush3.bf16.msra.mxu0 %v5880_v53  ;;  %v5948_v53 = vld [vmem:[%s7562_s1 + $0xa20] sm:$0xff]  }
 0x118   :  { %5369 = vmatprep.subr.bf16.mxu0 %v5883_v56  ;;  %v5951_v56 = vld [vmem:[%s7562_s1 + $0xa58] sm:$0xff]  }
 0x119   :  { %5390 = vmatpush3.bf16.msra.mxu1 %v5882_v55  ;;  %v5950_v55 = vld [vmem:[%s7562_s1 + $0xaa0] sm:$0xff]  }
 0x11a   :  { %5391 = vmatprep.subr.bf16.mxu1 %v5885_v58  ;;  %v5953_v58 = vld [vmem:[%s7562_s1 + $0xad8] sm:$0xff]  }
 0x11b   :  { %5370 = vmatpush3.bf16.msra.mxu0 %v5884_v57  ;;  %v5952_v57 = vld [vmem:[%s7562_s1 + $0xa18] sm:$0xff]  }
 0x11c   :  { %5371 = vmatprep.subr.bf16.mxu0 %v5887_v60  ;;  %v5955_v60 = vld [vmem:[%s7562_s1 + $0xa50] sm:$0xff]  }
 0x11d   :  { %5392 = vmatpush3.bf16.msra.mxu1 %v5886_v59  ;;  %v5954_v59 = vld [vmem:[%s7562_s1 + $0xa98] sm:$0xff]  }
 0x11e   :  { %5393 = vmatprep.subr.bf16.mxu1 %v5889_v62  ;;  %v5957_v62 = vld [vmem:[%s7562_s1 + $0xad0] sm:$0xff]  }
 0x11f   :  { %5372 = vmatpush3.bf16.msra.mxu0 %v5888_v61  ;;  %v5956_v61 = vld [vmem:[%s7562_s1 + $0xa10] sm:$0xff]  }
 0x120   :  { %5401 = vmatprep.subr.bf16.mxu0 %v5894_v2  ;;  %v5961_v2 = vld [vmem:[%s7562_s1 + $0xac8] sm:$0xff]  }
 0x121   :  { %5394 = vmatpush3.bf16.msra.mxu1 %v5893_v1  ;;  %v5960_v1 = vld [vmem:[%s7562_s1 + $0xa08] sm:$0xff]  }
 0x122   :  { %4211 = vmatmul.mubr.bf16.vlgmr.msra.gmra.mxu0 %v5890_v63  ;;  %5423 = vmatprep.subr.bf16.mxu1 %v5899_v6  ;;  %v5958_v63 = vld [vmem:[%s7562_s1 + $0xa90] sm:$0xff]   ;;  %v5965_v6 = vld [vmem:[%s7562_s1 + $0xac0] sm:$0xff]  }
 0x123   :  { %5402 = vmatpush3.bf16.msra.mxu0 %v5898_v5  ;;  %4292 = vmatprep.mubr.bf16.mxu0 %v5930_v36  ;;  %v5964_v5 = vld [vmem:[%s7562_s1 + $0xa00] sm:$0xff]   ;;  %v5997_v36 = vld [vmem:[%s7562_s1 + $0xb48] sm:$0xff]  }
 0x124   :  { %4252 = vmatmul.mubr.bf16.vlgmr.msra.gmra.mxu1 %v5895_v3  ;;  %5403 = vmatprep.subr.bf16.mxu0 %v5901_v8  ;;  %v5962_v3 = vld [vmem:[%s7562_s1 + $0xa88] sm:$0xff]  }
 0x125   :  { %5424 = vmatpush3.bf16.msra.mxu1 %v5900_v7  ;;  %4333 = vmatprep.mubr.bf16.mxu1 %v5935_v40  ;;  %v5966_v7 = vld [vmem:[%s7563_s0 + $0xa0] ss:$200 sps:$4 sm:$0xff]   ;;  %v5968_v8 = vld [vmem:[%s7563_s0 + $0xa4] ss:$200 sps:$4 sm:$0xff]  }
 0x126   :  { %5425 = vmatprep.subr.bf16.mxu1 %v5903_v10  ;;  %v5970_v10 = vld [vmem:[%s7562_s1 + $0xb78] sm:$0xff]   ;;  %v6001_v40 = vld [vmem:[%s7562_s1 + $0xb40] sm:$0xff]  }
 0x127   :  { %5404 = vmatpush3.bf16.msra.mxu0 %v5902_v9  ;;  %v5969_v9 = vld [vmem:[%s7562_s1 + $0xa80] sm:$0xff]  }
 0x128   :  { %5405 = vmatprep.subr.bf16.mxu0 %v5905_v12  ;;  %v5973_v12 = vld [vmem:[%s7563_s0 + $0xac] ss:$200 sps:$4 sm:$0xff]  }
 0x129   :  { %5426 = vmatpush3.bf16.msra.mxu1 %v5904_v11  ;;  %v5971_v11 = vld [vmem:[%s7563_s0 + $0xa8] ss:$200 sps:$4 sm:$0xff]  }
 0x12a   :  { %5427 = vmatprep.subr.bf16.mxu1 %v5907_v14  ;;  %v5975_v14 = vld [vmem:[%s7562_s1 + $0xbf8] sm:$0xff]  }
 0x12b   :  { %5406 = vmatpush3.bf16.msra.mxu0 %v5906_v13  ;;  %v5974_v13 = vld [vmem:[%s7562_s1 + $0xb38] sm:$0xff]  }
 0x12c   :  { %5407 = vmatprep.subr.bf16.mxu0 %v5909_v16  ;;  %v5977_v16 = vld [vmem:[%s7562_s1 + $0xb70] sm:$0xff]  }
 0x12d   :  { %5428 = vmatpush3.bf16.msra.mxu1 %v5908_v15  ;;  %v5976_v15 = vld [vmem:[%s7562_s1 + $0xbb8] sm:$0xff]  }
 0x12e   :  { %5429 = vmatprep.subr.bf16.mxu1 %v5911_v18  ;;  %v5979_v18 = vld [vmem:[%s7562_s1 + $0xbf0] sm:$0xff]  }
 0x12f   :  { %5408 = vmatpush3.bf16.msra.mxu0 %v5910_v17  ;;  %v5978_v17 = vld [vmem:[%s7562_s1 + $0xb30] sm:$0xff]  }
 0x130   :  { %5409 = vmatprep.subr.bf16.mxu0 %v5913_v20  ;;  %v5981_v20 = vld [vmem:[%s7562_s1 + $0xb68] sm:$0xff]  }
 0x131   :  { %5430 = vmatpush3.bf16.msra.mxu1 %v5912_v19  ;;  %v5980_v19 = vld [vmem:[%s7562_s1 + $0xbb0] sm:$0xff]  }
 0x132   :  { %5431 = vmatprep.subr.bf16.mxu1 %v5915_v22  ;;  %v5983_v22 = vld [vmem:[%s7562_s1 + $0xbe8] sm:$0xff]  }
 0x133   :  { %5410 = vmatpush3.bf16.msra.mxu0 %v5914_v21  ;;  %v5982_v21 = vld [vmem:[%s7562_s1 + $0xb28] sm:$0xff]  }
 0x134   :  { %5411 = vmatprep.subr.bf16.mxu0 %v5917_v24  ;;  %v5985_v24 = vld [vmem:[%s7562_s1 + $0xb60] sm:$0xff]  }
 0x135   :  { %5432 = vmatpush3.bf16.msra.mxu1 %v5916_v23  ;;  %v5984_v23 = vld [vmem:[%s7562_s1 + $0xba8] sm:$0xff]  }
 0x136   :  { %5433 = vmatprep.subr.bf16.mxu1 %v5919_v26  ;;  %v5987_v26 = vld [vmem:[%s7562_s1 + $0xbe0] sm:$0xff]  }
 0x137   :  { %5412 = vmatpush3.bf16.msra.mxu0 %v5918_v25  ;;  %v5986_v25 = vld [vmem:[%s7562_s1 + $0xb20] sm:$0xff]  }
 0x138   :  { %5413 = vmatprep.subr.bf16.mxu0 %v5921_v28  ;;  %v5989_v28 = vld [vmem:[%s7562_s1 + $0xb58] sm:$0xff]  }
 0x139   :  { %5434 = vmatpush3.bf16.msra.mxu1 %v5920_v27  ;;  %v5988_v27 = vld [vmem:[%s7562_s1 + $0xba0] sm:$0xff]  }
 0x13a   :  { %5435 = vmatprep.subr.bf16.mxu1 %v5923_v30  ;;  %v5991_v30 = vld [vmem:[%s7562_s1 + $0xbd8] sm:$0xff]  }
 0x13b   :  { %5414 = vmatpush3.bf16.msra.mxu0 %v5922_v29  ;;  %v5990_v29 = vld [vmem:[%s7562_s1 + $0xb18] sm:$0xff]  }
 0x13c   :  { %5415 = vmatprep.subr.bf16.mxu0 %v5925_v32  ;;  %v5993_v32 = vld [vmem:[%s7562_s1 + $0xb50] sm:$0xff]  }
 0x13d   :  { %5436 = vmatpush3.bf16.msra.mxu1 %v5924_v31  ;;  %v5992_v31 = vld [vmem:[%s7562_s1 + $0xb98] sm:$0xff]  }
 0x13e   :  { %5437 = vmatprep.subr.bf16.mxu1 %v5927_v34  ;;  %v5995_v34 = vld [vmem:[%s7562_s1 + $0xbd0] sm:$0xff]  }
 0x13f   :  { %5416 = vmatpush3.bf16.msra.mxu0 %v5926_v33  ;;  %v5994_v33 = vld [vmem:[%s7562_s1 + $0xb10] sm:$0xff]  }
 0x140   :  { %5445 = vmatprep.subr.bf16.mxu0 %v5932_v38  ;;  %v5999_v38 = vld [vmem:[%s7562_s1 + $0xbc8] sm:$0xff]  }
 0x141   :  { %5438 = vmatpush3.bf16.msra.mxu1 %v5931_v37  ;;  %v5998_v37 = vld [vmem:[%s7562_s1 + $0xb08] sm:$0xff]  }
 0x142   :  { %4293 = vmatmul.mubr.bf16.vlgmr.msra.gmra.mxu0 %v5928_v35  ;;  %5467 = vmatprep.subr.bf16.mxu1 %v5937_v42  ;;  %v5996_v35 = vld [vmem:[%s7562_s1 + $0xb90] sm:$0xff]   ;;  %v6003_v42 = vld [vmem:[%s7562_s1 + $0xbc0] sm:$0xff]  }
 0x143   :  { %5446 = vmatpush3.bf16.msra.mxu0 %v5936_v41  ;;  %4374 = vmatprep.mubr.bf16.mxu0 %v5968_v8  ;;  %v6002_v41 = vld [vmem:[%s7562_s1 + $0xb00] sm:$0xff]  }
 0x144   :  { %4334 = vmatmul.mubr.bf16.vlgmr.msra.gmra.mxu1 %v5933_v39  ;;  %5447 = vmatprep.subr.bf16.mxu0 %v5939_v44  ;;  %v6000_v39 = vld [vmem:[%s7562_s1 + $0xb88] sm:$0xff]   ;;  %v6006_v44 = vld [vmem:[%s7563_s0 + $0xb4] ss:$200 sps:$4 sm:$0xff]  }
 0x145   :  { %5468 = vmatpush3.bf16.msra.mxu1 %v5938_v43  ;;  %4415 = vmatprep.mubr.bf16.mxu1 %v5973_v12  ;;  %v6004_v43 = vld [vmem:[%s7563_s0 + $0xb0] ss:$200 sps:$4 sm:$0xff]  }
 0x146   :  { %5469 = vmatprep.subr.bf16.mxu1 %v5941_v46  ;;  %v6008_v46 = vld [vmem:[%s7562_s1 + $0xc78] sm:$0xff]  }
 0x147   :  { %5448 = vmatpush3.bf16.msra.mxu0 %v5940_v45  ;;  %v6007_v45 = vld [vmem:[%s7562_s1 + $0xb80] sm:$0xff]  }
 0x148   :  { %5449 = vmatprep.subr.bf16.mxu0 %v5943_v48  ;;  %v6011_v48 = vld [vmem:[%s7563_s0 + $0xbc] ss:$200 sps:$4 sm:$0xff]  }
 0x149   :  { %5470 = vmatpush3.bf16.msra.mxu1 %v5942_v47  ;;  %v6009_v47 = vld [vmem:[%s7563_s0 + $0xb8] ss:$200 sps:$4 sm:$0xff]  }
 0x14a   :  { %5471 = vmatprep.subr.bf16.mxu1 %v5945_v50  ;;  %v6013_v50 = vld [vmem:[%s7562_s1 + $0xc70] sm:$0xff]  }
 0x14b   :  { %5450 = vmatpush3.bf16.msra.mxu0 %v5944_v49  ;;  %v6012_v49 = vld [vmem:[%s7562_s1 + $0xc38] sm:$0xff]  }
 0x14c   :  { %5451 = vmatprep.subr.bf16.mxu0 %v5947_v52  ;;  %v6015_v52 = vld [vmem:[%s7562_s1 + $0xc68] sm:$0xff]  }
 0x14d   :  { %5472 = vmatpush3.bf16.msra.mxu1 %v5946_v51  ;;  %v6014_v51 = vld [vmem:[%s7562_s1 + $0xc30] sm:$0xff]  }
 0x14e   :  { %5473 = vmatprep.subr.bf16.mxu1 %v5949_v54  ;;  %v6017_v54 = vld [vmem:[%s7562_s1 + $0xc60] sm:$0xff]  }
 0x14f   :  { %5452 = vmatpush3.bf16.msra.mxu0 %v5948_v53  ;;  %v6016_v53 = vld [vmem:[%s7562_s1 + $0xc28] sm:$0xff]  }
 0x150   :  { %5453 = vmatprep.subr.bf16.mxu0 %v5951_v56  ;;  %v6019_v56 = vld [vmem:[%s7562_s1 + $0xc58] sm:$0xff]  }
 0x151   :  { %5474 = vmatpush3.bf16.msra.mxu1 %v5950_v55  ;;  %v6018_v55 = vld [vmem:[%s7562_s1 + $0xc20] sm:$0xff]  }
 0x152   :  { %5475 = vmatprep.subr.bf16.mxu1 %v5953_v58  ;;  %v6021_v58 = vld [vmem:[%s7562_s1 + $0xc50] sm:$0xff]  }
 0x153   :  { %5454 = vmatpush3.bf16.msra.mxu0 %v5952_v57  ;;  %v6020_v57 = vld [vmem:[%s7562_s1 + $0xc18] sm:$0xff]  }
 0x154   :  { %5455 = vmatprep.subr.bf16.mxu0 %v5955_v60  ;;  %v6022_v60 = vld [vmem:[%s7562_s1 + $0xc10] sm:$0xff]  }
 0x155   :  { %5476 = vmatpush3.bf16.msra.mxu1 %v5954_v59  ;;  %v6029_v59 = vld [vmem:[%s7563_s0 + $0xc4] ss:$200 sps:$4 sm:$0xff]  }
 0x156   :  { %5477 = vmatprep.subr.bf16.mxu1 %v5957_v62  ;;  %v6024_v62 = vld [vmem:[%s7562_s1 + $0xc08] sm:$0xff]  }
 0x157   :  { %5456 = vmatpush3.bf16.msra.mxu0 %v5956_v61  ;;  %v6023_v61 = vld [vmem:[%s7562_s1 + $0xc48] sm:$0xff]  }
 0x158   :  { %5457 = vmatprep.subr.bf16.mxu0 %v5959_v0  ;;  %v6026_v0 = vld [vmem:[%s7562_s1 + $0xc00] sm:$0xff]  }
 0x159   :  { %5478 = vmatpush3.bf16.msra.mxu1 %v5958_v63  ;;  %v6025_v63 = vld [vmem:[%s7562_s1 + $0xc40] sm:$0xff]  }
 0x15a   :  { %5479 = vmatprep.subr.bf16.mxu1 %v5961_v2  ;;  %v5021_v2 = vpop.f32.mrf.mxu0 }
 0x15b   :  { %5458 = vmatpush3.bf16.msra.mxu0 %v5960_v1  ;;  %v6027_v1 = vld [vmem:[%s7563_s0 + $0xc0] ss:$200 sps:$4 sm:$0xff]  }
 0x15c   :  { %5459 = vmatprep.subr.bf16.mxu0 %v5963_v4  ;;  %v5043_v4 = vpop.f32.mrf.mxu1 }
 0x15d   :  { %5480 = vmatpush3.bf16.msra.mxu1 %v5962_v3  ;;  %v5022_v3 = vpop.f32.mrf.mxu0 }
 0x15e   :  { %5481 = vmatprep.subr.bf16.mxu1 %v5965_v6  ;;  %v5044_v6 = vpop.f32.mrf.mxu1 }
 0x15f   :  { %5460 = vmatpush3.bf16.msra.mxu0 %v5964_v5  ;;  %v5024_v5 = vpop.f32.mrf.mxu0 }
 0x160   :  { %5489 = vmatprep.subr.bf16.mxu0 %v5970_v10  ;;  %v7400_v8 = vpop.f32.mrf.mxu1 }
 0x161   :  { %5482 = vmatpush3.bf16.msra.mxu1 %v5969_v9 }
 0x162   :  { %4375 = vmatmul.mubr.bf16.vlgmr.msra.gmra.mxu0 %v5966_v7  ;;  %5511 = vmatprep.subr.bf16.mxu1 %v5975_v14  ;;  %v5025_v7 = vpop.f32.mrf.mxu0  ;;  %v5047_v10 = vpop.f32.mrf.mxu1 }
 0x163   :  { %5490 = vmatpush3.bf16.msra.mxu0 %v5974_v13  ;;  %4456 = vmatprep.mubr.bf16.mxu0 %v6006_v44 }
 0x164   :  { %4416 = vmatmul.mubr.bf16.vlgmr.msra.gmra.mxu1 %v5971_v11  ;;  %5491 = vmatprep.subr.bf16.mxu0 %v5977_v16  ;;  %v5065_v9 = vpop.f32.mrf.mxu0  ;;  %v5087_v12 = vpop.f32.mrf.mxu1 }
 0x165   :  { %5512 = vmatpush3.bf16.msra.mxu1 %v5976_v15  ;;  %4497 = vmatprep.mubr.bf16.mxu1 %v6011_v48 }
 0x166   :  { %5513 = vmatprep.subr.bf16.mxu1 %v5979_v18  ;;  %v5066_v11 = vpop.f32.mrf.mxu0  ;;  %v5088_v14 = vpop.f32.mrf.mxu1 }
 0x167   :  { %5492 = vmatpush3.bf16.msra.mxu0 %v5978_v17 }
 0x168   :  { %5493 = vmatprep.subr.bf16.mxu0 %v5981_v20  ;;  %v5068_v13 = vpop.f32.mrf.mxu0  ;;  %v7402_v16 = vpop.f32.mrf.mxu1 }
 0x169   :  { %5514 = vmatpush3.bf16.msra.mxu1 %v5980_v19 }
 0x16a   :  { %5515 = vmatprep.subr.bf16.mxu1 %v5983_v22  ;;  %v5069_v15 = vpop.f32.mrf.mxu0  ;;  %v7404_v18 = vpop.f32.mrf.mxu1 }
 0x16b   :  { %5494 = vmatpush3.bf16.msra.mxu0 %v5982_v21 }
 0x16c   :  { %5495 = vmatprep.subr.bf16.mxu0 %v5985_v24  ;;  %v5109_v17 = vpop.f32.mrf.mxu0  ;;  %v7406_v20 = vpop.f32.mrf.mxu1 }
 0x16d   :  { %5516 = vmatpush3.bf16.msra.mxu1 %v5984_v23 }
 0x16e   :  { %5517 = vmatprep.subr.bf16.mxu1 %v5987_v26  ;;  %v5110_v19 = vpop.f32.mrf.mxu0  ;;  %v7410_v22 = vpop.f32.mrf.mxu1 }
 0x16f   :  { %5496 = vmatpush3.bf16.msra.mxu0 %v5986_v25 }
 0x170   :  { %5497 = vmatprep.subr.bf16.mxu0 %v5989_v28  ;;  %v7408_v21 = vpop.f32.mrf.mxu0  ;;  %v7414_v24 = vpop.f32.mrf.mxu1 }
 0x171   :  { %5518 = vmatpush3.bf16.msra.mxu1 %v5988_v27 }
 0x172   :  { %5519 = vmatprep.subr.bf16.mxu1 %v5991_v30  ;;  %v7412_v23 = vpop.f32.mrf.mxu0  ;;  %v7418_v26 = vpop.f32.mrf.mxu1 }
 0x173   :  { %5498 = vmatpush3.bf16.msra.mxu0 %v5990_v29 }
 0x174   :  { %5499 = vmatprep.subr.bf16.mxu0 %v5993_v32  ;;  %v7416_v25 = vpop.f32.mrf.mxu0  ;;  %v7422_v28 = vpop.f32.mrf.mxu1 }
 0x175   :  { %5520 = vmatpush3.bf16.msra.mxu1 %v5992_v31 }
 0x176   :  { %5521 = vmatprep.subr.bf16.mxu1 %v5995_v34  ;;  %v7420_v27 = vpop.f32.mrf.mxu0  ;;  %v7426_v30 = vpop.f32.mrf.mxu1 }
 0x177   :  { %5500 = vmatpush3.bf16.msra.mxu0 %v5994_v33 }
 0x178   :  { %5501 = vmatprep.subr.bf16.mxu0 %v5997_v36  ;;  %v7424_v29 = vpop.f32.mrf.mxu0  ;;  %v7430_v32 = vpop.f32.mrf.mxu1 }
 0x179   :  { %5522 = vmatpush3.bf16.msra.mxu1 %v5996_v35 }
 0x17a   :  { %5523 = vmatprep.subr.bf16.mxu1 %v5999_v38  ;;  %v7428_v31 = vpop.f32.mrf.mxu0  ;;  %v7434_v34 = vpop.f32.mrf.mxu1 }
 0x17b   :  { %5502 = vmatpush3.bf16.msra.mxu0 %v5998_v37 }
 0x17c   :  { %5503 = vmatprep.subr.bf16.mxu0 %v6001_v40  ;;  %v7432_v33 = vpop.f32.mrf.mxu0  ;;  %v7438_v36 = vpop.f32.mrf.mxu1 }
 0x17d   :  { %5524 = vmatpush3.bf16.msra.mxu1 %v6000_v39 }
 0x17e   :  { %5525 = vmatprep.subr.bf16.mxu1 %v6003_v42  ;;  %v7436_v35 = vpop.f32.mrf.mxu0  ;;  %v7442_v38 = vpop.f32.mrf.mxu1 }
 0x17f   :  { %5504 = vmatpush3.bf16.msra.mxu0 %v6002_v41 }
 0x180   :  { %5533 = vmatprep.subr.bf16.mxu0 %v6008_v46  ;;  %v7440_v37 = vpop.f32.mrf.mxu0  ;;  %v7446_v40 = vpop.f32.mrf.mxu1 }
 0x181   :  { %5526 = vmatpush3.bf16.msra.mxu1 %v6007_v45 }
 0x182   :  { %4457 = vmatmul.mubr.bf16.vlgmr.msra.gmra.mxu0 %v6004_v43  ;;  %v7444_v39 = vpop.f32.mrf.mxu0  ;;  %v7450_v42 = vpop.f32.mrf.mxu1 }
 0x183   :  { %5534 = vmatpush3.bf16.msra.mxu0 %v6012_v49  ;;  %4538 = vmatprep.mubr.bf16.mxu0 %v6029_v59  ;;  %v4554_v59 = vld [vmem:[%s7564_s2] ss:$0 sm:$0xff] }
 0x184   :  { %4498 = vmatmul.mubr.bf16.vlgmr.msra.gmra.mxu1 %v6009_v47  ;;  %5535 = vmatprep.subr.bf16.mxu0 %v6013_v50  ;;  %v7448_v41 = vpop.f32.mrf.mxu0  ;;  %v7454_v44 = vpop.f32.mrf.mxu1 }
 0x186   :  { %v7452_v43 = vpop.f32.mrf.mxu0  ;;  %v7458_v46 = vpop.f32.mrf.mxu1 }
 0x187   :  { %5536 = vmatpush3.bf16.msra.mxu0 %v6014_v51 }
 0x188   :  { %5537 = vmatprep.subr.bf16.mxu0 %v6015_v52  ;;  %v7456_v45 = vpop.f32.mrf.mxu0  ;;  %v7462_v48 = vpop.f32.mrf.mxu1 }
 0x18a   :  { %v7460_v47 = vpop.f32.mrf.mxu0  ;;  %v7466_v50 = vpop.f32.mrf.mxu1 }
 0x18b   :  { %5538 = vmatpush3.bf16.msra.mxu0 %v6016_v53  ;;  %7566 = vst [vmem:[#allocation2_spill] sm:$0xff] %v7466_v50  ;;  %v5070_v50 = vadd.f32 %v5069_v15, %v5068_v13  ;;  %v5155_v15 = vadd.f32 %v7420_v27, %v7416_v25 }
 0x18c   :  { %5539 = vmatprep.subr.bf16.mxu0 %v6017_v54 }
 0x18f   :  { %5540 = vmatpush3.bf16.msra.mxu0 %v6018_v55 }
 0x190   :  { %5541 = vmatprep.subr.bf16.mxu0 %v6019_v56 }
 0x193   :  { %5542 = vmatpush3.bf16.msra.mxu0 %v6020_v57 }
 0x194   :  { %5543 = vmatprep.subr.bf16.mxu0 %v6021_v58  ;;  %v5023_v58 = vadd.f32 %v5022_v3, %v5021_v2  ;;  %v5048_v3 = vadd.f32 %v5047_v10, %v7400_v8  ;;  %v5133_v8 = vadd.f32 %v7410_v22, %v7406_v20  ;;  %v5114_v10 = vadd.f32 %v7412_v23, %v7408_v21 }
 0x195   :  { %v5177_v20 = vadd.f32 %v7426_v30, %v7422_v28  ;;  %v5158_v21 = vadd.f32 %v7428_v31, %v7424_v29  ;;  %v5199_v23 = vadd.f32 %v7436_v35, %v7432_v33  ;;  %v5202_v28 = vadd.f32 %v7444_v39, %v7440_v37 }
 0x196   :  { %v5243_v31 = vadd.f32 %v7452_v43, %v7448_v41 }
 0x197   :  { %5544 = vmatpush3.bf16.msra.mxu0 %v6022_v60 }
 0x198   :  { %5545 = vmatprep.subr.bf16.mxu0 %v6023_v61 }
 0x19b   :  { %5546 = vmatpush3.bf16.msra.mxu0 %v6024_v62 }
 0x19c   :  { %5547 = vmatprep.subr.bf16.mxu0 %v6025_v63  ;;  %v3557_v63 = vadd.f32 %v5023_v58, %v4554_v59  ;;  %v5111_v58 = vadd.f32 %v5110_v19, %v5109_v17 }
 0x19f   :  { %5548 = vmatpush3.bf16.msra.mxu0 %v6026_v0  ;;  %v5045_v0 = vadd.f32 %v5044_v6, %v5043_v4 }
 0x1a2   :  { %4539 = vmatmul.mubr.bf16.vlgmr.msra.gmra.mxu0 %v6027_v1  ;;  %v7464_v49 = vpop.f32.mrf.mxu0  ;;  %v5026_v1 = vadd.f32 %v5025_v7, %v5024_v5  ;;  %v5092_v7 = vadd.f32 %v7404_v18, %v7402_v16  ;;  %v5136_v16 = vadd.f32 %v7418_v26, %v7414_v24  ;;  %v5180_v24 = vadd.f32 %v7434_v34, %v7430_v32 }
 0x1a3   :  { %v5224_v32 = vadd.f32 %v7450_v42, %v7446_v40 }
 0x1a4   :  { %v7468_v51 = vpop.f32.mrf.mxu0  ;;  %v7470_v52 = vpop.f32.mrf.mxu1  ;;  %v3560_v2 = vadd.f32 %v5026_v1, %v4554_v59  ;;  %v5221_v59 = vadd.f32 %v7442_v38, %v7438_v36  ;;  %v5246_v36 = vadd.f32 %v7460_v47, %v7456_v45 }
 0x1a5   :  { %7567 = vst [vmem:[#allocation3_spill] sm:$0xff] %v7470_v52  ;;  %v5089_v52 = vadd.f32 %v5088_v14, %v5087_v12  ;;  %v5287_v41 = vadd.f32 %v7468_v51, %v7464_v49 }
 0x1a6   :  { %v7472_v53 = vpop.f32.mrf.mxu0  ;;  %v7474_v54 = vpop.f32.mrf.mxu1 }
 0x1a7   :  { %7568 = vst [vmem:[#allocation4_spill] sm:$0xff] %v7472_v53  ;;  %7569 = vst [vmem:[#allocation5_spill] sm:$0xff] %v7474_v54  ;;  %v5067_v53 = vadd.f32 %v5066_v11, %v5065_v9 }
 0x1a8   :  { %v7476_v55 = vpop.f32.mrf.mxu0  ;;  %v7478_v56 = vpop.f32.mrf.mxu1 }
 0x1a9   :  { %7570 = vst [vmem:[#allocation6_spill] sm:$0xff] %v7476_v55  ;;  %7571 = vst [vmem:[#allocation7_spill] sm:$0xff] %v7478_v56 }
 0x1aa   :  { %v7485_v60 = vpop.f32.mrf.mxu1 }
 0x1ab   :  { %7573 = vst [vmem:[#allocation9_spill] sm:$0xff] %v7485_v60 }
 0x1c2   :  { %v7480_v57 = vpop.f32.mrf.mxu0 }
 0x1c3   :  { %7572 = vst [vmem:[#allocation8_spill] sm:$0xff] %v7480_v57  ;;  %v3598_v57 = vadd.f32 %v5045_v0, %v3557_v63  ;;  %v5265_v0 = vadd.f32 %v7458_v46, %v7454_v44  ;;  %v7579_v46 = vld [vmem:[#allocation4_spill] sm:$0xff] }
 0x1c4   :  { %v7487_v61 = vpop.f32.mrf.mxu0  ;;  %v7489_v62 = vpop.f32.mrf.mxu1 }
 0x1c5   :  { %7574 = vst [vmem:[#allocation10_spill] sm:$0xff] %v7487_v61  ;;  %7575 = vst [vmem:[#allocation11_spill] sm:$0xff] %v7489_v62  ;;  %v3639_v54 = vadd.f32 %v5067_v53, %v3598_v57  ;;  %v3601_v62 = vadd.f32 %v5048_v3, %v3560_v2  ;;  %v7576_v2 = vld [vmem:[#allocation2_spill] sm:$0xff] }
 0x1c6   :  { %v7491_v55 = vpop.f32.mrf.mxu0  ;;  %v7493_v56 = vpop.f32.mrf.mxu1  ;;  %v5268_v3 = vadd.f32 %v7576_v2, %v7462_v48 }
 0x1c7   :  { %v3680_v5 = vadd.f32 %v5089_v52, %v3639_v54  ;;  %v3642_v6 = vadd.f32 %v5070_v50, %v3601_v62 }
 0x1c8   :  { %v7496_v60 = vpop.f32.mrf.mxu0  ;;  %v7498_v61 = vpop.f32.mrf.mxu1 }
 0x1c9   :  { %v3721_v11 = vadd.f32 %v5111_v58, %v3680_v5  ;;  %v3683_v14 = vadd.f32 %v5092_v7, %v3642_v6  ;;  %v7577_v5 = vld [vmem:[#allocation3_spill] sm:$0xff]  ;;  %v7578_v6 = vld [vmem:[#allocation5_spill] sm:$0xff]  ;;  %v7580_v7 = vld [vmem:[#allocation6_spill] sm:$0xff] }
 0x1ca   :  { %v7504_v9 = vpop.f32.mrf.mxu1  ;;  %v5309_v44 = vadd.f32 %v7578_v6, %v7577_v5  ;;  %v5290_v45 = vadd.f32 %v7580_v7, %v7579_v46 }
 0x1cb   :  { %v3762_v17 = vadd.f32 %v5133_v8, %v3721_v11  ;;  %v3724_v19 = vadd.f32 %v5114_v10, %v3683_v14  ;;  %v7581_v8 = vld [vmem:[#allocation8_spill] sm:$0xff] }
 0x1cc   :  { %v7582_v10 = vld [vmem:[#allocation10_spill] sm:$0xff] }
 0x1cd   :  { %v3803_v52 = vadd.f32 %v5155_v15, %v3762_v17  ;;  %v3765_v22 = vadd.f32 %v5136_v16, %v3724_v19  ;;  %v5331_v14 = vadd.f32 %v7582_v10, %v7581_v8  ;;  %v7583_v17 = vld [vmem:[#allocation7_spill] sm:$0xff]  ;;  %v7584_v19 = vld [vmem:[#allocation9_spill] sm:$0xff] }
 0x1ce   :  { %v5312_v48 = vadd.f32 %v7584_v19, %v7583_v17 }
 0x1cf   :  { %v3844_v27 = vadd.f32 %v5177_v20, %v3803_v52  ;;  %v3806_v54 = vadd.f32 %v5158_v21, %v3765_v22  ;;  %v7585_v21 = vld [vmem:[#allocation11_spill] sm:$0xff] }
 0x1d0   :  { %v5353_v22 = vadd.f32 %v7493_v56, %v7585_v21 }
 0x1d1   :  { %v3885_v57 = vadd.f32 %v5199_v23, %v3844_v27  ;;  %v3847_v30 = vadd.f32 %v5180_v24, %v3806_v54  ;;  %v5334_v23 = vadd.f32 %v7496_v60, %v7491_v55 }
 0x1d3   :  { %v3926_v62 = vadd.f32 %v5221_v59, %v3885_v57  ;;  %v3888_v63 = vadd.f32 %v5202_v28, %v3847_v30  ;;  %v5356_v30 = vadd.f32 %v7504_v9, %v7498_v61 }
 0x1d5   :  { %v3967_v34 = vadd.f32 %v5243_v31, %v3926_v62  ;;  %v3929_v39 = vadd.f32 %v5224_v32, %v3888_v63 }
 0x1d7   :  { %v4008_v43 = vadd.f32 %v5265_v0, %v3967_v34  ;;  %v3970_v1 = vadd.f32 %v5246_v36, %v3929_v39 }
 0x1d9   :  { %v4049_v42 = vadd.f32 %v5287_v41, %v4008_v43  ;;  %v4011_v11 = vadd.f32 %v5268_v3, %v3970_v1 }
 0x1db   :  { %v4090_v51 = vadd.f32 %v5309_v44, %v4049_v42  ;;  %v4052_v15 = vadd.f32 %v5290_v45, %v4011_v11 }
 0x1dd   :  { %v4131_v20 = vadd.f32 %v5331_v14, %v4090_v51  ;;  %v4093_v27 = vadd.f32 %v5312_v48, %v4052_v15 }
 0x1df   :  { %v4172_v59 = vadd.f32 %v5353_v22, %v4131_v20  ;;  %v4134_v28 = vadd.f32 %v5334_v23, %v4093_v27 }
 0x1e1   :  { %v4175_v56 = vadd.f32 %v5356_v30, %v4134_v28 }
 0x1e2   :  { %v7500_v4 = vpop.f32.mrf.mxu0 }
 0x1e4   :  { %v5374_v12 = vpop.f32.mrf.mxu0  ;;  %v7510_v13 = vpop.f32.mrf.mxu1 }
 0x1e5   :  { %v5375_v54 = vadd.f32 %v5374_v12, %v7500_v4 }
 0x1e6   :  { %v5376_v18 = vpop.f32.mrf.mxu0  ;;  %v5396_v50 = vpop.f32.mrf.mxu1 }
 0x1e7   :  { %v4213_v31 = vadd.f32 %v5375_v54, %v4172_v59  ;;  %v5397_v62 = vadd.f32 %v5396_v50, %v7510_v13 }
 0x1e8   :  { %v5377_v53 = vpop.f32.mrf.mxu0  ;;  %v5398_v25 = vpop.f32.mrf.mxu1 }
 0x1e9   :  { %v5378_v63 = vadd.f32 %v5377_v53, %v5376_v18  ;;  %v4254_v55 = vadd.f32 %v5397_v62, %v4213_v31 }
 0x1ea   :  { %v5399_v29 = vpop.f32.mrf.mxu1 }
 0x1eb   :  { %v4216_v60 = vadd.f32 %v5378_v63, %v4175_v56  ;;  %v5400_v39 = vadd.f32 %v5399_v29, %v5398_v25 }
 0x1ed   :  { %v4257_v3 = vadd.f32 %v5400_v39, %v4216_v60 }
 0x202   :  { %v5417_v26 = vpop.f32.mrf.mxu0 }
 0x204   :  { %v5418_v33 = vpop.f32.mrf.mxu0  ;;  %v5439_v35 = vpop.f32.mrf.mxu1 }
 0x205   :  { %v5419_v0 = vadd.f32 %v5418_v33, %v5417_v26 }
 0x206   :  { %v5420_v37 = vpop.f32.mrf.mxu0  ;;  %v5440_v38 = vpop.f32.mrf.mxu1 }
 0x207   :  { %v4295_v12 = vadd.f32 %v5419_v0, %v4254_v55  ;;  %v5441_v41 = vadd.f32 %v5440_v38, %v5439_v35 }
 0x208   :  { %v5421_v58 = vpop.f32.mrf.mxu0  ;;  %v5442_v40 = vpop.f32.mrf.mxu1 }
 0x209   :  { %v5422_v43 = vadd.f32 %v5421_v58, %v5420_v37  ;;  %v4336_v9 = vadd.f32 %v5441_v41, %v4295_v12 }
 0x20a   :  { %v5443_v49 = vpop.f32.mrf.mxu1 }
 0x20b   :  { %v4298_v42 = vadd.f32 %v5422_v43, %v4257_v3  ;;  %v5444_v13 = vadd.f32 %v5443_v49, %v5442_v40 }
 0x20d   :  { %v4339_v33 = vadd.f32 %v5444_v13, %v4298_v42 }
 0x222   :  { %v5461_v47 = vpop.f32.mrf.mxu0 }
 0x224   :  { %v5462_v16 = vpop.f32.mrf.mxu0  ;;  %v5483_v52 = vpop.f32.mrf.mxu1 }
 0x225   :  { %v5463_v61 = vadd.f32 %v5462_v16, %v5461_v47 }
 0x226   :  { %v5464_v24 = vpop.f32.mrf.mxu0  ;;  %v5484_v57 = vpop.f32.mrf.mxu1 }
 0x227   :  { %v4377_v53 = vadd.f32 %v5463_v61, %v4336_v9  ;;  %v5485_v5 = vadd.f32 %v5484_v57, %v5483_v52 }
 0x228   :  { %v5465_v32 = vpop.f32.mrf.mxu0  ;;  %v5486_v34 = vpop.f32.mrf.mxu1 }
 0x229   :  { %v5466_v26 = vadd.f32 %v5465_v32, %v5464_v24  ;;  %v4418_v29 = vadd.f32 %v5485_v5, %v4377_v53 }
 0x22a   :  { %v5487_v4 = vpop.f32.mrf.mxu1 }
 0x22b   :  { %v4380_v46 = vadd.f32 %v5466_v26, %v4339_v33  ;;  %v5488_v35 = vadd.f32 %v5487_v4, %v5486_v34 }
 0x22d   :  { %v4421_v47 = vadd.f32 %v5488_v35, %v4380_v46 }
 0x242   :  { %v5505_v36 = vpop.f32.mrf.mxu0 }
 0x244   :  { %v5506_v1 = vpop.f32.mrf.mxu0  ;;  %v5527_v2 = vpop.f32.mrf.mxu1 }
 0x245   :  { %v5507_v6 = vadd.f32 %v5506_v1, %v5505_v36 }
 0x246   :  { %v5508_v18 = vpop.f32.mrf.mxu0  ;;  %v5528_v50 = vpop.f32.mrf.mxu1 }
 0x247   :  { %v4459_v37 = vadd.f32 %v5507_v6, %v4418_v29  ;;  %v5529_v38 = vadd.f32 %v5528_v50, %v5527_v2 }
 0x248   :  { %v5509_v44 = vpop.f32.mrf.mxu0  ;;  %v5530_v25 = vpop.f32.mrf.mxu1 }
 0x249   :  { %v5510_v58 = vadd.f32 %v5509_v44, %v5508_v18  ;;  %v4500_v40 = vadd.f32 %v5529_v38, %v4459_v37 }
 0x24a   :  { %v5531_v7 = vpop.f32.mrf.mxu1 }
 0x24b   :  { %v4462_v8 = vadd.f32 %v5510_v58, %v4421_v47  ;;  %v5532_v10 = vadd.f32 %v5531_v7, %v5530_v25 }
 0x24d   :  { %v4503_v17 = vadd.f32 %v5532_v10, %v4462_v8 }
 0x262   :  { %v5549_v45 = vpop.f32.mrf.mxu0 }
 0x264   :  { %v5550_v11 = vpop.f32.mrf.mxu0 }
 0x265   :  { %v5551_v14 = vadd.f32 %v5550_v11, %v5549_v45 }
 0x266   :  { %v5552_v49 = vpop.f32.mrf.mxu0 }
 0x267   :  { %v4541_v51 = vadd.f32 %v5551_v14, %v4500_v40 }
 0x268   :  { %v5553_v15 = vpop.f32.mrf.mxu0 }
 0x269   :  { %4548 = vst.msk [vmem:[%s7565_s3] sm:$0xff] %vm4547_vm0, %v4541_v51  ;;  %v5554_v19 = vadd.f32 %v5553_v15, %v5552_v49 }
 0x26b   :  { %v4544_v48 = vadd.f32 %v5554_v19, %v4503_v17 }
 0x26d   :  { %4549 = vst.msk [vmem:[%s7565_s3 + $0x8] sm:$0xff] %vm4547_vm0, %v4544_v48 }

</bundles_post_ra>
